<compile_context>
chip_gen: v7x
topology: tpu7x:2x2x1
jax: 0.10.0
libtpu: 0.0.40
codegen_flags: <defaults>
</compile_context>

<pallas_src>
import functools

import jax
import jax.numpy as jnp
from jax.experimental import pallas as pl
from jax.experimental.pallas import tpu as pltpu


def _round_up(x, m):
    return ((x + m - 1) // m) * m


# ----------------------------------------------------------------------------
# Chip-aware configuration helpers
# ----------------------------------------------------------------------------
@functools.lru_cache(maxsize=None)
def _vmem_limit_bytes():
    """Scoped-VMEM limit derived from the physical VMEM of the current chip."""
    cap = 64 * 1024 * 1024
    try:
        info = pltpu.get_tpu_info()
        for attr in ("vmem_capacity_bytes", "vmem_size_bytes", "vmem_bytes"):
            v = getattr(info, attr, None)
            if v:
                cap = int(v)
                break
    except Exception:
        pass
    if cap >= 128 * 1024 * 1024:
        return 96 * 1024 * 1024      # v5e / v6e: 128 MiB physical -> big tiles
    return 32 * 1024 * 1024          # v7x (64 MiB per TC) or unknown: safe default


def _pick_tm(m, k_pad, n_pad, out_w, out_elem_bytes, vmem_limit):
    """Largest row-tile whose double-buffered in/out + resident weight fit VMEM."""
    m16 = _round_up(max(m, 1), 16)
    budget = int(vmem_limit * 0.7)
    weight_bytes = 2 * k_pad * n_pad * 2          # worst case: double-buffered bf16
    cands = [c for c in (2048, 1024, 512, 256, 128) if c <= m16] or [m16]
    for tm in cands:
        need = 2 * tm * k_pad * 2 + weight_bytes + 2 * tm * out_w * out_elem_bytes
        if need <= budget:
            return tm
    return cands[-1]


_BUFFERED_SUPPORT = None


def _resident_pipeline_mode():
    """Probe (once) whether pipeline_mode=pl.Buffered(1) works on this JAX/TPU."""
    global _BUFFERED_SUPPORT
    if _BUFFERED_SUPPORT is not None:
        return _BUFFERED_SUPPORT
    mode = False
    if hasattr(pl, "Buffered"):
        try:
            spec = pl.BlockSpec((8, 128), lambda i: (0, 0), pipeline_mode=pl.Buffered(1))

            def _probe(x_ref, o_ref):
                o_ref[...] = x_ref[...] + 1.0

            out = pl.pallas_call(
                _probe,
                out_shape=jax.ShapeDtypeStruct((8, 128), jnp.float32),
                grid=(1,),
                in_specs=[spec],
                out_specs=pl.BlockSpec((8, 128), lambda i: (0, 0)),
            )(jnp.zeros((8, 128), jnp.float32))
            jax.block_until_ready(out)
            mode = pl.Buffered(1)
        except Exception:
            mode = False
    _BUFFERED_SUPPORT = mode
    return _BUFFERED_SUPPORT


def _resident_spec(shape, index_map):
    """BlockSpec for a block whose index never changes; single-buffer if possible."""
    mode = _resident_pipeline_mode()
    if mode:
        return pl.BlockSpec(shape, index_map, pipeline_mode=mode)
    return pl.BlockSpec(shape, index_map)


# ----------------------------------------------------------------------------
# Pallas kernels
# ----------------------------------------------------------------------------
def _matmul_act_kernel(p_ref, w_ref, o_ref, *, act):
    """(TM, K_pad) x (K_pad, N_pad) tile-matmul; stores only the true Cout columns."""
    acc = jnp.dot(p_ref[...], w_ref[...], preferred_element_type=jnp.float32)
    acc = acc[:, : o_ref.shape[1]]
    if act == "lrelu":
        acc = jnp.where(acc > 0, acc, 0.2 * acc)
    elif act == "sigmoid":
        acc = jax.nn.sigmoid(acc)
    o_ref[...] = acc.astype(o_ref.dtype)


def _matmul_bnstats_kernel(p_ref, w_ref, o_ref, psum_ref, psq_ref):
    """Conv matmul tile + per-tile partial sum / sum-of-squares (fully parallel grid).

    Zero-padded rows contribute 0 to both partials, so dividing by the true row
    count on the host keeps the batch statistics exact.
    """
    acc = jnp.dot(p_ref[...], w_ref[...], preferred_element_type=jnp.float32)
    acc = acc[:, : o_ref.shape[1]]
    o_ref[...] = acc.astype(o_ref.dtype)
    s = jnp.sum(acc, axis=0, keepdims=True)            # (1, Cout) f32
    sq = jnp.sum(acc * acc, axis=0, keepdims=True)
    psum_ref[...] = s[None, :, :]                      # (1, 1, Cout)
    psq_ref[...] = sq[None, :, :]


def _bn_apply_lrelu_kernel(x_ref, scale_ref, shift_ref, o_ref):
    y = x_ref[...].astype(jnp.float32) * scale_ref[...] + shift_ref[...]
    o_ref[...] = jnp.where(y > 0, y, 0.2 * y).astype(o_ref.dtype)


# ----------------------------------------------------------------------------
# Host-side glue: NHWC im2col (bf16) + per-layer plumbing
# ----------------------------------------------------------------------------
def im2col_nhwc(x, k, stride, pad):
    """x: [N, H, W, C] -> ([N*OH*OW, k*k*C], OH, OW); column order = (kh, kw, cin)."""
    N, H, W, C = x.shape
    xp = jnp.pad(x, ((0, 0), (pad, pad), (pad, pad), (0, 0)))
    Hp, Wp = H + 2 * pad, W + 2 * pad
    oh = (Hp - k) // stride + 1
    ow = (Wp - k) // stride + 1
    pieces = []
    for i in range(k):
        for j in range(k):
            pieces.append(
                xp[:, i:i + stride * (oh - 1) + 1:stride,
                      j:j + stride * (ow - 1) + 1:stride, :]
            )
    p = jnp.stack(pieces, axis=3).reshape(N * oh * ow, k * k * C)
    return p, oh, ow


def conv_layer(x, w, stride, pad, *, act="lrelu", gamma=None, beta=None, eps=1e-5):
    """x: [N, H, W, Cin] NHWC (bf16), w: [Cout, Cin, k, k] (PyTorch layout).

    act in {"lrelu", "sigmoid", "bn"}; "bn" = BatchNorm(batch stats) + LeakyReLU.
    Returns NHWC output [N, OH, OW, Cout] (bf16, except f32 for the sigmoid head).
    """
    N = x.shape[0]
    Cout, Cin, k, _ = w.shape
    patches, oh, ow = im2col_nhwc(x.astype(jnp.bfloat16), k, stride, pad)
    M, K = patches.shape

    K_pad = _round_up(K, 128)
    N_pad = _round_up(Cout, 128)                 # MXU columns; only Cout is stored
    out_dtype = jnp.float32 if act == "sigmoid" else jnp.bfloat16
    out_bytes = 4 if out_dtype == jnp.float32 else 2

    vmem_limit = _vmem_limit_bytes()
    TM = _pick_tm(M, K_pad, N_pad, Cout, out_bytes, vmem_limit)
    M_pad = _round_up(M, TM)
    grid = (M_pad // TM,)
    n_tiles = M_pad // TM

    p = jnp.pad(patches, ((0, M_pad - M), (0, K_pad - K)))
    w2 = w.transpose(2, 3, 1, 0).reshape(K, Cout)              # (kh, kw, cin) x Cout
    w2 = jnp.pad(w2, ((0, K_pad - K), (0, N_pad - Cout))).astype(jnp.bfloat16)

    cost = pl.CostEstimate(
        flops=2 * M_pad * K_pad * N_pad,
        transcendentals=M_pad * Cout if act == "sigmoid" else 0,
        bytes_accessed=M_pad * K_pad * 2 + K_pad * N_pad * 2 + M_pad * Cout * out_bytes,
    )

    p_spec = pl.BlockSpec((TM, K_pad), lambda i: (i, 0))
    w_spec = _resident_spec((K_pad, N_pad), lambda i: (0, 0))
    o_spec = pl.BlockSpec((TM, Cout), lambda i: (i, 0))
    cparams = pltpu.CompilerParams(
        dimension_semantics=("parallel",), vmem_limit_bytes=vmem_limit)

    if act != "bn":
        flat = pl.pallas_call(
            functools.partial(_matmul_act_kernel, act=act),
            out_shape=jax.ShapeDtypeStruct((M_pad, Cout), out_dtype),
            grid=grid,
            in_specs=[p_spec, w_spec],
            out_specs=o_spec,
            compiler_params=cparams,
            cost_estimate=cost,
        )(p, w2)
    else:
        slab, psum, psq = pl.pallas_call(
            _matmul_bnstats_kernel,
            out_shape=(
                jax.ShapeDtypeStruct((M_pad, Cout), jnp.bfloat16),
                jax.ShapeDtypeStruct((n_tiles, 1, Cout), jnp.float32),
                jax.ShapeDtypeStruct((n_tiles, 1, Cout), jnp.float32),
            ),
            grid=grid,
            in_specs=[p_spec, w_spec],
            out_specs=(
                o_spec,
                pl.BlockSpec((1, 1, Cout), lambda i: (i, 0, 0)),
                pl.BlockSpec((1, 1, Cout), lambda i: (i, 0, 0)),
            ),
            compiler_params=cparams,
            cost_estimate=cost,
        )(p, w2)

        # Tiny host-side finalize (training-mode / biased batch statistics).
        inv_m = 1.0 / float(M)
        mean = jnp.sum(psum, axis=(0, 1)) * inv_m                       # (Cout,)
        var = jnp.maximum(jnp.sum(psq, axis=(0, 1)) * inv_m - mean * mean, 0.0)
        scale1 = gamma.astype(jnp.float32) * jax.lax.rsqrt(var + eps)
        shift1 = beta.astype(jnp.float32) - mean * scale1
        scale = scale1.reshape(1, Cout)
        shift = shift1.reshape(1, Cout)

        flat = pl.pallas_call(
            _bn_apply_lrelu_kernel,
            out_shape=jax.ShapeDtypeStruct((M_pad, Cout), jnp.bfloat16),
            grid=grid,
            in_specs=[
                pl.BlockSpec((TM, Cout), lambda i: (i, 0)),
                _resident_spec((1, Cout), lambda i: (0, 0)),
                _resident_spec((1, Cout), lambda i: (0, 0)),
            ],
            out_specs=pl.BlockSpec((TM, Cout), lambda i: (i, 0)),
            compiler_params=cparams,
        )(slab, scale, shift)

    return flat[:M].reshape(N, oh, ow, Cout)


# ----------------------------------------------------------------------------
# Discriminator forward (spectral_norm=False path)
# ----------------------------------------------------------------------------
def init_params(key, feature_d=8, nCh=3):
    ks = jax.random.split(key, 5)

    def w(k, cout, cin):
        return (0.02 * jax.random.normal(k, (cout, cin, 4, 4))).astype(jnp.float32)

    return {
        "w1": w(ks[0], feature_d, nCh),
        "w2": w(ks[1], feature_d * 2, feature_d),
        "g2": jnp.ones((feature_d * 2,), jnp.float32),
        "b2": jnp.zeros((feature_d * 2,), jnp.float32),
        "w3": w(ks[2], feature_d * 4, feature_d * 2),
        "g3": jnp.ones((feature_d * 4,), jnp.float32),
        "b3": jnp.zeros((feature_d * 4,), jnp.float32),
        "w4": w(ks[3], feature_d * 8, feature_d * 4),
        "g4": jnp.ones((feature_d * 8,), jnp.float32),
        "b4": jnp.zeros((feature_d * 8,), jnp.float32),
        "w5": w(ks[4], 1, feature_d * 8),
    }


def discriminator_forward(params, img):
    """img: [N, nCh, 64, 64] (NCHW, like PyTorch) -> [N, 1] sigmoid probabilities."""
    N = img.shape[0]
    # Single layout change + single cast; activations stay NHWC bf16 end-to-end.
    x = jnp.transpose(img, (0, 2, 3, 1)).astype(jnp.bfloat16)

    x = conv_layer(x, params["w1"], 2, 1, act="lrelu")                                      # 32x32, fd
    x = conv_layer(x, params["w2"], 2, 1, act="bn", gamma=params["g2"], beta=params["b2"])  # 16x16, 2fd
    x = conv_layer(x, params["w3"], 2, 1, act="bn", gamma=params["g3"], beta=params["b3"])  # 8x8,  4fd
    x = conv_layer(x, params["w4"], 2, 1, act="bn", gamma=params["g4"], beta=params["b4"])  # 4x4,  8fd
    x = conv_layer(x, params["w5"], 1, 0, act="sigmoid")                                    # 1x1,  1

    return x.reshape(N, -1).astype(jnp.float32)


if __name__ == "__main__":
    key = jax.random.PRNGKey(0)
    k_params, k_img = jax.random.split(key)

    feature_d, nCh = 8, 3          # small feature_d for test; arch requires 64x64 input
    params = init_params(k_params, feature_d=feature_d, nCh=nCh)
    img = jax.random.normal(k_img, (2, nCh, 64, 64), dtype=jnp.float32)

    fwd = jax.jit(discriminator_forward)
    out = jax.block_until_ready(fwd(params, img))

    assert out.shape == (2, 1), out.shape
    assert bool(jnp.all(jnp.isfinite(out)))
    assert bool(jnp.all((out >= 0.0) & (out <= 1.0)))
    print("KERNEL_OK")
</pallas_src>

<mosaic_0001>
module attributes {stable_mosaic.version = 11 : i64} {
  func.func @_matmul_act_kernel(%arg0: i32, %arg1: memref<2048x128xbf16, #tpu.memory_space<vmem>>, %arg2: memref<128x128xbf16, #tpu.memory_space<vmem>>, %arg3: memref<2048x8xbf16, #tpu.memory_space<vmem>>) attributes {dimension_semantics = [#tpu.dimension_semantics<parallel>], iteration_bounds = array<i64: 1>, scalar_prefetch = 0 : i64, scratch_operands = 0 : i64, tpu.core_type = #tpu.core_type<tc>, window_params = [{transform_indices = @transform_0, window_bounds = array<i64: 2048, 128>}, {pipeline_mode = #tpu.pipeline_mode<synchronous>, transform_indices = @transform_1, window_bounds = array<i64: 128, 128>}, {transform_indices = @transform_2, window_bounds = array<i64: 2048, 8>}]} {
    %c0 = arith.constant 0 : index
    %c0_0 = arith.constant 0 : index
    %0 = vector.load %arg1[%c0, %c0_0] : memref<2048x128xbf16, #tpu.memory_space<vmem>>, vector<2048x128xbf16>
    %c0_1 = arith.constant 0 : index
    %c0_2 = arith.constant 0 : index
    %1 = vector.load %arg2[%c0_1, %c0_2] : memref<128x128xbf16, #tpu.memory_space<vmem>>, vector<128x128xbf16>
    %cst = arith.constant dense<0.000000e+00> : vector<2048x128xf32>
    %2 = tpu.matmul %0, %1, %cst {dimension_numbers = #tpu.dot_dimension_numbers<[1], [0], [0], [1], [0, 0, 1, 1], [], []>} : vector<2048x128xbf16>, vector<128x128xbf16>, vector<2048x128xf32> -> vector<2048x128xf32>
    %3 = vector.extract_strided_slice %2 {offsets = [0, 0], sizes = [2048, 8], strides = [1, 1]} : vector<2048x128xf32> to vector<2048x8xf32>
    %cst_3 = arith.constant 0.000000e+00 : f32
    %4 = vector.broadcast %cst_3 : f32 to vector<2048x8xf32>
    %5 = arith.cmpf ogt, %3, %4 : vector<2048x8xf32>
    %cst_4 = arith.constant 2.000000e-01 : f32
    %6 = vector.broadcast %cst_4 : f32 to vector<2048x8xf32>
    %7 = arith.mulf %6, %3 : vector<2048x8xf32>
    %8 = arith.select %5, %3, %7 : vector<2048x8xi1>, vector<2048x8xf32>
    %9 = arith.truncf %8 : vector<2048x8xf32> to vector<2048x8xbf16>
    %c0_5 = arith.constant 0 : index
    %c0_6 = arith.constant 0 : index
    %10 = vector.load %arg3[%c0_5, %c0_6] : memref<2048x8xbf16, #tpu.memory_space<vmem>>, vector<2048x8xbf16>
    tpu.vector_store %arg3[%c0_5, %c0_6], %9 {strides = array<i32>} : memref<2048x8xbf16, #tpu.memory_space<vmem>>, vector<2048x8xbf16>,
    return
  }
  func.func @transform_0(%arg0: i32) -> (i32, i32) {
    %c0_i32 = arith.constant 0 : i32
    %c0_i32_0 = arith.constant 0 : i32
    return %arg0, %c0_i32 : i32, i32
  }
  func.func @transform_1(%arg0: i32) -> (i32, i32) {
    %c0_i32 = arith.constant 0 : i32
    %c0_i32_0 = arith.constant 0 : i32
    %c0_i32_1 = arith.constant 0 : i32
    return %c0_i32, %c0_i32_0 : i32, i32
  }
  func.func @transform_2(%arg0: i32) -> (i32, i32) {
    %c0_i32 = arith.constant 0 : i32
    %c0_i32_0 = arith.constant 0 : i32
    return %arg0, %c0_i32 : i32, i32
  }
}

module attributes {stable_mosaic.version = 11 : i64} {
  func.func @_matmul_bnstats_kernel(%arg0: i32, %arg1: memref<512x128xbf16, #tpu.memory_space<vmem>>, %arg2: memref<128x128xbf16, #tpu.memory_space<vmem>>, %arg3: memref<512x16xbf16, #tpu.memory_space<vmem>>, %arg4: memref<1x1x16xf32, #tpu.memory_space<vmem>>, %arg5: memref<1x1x16xf32, #tpu.memory_space<vmem>>) attributes {dimension_semantics = [#tpu.dimension_semantics<parallel>], iteration_bounds = array<i64: 1>, scalar_prefetch = 0 : i64, scratch_operands = 0 : i64, tpu.core_type = #tpu.core_type<tc>, window_params = [{transform_indices = @transform_0, window_bounds = array<i64: 512, 128>}, {pipeline_mode = #tpu.pipeline_mode<synchronous>, transform_indices = @transform_1, window_bounds = array<i64: 128, 128>}, {transform_indices = @transform_2, window_bounds = array<i64: 512, 16>}, {transform_indices = @transform_3, window_bounds = array<i64: 1, 1, 16>}, {transform_indices = @transform_4, window_bounds = array<i64: 1, 1, 16>}]} {
    %c0 = arith.constant 0 : index
    %c0_0 = arith.constant 0 : index
    %0 = vector.load %arg1[%c0, %c0_0] : memref<512x128xbf16, #tpu.memory_space<vmem>>, vector<512x128xbf16>
    %c0_1 = arith.constant 0 : index
    %c0_2 = arith.constant 0 : index
    %1 = vector.load %arg2[%c0_1, %c0_2] : memref<128x128xbf16, #tpu.memory_space<vmem>>, vector<128x128xbf16>
    %cst = arith.constant dense<0.000000e+00> : vector<512x128xf32>
    %2 = tpu.matmul %0, %1, %cst {dimension_numbers = #tpu.dot_dimension_numbers<[1], [0], [0], [1], [0, 0, 1, 1], [], []>} : vector<512x128xbf16>, vector<128x128xbf16>, vector<512x128xf32> -> vector<512x128xf32>
    %3 = vector.extract_strided_slice %2 {offsets = [0, 0], sizes = [512, 16], strides = [1, 1]} : vector<512x128xf32> to vector<512x16xf32>
    %4 = arith.truncf %3 : vector<512x16xf32> to vector<512x16xbf16>
    %c0_3 = arith.constant 0 : index
    %c0_4 = arith.constant 0 : index
    %5 = vector.load %arg3[%c0_3, %c0_4] : memref<512x16xbf16, #tpu.memory_space<vmem>>, vector<512x16xbf16>
    tpu.vector_store %arg3[%c0_3, %c0_4], %4 {strides = array<i32>} : memref<512x16xbf16, #tpu.memory_space<vmem>>, vector<512x16xbf16>,
    %cst_5 = arith.constant dense<0.000000e+00> : vector<16xf32>
    %6 = vector.multi_reduction <add>, %3, %cst_5 [0] : vector<512x16xf32> to vector<16xf32>
    %7 = vector.shape_cast %6 : vector<16xf32> to vector<1x16xf32>
    %8 = arith.mulf %3, %3 : vector<512x16xf32>
    %cst_6 = arith.constant dense<0.000000e+00> : vector<16xf32>
    %9 = vector.multi_reduction <add>, %8, %cst_6 [0] : vector<512x16xf32> to vector<16xf32>
    %10 = vector.shape_cast %9 : vector<16xf32> to vector<1x16xf32>
    %11 = vector.shape_cast %7 : vector<1x16xf32> to vector<1x1x16xf32>
    %c0_7 = arith.constant 0 : index
    %c0_8 = arith.constant 0 : index
    %c0_9 = arith.constant 0 : index
    %12 = vector.load %arg4[%c0_7, %c0_8, %c0_9] : memref<1x1x16xf32, #tpu.memory_space<vmem>>, vector<1x1x16xf32>
    tpu.vector_store %arg4[%c0_7, %c0_8, %c0_9], %11 {strides = array<i32>} : memref<1x1x16xf32, #tpu.memory_space<vmem>>, vector<1x1x16xf32>,
    %13 = vector.shape_cast %10 : vector<1x16xf32> to vector<1x1x16xf32>
    %c0_10 = arith.constant 0 : index
    %c0_11 = arith.constant 0 : index
    %c0_12 = arith.constant 0 : index
    %14 = vector.load %arg5[%c0_10, %c0_11, %c0_12] : memref<1x1x16xf32, #tpu.memory_space<vmem>>, vector<1x1x16xf32>
    tpu.vector_store %arg5[%c0_10, %c0_11, %c0_12], %13 {strides = array<i32>} : memref<1x1x16xf32, #tpu.memory_space<vmem>>, vector<1x1x16xf32>,
    return
  }
  func.func @transform_0(%arg0: i32) -> (i32, i32) {
    %c0_i32 = arith.constant 0 : i32
    %c0_i32_0 = arith.constant 0 : i32
    return %arg0, %c0_i32 : i32, i32
  }
  func.func @transform_1(%arg0: i32) -> (i32, i32) {
    %c0_i32 = arith.constant 0 : i32
    %c0_i32_0 = arith.constant 0 : i32
    %c0_i32_1 = arith.constant 0 : i32
    return %c0_i32, %c0_i32_0 : i32, i32
  }
  func.func @transform_2(%arg0: i32) -> (i32, i32) {
    %c0_i32 = arith.constant 0 : i32
    %c0_i32_0 = arith.constant 0 : i32
    return %arg0, %c0_i32 : i32, i32
  }
  func.func @transform_3(%arg0: i32) -> (i32, i32, i32) {
    %c0_i32 = arith.constant 0 : i32
    %c0_i32_0 = arith.constant 0 : i32
    %c0_i32_1 = arith.constant 0 : i32
    return %arg0, %c0_i32, %c0_i32_0 : i32, i32, i32
  }
  func.func @transform_4(%arg0: i32) -> (i32, i32, i32) {
    %c0_i32 = arith.constant 0 : i32
    %c0_i32_0 = arith.constant 0 : i32
    %c0_i32_1 = arith.constant 0 : i32
    return %arg0, %c0_i32, %c0_i32_0 : i32, i32, i32
  }
}

module attributes {stable_mosaic.version = 11 : i64} {
  func.func @_bn_apply_lrelu_kernel(%arg0: i32, %arg1: memref<512x16xbf16, #tpu.memory_space<vmem>>, %arg2: memref<1x16xf32, #tpu.memory_space<vmem>>, %arg3: memref<1x16xf32, #tpu.memory_space<vmem>>, %arg4: memref<512x16xbf16, #tpu.memory_space<vmem>>) attributes {dimension_semantics = [#tpu.dimension_semantics<parallel>], iteration_bounds = array<i64: 1>, scalar_prefetch = 0 : i64, scratch_operands = 0 : i64, tpu.core_type = #tpu.core_type<tc>, window_params = [{transform_indices = @transform_0, window_bounds = array<i64: 512, 16>}, {pipeline_mode = #tpu.pipeline_mode<synchronous>, transform_indices = @transform_1, window_bounds = array<i64: 1, 16>}, {pipeline_mode = #tpu.pipeline_mode<synchronous>, transform_indices = @transform_2, window_bounds = array<i64: 1, 16>}, {transform_indices = @transform_3, window_bounds = array<i64: 512, 16>}]} {
    %c0 = arith.constant 0 : index
    %c0_0 = arith.constant 0 : index
    %0 = vector.load %arg1[%c0, %c0_0] : memref<512x16xbf16, #tpu.memory_space<vmem>>, vector<512x16xbf16>
    %1 = arith.extf %0 : vector<512x16xbf16> to vector<512x16xf32>
    %c0_1 = arith.constant 0 : index
    %c0_2 = arith.constant 0 : index
    %2 = vector.load %arg2[%c0_1, %c0_2] : memref<1x16xf32, #tpu.memory_space<vmem>>, vector<1x16xf32>
    %3 = vector.broadcast %2 : vector<1x16xf32> to vector<512x16xf32>
    %4 = arith.mulf %1, %3 : vector<512x16xf32>
    %c0_3 = arith.constant 0 : index
    %c0_4 = arith.constant 0 : index
    %5 = vector.load %arg3[%c0_3, %c0_4] : memref<1x16xf32, #tpu.memory_space<vmem>>, vector<1x16xf32>
    %6 = vector.broadcast %5 : vector<1x16xf32> to vector<512x16xf32>
    %7 = arith.addf %4, %6 : vector<512x16xf32>
    %cst = arith.constant 0.000000e+00 : f32
    %8 = vector.broadcast %cst : f32 to vector<512x16xf32>
    %9 = arith.cmpf ogt, %7, %8 : vector<512x16xf32>
    %cst_5 = arith.constant 2.000000e-01 : f32
    %10 = vector.broadcast %cst_5 : f32 to vector<512x16xf32>
    %11 = arith.mulf %10, %7 : vector<512x16xf32>
    %12 = arith.select %9, %7, %11 : vector<512x16xi1>, vector<512x16xf32>
    %13 = arith.truncf %12 : vector<512x16xf32> to vector<512x16xbf16>
    %c0_6 = arith.constant 0 : index
    %c0_7 = arith.constant 0 : index
    %14 = vector.load %arg4[%c0_6, %c0_7] : memref<512x16xbf16, #tpu.memory_space<vmem>>, vector<512x16xbf16>
    tpu.vector_store %arg4[%c0_6, %c0_7], %13 {strides = array<i32>} : memref<512x16xbf16, #tpu.memory_space<vmem>>, vector<512x16xbf16>,
    return
  }
  func.func @transform_0(%arg0: i32) -> (i32, i32) {
    %c0_i32 = arith.constant 0 : i32
    %c0_i32_0 = arith.constant 0 : i32
    return %arg0, %c0_i32 : i32, i32
  }
  func.func @transform_1(%arg0: i32) -> (i32, i32) {
    %c0_i32 = arith.constant 0 : i32
    %c0_i32_0 = arith.constant 0 : i32
    %c0_i32_1 = arith.constant 0 : i32
    return %c0_i32, %c0_i32_0 : i32, i32
  }
  func.func @transform_2(%arg0: i32) -> (i32, i32) {
    %c0_i32 = arith.constant 0 : i32
    %c0_i32_0 = arith.constant 0 : i32
    %c0_i32_1 = arith.constant 0 : i32
    return %c0_i32, %c0_i32_0 : i32, i32
  }
  func.func @transform_3(%arg0: i32) -> (i32, i32) {
    %c0_i32 = arith.constant 0 : i32
    %c0_i32_0 = arith.constant 0 : i32
    return %arg0, %c0_i32 : i32, i32
  }
}

module attributes {stable_mosaic.version = 11 : i64} {
  func.func @_matmul_bnstats_kernel(%arg0: i32, %arg1: memref<128x256xbf16, #tpu.memory_space<vmem>>, %arg2: memref<256x128xbf16, #tpu.memory_space<vmem>>, %arg3: memref<128x32xbf16, #tpu.memory_space<vmem>>, %arg4: memref<1x1x32xf32, #tpu.memory_space<vmem>>, %arg5: memref<1x1x32xf32, #tpu.memory_space<vmem>>) attributes {dimension_semantics = [#tpu.dimension_semantics<parallel>], iteration_bounds = array<i64: 1>, scalar_prefetch = 0 : i64, scratch_operands = 0 : i64, tpu.core_type = #tpu.core_type<tc>, window_params = [{transform_indices = @transform_0, window_bounds = array<i64: 128, 256>}, {pipeline_mode = #tpu.pipeline_mode<synchronous>, transform_indices = @transform_1, window_bounds = array<i64: 256, 128>}, {transform_indices = @transform_2, window_bounds = array<i64: 128, 32>}, {transform_indices = @transform_3, window_bounds = array<i64: 1, 1, 32>}, {transform_indices = @transform_4, window_bounds = array<i64: 1, 1, 32>}]} {
    %c0 = arith.constant 0 : index
    %c0_0 = arith.constant 0 : index
    %0 = vector.load %arg1[%c0, %c0_0] : memref<128x256xbf16, #tpu.memory_space<vmem>>, vector<128x256xbf16>
    %c0_1 = arith.constant 0 : index
    %c0_2 = arith.constant 0 : index
    %1 = vector.load %arg2[%c0_1, %c0_2] : memref<256x128xbf16, #tpu.memory_space<vmem>>, vector<256x128xbf16>
    %cst = arith.constant dense<0.000000e+00> : vector<128x128xf32>
    %2 = tpu.matmul %0, %1, %cst {dimension_numbers = #tpu.dot_dimension_numbers<[1], [0], [0], [1], [0, 0, 1, 1], [], []>} : vector<128x256xbf16>, vector<256x128xbf16>, vector<128x128xf32> -> vector<128x128xf32>
    %3 = vector.extract_strided_slice %2 {offsets = [0, 0], sizes = [128, 32], strides = [1, 1]} : vector<128x128xf32> to vector<128x32xf32>
    %4 = arith.truncf %3 : vector<128x32xf32> to vector<128x32xbf16>
    %c0_3 = arith.constant 0 : index
    %c0_4 = arith.constant 0 : index
    %5 = vector.load %arg3[%c0_3, %c0_4] : memref<128x32xbf16, #tpu.memory_space<vmem>>, vector<128x32xbf16>
    tpu.vector_store %arg3[%c0_3, %c0_4], %4 {strides = array<i32>} : memref<128x32xbf16, #tpu.memory_space<vmem>>, vector<128x32xbf16>,
    %cst_5 = arith.constant dense<0.000000e+00> : vector<32xf32>
    %6 = vector.multi_reduction <add>, %3, %cst_5 [0] : vector<128x32xf32> to vector<32xf32>
    %7 = vector.shape_cast %6 : vector<32xf32> to vector<1x32xf32>
    %8 = arith.mulf %3, %3 : vector<128x32xf32>
    %cst_6 = arith.constant dense<0.000000e+00> : vector<32xf32>
    %9 = vector.multi_reduction <add>, %8, %cst_6 [0] : vector<128x32xf32> to vector<32xf32>
    %10 = vector.shape_cast %9 : vector<32xf32> to vector<1x32xf32>
    %11 = vector.shape_cast %7 : vector<1x32xf32> to vector<1x1x32xf32>
    %c0_7 = arith.constant 0 : index
    %c0_8 = arith.constant 0 : index
    %c0_9 = arith.constant 0 : index
    %12 = vector.load %arg4[%c0_7, %c0_8, %c0_9] : memref<1x1x32xf32, #tpu.memory_space<vmem>>, vector<1x1x32xf32>
    tpu.vector_store %arg4[%c0_7, %c0_8, %c0_9], %11 {strides = array<i32>} : memref<1x1x32xf32, #tpu.memory_space<vmem>>, vector<1x1x32xf32>,
    %13 = vector.shape_cast %10 : vector<1x32xf32> to vector<1x1x32xf32>
    %c0_10 = arith.constant 0 : index
    %c0_11 = arith.constant 0 : index
    %c0_12 = arith.constant 0 : index
    %14 = vector.load %arg5[%c0_10, %c0_11, %c0_12] : memref<1x1x32xf32, #tpu.memory_space<vmem>>, vector<1x1x32xf32>
    tpu.vector_store %arg5[%c0_10, %c0_11, %c0_12], %13 {strides = array<i32>} : memref<1x1x32xf32, #tpu.memory_space<vmem>>, vector<1x1x32xf32>,
    return
  }
  func.func @transform_0(%arg0: i32) -> (i32, i32) {
    %c0_i32 = arith.constant 0 : i32
    %c0_i32_0 = arith.constant 0 : i32
    return %arg0, %c0_i32 : i32, i32
  }
  func.func @transform_1(%arg0: i32) -> (i32, i32) {
    %c0_i32 = arith.constant 0 : i32
    %c0_i32_0 = arith.constant 0 : i32
    %c0_i32_1 = arith.constant 0 : i32
    return %c0_i32, %c0_i32_0 : i32, i32
  }
  func.func @transform_2(%arg0: i32) -> (i32, i32) {
    %c0_i32 = arith.constant 0 : i32
    %c0_i32_0 = arith.constant 0 : i32
    return %arg0, %c0_i32 : i32, i32
  }
  func.func @transform_3(%arg0: i32) -> (i32, i32, i32) {
    %c0_i32 = arith.constant 0 : i32
    %c0_i32_0 = arith.constant 0 : i32
    %c0_i32_1 = arith.constant 0 : i32
    return %arg0, %c0_i32, %c0_i32_0 : i32, i32, i32
  }
  func.func @transform_4(%arg0: i32) -> (i32, i32, i32) {
    %c0_i32 = arith.constant 0 : i32
    %c0_i32_0 = arith.constant 0 : i32
    %c0_i32_1 = arith.constant 0 : i32
    return %arg0, %c0_i32, %c0_i32_0 : i32, i32, i32
  }
}

module attributes {stable_mosaic.version = 11 : i64} {
  func.func @_bn_apply_lrelu_kernel(%arg0: i32, %arg1: memref<128x32xbf16, #tpu.memory_space<vmem>>, %arg2: memref<1x32xf32, #tpu.memory_space<vmem>>, %arg3: memref<1x32xf32, #tpu.memory_space<vmem>>, %arg4: memref<128x32xbf16, #tpu.memory_space<vmem>>) attributes {dimension_semantics = [#tpu.dimension_semantics<parallel>], iteration_bounds = array<i64: 1>, scalar_prefetch = 0 : i64, scratch_operands = 0 : i64, tpu.core_type = #tpu.core_type<tc>, window_params = [{transform_indices = @transform_0, window_bounds = array<i64: 128, 32>}, {pipeline_mode = #tpu.pipeline_mode<synchronous>, transform_indices = @transform_1, window_bounds = array<i64: 1, 32>}, {pipeline_mode = #tpu.pipeline_mode<synchronous>, transform_indices = @transform_2, window_bounds = array<i64: 1, 32>}, {transform_indices = @transform_3, window_bounds = array<i64: 128, 32>}]} {
    %c0 = arith.constant 0 : index
    %c0_0 = arith.constant 0 : index
    %0 = vector.load %arg1[%c0, %c0_0] : memref<128x32xbf16, #tpu.memory_space<vmem>>, vector<128x32xbf16>
    %1 = arith.extf %0 : vector<128x32xbf16> to vector<128x32xf32>
    %c0_1 = arith.constant 0 : index
    %c0_2 = arith.constant 0 : index
    %2 = vector.load %arg2[%c0_1, %c0_2] : memref<1x32xf32, #tpu.memory_space<vmem>>, vector<1x32xf32>
    %3 = vector.broadcast %2 : vector<1x32xf32> to vector<128x32xf32>
    %4 = arith.mulf %1, %3 : vector<128x32xf32>
    %c0_3 = arith.constant 0 : index
    %c0_4 = arith.constant 0 : index
    %5 = vector.load %arg3[%c0_3, %c0_4] : memref<1x32xf32, #tpu.memory_space<vmem>>, vector<1x32xf32>
    %6 = vector.broadcast %5 : vector<1x32xf32> to vector<128x32xf32>
    %7 = arith.addf %4, %6 : vector<128x32xf32>
    %cst = arith.constant 0.000000e+00 : f32
    %8 = vector.broadcast %cst : f32 to vector<128x32xf32>
    %9 = arith.cmpf ogt, %7, %8 : vector<128x32xf32>
    %cst_5 = arith.constant 2.000000e-01 : f32
    %10 = vector.broadcast %cst_5 : f32 to vector<128x32xf32>
    %11 = arith.mulf %10, %7 : vector<128x32xf32>
    %12 = arith.select %9, %7, %11 : vector<128x32xi1>, vector<128x32xf32>
    %13 = arith.truncf %12 : vector<128x32xf32> to vector<128x32xbf16>
    %c0_6 = arith.constant 0 : index
    %c0_7 = arith.constant 0 : index
    %14 = vector.load %arg4[%c0_6, %c0_7] : memref<128x32xbf16, #tpu.memory_space<vmem>>, vector<128x32xbf16>
    tpu.vector_store %arg4[%c0_6, %c0_7], %13 {strides = array<i32>} : memref<128x32xbf16, #tpu.memory_space<vmem>>, vector<128x32xbf16>,
    return
  }
  func.func @transform_0(%arg0: i32) -> (i32, i32) {
    %c0_i32 = arith.constant 0 : i32
    %c0_i32_0 = arith.constant 0 : i32
    return %arg0, %c0_i32 : i32, i32
  }
  func.func @transform_1(%arg0: i32) -> (i32, i32) {
    %c0_i32 = arith.constant 0 : i32
    %c0_i32_0 = arith.constant 0 : i32
    %c0_i32_1 = arith.constant 0 : i32
    return %c0_i32, %c0_i32_0 : i32, i32
  }
  func.func @transform_2(%arg0: i32) -> (i32, i32) {
    %c0_i32 = arith.constant 0 : i32
    %c0_i32_0 = arith.constant 0 : i32
    %c0_i32_1 = arith.constant 0 : i32
    return %c0_i32, %c0_i32_0 : i32, i32
  }
  func.func @transform_3(%arg0: i32) -> (i32, i32) {
    %c0_i32 = arith.constant 0 : i32
    %c0_i32_0 = arith.constant 0 : i32
    return %arg0, %c0_i32 : i32, i32
  }
}

module attributes {stable_mosaic.version = 11 : i64} {
  func.func @_matmul_bnstats_kernel(%arg0: i32, %arg1: memref<32x512xbf16, #tpu.memory_space<vmem>>, %arg2: memref<512x128xbf16, #tpu.memory_space<vmem>>, %arg3: memref<32x64xbf16, #tpu.memory_space<vmem>>, %arg4: memref<1x1x64xf32, #tpu.memory_space<vmem>>, %arg5: memref<1x1x64xf32, #tpu.memory_space<vmem>>) attributes {dimension_semantics = [#tpu.dimension_semantics<parallel>], iteration_bounds = array<i64: 1>, scalar_prefetch = 0 : i64, scratch_operands = 0 : i64, tpu.core_type = #tpu.core_type<tc>, window_params = [{transform_indices = @transform_0, window_bounds = array<i64: 32, 512>}, {pipeline_mode = #tpu.pipeline_mode<synchronous>, transform_indices = @transform_1, window_bounds = array<i64: 512, 128>}, {transform_indices = @transform_2, window_bounds = array<i64: 32, 64>}, {transform_indices = @transform_3, window_bounds = array<i64: 1, 1, 64>}, {transform_indices = @transform_4, window_bounds = array<i64: 1, 1, 64>}]} {
    %c0 = arith.constant 0 : index
    %c0_0 = arith.constant 0 : index
    %0 = vector.load %arg1[%c0, %c0_0] : memref<32x512xbf16, #tpu.memory_space<vmem>>, vector<32x512xbf16>
    %c0_1 = arith.constant 0 : index
    %c0_2 = arith.constant 0 : index
    %1 = vector.load %arg2[%c0_1, %c0_2] : memref<512x128xbf16, #tpu.memory_space<vmem>>, vector<512x128xbf16>
    %cst = arith.constant dense<0.000000e+00> : vector<32x128xf32>
    %2 = tpu.matmul %0, %1, %cst {dimension_numbers = #tpu.dot_dimension_numbers<[1], [0], [0], [1], [0, 0, 1, 1], [], []>} : vector<32x512xbf16>, vector<512x128xbf16>, vector<32x128xf32> -> vector<32x128xf32>
    %3 = vector.extract_strided_slice %2 {offsets = [0, 0], sizes = [32, 64], strides = [1, 1]} : vector<32x128xf32> to vector<32x64xf32>
    %4 = arith.truncf %3 : vector<32x64xf32> to vector<32x64xbf16>
    %c0_3 = arith.constant 0 : index
    %c0_4 = arith.constant 0 : index
    %5 = vector.load %arg3[%c0_3, %c0_4] : memref<32x64xbf16, #tpu.memory_space<vmem>>, vector<32x64xbf16>
    tpu.vector_store %arg3[%c0_3, %c0_4], %4 {strides = array<i32>} : memref<32x64xbf16, #tpu.memory_space<vmem>>, vector<32x64xbf16>,
    %cst_5 = arith.constant dense<0.000000e+00> : vector<64xf32>
    %6 = vector.multi_reduction <add>, %3, %cst_5 [0] : vector<32x64xf32> to vector<64xf32>
    %7 = vector.shape_cast %6 : vector<64xf32> to vector<1x64xf32>
    %8 = arith.mulf %3, %3 : vector<32x64xf32>
    %cst_6 = arith.constant dense<0.000000e+00> : vector<64xf32>
    %9 = vector.multi_reduction <add>, %8, %cst_6 [0] : vector<32x64xf32> to vector<64xf32>
    %10 = vector.shape_cast %9 : vector<64xf32> to vector<1x64xf32>
    %11 = vector.shape_cast %7 : vector<1x64xf32> to vector<1x1x64xf32>
    %c0_7 = arith.constant 0 : index
    %c0_8 = arith.constant 0 : index
    %c0_9 = arith.constant 0 : index
    %12 = vector.load %arg4[%c0_7, %c0_8, %c0_9] : memref<1x1x64xf32, #tpu.memory_space<vmem>>, vector<1x1x64xf32>
    tpu.vector_store %arg4[%c0_7, %c0_8, %c0_9], %11 {strides = array<i32>} : memref<1x1x64xf32, #tpu.memory_space<vmem>>, vector<1x1x64xf32>,
    %13 = vector.shape_cast %10 : vector<1x64xf32> to vector<1x1x64xf32>
    %c0_10 = arith.constant 0 : index
    %c0_11 = arith.constant 0 : index
    %c0_12 = arith.constant 0 : index
    %14 = vector.load %arg5[%c0_10, %c0_11, %c0_12] : memref<1x1x64xf32, #tpu.memory_space<vmem>>, vector<1x1x64xf32>
    tpu.vector_store %arg5[%c0_10, %c0_11, %c0_12], %13 {strides = array<i32>} : memref<1x1x64xf32, #tpu.memory_space<vmem>>, vector<1x1x64xf32>,
    return
  }
  func.func @transform_0(%arg0: i32) -> (i32, i32) {
    %c0_i32 = arith.constant 0 : i32
    %c0_i32_0 = arith.constant 0 : i32
    return %arg0, %c0_i32 : i32, i32
  }
  func.func @transform_1(%arg0: i32) -> (i32, i32) {
    %c0_i32 = arith.constant 0 : i32
    %c0_i32_0 = arith.constant 0 : i32
    %c0_i32_1 = arith.constant 0 : i32
    return %c0_i32, %c0_i32_0 : i32, i32
  }
  func.func @transform_2(%arg0: i32) -> (i32, i32) {
    %c0_i32 = arith.constant 0 : i32
    %c0_i32_0 = arith.constant 0 : i32
    return %arg0, %c0_i32 : i32, i32
  }
  func.func @transform_3(%arg0: i32) -> (i32, i32, i32) {
    %c0_i32 = arith.constant 0 : i32
    %c0_i32_0 = arith.constant 0 : i32
    %c0_i32_1 = arith.constant 0 : i32
    return %arg0, %c0_i32, %c0_i32_0 : i32, i32, i32
  }
  func.func @transform_4(%arg0: i32) -> (i32, i32, i32) {
    %c0_i32 = arith.constant 0 : i32
    %c0_i32_0 = arith.constant 0 : i32
    %c0_i32_1 = arith.constant 0 : i32
    return %arg0, %c0_i32, %c0_i32_0 : i32, i32, i32
  }
}

module attributes {stable_mosaic.version = 11 : i64} {
  func.func @_bn_apply_lrelu_kernel(%arg0: i32, %arg1: memref<32x64xbf16, #tpu.memory_space<vmem>>, %arg2: memref<1x64xf32, #tpu.memory_space<vmem>>, %arg3: memref<1x64xf32, #tpu.memory_space<vmem>>, %arg4: memref<32x64xbf16, #tpu.memory_space<vmem>>) attributes {dimension_semantics = [#tpu.dimension_semantics<parallel>], iteration_bounds = array<i64: 1>, scalar_prefetch = 0 : i64, scratch_operands = 0 : i64, tpu.core_type = #tpu.core_type<tc>, window_params = [{transform_indices = @transform_0, window_bounds = array<i64: 32, 64>}, {pipeline_mode = #tpu.pipeline_mode<synchronous>, transform_indices = @transform_1, window_bounds = array<i64: 1, 64>}, {pipeline_mode = #tpu.pipeline_mode<synchronous>, transform_indices = @transform_2, window_bounds = array<i64: 1, 64>}, {transform_indices = @transform_3, window_bounds = array<i64: 32, 64>}]} {
    %c0 = arith.constant 0 : index
    %c0_0 = arith.constant 0 : index
    %0 = vector.load %arg1[%c0, %c0_0] : memref<32x64xbf16, #tpu.memory_space<vmem>>, vector<32x64xbf16>
    %1 = arith.extf %0 : vector<32x64xbf16> to vector<32x64xf32>
    %c0_1 = arith.constant 0 : index
    %c0_2 = arith.constant 0 : index
    %2 = vector.load %arg2[%c0_1, %c0_2] : memref<1x64xf32, #tpu.memory_space<vmem>>, vector<1x64xf32>
    %3 = vector.broadcast %2 : vector<1x64xf32> to vector<32x64xf32>
    %4 = arith.mulf %1, %3 : vector<32x64xf32>
    %c0_3 = arith.constant 0 : index
    %c0_4 = arith.constant 0 : index
    %5 = vector.load %arg3[%c0_3, %c0_4] : memref<1x64xf32, #tpu.memory_space<vmem>>, vector<1x64xf32>
    %6 = vector.broadcast %5 : vector<1x64xf32> to vector<32x64xf32>
    %7 = arith.addf %4, %6 : vector<32x64xf32>
    %cst = arith.constant 0.000000e+00 : f32
    %8 = vector.broadcast %cst : f32 to vector<32x64xf32>
    %9 = arith.cmpf ogt, %7, %8 : vector<32x64xf32>
    %cst_5 = arith.constant 2.000000e-01 : f32
    %10 = vector.broadcast %cst_5 : f32 to vector<32x64xf32>
    %11 = arith.mulf %10, %7 : vector<32x64xf32>
    %12 = arith.select %9, %7, %11 : vector<32x64xi1>, vector<32x64xf32>
    %13 = arith.truncf %12 : vector<32x64xf32> to vector<32x64xbf16>
    %c0_6 = arith.constant 0 : index
    %c0_7 = arith.constant 0 : index
    %14 = vector.load %arg4[%c0_6, %c0_7] : memref<32x64xbf16, #tpu.memory_space<vmem>>, vector<32x64xbf16>
    tpu.vector_store %arg4[%c0_6, %c0_7], %13 {strides = array<i32>} : memref<32x64xbf16, #tpu.memory_space<vmem>>, vector<32x64xbf16>,
    return
  }
  func.func @transform_0(%arg0: i32) -> (i32, i32) {
    %c0_i32 = arith.constant 0 : i32
    %c0_i32_0 = arith.constant 0 : i32
    return %arg0, %c0_i32 : i32, i32
  }
  func.func @transform_1(%arg0: i32) -> (i32, i32) {
    %c0_i32 = arith.constant 0 : i32
    %c0_i32_0 = arith.constant 0 : i32
    %c0_i32_1 = arith.constant 0 : i32
    return %c0_i32, %c0_i32_0 : i32, i32
  }
  func.func @transform_2(%arg0: i32) -> (i32, i32) {
    %c0_i32 = arith.constant 0 : i32
    %c0_i32_0 = arith.constant 0 : i32
    %c0_i32_1 = arith.constant 0 : i32
    return %c0_i32, %c0_i32_0 : i32, i32
  }
  func.func @transform_3(%arg0: i32) -> (i32, i32) {
    %c0_i32 = arith.constant 0 : i32
    %c0_i32_0 = arith.constant 0 : i32
    return %arg0, %c0_i32 : i32, i32
  }
}

module attributes {stable_mosaic.version = 11 : i64} {
  func.func @_matmul_act_kernel(%arg0: i32, %arg1: memref<16x1024xbf16, #tpu.memory_space<vmem>>, %arg2: memref<1024x128xbf16, #tpu.memory_space<vmem>>, %arg3: memref<16x1xf32, #tpu.memory_space<vmem>>) attributes {dimension_semantics = [#tpu.dimension_semantics<parallel>], iteration_bounds = array<i64: 1>, scalar_prefetch = 0 : i64, scratch_operands = 0 : i64, tpu.core_type = #tpu.core_type<tc>, window_params = [{transform_indices = @transform_0, window_bounds = array<i64: 16, 1024>}, {pipeline_mode = #tpu.pipeline_mode<synchronous>, transform_indices = @transform_1, window_bounds = array<i64: 1024, 128>}, {transform_indices = @transform_2, window_bounds = array<i64: 16, 1>}]} {
    %c0 = arith.constant 0 : index
    %c0_0 = arith.constant 0 : index
    %0 = vector.load %arg1[%c0, %c0_0] : memref<16x1024xbf16, #tpu.memory_space<vmem>>, vector<16x1024xbf16>
    %c0_1 = arith.constant 0 : index
    %c0_2 = arith.constant 0 : index
    %1 = vector.load %arg2[%c0_1, %c0_2] : memref<1024x128xbf16, #tpu.memory_space<vmem>>, vector<1024x128xbf16>
    %cst = arith.constant dense<0.000000e+00> : vector<16x128xf32>
    %2 = tpu.matmul %0, %1, %cst {dimension_numbers = #tpu.dot_dimension_numbers<[1], [0], [0], [1], [0, 0, 1, 1], [], []>} : vector<16x1024xbf16>, vector<1024x128xbf16>, vector<16x128xf32> -> vector<16x128xf32>
    %3 = vector.extract_strided_slice %2 {offsets = [0, 0], sizes = [16, 1], strides = [1, 1]} : vector<16x128xf32> to vector<16x1xf32>
    %4 = arith.negf %3 : vector<16x1xf32>
    %5 = math.exp %4 : vector<16x1xf32>
    %cst_3 = arith.constant 1.000000e+00 : f32
    %6 = vector.broadcast %cst_3 : f32 to vector<16x1xf32>
    %7 = arith.addf %6, %5 : vector<16x1xf32>
    %8 = arith.divf %6, %7 : vector<16x1xf32>
    %c0_4 = arith.constant 0 : index
    %c0_5 = arith.constant 0 : index
    %9 = vector.load %arg3[%c0_4, %c0_5] : memref<16x1xf32, #tpu.memory_space<vmem>>, vector<16x1xf32>
    tpu.vector_store %arg3[%c0_4, %c0_5], %8 {strides = array<i32>} : memref<16x1xf32, #tpu.memory_space<vmem>>, vector<16x1xf32>,
    return
  }
  func.func @transform_0(%arg0: i32) -> (i32, i32) {
    %c0_i32 = arith.constant 0 : i32
    %c0_i32_0 = arith.constant 0 : i32
    return %arg0, %c0_i32 : i32, i32
  }
  func.func @transform_1(%arg0: i32) -> (i32, i32) {
    %c0_i32 = arith.constant 0 : i32
    %c0_i32_0 = arith.constant 0 : i32
    %c0_i32_1 = arith.constant 0 : i32
    return %c0_i32, %c0_i32_0 : i32, i32
  }
  func.func @transform_2(%arg0: i32) -> (i32, i32) {
    %c0_i32 = arith.constant 0 : i32
    %c0_i32_0 = arith.constant 0 : i32
    return %arg0, %c0_i32 : i32, i32
  }
}

</mosaic_0001>

<bundles_post_ra>
// kernel: discriminator_forward.8
= control target key start
LH: loop header
LB: loop body
LE: loop exit
PB: predicated region body
PF: predicated region fallthrough
CT: control target
= control target key end

     0   :  { %vm3949_vm2 = vcmask 60416   ;;  %s6868_s1 = inlined_call_operand.vmem [shape: bf16[128,128], index: 1, kind: input, shape index: {}]   ;;  %s6869_s0 = inlined_call_operand.vmem [shape: bf16[2048,128], index: 0, kind: input, shape index: {}]   ;;  %s6870_s2 = inlined_call_operand.vmem [shape: bf16[2048,8], index: 2, kind: output, shape index: {}]  }
   0x1   :  { %v5282_v0 = vld [vmem:[%s6868_s1] sm:$0xff]   ;;  %v5283_v1 = vld [vmem:[%s6868_s1 + $0x8] sm:$0xff]   ;;  %v5284_v2 = vld [vmem:[%s6868_s1 + $0x10] sm:$0xff]  }
   0x2   :  { %4994 = vmatprep.subr.bf16.mxu0 %v5282_v0  ;;  %5266 = vmatprep.subr.bf16.mxu1 %v5282_v0  ;;  %v5285_v3 = vld [vmem:[%s6868_s1 + $0x18] sm:$0xff]   ;;  %v5290_v4 = vld [vmem:[%s6869_s0] sm:$0xff]   ;;  %v5287_v7 = vld [vmem:[%s6868_s1 + $0x28] sm:$0xff]  }
   0x3   :  { %4995 = vmatpush3.bf16.msra.mxu0 %v5282_v0  ;;  %5274 = vmatpush3.bf16.msra.mxu1 %v5282_v0  ;;  %v5291_v5 = vld [vmem:[%s6869_s0 + $0x200] sm:$0xff]   ;;  %v5288_v8 = vld [vmem:[%s6868_s1 + $0x30] sm:$0xff]   ;;  %v5289_v9 = vld [vmem:[%s6868_s1 + $0x38] sm:$0xff]  }
   0x4   :  { %4996 = vmatprep.subr.bf16.mxu0 %v5283_v1  ;;  %5267 = vmatprep.subr.bf16.mxu1 %v5283_v1  ;;  %v5286_v6 = vld [vmem:[%s6868_s1 + $0x20] sm:$0xff]   ;;  %v5292_v10 = vld [vmem:[%s6869_s0 + $0x8] sm:$0xff]   ;;  %v5294_v12 = vld [vmem:[%s6869_s0 + $0x10] sm:$0xff]  }
   0x5   :  { %5010 = vmatprep.mubr.bf16.mxu0 %v5290_v4  ;;  %5138 = vmatprep.mubr.bf16.mxu1 %v5291_v5  ;;  %v5293_v11 = vld [vmem:[%s6869_s0 + $0x208] sm:$0xff]   ;;  %v5295_v13 = vld [vmem:[%s6869_s0 + $0x210] sm:$0xff]   ;;  %v5296_v14 = vld [vmem:[%s6869_s0 + $0x18] sm:$0xff]  }
   0x6   :  { %v5297_v15 = vld [vmem:[%s6869_s0 + $0x218] sm:$0xff]   ;;  %v5298_v16 = vld [vmem:[%s6869_s0 + $0x20] sm:$0xff]   ;;  %v5300_v18 = vld [vmem:[%s6869_s0 + $0x28] sm:$0xff]  }
   0x7   :  { %4997 = vmatpush3.bf16.msra.mxu0 %v5283_v1  ;;  %5275 = vmatpush3.bf16.msra.mxu1 %v5283_v1  ;;  %v5299_v17 = vld [vmem:[%s6869_s0 + $0x220] sm:$0xff]   ;;  %v5301_v19 = vld [vmem:[%s6869_s0 + $0x228] sm:$0xff]   ;;  %v5302_v20 = vld [vmem:[%s6869_s0 + $0x30] sm:$0xff]  }
   0x8   :  { %4998 = vmatprep.subr.bf16.mxu0 %v5284_v2  ;;  %5268 = vmatprep.subr.bf16.mxu1 %v5284_v2  ;;  %v5303_v21 = vld [vmem:[%s6869_s0 + $0x230] sm:$0xff]   ;;  %v5304_v22 = vld [vmem:[%s6869_s0 + $0x38] sm:$0xff]   ;;  %v5306_v24 = vld [vmem:[%s6869_s0 + $0x40] sm:$0xff]  }
   0x9   :  { %v5305_v23 = vld [vmem:[%s6869_s0 + $0x238] sm:$0xff]   ;;  %v5307_v25 = vld [vmem:[%s6869_s0 + $0x240] sm:$0xff]   ;;  %v5308_v26 = vld [vmem:[%s6869_s0 + $0x48] sm:$0xff]  }
   0xa   :  { %v5309_v27 = vld [vmem:[%s6869_s0 + $0x248] sm:$0xff]   ;;  %v5310_v28 = vld [vmem:[%s6869_s0 + $0x50] sm:$0xff]   ;;  %v5312_v30 = vld [vmem:[%s6869_s0 + $0x58] sm:$0xff]  }
   0xb   :  { %4999 = vmatpush3.bf16.msra.mxu0 %v5284_v2  ;;  %5276 = vmatpush3.bf16.msra.mxu1 %v5284_v2  ;;  %v5311_v29 = vld [vmem:[%s6869_s0 + $0x250] sm:$0xff]   ;;  %v5313_v31 = vld [vmem:[%s6869_s0 + $0x258] sm:$0xff]   ;;  %v5314_v32 = vld [vmem:[%s6869_s0 + $0x60] sm:$0xff]  }
   0xc   :  { %5000 = vmatprep.subr.bf16.mxu0 %v5285_v3  ;;  %5269 = vmatprep.subr.bf16.mxu1 %v5285_v3  ;;  %v5315_v33 = vld [vmem:[%s6869_s0 + $0x260] sm:$0xff]   ;;  %v5316_v34 = vld [vmem:[%s6869_s0 + $0x68] sm:$0xff]   ;;  %v5318_v36 = vld [vmem:[%s6869_s0 + $0x70] sm:$0xff]  }
   0xd   :  { %v5317_v35 = vld [vmem:[%s6869_s0 + $0x268] sm:$0xff]   ;;  %v5319_v37 = vld [vmem:[%s6869_s0 + $0x270] sm:$0xff]   ;;  %v5320_v38 = vld [vmem:[%s6869_s0 + $0x78] sm:$0xff]  }
   0xe   :  { %v5321_v39 = vld [vmem:[%s6869_s0 + $0x278] sm:$0xff]   ;;  %v5322_v40 = vld [vmem:[%s6869_s0 + $0x80] sm:$0xff]   ;;  %v5324_v42 = vld [vmem:[%s6869_s0 + $0x88] sm:$0xff]  }
   0xf   :  { %5001 = vmatpush3.bf16.msra.mxu0 %v5285_v3  ;;  %5277 = vmatpush3.bf16.msra.mxu1 %v5285_v3  ;;  %v5323_v41 = vld [vmem:[%s6869_s0 + $0x280] sm:$0xff]   ;;  %v5325_v43 = vld [vmem:[%s6869_s0 + $0x288] sm:$0xff]   ;;  %v5326_v44 = vld [vmem:[%s6869_s0 + $0x90] sm:$0xff]  }
  0x10   :  { %5002 = vmatprep.subr.bf16.mxu0 %v5286_v6  ;;  %5270 = vmatprep.subr.bf16.mxu1 %v5286_v6  ;;  %v5327_v45 = vld [vmem:[%s6869_s0 + $0x290] sm:$0xff]   ;;  %v5328_v46 = vld [vmem:[%s6869_s0 + $0x98] sm:$0xff]   ;;  %v5330_v48 = vld [vmem:[%s6869_s0 + $0xa0] sm:$0xff]  }
  0x11   :  { %v5329_v47 = vld [vmem:[%s6869_s0 + $0x298] sm:$0xff]   ;;  %v5331_v49 = vld [vmem:[%s6869_s0 + $0x2a0] sm:$0xff]   ;;  %v5332_v50 = vld [vmem:[%s6869_s0 + $0xa8] sm:$0xff]  }
  0x12   :  { %v5333_v51 = vld [vmem:[%s6869_s0 + $0x2a8] sm:$0xff]   ;;  %v5334_v52 = vld [vmem:[%s6869_s0 + $0xb0] sm:$0xff]   ;;  %v5336_v54 = vld [vmem:[%s6869_s0 + $0xb8] sm:$0xff]  }
  0x13   :  { %5003 = vmatpush3.bf16.msra.mxu0 %v5286_v6  ;;  %5278 = vmatpush3.bf16.msra.mxu1 %v5286_v6  ;;  %v5335_v53 = vld [vmem:[%s6869_s0 + $0x2b0] sm:$0xff]   ;;  %v5337_v55 = vld [vmem:[%s6869_s0 + $0x2b8] sm:$0xff]   ;;  %v5338_v56 = vld [vmem:[%s6869_s0 + $0xc0] sm:$0xff]  }
  0x14   :  { %5004 = vmatprep.subr.bf16.mxu0 %v5287_v7  ;;  %5271 = vmatprep.subr.bf16.mxu1 %v5287_v7  ;;  %v5339_v57 = vld [vmem:[%s6869_s0 + $0x2c0] sm:$0xff]   ;;  %v5340_v58 = vld [vmem:[%s6869_s0 + $0xc8] sm:$0xff]   ;;  %v5342_v60 = vld [vmem:[%s6869_s0 + $0xd0] sm:$0xff]  }
  0x15   :  { %v5341_v59 = vld [vmem:[%s6869_s0 + $0x2c8] sm:$0xff]   ;;  %v5343_v61 = vld [vmem:[%s6869_s0 + $0x2d0] sm:$0xff]   ;;  %v5344_v62 = vld [vmem:[%s6869_s0 + $0xd8] sm:$0xff]  }
  0x16   :  { %v5345_v63 = vld [vmem:[%s6869_s0 + $0x2d8] sm:$0xff]   ;;  %v5346_v0 = vld [vmem:[%s6869_s0 + $0xe0] sm:$0xff]   ;;  %v5348_v2 = vld [vmem:[%s6869_s0 + $0xe8] sm:$0xff]  }
  0x17   :  { %5005 = vmatpush3.bf16.msra.mxu0 %v5287_v7  ;;  %5279 = vmatpush3.bf16.msra.mxu1 %v5287_v7  ;;  %v5347_v1 = vld [vmem:[%s6869_s0 + $0x2e0] sm:$0xff]   ;;  %v5349_v3 = vld [vmem:[%s6869_s0 + $0x2e8] sm:$0xff]   ;;  %v5350_v4 = vld [vmem:[%s6869_s0 + $0xf0] sm:$0xff]  }
  0x18   :  { %5006 = vmatprep.subr.bf16.mxu0 %v5288_v8  ;;  %5272 = vmatprep.subr.bf16.mxu1 %v5288_v8  ;;  %v5351_v5 = vld [vmem:[%s6869_s0 + $0x2f0] sm:$0xff]   ;;  %v5352_v6 = vld [vmem:[%s6869_s0 + $0xf8] sm:$0xff]  }
  0x19   :  { %v5353_v7 = vld [vmem:[%s6869_s0 + $0x2f8] sm:$0xff]  }
  0x1b   :  { %5007 = vmatpush3.bf16.msra.mxu0 %v5288_v8  ;;  %5280 = vmatpush3.bf16.msra.mxu1 %v5288_v8  ;;  %v5354_v8 = vld [vmem:[%s6869_s0 + $0x100] sm:$0xff]  }
  0x1c   :  { %5008 = vmatprep.subr.bf16.mxu0 %v5289_v9  ;;  %5273 = vmatprep.subr.bf16.mxu1 %v5289_v9 }
  0x1f   :  { %5009 = vmatpush3.bf16.msra.mxu0 %v5289_v9  ;;  %5281 = vmatpush3.bf16.msra.mxu1 %v5289_v9  ;;  %v5355_v9 = vld [vmem:[%s6869_s0 + $0x300] sm:$0xff]  }
  0x22   :  { %5011 = vmatmul.mubr.bf16.vlgmr.msra.gmra.mrb[0].mxu0 %v5292_v10  ;;  %5139 = vmatmul.mubr.bf16.vlgmr.msra.gmra.mrb[0].mxu1 %v5293_v11  ;;  %v5356_v10 = vld [vmem:[%s6869_s0 + $0x108] sm:$0xff]  }
  0x23   :  { %5014 = vmatprep.mubr.bf16.mxu0 %v5294_v12  ;;  %5142 = vmatprep.mubr.bf16.mxu1 %v5295_v13  ;;  %v5357_v11 = vld [vmem:[%s6869_s0 + $0x308] sm:$0xff]   ;;  %v5358_v12 = vld [vmem:[%s6869_s0 + $0x110] sm:$0xff]  }
  0x24   :  { %v5359_v13 = vld [vmem:[%s6869_s0 + $0x310] sm:$0xff]  }
  0x2a   :  { %5015 = vmatmul.mubr.bf16.gmra.mrb[4].mxu0 %v5296_v14  ;;  %5143 = vmatmul.mubr.bf16.gmra.mrb[4].mxu1 %v5297_v15  ;;  %v5360_v14 = vld [vmem:[%s6869_s0 + $0x118] sm:$0xff]  }
  0x2b   :  { %5018 = vmatprep.mubr.bf16.mxu0 %v5298_v16  ;;  %5146 = vmatprep.mubr.bf16.mxu1 %v5299_v17  ;;  %v5361_v15 = vld [vmem:[%s6869_s0 + $0x318] sm:$0xff]   ;;  %v5362_v16 = vld [vmem:[%s6869_s0 + $0x120] sm:$0xff]  }
  0x2c   :  { %v5363_v17 = vld [vmem:[%s6869_s0 + $0x320] sm:$0xff]  }
  0x32   :  { %5019 = vmatmul.mubr.bf16.gmra.mrb[8].mxu0 %v5300_v18  ;;  %5147 = vmatmul.mubr.bf16.gmra.mrb[8].mxu1 %v5301_v19  ;;  %v5364_v18 = vld [vmem:[%s6869_s0 + $0x128] sm:$0xff]  }
  0x33   :  { %5022 = vmatprep.mubr.bf16.mxu0 %v5302_v20  ;;  %5150 = vmatprep.mubr.bf16.mxu1 %v5303_v21  ;;  %v5365_v19 = vld [vmem:[%s6869_s0 + $0x328] sm:$0xff]   ;;  %v5366_v20 = vld [vmem:[%s6869_s0 + $0x130] sm:$0xff]  }
  0x34   :  { %v5367_v21 = vld [vmem:[%s6869_s0 + $0x330] sm:$0xff]  }
  0x3a   :  { %5023 = vmatmul.mubr.bf16.gmra.mrb[12].mxu0 %v5304_v22  ;;  %5151 = vmatmul.mubr.bf16.gmra.mrb[12].mxu1 %v5305_v23  ;;  %v5368_v22 = vld [vmem:[%s6869_s0 + $0x138] sm:$0xff]  }
  0x3b   :  { %5026 = vmatprep.mubr.bf16.mxu0 %v5306_v24  ;;  %5154 = vmatprep.mubr.bf16.mxu1 %v5307_v25  ;;  %v5369_v23 = vld [vmem:[%s6869_s0 + $0x338] sm:$0xff]   ;;  %v5370_v24 = vld [vmem:[%s6869_s0 + $0x140] sm:$0xff]  }
  0x3c   :  { %v5371_v25 = vld [vmem:[%s6869_s0 + $0x340] sm:$0xff]  }
  0x42   :  { %5027 = vmatmul.mubr.bf16.gmra.mrb[16].mxu0 %v5308_v26  ;;  %5155 = vmatmul.mubr.bf16.gmra.mrb[16].mxu1 %v5309_v27  ;;  %v5372_v26 = vld [vmem:[%s6869_s0 + $0x148] sm:$0xff]  }
  0x43   :  { %5030 = vmatprep.mubr.bf16.mxu0 %v5310_v28  ;;  %5158 = vmatprep.mubr.bf16.mxu1 %v5311_v29  ;;  %v5373_v27 = vld [vmem:[%s6869_s0 + $0x348] sm:$0xff]   ;;  %v5374_v28 = vld [vmem:[%s6869_s0 + $0x150] sm:$0xff]  }
  0x44   :  { %v5375_v29 = vld [vmem:[%s6869_s0 + $0x350] sm:$0xff]  }
  0x4a   :  { %5031 = vmatmul.mubr.bf16.gmra.mrb[20].mxu0 %v5312_v30  ;;  %5159 = vmatmul.mubr.bf16.gmra.mrb[20].mxu1 %v5313_v31  ;;  %v5376_v30 = vld [vmem:[%s6869_s0 + $0x158] sm:$0xff]  }
  0x4b   :  { %5034 = vmatprep.mubr.bf16.mxu0 %v5314_v32  ;;  %5162 = vmatprep.mubr.bf16.mxu1 %v5315_v33  ;;  %v5377_v31 = vld [vmem:[%s6869_s0 + $0x358] sm:$0xff]   ;;  %v5378_v32 = vld [vmem:[%s6869_s0 + $0x160] sm:$0xff]  }
  0x4c   :  { %v5379_v33 = vld [vmem:[%s6869_s0 + $0x360] sm:$0xff]  }
  0x52   :  { %5035 = vmatmul.mubr.bf16.gmra.mrb[24].mxu0 %v5316_v34  ;;  %5163 = vmatmul.mubr.bf16.gmra.mrb[24].mxu1 %v5317_v35  ;;  %v5380_v34 = vld [vmem:[%s6869_s0 + $0x168] sm:$0xff]  }
  0x53   :  { %5038 = vmatprep.mubr.bf16.mxu0 %v5318_v36  ;;  %5166 = vmatprep.mubr.bf16.mxu1 %v5319_v37  ;;  %v5381_v35 = vld [vmem:[%s6869_s0 + $0x368] sm:$0xff]   ;;  %v5382_v36 = vld [vmem:[%s6869_s0 + $0x170] sm:$0xff]  }
  0x54   :  { %v5383_v37 = vld [vmem:[%s6869_s0 + $0x370] sm:$0xff]  }
  0x5a   :  { %5039 = vmatmul.mubr.bf16.gmra.mrb[28].mxu0 %v5320_v38  ;;  %5167 = vmatmul.mubr.bf16.gmra.mrb[28].mxu1 %v5321_v39  ;;  %v5384_v38 = vld [vmem:[%s6869_s0 + $0x178] sm:$0xff]  }
  0x5b   :  { %5042 = vmatprep.mubr.bf16.mxu0 %v5322_v40  ;;  %5170 = vmatprep.mubr.bf16.mxu1 %v5323_v41  ;;  %v5385_v39 = vld [vmem:[%s6869_s0 + $0x378] sm:$0xff]   ;;  %v5386_v40 = vld [vmem:[%s6869_s0 + $0x180] sm:$0xff]  }
  0x5c   :  { %v5387_v41 = vld [vmem:[%s6869_s0 + $0x380] sm:$0xff]  }
  0x62   :  { %5043 = vmatmul.mubr.bf16.gmra.mrb[32].mxu0 %v5324_v42  ;;  %5171 = vmatmul.mubr.bf16.gmra.mrb[32].mxu1 %v5325_v43  ;;  %v5388_v42 = vld [vmem:[%s6869_s0 + $0x188] sm:$0xff]  }
  0x63   :  { %5046 = vmatprep.mubr.bf16.mxu0 %v5326_v44  ;;  %5174 = vmatprep.mubr.bf16.mxu1 %v5327_v45  ;;  %v5389_v43 = vld [vmem:[%s6869_s0 + $0x388] sm:$0xff]   ;;  %v5390_v44 = vld [vmem:[%s6869_s0 + $0x190] sm:$0xff]  }
  0x64   :  { %v5391_v45 = vld [vmem:[%s6869_s0 + $0x390] sm:$0xff]  }
  0x6a   :  { %5047 = vmatmul.mubr.bf16.gmra.mrb[36].mxu0 %v5328_v46  ;;  %5175 = vmatmul.mubr.bf16.gmra.mrb[36].mxu1 %v5329_v47  ;;  %v5392_v46 = vld [vmem:[%s6869_s0 + $0x198] sm:$0xff]  }
  0x6b   :  { %5050 = vmatprep.mubr.bf16.mxu0 %v5330_v48  ;;  %5178 = vmatprep.mubr.bf16.mxu1 %v5331_v49  ;;  %v5393_v47 = vld [vmem:[%s6869_s0 + $0x398] sm:$0xff]   ;;  %v5394_v48 = vld [vmem:[%s6869_s0 + $0x1a0] sm:$0xff]  }
  0x6c   :  { %v5395_v49 = vld [vmem:[%s6869_s0 + $0x3a0] sm:$0xff]  }
  0x72   :  { %5051 = vmatmul.mubr.bf16.gmra.mrb[40].mxu0 %v5332_v50  ;;  %5179 = vmatmul.mubr.bf16.gmra.mrb[40].mxu1 %v5333_v51  ;;  %v5396_v50 = vld [vmem:[%s6869_s0 + $0x1a8] sm:$0xff]  }
  0x73   :  { %5054 = vmatprep.mubr.bf16.mxu0 %v5334_v52  ;;  %5182 = vmatprep.mubr.bf16.mxu1 %v5335_v53  ;;  %v5397_v51 = vld [vmem:[%s6869_s0 + $0x3a8] sm:$0xff]   ;;  %v5398_v52 = vld [vmem:[%s6869_s0 + $0x1b0] sm:$0xff]  }
  0x74   :  { %v5399_v53 = vld [vmem:[%s6869_s0 + $0x3b0] sm:$0xff]  }
  0x7a   :  { %5055 = vmatmul.mubr.bf16.gmra.mrb[44].mxu0 %v5336_v54  ;;  %5183 = vmatmul.mubr.bf16.gmra.mrb[44].mxu1 %v5337_v55 }
  0x7b   :  { %5058 = vmatprep.mubr.bf16.mxu0 %v5338_v56  ;;  %5186 = vmatprep.mubr.bf16.mxu1 %v5339_v57  ;;  %v5400_v56 = vld [vmem:[%s6869_s0 + $0x1b8] sm:$0xff]  }
  0x7c   :  { %v5401_v57 = vld [vmem:[%s6869_s0 + $0x3b8] sm:$0xff]  }
  0x82   :  { %5059 = vmatmul.mubr.bf16.gmra.mrb[48].mxu0 %v5340_v58  ;;  %5187 = vmatmul.mubr.bf16.gmra.mrb[48].mxu1 %v5341_v59 }
  0x83   :  { %5062 = vmatprep.mubr.bf16.mxu0 %v5342_v60  ;;  %5190 = vmatprep.mubr.bf16.mxu1 %v5343_v61 }
  0x8a   :  { %5063 = vmatmul.mubr.bf16.gmra.mrb[52].mxu0 %v5344_v62  ;;  %5191 = vmatmul.mubr.bf16.gmra.mrb[52].mxu1 %v5345_v63  ;;  %v5402_v62 = vld [vmem:[%s6869_s0 + $0x1c0] sm:$0xff]  }
  0x8b   :  { %5066 = vmatprep.mubr.bf16.mxu0 %v5346_v0  ;;  %5194 = vmatprep.mubr.bf16.mxu1 %v5347_v1  ;;  %v5403_v63 = vld [vmem:[%s6869_s0 + $0x3c0] sm:$0xff]  }
  0x92   :  { %5067 = vmatmul.mubr.bf16.gmra.mrb[56].mxu0 %v5348_v2  ;;  %5195 = vmatmul.mubr.bf16.gmra.mrb[56].mxu1 %v5349_v3 }
  0x93   :  { %5070 = vmatprep.mubr.bf16.mxu0 %v5350_v4  ;;  %5198 = vmatprep.mubr.bf16.mxu1 %v5351_v5 }
  0x9a   :  { %5071 = vmatmul.mubr.bf16.gmra.mrb[60].mxu0 %v5352_v6  ;;  %5199 = vmatmul.mubr.bf16.gmra.mrb[60].mxu1 %v5353_v7 }
  0x9b   :  { %5074 = vmatprep.mubr.bf16.mxu0 %v5354_v8  ;;  %5202 = vmatprep.mubr.bf16.mxu1 %v5355_v9 }
  0xa2   :  { %5075 = vmatmul.mubr.bf16.gmra.mrb[64].mxu0 %v5356_v10  ;;  %5203 = vmatmul.mubr.bf16.gmra.mrb[64].mxu1 %v5357_v11 }
  0xa3   :  { %5078 = vmatprep.mubr.bf16.mxu0 %v5358_v12  ;;  %5206 = vmatprep.mubr.bf16.mxu1 %v5359_v13 }
  0xaa   :  { %5079 = vmatmul.mubr.bf16.gmra.mrb[68].mxu0 %v5360_v14  ;;  %5207 = vmatmul.mubr.bf16.gmra.mrb[68].mxu1 %v5361_v15 }
  0xab   :  { %5082 = vmatprep.mubr.bf16.mxu0 %v5362_v16  ;;  %5210 = vmatprep.mubr.bf16.mxu1 %v5363_v17 }
  0xb2   :  { %5083 = vmatmul.mubr.bf16.gmra.mrb[72].mxu0 %v5364_v18  ;;  %5211 = vmatmul.mubr.bf16.gmra.mrb[72].mxu1 %v5365_v19 }
  0xb3   :  { %5086 = vmatprep.mubr.bf16.mxu0 %v5366_v20  ;;  %5214 = vmatprep.mubr.bf16.mxu1 %v5367_v21 }
  0xba   :  { %5087 = vmatmul.mubr.bf16.gmra.mrb[76].mxu0 %v5368_v22  ;;  %5215 = vmatmul.mubr.bf16.gmra.mrb[76].mxu1 %v5369_v23  ;;  %v5404_v23 = vld [vmem:[%s6869_s0 + $0x1c8] sm:$0xff]  }
  0xbb   :  { %5090 = vmatprep.mubr.bf16.mxu0 %v5370_v24  ;;  %5218 = vmatprep.mubr.bf16.mxu1 %v5371_v25  ;;  %v5405_v24 = vld [vmem:[%s6869_s0 + $0x3c8] sm:$0xff]  }
  0xc2   :  { %5091 = vmatmul.mubr.bf16.gmra.mrb[80].mxu0 %v5372_v26  ;;  %5219 = vmatmul.mubr.bf16.gmra.mrb[80].mxu1 %v5373_v27 }
  0xc3   :  { %5094 = vmatprep.mubr.bf16.mxu0 %v5374_v28  ;;  %5222 = vmatprep.mubr.bf16.mxu1 %v5375_v29 }
  0xca   :  { %5095 = vmatmul.mubr.bf16.gmra.mrb[84].mxu0 %v5376_v30  ;;  %5223 = vmatmul.mubr.bf16.gmra.mrb[84].mxu1 %v5377_v31  ;;  %v5406_v30 = vld [vmem:[%s6869_s0 + $0x1d0] sm:$0xff]  }
  0xcb   :  { %5098 = vmatprep.mubr.bf16.mxu0 %v5378_v32  ;;  %5226 = vmatprep.mubr.bf16.mxu1 %v5379_v33 }
  0xd2   :  { %5099 = vmatmul.mubr.bf16.gmra.mrb[88].mxu0 %v5380_v34  ;;  %5227 = vmatmul.mubr.bf16.gmra.mrb[88].mxu1 %v5381_v35 }
  0xd3   :  { %5102 = vmatprep.mubr.bf16.mxu0 %v5382_v36  ;;  %5230 = vmatprep.mubr.bf16.mxu1 %v5383_v37  ;;  %v5407_v36 = vld [vmem:[%s6869_s0 + $0x3d0] sm:$0xff]  }
  0xda   :  { %5103 = vmatmul.mubr.bf16.gmra.mrb[92].mxu0 %v5384_v38  ;;  %5231 = vmatmul.mubr.bf16.gmra.mrb[92].mxu1 %v5385_v39 }
  0xdb   :  { %5106 = vmatprep.mubr.bf16.mxu0 %v5386_v40  ;;  %5234 = vmatprep.mubr.bf16.mxu1 %v5387_v41 }
  0xe2   :  { %5107 = vmatmul.mubr.bf16.gmra.mrb[96].mxu0 %v5388_v42  ;;  %5235 = vmatmul.mubr.bf16.gmra.mrb[96].mxu1 %v5389_v43 }
  0xe3   :  { %5110 = vmatprep.mubr.bf16.mxu0 %v5390_v44  ;;  %5238 = vmatprep.mubr.bf16.mxu1 %v5391_v45 }
  0xea   :  { %5111 = vmatmul.mubr.bf16.gmra.mrb[100].mxu0 %v5392_v46  ;;  %5239 = vmatmul.mubr.bf16.gmra.mrb[100].mxu1 %v5393_v47 }
  0xeb   :  { %5114 = vmatprep.mubr.bf16.mxu0 %v5394_v48  ;;  %5242 = vmatprep.mubr.bf16.mxu1 %v5395_v49 }
  0xf2   :  { %5115 = vmatmul.mubr.bf16.gmra.mrb[104].mxu0 %v5396_v50  ;;  %5243 = vmatmul.mubr.bf16.gmra.mrb[104].mxu1 %v5397_v51 }
  0xf3   :  { %5118 = vmatprep.mubr.bf16.mxu0 %v5398_v52  ;;  %5246 = vmatprep.mubr.bf16.mxu1 %v5399_v53 }
  0xf5   :  { %v5012_v54 = vpop.f32.mrb[0].mxu0  ;;  %v5140_v55 = vpop.f32.mrb[0].mxu1 }
  0xf6   :  { %vm2159_vm0 = vcmp.gt.f32.partialorder %v5012_v54, 0.0  ;;  %v2415_v58 = vmul.f32 0.2, %v5012_v54  ;;  %vm2287_vm1 = vcmp.gt.f32.partialorder %v5140_v55, 0.0  ;;  %v2543_v59 = vmul.f32 0.2, %v5140_v55 }
  0xf7   :  { %v1134_v60 = vpop.f32.mrb[1].mxu0  ;;  %v1646_v61 = vpop.f32.mrb[1].mxu1 }
  0xf8   :  { %v2671_v0 = vsel %vm2159_vm0, %v5012_v54, %v2415_v58  ;;  %v2799_v1 = vsel %vm2287_vm1, %v5140_v55, %v2543_v59  ;;  %vm2157_vm3 = vcmp.gt.f32.partialorder %v1134_v60, 0.0  ;;  %v2413_v2 = vmul.f32 0.2, %v1134_v60  ;;  %v5013_v3 = vpop.f32.mrb[2].mxu0  ;;  %v5141_v4 = vpop.f32.mrb[2].mxu1  ;;  %v5408_v54 = vld [vmem:[%s6869_s0 + $0x1d8] sm:$0xff]  }
  0xf9   :  { %v4604_v5 = vpack.c.bf16 %v2671_v0, %v2671_v0  ;;  %v4732_v6 = vpack.c.bf16 %v2799_v1, %v2799_v1  ;;  %vm2285_vm4 = vcmp.gt.f32.partialorder %v1646_v61, 0.0  ;;  %v2541_v7 = vmul.f32 0.2, %v1646_v61  ;;  %v1137_v8 = vpop.f32.mrb[3].mxu0  ;;  %v1649_v9 = vpop.f32.mrb[3].mxu1 }
  0xfa   :  { %v2669_v10 = vsel %vm2157_vm3, %v1134_v60, %v2413_v2  ;;  %vm2160_vm5 = vcmp.gt.f32.partialorder %v5013_v3, 0.0  ;;  %v2416_v11 = vmul.f32 0.2, %v5013_v3  ;;  %vm2288_vm6 = vcmp.gt.f32.partialorder %v5141_v4, 0.0  ;;  %5119 = vmatmul.mubr.bf16.gmra.mrb[108].mxu0 %v5400_v56  ;;  %5247 = vmatmul.mubr.bf16.gmra.mrb[108].mxu1 %v5401_v57  ;;  %v5409_v60 = vld [vmem:[%s6869_s0 + $0x3d8] sm:$0xff]   ;;  %v5410_v2 = vld [vmem:[%s6869_s0 + $0x1e0] sm:$0xff]  }
  0xfb   :  { %3952 = vst.msk [vmem:[%s6870_s2 + $0x8] sm:$0xf] %vm3949_vm2, %v4604_v5  ;;  %4080 = vst.msk [vmem:[%s6870_s2 + $0x208] sm:$0xf] %vm3949_vm2, %v4732_v6  ;;  %v4602_v12 = vpack.c.bf16 %v2669_v10, %v2669_v10  ;;  %v2797_v13 = vsel %vm2285_vm4, %v1646_v61, %v2541_v7  ;;  %v2544_v14 = vmul.f32 0.2, %v5141_v4  ;;  %5122 = vmatprep.mubr.bf16.mxu0 %v5402_v62  ;;  %5250 = vmatprep.mubr.bf16.mxu1 %v5403_v63 }
  0xfc   :  { %vm2158_vm7 = vcmp.gt.f32.partialorder %v1137_v8, 0.0  ;;  %v4730_v15 = vpack.c.bf16 %v2797_v13, %v2797_v13  ;;  %v2672_v16 = vsel %vm2160_vm5, %v5013_v3, %v2416_v11  ;;  %v2414_v17 = vmul.f32 0.2, %v1137_v8 }
  0xfd   :  { %vm2286_vm8 = vcmp.gt.f32.partialorder %v1649_v9, 0.0  ;;  %3950 = vst.msk [vmem:[%s6870_s2] sm:$0xf] %vm3949_vm2, %v4602_v12  ;;  %v4605_v18 = vpack.c.bf16 %v2672_v16, %v2672_v16  ;;  %v2800_v19 = vsel %vm2288_vm6, %v5141_v4, %v2544_v14  ;;  %v2542_v20 = vmul.f32 0.2, %v1649_v9  ;;  %v5016_v21 = vpop.f32.mrb[4].mxu0 }
  0xfe   :  { %v5144_v22 = vpop.f32.mrb[4].mxu1  ;;  %4078 = vst.msk [vmem:[%s6870_s2 + $0x200] sm:$0xf] %vm3949_vm2, %v4730_v15  ;;  %v4733_v25 = vpack.c.bf16 %v2800_v19, %v2800_v19  ;;  %v2670_v26 = vsel %vm2158_vm7, %v1137_v8, %v2414_v17  ;;  %vm2163_vm9 = vcmp.gt.f32.partialorder %v5016_v21, 0.0  ;;  %v2419_v27 = vmul.f32 0.2, %v5016_v21 }
  0xff   :  { %v1150_v28 = vpop.f32.mrb[5].mxu0  ;;  %v1662_v29 = vpop.f32.mrb[5].mxu1  ;;  %3953 = vst.msk [vmem:[%s6870_s2 + $0xc] sm:$0xf] %vm3949_vm2, %v4605_v18  ;;  %v4603_v31 = vpack.c.bf16 %v2670_v26, %v2670_v26  ;;  %v2798_v32 = vsel %vm2286_vm8, %v1649_v9, %v2542_v20  ;;  %vm2291_vm10 = vcmp.gt.f32.partialorder %v5144_v22, 0.0  ;;  %v5411_v8 = vld [vmem:[%s6869_s0 + $0x3e0] sm:$0xff]  }
 0x100   :  { %v2547_v33 = vmul.f32 0.2, %v5144_v22  ;;  %v5017_v34 = vpop.f32.mrb[6].mxu0  ;;  %v5145_v35 = vpop.f32.mrb[6].mxu1  ;;  %4081 = vst.msk [vmem:[%s6870_s2 + $0x20c] sm:$0xf] %vm3949_vm2, %v4733_v25  ;;  %v4731_v37 = vpack.c.bf16 %v2798_v32, %v2798_v32  ;;  %v2675_v38 = vsel %vm2163_vm9, %v5016_v21, %v2419_v27 }
 0x101   :  { %vm2161_vm11 = vcmp.gt.f32.partialorder %v1150_v28, 0.0  ;;  %v2417_v39 = vmul.f32 0.2, %v1150_v28  ;;  %v1153_v40 = vpop.f32.mrb[7].mxu0  ;;  %v1665_v41 = vpop.f32.mrb[7].mxu1  ;;  %v4608_v42 = vpack.c.bf16 %v2675_v38, %v2675_v38  ;;  %vm2289_vm12 = vcmp.gt.f32.partialorder %v1662_v29, 0.0 }
 0x102   :  { %3951 = vst.msk [vmem:[%s6870_s2 + $0x4] sm:$0xf] %vm3949_vm2, %v4603_v31  ;;  %v2803_v43 = vsel %vm2291_vm10, %v5144_v22, %v2547_v33  ;;  %v2545_v44 = vmul.f32 0.2, %v1662_v29  ;;  %4079 = vst.msk [vmem:[%s6870_s2 + $0x204] sm:$0xf] %vm3949_vm2, %v4731_v37  ;;  %5123 = vmatmul.mubr.bf16.gmra.mrb[112].mxu0 %v5404_v23  ;;  %5251 = vmatmul.mubr.bf16.gmra.mrb[112].mxu1 %v5405_v24 }
 0x103   :  { %v4736_v45 = vpack.c.bf16 %v2803_v43, %v2803_v43  ;;  %v2673_v46 = vsel %vm2161_vm11, %v1150_v28, %v2417_v39  ;;  %vm2164_vm13 = vcmp.gt.f32.partialorder %v5017_v34, 0.0  ;;  %v2420_v47 = vmul.f32 0.2, %v5017_v34  ;;  %3956 = vst.msk [vmem:[%s6870_s2 + $0x18] sm:$0xf] %vm3949_vm2, %v4608_v42  ;;  %5126 = vmatprep.mubr.bf16.mxu0 %v5406_v30  ;;  %5254 = vmatprep.mubr.bf16.mxu1 %v5407_v36  ;;  %v5412_v26 = vld [vmem:[%s6869_s0 + $0x1e8] sm:$0xff]  }
 0x104   :  { %v4606_v48 = vpack.c.bf16 %v2673_v46, %v2673_v46  ;;  %v2801_v49 = vsel %vm2289_vm12, %v1662_v29, %v2545_v44  ;;  %vm2292_vm14 = vcmp.gt.f32.partialorder %v5145_v35, 0.0  ;;  %v2548_v50 = vmul.f32 0.2, %v5145_v35  ;;  %v5413_v32 = vld [vmem:[%s6869_s0 + $0x3e8] sm:$0xff]   ;;  %v5414_v38 = vld [vmem:[%s6869_s0 + $0x1f0] sm:$0xff]  }
 0x105   :  { %4084 = vst.msk [vmem:[%s6870_s2 + $0x218] sm:$0xf] %vm3949_vm2, %v4736_v45  ;;  %v4734_v51 = vpack.c.bf16 %v2801_v49, %v2801_v49  ;;  %v2676_v52 = vsel %vm2164_vm13, %v5017_v34, %v2420_v47  ;;  %vm2162_vm15 = vcmp.gt.f32.partialorder %v1153_v40, 0.0  ;;  %v2418_v53 = vmul.f32 0.2, %v1153_v40  ;;  %v5020_v58 = vpop.f32.mrb[8].mxu0 }
 0x106   :  { %3954 = vst.msk [vmem:[%s6870_s2 + $0x10] sm:$0xf] %vm3949_vm2, %v4606_v48  ;;  %v4609_v55 = vpack.c.bf16 %v2676_v52, %v2676_v52  ;;  %v2804_v56 = vsel %vm2292_vm14, %v5145_v35, %v2548_v50  ;;  %vm2290_vm0 = vcmp.gt.f32.partialorder %v1665_v41, 0.0  ;;  %v2546_v57 = vmul.f32 0.2, %v1665_v41  ;;  %v5148_v59 = vpop.f32.mrb[8].mxu1 }
 0x107   :  { %4082 = vst.msk [vmem:[%s6870_s2 + $0x210] sm:$0xf] %vm3949_vm2, %v4734_v51  ;;  %v4737_v61 = vpack.c.bf16 %v2804_v56, %v2804_v56  ;;  %v2674_v62 = vsel %vm2162_vm15, %v1153_v40, %v2418_v53  ;;  %vm2167_vm1 = vcmp.gt.f32.partialorder %v5020_v58, 0.0  ;;  %v2423_v63 = vmul.f32 0.2, %v5020_v58  ;;  %v1166_v0 = vpop.f32.mrb[9].mxu0 }
 0x108   :  { %v1678_v1 = vpop.f32.mrb[9].mxu1  ;;  %3957 = vst.msk [vmem:[%s6870_s2 + $0x1c] sm:$0xf] %vm3949_vm2, %v4609_v55  ;;  %v4607_v3 = vpack.c.bf16 %v2674_v62, %v2674_v62  ;;  %v2802_v4 = vsel %vm2290_vm0, %v1665_v41, %v2546_v57  ;;  %vm2295_vm3 = vcmp.gt.f32.partialorder %v5148_v59, 0.0  ;;  %v2551_v5 = vmul.f32 0.2, %v5148_v59 }
 0x109   :  { %v5021_v6 = vpop.f32.mrb[10].mxu0  ;;  %v5149_v7 = vpop.f32.mrb[10].mxu1  ;;  %4085 = vst.msk [vmem:[%s6870_s2 + $0x21c] sm:$0xf] %vm3949_vm2, %v4737_v61  ;;  %v4735_v9 = vpack.c.bf16 %v2802_v4, %v2802_v4  ;;  %v2679_v10 = vsel %vm2167_vm1, %v5020_v58, %v2423_v63  ;;  %vm2165_vm4 = vcmp.gt.f32.partialorder %v1166_v0, 0.0  ;;  %vm2293_vm5 = vcmp.gt.f32.partialorder %v1678_v1, 0.0 }
 0x10a   :  { %v2421_v11 = vmul.f32 0.2, %v1166_v0  ;;  %v1169_v12 = vpop.f32.mrb[11].mxu0  ;;  %v1681_v13 = vpop.f32.mrb[11].mxu1  ;;  %3955 = vst.msk [vmem:[%s6870_s2 + $0x14] sm:$0xf] %vm3949_vm2, %v4607_v3  ;;  %v4612_v14 = vpack.c.bf16 %v2679_v10, %v2679_v10  ;;  %v2807_v15 = vsel %vm2295_vm3, %v5148_v59, %v2551_v5  ;;  %5127 = vmatmul.mubr.bf16.gmra.mrb[116].mxu0 %v5408_v54  ;;  %5255 = vmatmul.mubr.bf16.gmra.mrb[116].mxu1 %v5409_v60 }
 0x10b   :  { %v2549_v16 = vmul.f32 0.2, %v1678_v1  ;;  %4083 = vst.msk [vmem:[%s6870_s2 + $0x214] sm:$0xf] %vm3949_vm2, %v4735_v9  ;;  %v4740_v17 = vpack.c.bf16 %v2807_v15, %v2807_v15  ;;  %vm2168_vm6 = vcmp.gt.f32.partialorder %v5021_v6, 0.0  ;;  %vm2296_vm7 = vcmp.gt.f32.partialorder %v5149_v7, 0.0  ;;  %5130 = vmatprep.mubr.bf16.mxu0 %v5410_v2  ;;  %5258 = vmatprep.mubr.bf16.mxu1 %v5411_v8 }
 0x10c   :  { %v2677_v18 = vsel %vm2165_vm4, %v1166_v0, %v2421_v11  ;;  %v2424_v19 = vmul.f32 0.2, %v5021_v6  ;;  %3960 = vst.msk [vmem:[%s6870_s2 + $0x28] sm:$0xf] %vm3949_vm2, %v4612_v14  ;;  %v2552_v22 = vmul.f32 0.2, %v5149_v7 }
 0x10d   :  { %v4610_v20 = vpack.c.bf16 %v2677_v18, %v2677_v18  ;;  %v2805_v21 = vsel %vm2293_vm5, %v1678_v1, %v2549_v16  ;;  %4088 = vst.msk [vmem:[%s6870_s2 + $0x228] sm:$0xf] %vm3949_vm2, %v4740_v17  ;;  %vm2166_vm8 = vcmp.gt.f32.partialorder %v1169_v12, 0.0  ;;  %v2422_v25 = vmul.f32 0.2, %v1169_v12  ;;  %v5024_v30 = vpop.f32.mrb[12].mxu0 }
 0x10e   :  { %v4738_v23 = vpack.c.bf16 %v2805_v21, %v2805_v21  ;;  %v2680_v24 = vsel %vm2168_vm6, %v5021_v6, %v2424_v19  ;;  %v2808_v28 = vsel %vm2296_vm7, %v5149_v7, %v2552_v22  ;;  %vm2294_vm9 = vcmp.gt.f32.partialorder %v1681_v13, 0.0  ;;  %v5152_v31 = vpop.f32.mrb[12].mxu1  ;;  %v1182_v36 = vpop.f32.mrb[13].mxu0  ;;  %v5415_v44 = vld [vmem:[%s6869_s0 + $0x3f0] sm:$0xff]   ;;  %v5416_v3 = vld [vmem:[%s6869_s0 + $0x1f8] sm:$0xff]  }
 0x10f   :  { %3958 = vst.msk [vmem:[%s6870_s2 + $0x20] sm:$0xf] %vm3949_vm2, %v4610_v20  ;;  %v4613_v27 = vpack.c.bf16 %v2680_v24, %v2680_v24  ;;  %v2550_v29 = vmul.f32 0.2, %v1681_v13  ;;  %v4741_v33 = vpack.c.bf16 %v2808_v28, %v2808_v28  ;;  %v2678_v34 = vsel %vm2166_vm8, %v1169_v12, %v2422_v25  ;;  %v1694_v37 = vpop.f32.mrb[13].mxu1  ;;  %v5025_v42 = vpop.f32.mrb[14].mxu0 }
 0x110   :  { %4086 = vst.msk [vmem:[%s6870_s2 + $0x220] sm:$0xf] %vm3949_vm2, %v4738_v23  ;;  %vm2171_vm10 = vcmp.gt.f32.partialorder %v5024_v30, 0.0  ;;  %v2427_v35 = vmul.f32 0.2, %v5024_v30  ;;  %v4611_v39 = vpack.c.bf16 %v2678_v34, %v2678_v34  ;;  %vm2299_vm11 = vcmp.gt.f32.partialorder %v5152_v31, 0.0 }
 0x111   :  { %3961 = vst.msk [vmem:[%s6870_s2 + $0x2c] sm:$0xf] %vm3949_vm2, %v4613_v27  ;;  %v2806_v40 = vsel %vm2294_vm9, %v1681_v13, %v2550_v29  ;;  %v2555_v41 = vmul.f32 0.2, %v5152_v31  ;;  %v5153_v43 = vpop.f32.mrb[14].mxu1  ;;  %vm2169_vm12 = vcmp.gt.f32.partialorder %v1182_v36, 0.0 }
 0x112   :  { %4089 = vst.msk [vmem:[%s6870_s2 + $0x22c] sm:$0xf] %vm3949_vm2, %v4741_v33  ;;  %v4739_v45 = vpack.c.bf16 %v2806_v40, %v2806_v40  ;;  %v2683_v46 = vsel %vm2171_vm10, %v5024_v30, %v2427_v35  ;;  %v2425_v47 = vmul.f32 0.2, %v1182_v36  ;;  %v1185_v48 = vpop.f32.mrb[15].mxu0  ;;  %v1697_v49 = vpop.f32.mrb[15].mxu1  ;;  %5131 = vmatmul.mubr.bf16.gmra.mrb[120].mxu0 %v5412_v26  ;;  %5259 = vmatmul.mubr.bf16.gmra.mrb[120].mxu1 %v5413_v32 }
 0x113   :  { %3959 = vst.msk [vmem:[%s6870_s2 + $0x24] sm:$0xf] %vm3949_vm2, %v4611_v39  ;;  %v4616_v50 = vpack.c.bf16 %v2683_v46, %v2683_v46  ;;  %v2811_v51 = vsel %vm2299_vm11, %v5152_v31, %v2555_v41  ;;  %vm2297_vm13 = vcmp.gt.f32.partialorder %v1694_v37, 0.0  ;;  %v2553_v52 = vmul.f32 0.2, %v1694_v37  ;;  %5134 = vmatprep.mubr.bf16.mxu0 %v5414_v38  ;;  %5262 = vmatprep.mubr.bf16.mxu1 %v5415_v44  ;;  %v5417_v9 = vld [vmem:[%s6869_s0 + $0x3f8] sm:$0xff]  }
 0x114   :  { %4087 = vst.msk [vmem:[%s6870_s2 + $0x224] sm:$0xf] %vm3949_vm2, %v4739_v45  ;;  %v4744_v53 = vpack.c.bf16 %v2811_v51, %v2811_v51  ;;  %v2681_v54 = vsel %vm2169_vm12, %v1182_v36, %v2425_v47  ;;  %vm2172_vm14 = vcmp.gt.f32.partialorder %v5025_v42, 0.0  ;;  %v2428_v55 = vmul.f32 0.2, %v5025_v42 }
 0x115   :  { %3964 = vst.msk [vmem:[%s6870_s2 + $0x38] sm:$0xf] %vm3949_vm2, %v4616_v50  ;;  %v4614_v56 = vpack.c.bf16 %v2681_v54, %v2681_v54  ;;  %v2809_v57 = vsel %vm2297_vm13, %v1694_v37, %v2553_v52  ;;  %vm2300_vm15 = vcmp.gt.f32.partialorder %v5153_v43, 0.0  ;;  %v2556_v58 = vmul.f32 0.2, %v5153_v43  ;;  %v5028_v1 = vpop.f32.mrb[16].mxu0 }
 0x116   :  { %4092 = vst.msk [vmem:[%s6870_s2 + $0x238] sm:$0xf] %vm3949_vm2, %v4744_v53  ;;  %v4742_v59 = vpack.c.bf16 %v2809_v57, %v2809_v57  ;;  %v2684_v60 = vsel %vm2172_vm14, %v5025_v42, %v2428_v55  ;;  %vm2170_vm0 = vcmp.gt.f32.partialorder %v1185_v48, 0.0  ;;  %v2426_v61 = vmul.f32 0.2, %v1185_v48  ;;  %v5156_v2 = vpop.f32.mrb[16].mxu1 }
 0x117   :  { %3962 = vst.msk [vmem:[%s6870_s2 + $0x30] sm:$0xf] %vm3949_vm2, %v4614_v56  ;;  %v4617_v62 = vpack.c.bf16 %v2684_v60, %v2684_v60  ;;  %v2812_v63 = vsel %vm2300_vm15, %v5153_v43, %v2556_v58  ;;  %vm2298_vm1 = vcmp.gt.f32.partialorder %v1697_v49, 0.0  ;;  %v2554_v0 = vmul.f32 0.2, %v1697_v49  ;;  %v1198_v7 = vpop.f32.mrb[17].mxu0 }
 0x118   :  { %4090 = vst.msk [vmem:[%s6870_s2 + $0x230] sm:$0xf] %vm3949_vm2, %v4742_v59  ;;  %v4745_v4 = vpack.c.bf16 %v2812_v63, %v2812_v63  ;;  %v2682_v5 = vsel %vm2170_vm0, %v1185_v48, %v2426_v61  ;;  %vm2175_vm3 = vcmp.gt.f32.partialorder %v5028_v1, 0.0  ;;  %v2431_v6 = vmul.f32 0.2, %v5028_v1  ;;  %v1710_v8 = vpop.f32.mrb[17].mxu1 }
 0x119   :  { %3965 = vst.msk [vmem:[%s6870_s2 + $0x3c] sm:$0xf] %vm3949_vm2, %v4617_v62  ;;  %v4615_v10 = vpack.c.bf16 %v2682_v5, %v2682_v5  ;;  %v2810_v11 = vsel %vm2298_vm1, %v1697_v49, %v2554_v0  ;;  %vm2303_vm4 = vcmp.gt.f32.partialorder %v5156_v2, 0.0  ;;  %v2559_v12 = vmul.f32 0.2, %v5156_v2  ;;  %v5029_v13 = vpop.f32.mrb[18].mxu0 }
 0x11a   :  { %v5157_v14 = vpop.f32.mrb[18].mxu1  ;;  %4093 = vst.msk [vmem:[%s6870_s2 + $0x23c] sm:$0xf] %vm3949_vm2, %v4745_v4  ;;  %v4743_v15 = vpack.c.bf16 %v2810_v11, %v2810_v11  ;;  %v2687_v16 = vsel %vm2175_vm3, %v5028_v1, %v2431_v6  ;;  %vm2173_vm5 = vcmp.gt.f32.partialorder %v1198_v7, 0.0  ;;  %v2429_v17 = vmul.f32 0.2, %v1198_v7  ;;  %5135 = vmatmul.mubr.bf16.gmra.mrb[124].mxu0 %v5416_v3  ;;  %5263 = vmatmul.mubr.bf16.gmra.mrb[124].mxu1 %v5417_v9 }
 0x11b   :  { %v1201_v18 = vpop.f32.mrb[19].mxu0  ;;  %v1713_v19 = vpop.f32.mrb[19].mxu1  ;;  %3963 = vst.msk [vmem:[%s6870_s2 + $0x34] sm:$0xf] %vm3949_vm2, %v4615_v10  ;;  %v4620_v20 = vpack.c.bf16 %v2687_v16, %v2687_v16  ;;  %v2815_v21 = vsel %vm2303_vm4, %v5156_v2, %v2559_v12  ;;  %vm2301_vm6 = vcmp.gt.f32.partialorder %v1710_v8, 0.0  ;;  %vm2176_vm7 = vcmp.gt.f32.partialorder %v5029_v13, 0.0 }
 0x11c   :  { %v2557_v22 = vmul.f32 0.2, %v1710_v8  ;;  %4091 = vst.msk [vmem:[%s6870_s2 + $0x234] sm:$0xf] %vm3949_vm2, %v4743_v15  ;;  %v4748_v23 = vpack.c.bf16 %v2815_v21, %v2815_v21  ;;  %v2685_v24 = vsel %vm2173_vm5, %v1198_v7, %v2429_v17  ;;  %v2432_v25 = vmul.f32 0.2, %v5029_v13 }
 0x11d   :  { %3968 = vst.msk [vmem:[%s6870_s2 + $0x48] sm:$0xf] %vm3949_vm2, %v4620_v20  ;;  %v4618_v26 = vpack.c.bf16 %v2685_v24, %v2685_v24  ;;  %vm2304_vm8 = vcmp.gt.f32.partialorder %v5157_v14, 0.0  ;;  %v2560_v28 = vmul.f32 0.2, %v5157_v14  ;;  %vm2174_vm9 = vcmp.gt.f32.partialorder %v1201_v18, 0.0 }
 0x11e   :  { %v2813_v27 = vsel %vm2301_vm6, %v1710_v8, %v2557_v22  ;;  %4096 = vst.msk [vmem:[%s6870_s2 + $0x248] sm:$0xf] %vm3949_vm2, %v4748_v23  ;;  %v2688_v30 = vsel %vm2176_vm7, %v5029_v13, %v2432_v25  ;;  %v2430_v31 = vmul.f32 0.2, %v1201_v18  ;;  %vm2302_vm10 = vcmp.gt.f32.partialorder %v1713_v19, 0.0  ;;  %v5032_v35 = vpop.f32.mrb[20].mxu0 }
 0x11f   :  { %v4746_v29 = vpack.c.bf16 %v2813_v27, %v2813_v27  ;;  %3966 = vst.msk [vmem:[%s6870_s2 + $0x40] sm:$0xf] %vm3949_vm2, %v4618_v26  ;;  %v4621_v32 = vpack.c.bf16 %v2688_v30, %v2688_v30  ;;  %v2816_v33 = vsel %vm2304_vm8, %v5157_v14, %v2560_v28  ;;  %v2558_v34 = vmul.f32 0.2, %v1713_v19  ;;  %v5160_v36 = vpop.f32.mrb[20].mxu1  ;;  %v1214_v40 = vpop.f32.mrb[21].mxu0 }
 0x120   :  { %v4749_v37 = vpack.c.bf16 %v2816_v33, %v2816_v33  ;;  %v2686_v38 = vsel %vm2174_vm9, %v1201_v18, %v2430_v31  ;;  %vm2179_vm11 = vcmp.gt.f32.partialorder %v5032_v35, 0.0  ;;  %v2435_v39 = vmul.f32 0.2, %v5032_v35  ;;  %v1726_v41 = vpop.f32.mrb[21].mxu1  ;;  %v5033_v45 = vpop.f32.mrb[22].mxu0 }
 0x121   :  { %4094 = vst.msk [vmem:[%s6870_s2 + $0x240] sm:$0xf] %vm3949_vm2, %v4746_v29  ;;  %3969 = vst.msk [vmem:[%s6870_s2 + $0x4c] sm:$0xf] %vm3949_vm2, %v4621_v32  ;;  %v4619_v42 = vpack.c.bf16 %v2686_v38, %v2686_v38  ;;  %v2814_v43 = vsel %vm2302_vm10, %v1713_v19, %v2558_v34  ;;  %vm2307_vm12 = vcmp.gt.f32.partialorder %v5160_v36, 0.0  ;;  %v5161_v46 = vpop.f32.mrb[22].mxu1 }
 0x122   :  { %v2563_v44 = vmul.f32 0.2, %v5160_v36  ;;  %4097 = vst.msk [vmem:[%s6870_s2 + $0x24c] sm:$0xf] %vm3949_vm2, %v4749_v37  ;;  %v4747_v47 = vpack.c.bf16 %v2814_v43, %v2814_v43  ;;  %v2691_v48 = vsel %vm2179_vm11, %v5032_v35, %v2435_v39  ;;  %vm2177_vm13 = vcmp.gt.f32.partialorder %v1214_v40, 0.0  ;;  %v1217_v50 = vpop.f32.mrb[23].mxu0 }
 0x123   :  { %v2433_v49 = vmul.f32 0.2, %v1214_v40  ;;  %v1729_v51 = vpop.f32.mrb[23].mxu1  ;;  %3967 = vst.msk [vmem:[%s6870_s2 + $0x44] sm:$0xf] %vm3949_vm2, %v4619_v42  ;;  %v4624_v52 = vpack.c.bf16 %v2691_v48, %v2691_v48  ;;  %vm2305_vm14 = vcmp.gt.f32.partialorder %v1726_v41, 0.0 }
 0x124   :  { %v2819_v53 = vsel %vm2307_vm12, %v5160_v36, %v2563_v44  ;;  %v2561_v54 = vmul.f32 0.2, %v1726_v41  ;;  %4095 = vst.msk [vmem:[%s6870_s2 + $0x244] sm:$0xf] %vm3949_vm2, %v4747_v47  ;;  %vm2180_vm15 = vcmp.gt.f32.partialorder %v5033_v45, 0.0  ;;  %vm2308_vm0 = vcmp.gt.f32.partialorder %v5161_v46, 0.0 }
 0x125   :  { %v4752_v55 = vpack.c.bf16 %v2819_v53, %v2819_v53  ;;  %v2689_v56 = vsel %vm2177_vm13, %v1214_v40, %v2433_v49  ;;  %v2436_v57 = vmul.f32 0.2, %v5033_v45  ;;  %3972 = vst.msk [vmem:[%s6870_s2 + $0x58] sm:$0xf] %vm3949_vm2, %v4624_v52  ;;  %v2564_v60 = vmul.f32 0.2, %v5161_v46 }
 0x126   :  { %v4622_v58 = vpack.c.bf16 %v2689_v56, %v2689_v56  ;;  %v2817_v59 = vsel %vm2305_vm14, %v1726_v41, %v2561_v54  ;;  %vm2178_vm1 = vcmp.gt.f32.partialorder %v1217_v50, 0.0  ;;  %v2434_v63 = vmul.f32 0.2, %v1217_v50  ;;  %v5036_v3 = vpop.f32.mrb[24].mxu0  ;;  %v5164_v4 = vpop.f32.mrb[24].mxu1 }
 0x127   :  { %4100 = vst.msk [vmem:[%s6870_s2 + $0x258] sm:$0xf] %vm3949_vm2, %v4752_v55  ;;  %v4750_v61 = vpack.c.bf16 %v2817_v59, %v2817_v59  ;;  %v2692_v62 = vsel %vm2180_vm15, %v5033_v45, %v2436_v57  ;;  %v2820_v1 = vsel %vm2308_vm0, %v5161_v46, %v2564_v60  ;;  %vm2306_vm3 = vcmp.gt.f32.partialorder %v1729_v51, 0.0  ;;  %v1230_v8 = vpop.f32.mrb[25].mxu0  ;;  %v1742_v9 = vpop.f32.mrb[25].mxu1 }
 0x128   :  { %3970 = vst.msk [vmem:[%s6870_s2 + $0x50] sm:$0xf] %vm3949_vm2, %v4622_v58  ;;  %v4625_v0 = vpack.c.bf16 %v2692_v62, %v2692_v62  ;;  %v2562_v2 = vmul.f32 0.2, %v1729_v51  ;;  %v4753_v5 = vpack.c.bf16 %v2820_v1, %v2820_v1  ;;  %v2690_v6 = vsel %vm2178_vm1, %v1217_v50, %v2434_v63  ;;  %v5037_v13 = vpop.f32.mrb[26].mxu0  ;;  %v5165_v14 = vpop.f32.mrb[26].mxu1 }
 0x129   :  { %4098 = vst.msk [vmem:[%s6870_s2 + $0x250] sm:$0xf] %vm3949_vm2, %v4750_v61  ;;  %vm2183_vm4 = vcmp.gt.f32.partialorder %v5036_v3, 0.0  ;;  %v2439_v7 = vmul.f32 0.2, %v5036_v3  ;;  %v4623_v10 = vpack.c.bf16 %v2690_v6, %v2690_v6  ;;  %vm2311_vm5 = vcmp.gt.f32.partialorder %v5164_v4, 0.0 }
 0x12a   :  { %3973 = vst.msk [vmem:[%s6870_s2 + $0x5c] sm:$0xf] %vm3949_vm2, %v4625_v0  ;;  %v2818_v11 = vsel %vm2306_vm3, %v1729_v51, %v2562_v2  ;;  %v2567_v12 = vmul.f32 0.2, %v5164_v4  ;;  %4101 = vst.msk [vmem:[%s6870_s2 + $0x25c] sm:$0xf] %vm3949_vm2, %v4753_v5 }
 0x12b   :  { %v4751_v15 = vpack.c.bf16 %v2818_v11, %v2818_v11  ;;  %v2695_v16 = vsel %vm2183_vm4, %v5036_v3, %v2439_v7  ;;  %vm2181_vm6 = vcmp.gt.f32.partialorder %v1230_v8, 0.0  ;;  %v2437_v17 = vmul.f32 0.2, %v1230_v8  ;;  %v1233_v18 = vpop.f32.mrb[27].mxu0  ;;  %v1745_v19 = vpop.f32.mrb[27].mxu1 }
 0x12c   :  { %3971 = vst.msk [vmem:[%s6870_s2 + $0x54] sm:$0xf] %vm3949_vm2, %v4623_v10  ;;  %v4628_v20 = vpack.c.bf16 %v2695_v16, %v2695_v16  ;;  %v2823_v21 = vsel %vm2311_vm5, %v5164_v4, %v2567_v12  ;;  %vm2309_vm7 = vcmp.gt.f32.partialorder %v1742_v9, 0.0  ;;  %v2565_v22 = vmul.f32 0.2, %v1742_v9 }
 0x12d   :  { %4099 = vst.msk [vmem:[%s6870_s2 + $0x254] sm:$0xf] %vm3949_vm2, %v4751_v15  ;;  %v4756_v23 = vpack.c.bf16 %v2823_v21, %v2823_v21  ;;  %v2693_v24 = vsel %vm2181_vm6, %v1230_v8, %v2437_v17  ;;  %vm2184_vm8 = vcmp.gt.f32.partialorder %v5037_v13, 0.0  ;;  %v2440_v25 = vmul.f32 0.2, %v5037_v13  ;;  %v5040_v35 = vpop.f32.mrb[28].mxu0 }
 0x12e   :  { %3976 = vst.msk [vmem:[%s6870_s2 + $0x68] sm:$0xf] %vm3949_vm2, %v4628_v20  ;;  %v4626_v26 = vpack.c.bf16 %v2693_v24, %v2693_v24  ;;  %v2821_v27 = vsel %vm2309_vm7, %v1742_v9, %v2565_v22  ;;  %vm2312_vm9 = vcmp.gt.f32.partialorder %v5165_v14, 0.0  ;;  %v2568_v28 = vmul.f32 0.2, %v5165_v14  ;;  %v5168_v36 = vpop.f32.mrb[28].mxu1 }
 0x12f   :  { %4104 = vst.msk [vmem:[%s6870_s2 + $0x268] sm:$0xf] %vm3949_vm2, %v4756_v23  ;;  %v4754_v29 = vpack.c.bf16 %v2821_v27, %v2821_v27  ;;  %v2696_v30 = vsel %vm2184_vm8, %v5037_v13, %v2440_v25  ;;  %vm2182_vm10 = vcmp.gt.f32.partialorder %v1233_v18, 0.0  ;;  %v2438_v31 = vmul.f32 0.2, %v1233_v18  ;;  %v1246_v40 = vpop.f32.mrb[29].mxu0 }
 0x130   :  { %3974 = vst.msk [vmem:[%s6870_s2 + $0x60] sm:$0xf] %vm3949_vm2, %v4626_v26  ;;  %v4629_v32 = vpack.c.bf16 %v2696_v30, %v2696_v30  ;;  %v2824_v33 = vsel %vm2312_vm9, %v5165_v14, %v2568_v28  ;;  %vm2310_vm11 = vcmp.gt.f32.partialorder %v1745_v19, 0.0  ;;  %v2566_v34 = vmul.f32 0.2, %v1745_v19  ;;  %v1758_v41 = vpop.f32.mrb[29].mxu1 }
 0x131   :  { %4102 = vst.msk [vmem:[%s6870_s2 + $0x260] sm:$0xf] %vm3949_vm2, %v4754_v29  ;;  %v4757_v37 = vpack.c.bf16 %v2824_v33, %v2824_v33  ;;  %v2694_v38 = vsel %vm2182_vm10, %v1233_v18, %v2438_v31  ;;  %vm2187_vm12 = vcmp.gt.f32.partialorder %v5040_v35, 0.0  ;;  %v2443_v39 = vmul.f32 0.2, %v5040_v35  ;;  %v5041_v45 = vpop.f32.mrb[30].mxu0 }
 0x132   :  { %3977 = vst.msk [vmem:[%s6870_s2 + $0x6c] sm:$0xf] %vm3949_vm2, %v4629_v32  ;;  %v4627_v42 = vpack.c.bf16 %v2694_v38, %v2694_v38  ;;  %v2822_v43 = vsel %vm2310_vm11, %v1745_v19, %v2566_v34  ;;  %vm2315_vm13 = vcmp.gt.f32.partialorder %v5168_v36, 0.0  ;;  %v2571_v44 = vmul.f32 0.2, %v5168_v36  ;;  %v5169_v46 = vpop.f32.mrb[30].mxu1 }
 0x133   :  { %4105 = vst.msk [vmem:[%s6870_s2 + $0x26c] sm:$0xf] %vm3949_vm2, %v4757_v37  ;;  %v4755_v47 = vpack.c.bf16 %v2822_v43, %v2822_v43  ;;  %v2699_v48 = vsel %vm2187_vm12, %v5040_v35, %v2443_v39  ;;  %vm2185_vm14 = vcmp.gt.f32.partialorder %v1246_v40, 0.0  ;;  %v2441_v49 = vmul.f32 0.2, %v1246_v40  ;;  %v1249_v50 = vpop.f32.mrb[31].mxu0 }
 0x134   :  { %v1761_v51 = vpop.f32.mrb[31].mxu1  ;;  %3975 = vst.msk [vmem:[%s6870_s2 + $0x64] sm:$0xf] %vm3949_vm2, %v4627_v42  ;;  %v4632_v52 = vpack.c.bf16 %v2699_v48, %v2699_v48  ;;  %v2827_v53 = vsel %vm2315_vm13, %v5168_v36, %v2571_v44  ;;  %vm2313_vm15 = vcmp.gt.f32.partialorder %v1758_v41, 0.0  ;;  %v2569_v54 = vmul.f32 0.2, %v1758_v41 }
 0x135   :  { %4103 = vst.msk [vmem:[%s6870_s2 + $0x264] sm:$0xf] %vm3949_vm2, %v4755_v47  ;;  %v4760_v55 = vpack.c.bf16 %v2827_v53, %v2827_v53  ;;  %v2697_v56 = vsel %vm2185_vm14, %v1246_v40, %v2441_v49  ;;  %vm2188_vm0 = vcmp.gt.f32.partialorder %v5041_v45, 0.0  ;;  %v2444_v57 = vmul.f32 0.2, %v5041_v45  ;;  %v5044_v3 = vpop.f32.mrb[32].mxu0 }
 0x136   :  { %3980 = vst.msk [vmem:[%s6870_s2 + $0x78] sm:$0xf] %vm3949_vm2, %v4632_v52  ;;  %v4630_v58 = vpack.c.bf16 %v2697_v56, %v2697_v56  ;;  %v2825_v59 = vsel %vm2313_vm15, %v1758_v41, %v2569_v54  ;;  %vm2316_vm1 = vcmp.gt.f32.partialorder %v5169_v46, 0.0  ;;  %v2572_v60 = vmul.f32 0.2, %v5169_v46  ;;  %v5172_v4 = vpop.f32.mrb[32].mxu1 }
 0x137   :  { %4108 = vst.msk [vmem:[%s6870_s2 + $0x278] sm:$0xf] %vm3949_vm2, %v4760_v55  ;;  %v4758_v61 = vpack.c.bf16 %v2825_v59, %v2825_v59  ;;  %v2700_v62 = vsel %vm2188_vm0, %v5041_v45, %v2444_v57  ;;  %vm2186_vm3 = vcmp.gt.f32.partialorder %v1249_v50, 0.0  ;;  %v2442_v63 = vmul.f32 0.2, %v1249_v50  ;;  %v1262_v8 = vpop.f32.mrb[33].mxu0 }
 0x138   :  { %3978 = vst.msk [vmem:[%s6870_s2 + $0x70] sm:$0xf] %vm3949_vm2, %v4630_v58  ;;  %v4633_v0 = vpack.c.bf16 %v2700_v62, %v2700_v62  ;;  %v2828_v1 = vsel %vm2316_vm1, %v5169_v46, %v2572_v60  ;;  %vm2314_vm4 = vcmp.gt.f32.partialorder %v1761_v51, 0.0  ;;  %v2570_v2 = vmul.f32 0.2, %v1761_v51  ;;  %v1774_v9 = vpop.f32.mrb[33].mxu1 }
 0x139   :  { %4106 = vst.msk [vmem:[%s6870_s2 + $0x270] sm:$0xf] %vm3949_vm2, %v4758_v61  ;;  %v4761_v5 = vpack.c.bf16 %v2828_v1, %v2828_v1  ;;  %v2698_v6 = vsel %vm2186_vm3, %v1249_v50, %v2442_v63  ;;  %vm2191_vm5 = vcmp.gt.f32.partialorder %v5044_v3, 0.0  ;;  %v2447_v7 = vmul.f32 0.2, %v5044_v3  ;;  %v5045_v13 = vpop.f32.mrb[34].mxu0 }
 0x13a   :  { %3981 = vst.msk [vmem:[%s6870_s2 + $0x7c] sm:$0xf] %vm3949_vm2, %v4633_v0  ;;  %v4631_v10 = vpack.c.bf16 %v2698_v6, %v2698_v6  ;;  %v2826_v11 = vsel %vm2314_vm4, %v1761_v51, %v2570_v2  ;;  %vm2319_vm6 = vcmp.gt.f32.partialorder %v5172_v4, 0.0  ;;  %v2575_v12 = vmul.f32 0.2, %v5172_v4  ;;  %v5173_v14 = vpop.f32.mrb[34].mxu1 }
 0x13b   :  { %4109 = vst.msk [vmem:[%s6870_s2 + $0x27c] sm:$0xf] %vm3949_vm2, %v4761_v5  ;;  %v4759_v15 = vpack.c.bf16 %v2826_v11, %v2826_v11  ;;  %v2703_v16 = vsel %vm2191_vm5, %v5044_v3, %v2447_v7  ;;  %vm2189_vm7 = vcmp.gt.f32.partialorder %v1262_v8, 0.0  ;;  %v2445_v17 = vmul.f32 0.2, %v1262_v8  ;;  %v1265_v18 = vpop.f32.mrb[35].mxu0 }
 0x13c   :  { %v1777_v19 = vpop.f32.mrb[35].mxu1  ;;  %3979 = vst.msk [vmem:[%s6870_s2 + $0x74] sm:$0xf] %vm3949_vm2, %v4631_v10  ;;  %v4636_v20 = vpack.c.bf16 %v2703_v16, %v2703_v16  ;;  %v2831_v21 = vsel %vm2319_vm6, %v5172_v4, %v2575_v12  ;;  %vm2317_vm8 = vcmp.gt.f32.partialorder %v1774_v9, 0.0  ;;  %v2573_v22 = vmul.f32 0.2, %v1774_v9 }
 0x13d   :  { %4107 = vst.msk [vmem:[%s6870_s2 + $0x274] sm:$0xf] %vm3949_vm2, %v4759_v15  ;;  %v4764_v23 = vpack.c.bf16 %v2831_v21, %v2831_v21  ;;  %v2701_v24 = vsel %vm2189_vm7, %v1262_v8, %v2445_v17  ;;  %vm2192_vm9 = vcmp.gt.f32.partialorder %v5045_v13, 0.0  ;;  %v2448_v25 = vmul.f32 0.2, %v5045_v13  ;;  %v5048_v35 = vpop.f32.mrb[36].mxu0 }
 0x13e   :  { %3984 = vst.msk [vmem:[%s6870_s2 + $0x88] sm:$0xf] %vm3949_vm2, %v4636_v20  ;;  %v4634_v26 = vpack.c.bf16 %v2701_v24, %v2701_v24  ;;  %v2829_v27 = vsel %vm2317_vm8, %v1774_v9, %v2573_v22  ;;  %vm2320_vm10 = vcmp.gt.f32.partialorder %v5173_v14, 0.0  ;;  %v2576_v28 = vmul.f32 0.2, %v5173_v14  ;;  %v5176_v36 = vpop.f32.mrb[36].mxu1 }
 0x13f   :  { %4112 = vst.msk [vmem:[%s6870_s2 + $0x288] sm:$0xf] %vm3949_vm2, %v4764_v23  ;;  %v4762_v29 = vpack.c.bf16 %v2829_v27, %v2829_v27  ;;  %v2704_v30 = vsel %vm2192_vm9, %v5045_v13, %v2448_v25  ;;  %vm2190_vm11 = vcmp.gt.f32.partialorder %v1265_v18, 0.0  ;;  %v2446_v31 = vmul.f32 0.2, %v1265_v18  ;;  %v1278_v40 = vpop.f32.mrb[37].mxu0 }
 0x140   :  { %3982 = vst.msk [vmem:[%s6870_s2 + $0x80] sm:$0xf] %vm3949_vm2, %v4634_v26  ;;  %v4637_v32 = vpack.c.bf16 %v2704_v30, %v2704_v30  ;;  %v2832_v33 = vsel %vm2320_vm10, %v5173_v14, %v2576_v28  ;;  %vm2318_vm12 = vcmp.gt.f32.partialorder %v1777_v19, 0.0  ;;  %v2574_v34 = vmul.f32 0.2, %v1777_v19  ;;  %v1790_v41 = vpop.f32.mrb[37].mxu1 }
 0x141   :  { %4110 = vst.msk [vmem:[%s6870_s2 + $0x280] sm:$0xf] %vm3949_vm2, %v4762_v29  ;;  %v4765_v37 = vpack.c.bf16 %v2832_v33, %v2832_v33  ;;  %v2702_v38 = vsel %vm2190_vm11, %v1265_v18, %v2446_v31  ;;  %vm2195_vm13 = vcmp.gt.f32.partialorder %v5048_v35, 0.0  ;;  %v2451_v39 = vmul.f32 0.2, %v5048_v35  ;;  %v5049_v45 = vpop.f32.mrb[38].mxu0 }
 0x142   :  { %3985 = vst.msk [vmem:[%s6870_s2 + $0x8c] sm:$0xf] %vm3949_vm2, %v4637_v32  ;;  %v4635_v42 = vpack.c.bf16 %v2702_v38, %v2702_v38  ;;  %v2830_v43 = vsel %vm2318_vm12, %v1777_v19, %v2574_v34  ;;  %vm2323_vm14 = vcmp.gt.f32.partialorder %v5176_v36, 0.0  ;;  %v2579_v44 = vmul.f32 0.2, %v5176_v36  ;;  %v5177_v46 = vpop.f32.mrb[38].mxu1 }
 0x143   :  { %4113 = vst.msk [vmem:[%s6870_s2 + $0x28c] sm:$0xf] %vm3949_vm2, %v4765_v37  ;;  %v4763_v47 = vpack.c.bf16 %v2830_v43, %v2830_v43  ;;  %v2707_v48 = vsel %vm2195_vm13, %v5048_v35, %v2451_v39  ;;  %vm2193_vm15 = vcmp.gt.f32.partialorder %v1278_v40, 0.0  ;;  %v2449_v49 = vmul.f32 0.2, %v1278_v40  ;;  %v1281_v50 = vpop.f32.mrb[39].mxu0 }
 0x144   :  { %v1793_v51 = vpop.f32.mrb[39].mxu1  ;;  %3983 = vst.msk [vmem:[%s6870_s2 + $0x84] sm:$0xf] %vm3949_vm2, %v4635_v42  ;;  %v4640_v52 = vpack.c.bf16 %v2707_v48, %v2707_v48  ;;  %v2835_v53 = vsel %vm2323_vm14, %v5176_v36, %v2579_v44  ;;  %vm2321_vm0 = vcmp.gt.f32.partialorder %v1790_v41, 0.0  ;;  %v2577_v54 = vmul.f32 0.2, %v1790_v41 }
 0x145   :  { %4111 = vst.msk [vmem:[%s6870_s2 + $0x284] sm:$0xf] %vm3949_vm2, %v4763_v47  ;;  %v4768_v55 = vpack.c.bf16 %v2835_v53, %v2835_v53  ;;  %v2705_v56 = vsel %vm2193_vm15, %v1278_v40, %v2449_v49  ;;  %vm2196_vm1 = vcmp.gt.f32.partialorder %v5049_v45, 0.0  ;;  %v2452_v57 = vmul.f32 0.2, %v5049_v45  ;;  %v5052_v3 = vpop.f32.mrb[40].mxu0 }
 0x146   :  { %3988 = vst.msk [vmem:[%s6870_s2 + $0x98] sm:$0xf] %vm3949_vm2, %v4640_v52  ;;  %v4638_v58 = vpack.c.bf16 %v2705_v56, %v2705_v56  ;;  %v2833_v59 = vsel %vm2321_vm0, %v1790_v41, %v2577_v54  ;;  %vm2324_vm3 = vcmp.gt.f32.partialorder %v5177_v46, 0.0  ;;  %v2580_v60 = vmul.f32 0.2, %v5177_v46  ;;  %v5180_v4 = vpop.f32.mrb[40].mxu1 }
 0x147   :  { %4116 = vst.msk [vmem:[%s6870_s2 + $0x298] sm:$0xf] %vm3949_vm2, %v4768_v55  ;;  %v4766_v61 = vpack.c.bf16 %v2833_v59, %v2833_v59  ;;  %v2708_v62 = vsel %vm2196_vm1, %v5049_v45, %v2452_v57  ;;  %vm2194_vm4 = vcmp.gt.f32.partialorder %v1281_v50, 0.0  ;;  %v2450_v63 = vmul.f32 0.2, %v1281_v50  ;;  %v1294_v8 = vpop.f32.mrb[41].mxu0 }
 0x148   :  { %3986 = vst.msk [vmem:[%s6870_s2 + $0x90] sm:$0xf] %vm3949_vm2, %v4638_v58  ;;  %v4641_v0 = vpack.c.bf16 %v2708_v62, %v2708_v62  ;;  %v2836_v1 = vsel %vm2324_vm3, %v5177_v46, %v2580_v60  ;;  %vm2322_vm5 = vcmp.gt.f32.partialorder %v1793_v51, 0.0  ;;  %v2578_v2 = vmul.f32 0.2, %v1793_v51  ;;  %v1806_v9 = vpop.f32.mrb[41].mxu1 }
 0x149   :  { %4114 = vst.msk [vmem:[%s6870_s2 + $0x290] sm:$0xf] %vm3949_vm2, %v4766_v61  ;;  %v4769_v5 = vpack.c.bf16 %v2836_v1, %v2836_v1  ;;  %v2706_v6 = vsel %vm2194_vm4, %v1281_v50, %v2450_v63  ;;  %vm2199_vm6 = vcmp.gt.f32.partialorder %v5052_v3, 0.0  ;;  %v2455_v7 = vmul.f32 0.2, %v5052_v3  ;;  %v5053_v13 = vpop.f32.mrb[42].mxu0 }
 0x14a   :  { %3989 = vst.msk [vmem:[%s6870_s2 + $0x9c] sm:$0xf] %vm3949_vm2, %v4641_v0  ;;  %v4639_v10 = vpack.c.bf16 %v2706_v6, %v2706_v6  ;;  %v2834_v11 = vsel %vm2322_vm5, %v1793_v51, %v2578_v2  ;;  %vm2327_vm7 = vcmp.gt.f32.partialorder %v5180_v4, 0.0  ;;  %v2583_v12 = vmul.f32 0.2, %v5180_v4  ;;  %v5181_v14 = vpop.f32.mrb[42].mxu1 }
 0x14b   :  { %4117 = vst.msk [vmem:[%s6870_s2 + $0x29c] sm:$0xf] %vm3949_vm2, %v4769_v5  ;;  %v4767_v15 = vpack.c.bf16 %v2834_v11, %v2834_v11  ;;  %v2711_v16 = vsel %vm2199_vm6, %v5052_v3, %v2455_v7  ;;  %vm2197_vm8 = vcmp.gt.f32.partialorder %v1294_v8, 0.0  ;;  %v2453_v17 = vmul.f32 0.2, %v1294_v8  ;;  %v1297_v18 = vpop.f32.mrb[43].mxu0 }
 0x14c   :  { %v1809_v19 = vpop.f32.mrb[43].mxu1  ;;  %3987 = vst.msk [vmem:[%s6870_s2 + $0x94] sm:$0xf] %vm3949_vm2, %v4639_v10  ;;  %v4644_v20 = vpack.c.bf16 %v2711_v16, %v2711_v16  ;;  %v2839_v21 = vsel %vm2327_vm7, %v5180_v4, %v2583_v12  ;;  %vm2325_vm9 = vcmp.gt.f32.partialorder %v1806_v9, 0.0  ;;  %v2581_v22 = vmul.f32 0.2, %v1806_v9 }
 0x14d   :  { %4115 = vst.msk [vmem:[%s6870_s2 + $0x294] sm:$0xf] %vm3949_vm2, %v4767_v15  ;;  %v4772_v23 = vpack.c.bf16 %v2839_v21, %v2839_v21  ;;  %v2709_v24 = vsel %vm2197_vm8, %v1294_v8, %v2453_v17  ;;  %vm2200_vm10 = vcmp.gt.f32.partialorder %v5053_v13, 0.0  ;;  %v2456_v25 = vmul.f32 0.2, %v5053_v13  ;;  %v5056_v35 = vpop.f32.mrb[44].mxu0 }
 0x14e   :  { %3992 = vst.msk [vmem:[%s6870_s2 + $0xa8] sm:$0xf] %vm3949_vm2, %v4644_v20  ;;  %v4642_v26 = vpack.c.bf16 %v2709_v24, %v2709_v24  ;;  %v2837_v27 = vsel %vm2325_vm9, %v1806_v9, %v2581_v22  ;;  %vm2328_vm11 = vcmp.gt.f32.partialorder %v5181_v14, 0.0  ;;  %v2584_v28 = vmul.f32 0.2, %v5181_v14  ;;  %v5184_v36 = vpop.f32.mrb[44].mxu1 }
 0x14f   :  { %4120 = vst.msk [vmem:[%s6870_s2 + $0x2a8] sm:$0xf] %vm3949_vm2, %v4772_v23  ;;  %v4770_v29 = vpack.c.bf16 %v2837_v27, %v2837_v27  ;;  %v2712_v30 = vsel %vm2200_vm10, %v5053_v13, %v2456_v25  ;;  %vm2198_vm12 = vcmp.gt.f32.partialorder %v1297_v18, 0.0  ;;  %v2454_v31 = vmul.f32 0.2, %v1297_v18  ;;  %v1310_v40 = vpop.f32.mrb[45].mxu0 }
 0x150   :  { %3990 = vst.msk [vmem:[%s6870_s2 + $0xa0] sm:$0xf] %vm3949_vm2, %v4642_v26  ;;  %v4645_v32 = vpack.c.bf16 %v2712_v30, %v2712_v30  ;;  %v2840_v33 = vsel %vm2328_vm11, %v5181_v14, %v2584_v28  ;;  %vm2326_vm13 = vcmp.gt.f32.partialorder %v1809_v19, 0.0  ;;  %v2582_v34 = vmul.f32 0.2, %v1809_v19  ;;  %v1822_v41 = vpop.f32.mrb[45].mxu1 }
 0x151   :  { %4118 = vst.msk [vmem:[%s6870_s2 + $0x2a0] sm:$0xf] %vm3949_vm2, %v4770_v29  ;;  %v4773_v37 = vpack.c.bf16 %v2840_v33, %v2840_v33  ;;  %v2710_v38 = vsel %vm2198_vm12, %v1297_v18, %v2454_v31  ;;  %vm2203_vm14 = vcmp.gt.f32.partialorder %v5056_v35, 0.0  ;;  %v2459_v39 = vmul.f32 0.2, %v5056_v35  ;;  %v5057_v45 = vpop.f32.mrb[46].mxu0 }
 0x152   :  { %3993 = vst.msk [vmem:[%s6870_s2 + $0xac] sm:$0xf] %vm3949_vm2, %v4645_v32  ;;  %v4643_v42 = vpack.c.bf16 %v2710_v38, %v2710_v38  ;;  %v2838_v43 = vsel %vm2326_vm13, %v1809_v19, %v2582_v34  ;;  %vm2331_vm15 = vcmp.gt.f32.partialorder %v5184_v36, 0.0  ;;  %v2587_v44 = vmul.f32 0.2, %v5184_v36  ;;  %v5185_v46 = vpop.f32.mrb[46].mxu1 }
 0x153   :  { %4121 = vst.msk [vmem:[%s6870_s2 + $0x2ac] sm:$0xf] %vm3949_vm2, %v4773_v37  ;;  %v4771_v47 = vpack.c.bf16 %v2838_v43, %v2838_v43  ;;  %v2715_v48 = vsel %vm2203_vm14, %v5056_v35, %v2459_v39  ;;  %vm2201_vm0 = vcmp.gt.f32.partialorder %v1310_v40, 0.0  ;;  %v2457_v49 = vmul.f32 0.2, %v1310_v40  ;;  %v1313_v50 = vpop.f32.mrb[47].mxu0 }
 0x154   :  { %v1825_v51 = vpop.f32.mrb[47].mxu1  ;;  %3991 = vst.msk [vmem:[%s6870_s2 + $0xa4] sm:$0xf] %vm3949_vm2, %v4643_v42  ;;  %v4648_v52 = vpack.c.bf16 %v2715_v48, %v2715_v48  ;;  %v2843_v53 = vsel %vm2331_vm15, %v5184_v36, %v2587_v44  ;;  %vm2329_vm1 = vcmp.gt.f32.partialorder %v1822_v41, 0.0  ;;  %v2585_v54 = vmul.f32 0.2, %v1822_v41 }
 0x155   :  { %4119 = vst.msk [vmem:[%s6870_s2 + $0x2a4] sm:$0xf] %vm3949_vm2, %v4771_v47  ;;  %v4776_v55 = vpack.c.bf16 %v2843_v53, %v2843_v53  ;;  %v2713_v56 = vsel %vm2201_vm0, %v1310_v40, %v2457_v49  ;;  %vm2204_vm3 = vcmp.gt.f32.partialorder %v5057_v45, 0.0  ;;  %v2460_v57 = vmul.f32 0.2, %v5057_v45  ;;  %v5060_v3 = vpop.f32.mrb[48].mxu0 }
 0x156   :  { %3996 = vst.msk [vmem:[%s6870_s2 + $0xb8] sm:$0xf] %vm3949_vm2, %v4648_v52  ;;  %v4646_v58 = vpack.c.bf16 %v2713_v56, %v2713_v56  ;;  %v2841_v59 = vsel %vm2329_vm1, %v1822_v41, %v2585_v54  ;;  %vm2332_vm4 = vcmp.gt.f32.partialorder %v5185_v46, 0.0  ;;  %v2588_v60 = vmul.f32 0.2, %v5185_v46  ;;  %v5188_v4 = vpop.f32.mrb[48].mxu1 }
 0x157   :  { %4124 = vst.msk [vmem:[%s6870_s2 + $0x2b8] sm:$0xf] %vm3949_vm2, %v4776_v55  ;;  %v4774_v61 = vpack.c.bf16 %v2841_v59, %v2841_v59  ;;  %v2716_v62 = vsel %vm2204_vm3, %v5057_v45, %v2460_v57  ;;  %vm2202_vm5 = vcmp.gt.f32.partialorder %v1313_v50, 0.0  ;;  %v2458_v63 = vmul.f32 0.2, %v1313_v50  ;;  %v1326_v8 = vpop.f32.mrb[49].mxu0 }
 0x158   :  { %3994 = vst.msk [vmem:[%s6870_s2 + $0xb0] sm:$0xf] %vm3949_vm2, %v4646_v58  ;;  %v4649_v0 = vpack.c.bf16 %v2716_v62, %v2716_v62  ;;  %v2844_v1 = vsel %vm2332_vm4, %v5185_v46, %v2588_v60  ;;  %vm2330_vm6 = vcmp.gt.f32.partialorder %v1825_v51, 0.0  ;;  %v2586_v2 = vmul.f32 0.2, %v1825_v51  ;;  %v1838_v9 = vpop.f32.mrb[49].mxu1 }
 0x159   :  { %4122 = vst.msk [vmem:[%s6870_s2 + $0x2b0] sm:$0xf] %vm3949_vm2, %v4774_v61  ;;  %v4777_v5 = vpack.c.bf16 %v2844_v1, %v2844_v1  ;;  %v2714_v6 = vsel %vm2202_vm5, %v1313_v50, %v2458_v63  ;;  %vm2207_vm7 = vcmp.gt.f32.partialorder %v5060_v3, 0.0  ;;  %v2463_v7 = vmul.f32 0.2, %v5060_v3  ;;  %v5061_v13 = vpop.f32.mrb[50].mxu0 }
 0x15a   :  { %3997 = vst.msk [vmem:[%s6870_s2 + $0xbc] sm:$0xf] %vm3949_vm2, %v4649_v0  ;;  %v4647_v10 = vpack.c.bf16 %v2714_v6, %v2714_v6  ;;  %v2842_v11 = vsel %vm2330_vm6, %v1825_v51, %v2586_v2  ;;  %vm2335_vm8 = vcmp.gt.f32.partialorder %v5188_v4, 0.0  ;;  %v2591_v12 = vmul.f32 0.2, %v5188_v4  ;;  %v5189_v14 = vpop.f32.mrb[50].mxu1 }
 0x15b   :  { %4125 = vst.msk [vmem:[%s6870_s2 + $0x2bc] sm:$0xf] %vm3949_vm2, %v4777_v5  ;;  %v4775_v15 = vpack.c.bf16 %v2842_v11, %v2842_v11  ;;  %v2719_v16 = vsel %vm2207_vm7, %v5060_v3, %v2463_v7  ;;  %vm2205_vm9 = vcmp.gt.f32.partialorder %v1326_v8, 0.0  ;;  %v2461_v17 = vmul.f32 0.2, %v1326_v8  ;;  %v1329_v18 = vpop.f32.mrb[51].mxu0 }
 0x15c   :  { %v1841_v19 = vpop.f32.mrb[51].mxu1  ;;  %3995 = vst.msk [vmem:[%s6870_s2 + $0xb4] sm:$0xf] %vm3949_vm2, %v4647_v10  ;;  %v4652_v20 = vpack.c.bf16 %v2719_v16, %v2719_v16  ;;  %v2847_v21 = vsel %vm2335_vm8, %v5188_v4, %v2591_v12  ;;  %vm2333_vm10 = vcmp.gt.f32.partialorder %v1838_v9, 0.0  ;;  %v2589_v22 = vmul.f32 0.2, %v1838_v9 }
 0x15d   :  { %4123 = vst.msk [vmem:[%s6870_s2 + $0x2b4] sm:$0xf] %vm3949_vm2, %v4775_v15  ;;  %v4780_v23 = vpack.c.bf16 %v2847_v21, %v2847_v21  ;;  %v2717_v24 = vsel %vm2205_vm9, %v1326_v8, %v2461_v17  ;;  %vm2208_vm11 = vcmp.gt.f32.partialorder %v5061_v13, 0.0  ;;  %v2464_v25 = vmul.f32 0.2, %v5061_v13  ;;  %v5064_v35 = vpop.f32.mrb[52].mxu0 }
 0x15e   :  { %4000 = vst.msk [vmem:[%s6870_s2 + $0xc8] sm:$0xf] %vm3949_vm2, %v4652_v20  ;;  %v4650_v26 = vpack.c.bf16 %v2717_v24, %v2717_v24  ;;  %v2845_v27 = vsel %vm2333_vm10, %v1838_v9, %v2589_v22  ;;  %vm2336_vm12 = vcmp.gt.f32.partialorder %v5189_v14, 0.0  ;;  %v2592_v28 = vmul.f32 0.2, %v5189_v14  ;;  %v5192_v36 = vpop.f32.mrb[52].mxu1 }
 0x15f   :  { %4128 = vst.msk [vmem:[%s6870_s2 + $0x2c8] sm:$0xf] %vm3949_vm2, %v4780_v23  ;;  %v4778_v29 = vpack.c.bf16 %v2845_v27, %v2845_v27  ;;  %v2720_v30 = vsel %vm2208_vm11, %v5061_v13, %v2464_v25  ;;  %vm2206_vm13 = vcmp.gt.f32.partialorder %v1329_v18, 0.0  ;;  %v2462_v31 = vmul.f32 0.2, %v1329_v18  ;;  %v1342_v40 = vpop.f32.mrb[53].mxu0 }
 0x160   :  { %3998 = vst.msk [vmem:[%s6870_s2 + $0xc0] sm:$0xf] %vm3949_vm2, %v4650_v26  ;;  %v4653_v32 = vpack.c.bf16 %v2720_v30, %v2720_v30  ;;  %v2848_v33 = vsel %vm2336_vm12, %v5189_v14, %v2592_v28  ;;  %vm2334_vm14 = vcmp.gt.f32.partialorder %v1841_v19, 0.0  ;;  %v2590_v34 = vmul.f32 0.2, %v1841_v19  ;;  %v1854_v41 = vpop.f32.mrb[53].mxu1 }
 0x161   :  { %4126 = vst.msk [vmem:[%s6870_s2 + $0x2c0] sm:$0xf] %vm3949_vm2, %v4778_v29  ;;  %v4781_v37 = vpack.c.bf16 %v2848_v33, %v2848_v33  ;;  %v2718_v38 = vsel %vm2206_vm13, %v1329_v18, %v2462_v31  ;;  %vm2211_vm15 = vcmp.gt.f32.partialorder %v5064_v35, 0.0  ;;  %v2467_v39 = vmul.f32 0.2, %v5064_v35  ;;  %v5065_v45 = vpop.f32.mrb[54].mxu0 }
 0x162   :  { %4001 = vst.msk [vmem:[%s6870_s2 + $0xcc] sm:$0xf] %vm3949_vm2, %v4653_v32  ;;  %v4651_v42 = vpack.c.bf16 %v2718_v38, %v2718_v38  ;;  %v2846_v43 = vsel %vm2334_vm14, %v1841_v19, %v2590_v34  ;;  %vm2339_vm0 = vcmp.gt.f32.partialorder %v5192_v36, 0.0  ;;  %v2595_v44 = vmul.f32 0.2, %v5192_v36  ;;  %v5193_v46 = vpop.f32.mrb[54].mxu1 }
 0x163   :  { %4129 = vst.msk [vmem:[%s6870_s2 + $0x2cc] sm:$0xf] %vm3949_vm2, %v4781_v37  ;;  %v4779_v47 = vpack.c.bf16 %v2846_v43, %v2846_v43  ;;  %v2723_v48 = vsel %vm2211_vm15, %v5064_v35, %v2467_v39  ;;  %vm2209_vm1 = vcmp.gt.f32.partialorder %v1342_v40, 0.0  ;;  %v2465_v49 = vmul.f32 0.2, %v1342_v40  ;;  %v1345_v50 = vpop.f32.mrb[55].mxu0 }
 0x164   :  { %v1857_v51 = vpop.f32.mrb[55].mxu1  ;;  %3999 = vst.msk [vmem:[%s6870_s2 + $0xc4] sm:$0xf] %vm3949_vm2, %v4651_v42  ;;  %v4656_v52 = vpack.c.bf16 %v2723_v48, %v2723_v48  ;;  %v2851_v53 = vsel %vm2339_vm0, %v5192_v36, %v2595_v44  ;;  %vm2337_vm3 = vcmp.gt.f32.partialorder %v1854_v41, 0.0  ;;  %v2593_v54 = vmul.f32 0.2, %v1854_v41 }
 0x165   :  { %4127 = vst.msk [vmem:[%s6870_s2 + $0x2c4] sm:$0xf] %vm3949_vm2, %v4779_v47  ;;  %v4784_v55 = vpack.c.bf16 %v2851_v53, %v2851_v53  ;;  %v2721_v56 = vsel %vm2209_vm1, %v1342_v40, %v2465_v49  ;;  %vm2212_vm4 = vcmp.gt.f32.partialorder %v5065_v45, 0.0  ;;  %v2468_v57 = vmul.f32 0.2, %v5065_v45  ;;  %v5068_v3 = vpop.f32.mrb[56].mxu0 }
 0x166   :  { %4004 = vst.msk [vmem:[%s6870_s2 + $0xd8] sm:$0xf] %vm3949_vm2, %v4656_v52  ;;  %v4654_v58 = vpack.c.bf16 %v2721_v56, %v2721_v56  ;;  %v2849_v59 = vsel %vm2337_vm3, %v1854_v41, %v2593_v54  ;;  %vm2340_vm5 = vcmp.gt.f32.partialorder %v5193_v46, 0.0  ;;  %v2596_v60 = vmul.f32 0.2, %v5193_v46  ;;  %v5196_v4 = vpop.f32.mrb[56].mxu1 }
 0x167   :  { %4132 = vst.msk [vmem:[%s6870_s2 + $0x2d8] sm:$0xf] %vm3949_vm2, %v4784_v55  ;;  %v4782_v61 = vpack.c.bf16 %v2849_v59, %v2849_v59  ;;  %v2724_v62 = vsel %vm2212_vm4, %v5065_v45, %v2468_v57  ;;  %vm2210_vm6 = vcmp.gt.f32.partialorder %v1345_v50, 0.0  ;;  %v2466_v63 = vmul.f32 0.2, %v1345_v50  ;;  %v1358_v8 = vpop.f32.mrb[57].mxu0 }
 0x168   :  { %4002 = vst.msk [vmem:[%s6870_s2 + $0xd0] sm:$0xf] %vm3949_vm2, %v4654_v58  ;;  %v4657_v0 = vpack.c.bf16 %v2724_v62, %v2724_v62  ;;  %v2852_v1 = vsel %vm2340_vm5, %v5193_v46, %v2596_v60  ;;  %vm2338_vm7 = vcmp.gt.f32.partialorder %v1857_v51, 0.0  ;;  %v2594_v2 = vmul.f32 0.2, %v1857_v51  ;;  %v1870_v9 = vpop.f32.mrb[57].mxu1 }
 0x169   :  { %4130 = vst.msk [vmem:[%s6870_s2 + $0x2d0] sm:$0xf] %vm3949_vm2, %v4782_v61  ;;  %v4785_v5 = vpack.c.bf16 %v2852_v1, %v2852_v1  ;;  %v2722_v6 = vsel %vm2210_vm6, %v1345_v50, %v2466_v63  ;;  %vm2215_vm8 = vcmp.gt.f32.partialorder %v5068_v3, 0.0  ;;  %v2471_v7 = vmul.f32 0.2, %v5068_v3  ;;  %v5069_v13 = vpop.f32.mrb[58].mxu0 }
 0x16a   :  { %4005 = vst.msk [vmem:[%s6870_s2 + $0xdc] sm:$0xf] %vm3949_vm2, %v4657_v0  ;;  %v4655_v10 = vpack.c.bf16 %v2722_v6, %v2722_v6  ;;  %v2850_v11 = vsel %vm2338_vm7, %v1857_v51, %v2594_v2  ;;  %vm2343_vm9 = vcmp.gt.f32.partialorder %v5196_v4, 0.0  ;;  %v2599_v12 = vmul.f32 0.2, %v5196_v4  ;;  %v5197_v14 = vpop.f32.mrb[58].mxu1 }
 0x16b   :  { %4133 = vst.msk [vmem:[%s6870_s2 + $0x2dc] sm:$0xf] %vm3949_vm2, %v4785_v5  ;;  %v4783_v15 = vpack.c.bf16 %v2850_v11, %v2850_v11  ;;  %v2727_v16 = vsel %vm2215_vm8, %v5068_v3, %v2471_v7  ;;  %vm2213_vm10 = vcmp.gt.f32.partialorder %v1358_v8, 0.0  ;;  %v2469_v17 = vmul.f32 0.2, %v1358_v8  ;;  %v1361_v18 = vpop.f32.mrb[59].mxu0 }
 0x16c   :  { %v1873_v19 = vpop.f32.mrb[59].mxu1  ;;  %4003 = vst.msk [vmem:[%s6870_s2 + $0xd4] sm:$0xf] %vm3949_vm2, %v4655_v10  ;;  %v4660_v20 = vpack.c.bf16 %v2727_v16, %v2727_v16  ;;  %v2855_v21 = vsel %vm2343_vm9, %v5196_v4, %v2599_v12  ;;  %vm2341_vm11 = vcmp.gt.f32.partialorder %v1870_v9, 0.0  ;;  %v2597_v22 = vmul.f32 0.2, %v1870_v9 }
 0x16d   :  { %4131 = vst.msk [vmem:[%s6870_s2 + $0x2d4] sm:$0xf] %vm3949_vm2, %v4783_v15  ;;  %v4788_v23 = vpack.c.bf16 %v2855_v21, %v2855_v21  ;;  %v2725_v24 = vsel %vm2213_vm10, %v1358_v8, %v2469_v17  ;;  %vm2216_vm12 = vcmp.gt.f32.partialorder %v5069_v13, 0.0  ;;  %v2472_v25 = vmul.f32 0.2, %v5069_v13  ;;  %v5072_v35 = vpop.f32.mrb[60].mxu0 }
 0x16e   :  { %4008 = vst.msk [vmem:[%s6870_s2 + $0xe8] sm:$0xf] %vm3949_vm2, %v4660_v20  ;;  %v4658_v26 = vpack.c.bf16 %v2725_v24, %v2725_v24  ;;  %v2853_v27 = vsel %vm2341_vm11, %v1870_v9, %v2597_v22  ;;  %vm2344_vm13 = vcmp.gt.f32.partialorder %v5197_v14, 0.0  ;;  %v2600_v28 = vmul.f32 0.2, %v5197_v14  ;;  %v5200_v36 = vpop.f32.mrb[60].mxu1 }
 0x16f   :  { %4136 = vst.msk [vmem:[%s6870_s2 + $0x2e8] sm:$0xf] %vm3949_vm2, %v4788_v23  ;;  %v4786_v29 = vpack.c.bf16 %v2853_v27, %v2853_v27  ;;  %v2728_v30 = vsel %vm2216_vm12, %v5069_v13, %v2472_v25  ;;  %vm2214_vm14 = vcmp.gt.f32.partialorder %v1361_v18, 0.0  ;;  %v2470_v31 = vmul.f32 0.2, %v1361_v18  ;;  %v1374_v40 = vpop.f32.mrb[61].mxu0 }
 0x170   :  { %4006 = vst.msk [vmem:[%s6870_s2 + $0xe0] sm:$0xf] %vm3949_vm2, %v4658_v26  ;;  %v4661_v32 = vpack.c.bf16 %v2728_v30, %v2728_v30  ;;  %v2856_v33 = vsel %vm2344_vm13, %v5197_v14, %v2600_v28  ;;  %vm2342_vm15 = vcmp.gt.f32.partialorder %v1873_v19, 0.0  ;;  %v2598_v34 = vmul.f32 0.2, %v1873_v19  ;;  %v1886_v41 = vpop.f32.mrb[61].mxu1 }
 0x171   :  { %4134 = vst.msk [vmem:[%s6870_s2 + $0x2e0] sm:$0xf] %vm3949_vm2, %v4786_v29  ;;  %v4789_v37 = vpack.c.bf16 %v2856_v33, %v2856_v33  ;;  %v2726_v38 = vsel %vm2214_vm14, %v1361_v18, %v2470_v31  ;;  %vm2219_vm0 = vcmp.gt.f32.partialorder %v5072_v35, 0.0  ;;  %v2475_v39 = vmul.f32 0.2, %v5072_v35  ;;  %v5073_v45 = vpop.f32.mrb[62].mxu0 }
 0x172   :  { %4009 = vst.msk [vmem:[%s6870_s2 + $0xec] sm:$0xf] %vm3949_vm2, %v4661_v32  ;;  %v4659_v42 = vpack.c.bf16 %v2726_v38, %v2726_v38  ;;  %v2854_v43 = vsel %vm2342_vm15, %v1873_v19, %v2598_v34  ;;  %vm2347_vm1 = vcmp.gt.f32.partialorder %v5200_v36, 0.0  ;;  %v2603_v44 = vmul.f32 0.2, %v5200_v36  ;;  %v5201_v46 = vpop.f32.mrb[62].mxu1 }
 0x173   :  { %4137 = vst.msk [vmem:[%s6870_s2 + $0x2ec] sm:$0xf] %vm3949_vm2, %v4789_v37  ;;  %v4787_v47 = vpack.c.bf16 %v2854_v43, %v2854_v43  ;;  %v2731_v48 = vsel %vm2219_vm0, %v5072_v35, %v2475_v39  ;;  %vm2217_vm3 = vcmp.gt.f32.partialorder %v1374_v40, 0.0  ;;  %v2473_v49 = vmul.f32 0.2, %v1374_v40  ;;  %v1377_v50 = vpop.f32.mrb[63].mxu0 }
 0x174   :  { %v1889_v51 = vpop.f32.mrb[63].mxu1  ;;  %4007 = vst.msk [vmem:[%s6870_s2 + $0xe4] sm:$0xf] %vm3949_vm2, %v4659_v42  ;;  %v4664_v52 = vpack.c.bf16 %v2731_v48, %v2731_v48  ;;  %v2859_v53 = vsel %vm2347_vm1, %v5200_v36, %v2603_v44  ;;  %vm2345_vm4 = vcmp.gt.f32.partialorder %v1886_v41, 0.0  ;;  %v2601_v54 = vmul.f32 0.2, %v1886_v41 }
 0x175   :  { %4135 = vst.msk [vmem:[%s6870_s2 + $0x2e4] sm:$0xf] %vm3949_vm2, %v4787_v47  ;;  %v4792_v55 = vpack.c.bf16 %v2859_v53, %v2859_v53  ;;  %v2729_v56 = vsel %vm2217_vm3, %v1374_v40, %v2473_v49  ;;  %vm2220_vm5 = vcmp.gt.f32.partialorder %v5073_v45, 0.0  ;;  %v2476_v57 = vmul.f32 0.2, %v5073_v45  ;;  %v5076_v3 = vpop.f32.mrb[64].mxu0 }
 0x176   :  { %4012 = vst.msk [vmem:[%s6870_s2 + $0xf8] sm:$0xf] %vm3949_vm2, %v4664_v52  ;;  %v4662_v58 = vpack.c.bf16 %v2729_v56, %v2729_v56  ;;  %v2857_v59 = vsel %vm2345_vm4, %v1886_v41, %v2601_v54  ;;  %vm2348_vm6 = vcmp.gt.f32.partialorder %v5201_v46, 0.0  ;;  %v2604_v60 = vmul.f32 0.2, %v5201_v46  ;;  %v5204_v4 = vpop.f32.mrb[64].mxu1 }
 0x177   :  { %4140 = vst.msk [vmem:[%s6870_s2 + $0x2f8] sm:$0xf] %vm3949_vm2, %v4792_v55  ;;  %v4790_v61 = vpack.c.bf16 %v2857_v59, %v2857_v59  ;;  %v2732_v62 = vsel %vm2220_vm5, %v5073_v45, %v2476_v57  ;;  %vm2218_vm7 = vcmp.gt.f32.partialorder %v1377_v50, 0.0  ;;  %v2474_v63 = vmul.f32 0.2, %v1377_v50  ;;  %v1390_v8 = vpop.f32.mrb[65].mxu0 }
 0x178   :  { %4010 = vst.msk [vmem:[%s6870_s2 + $0xf0] sm:$0xf] %vm3949_vm2, %v4662_v58  ;;  %v4665_v0 = vpack.c.bf16 %v2732_v62, %v2732_v62  ;;  %v2860_v1 = vsel %vm2348_vm6, %v5201_v46, %v2604_v60  ;;  %vm2346_vm8 = vcmp.gt.f32.partialorder %v1889_v51, 0.0  ;;  %v2602_v2 = vmul.f32 0.2, %v1889_v51  ;;  %v1902_v9 = vpop.f32.mrb[65].mxu1 }
 0x179   :  { %4138 = vst.msk [vmem:[%s6870_s2 + $0x2f0] sm:$0xf] %vm3949_vm2, %v4790_v61  ;;  %v4793_v5 = vpack.c.bf16 %v2860_v1, %v2860_v1  ;;  %v2730_v6 = vsel %vm2218_vm7, %v1377_v50, %v2474_v63  ;;  %vm2223_vm9 = vcmp.gt.f32.partialorder %v5076_v3, 0.0  ;;  %v2479_v7 = vmul.f32 0.2, %v5076_v3  ;;  %v5077_v13 = vpop.f32.mrb[66].mxu0 }
 0x17a   :  { %4013 = vst.msk [vmem:[%s6870_s2 + $0xfc] sm:$0xf] %vm3949_vm2, %v4665_v0  ;;  %v4663_v10 = vpack.c.bf16 %v2730_v6, %v2730_v6  ;;  %v2858_v11 = vsel %vm2346_vm8, %v1889_v51, %v2602_v2  ;;  %vm2351_vm10 = vcmp.gt.f32.partialorder %v5204_v4, 0.0  ;;  %v2607_v12 = vmul.f32 0.2, %v5204_v4  ;;  %v5205_v14 = vpop.f32.mrb[66].mxu1 }
 0x17b   :  { %4141 = vst.msk [vmem:[%s6870_s2 + $0x2fc] sm:$0xf] %vm3949_vm2, %v4793_v5  ;;  %v4791_v15 = vpack.c.bf16 %v2858_v11, %v2858_v11  ;;  %v2735_v16 = vsel %vm2223_vm9, %v5076_v3, %v2479_v7  ;;  %vm2221_vm11 = vcmp.gt.f32.partialorder %v1390_v8, 0.0  ;;  %v2477_v17 = vmul.f32 0.2, %v1390_v8  ;;  %v1393_v18 = vpop.f32.mrb[67].mxu0 }
 0x17c   :  { %v1905_v19 = vpop.f32.mrb[67].mxu1  ;;  %4011 = vst.msk [vmem:[%s6870_s2 + $0xf4] sm:$0xf] %vm3949_vm2, %v4663_v10  ;;  %v4668_v20 = vpack.c.bf16 %v2735_v16, %v2735_v16  ;;  %v2863_v21 = vsel %vm2351_vm10, %v5204_v4, %v2607_v12  ;;  %vm2349_vm12 = vcmp.gt.f32.partialorder %v1902_v9, 0.0  ;;  %v2605_v22 = vmul.f32 0.2, %v1902_v9 }
 0x17d   :  { %4139 = vst.msk [vmem:[%s6870_s2 + $0x2f4] sm:$0xf] %vm3949_vm2, %v4791_v15  ;;  %v4796_v23 = vpack.c.bf16 %v2863_v21, %v2863_v21  ;;  %v2733_v24 = vsel %vm2221_vm11, %v1390_v8, %v2477_v17  ;;  %vm2224_vm13 = vcmp.gt.f32.partialorder %v5077_v13, 0.0  ;;  %v2480_v25 = vmul.f32 0.2, %v5077_v13  ;;  %v5080_v35 = vpop.f32.mrb[68].mxu0 }
 0x17e   :  { %4016 = vst.msk [vmem:[%s6870_s2 + $0x108] sm:$0xf] %vm3949_vm2, %v4668_v20  ;;  %v4666_v26 = vpack.c.bf16 %v2733_v24, %v2733_v24  ;;  %v2861_v27 = vsel %vm2349_vm12, %v1902_v9, %v2605_v22  ;;  %vm2352_vm14 = vcmp.gt.f32.partialorder %v5205_v14, 0.0  ;;  %v2608_v28 = vmul.f32 0.2, %v5205_v14  ;;  %v5208_v36 = vpop.f32.mrb[68].mxu1 }
 0x17f   :  { %4144 = vst.msk [vmem:[%s6870_s2 + $0x308] sm:$0xf] %vm3949_vm2, %v4796_v23  ;;  %v4794_v29 = vpack.c.bf16 %v2861_v27, %v2861_v27  ;;  %v2736_v30 = vsel %vm2224_vm13, %v5077_v13, %v2480_v25  ;;  %vm2222_vm15 = vcmp.gt.f32.partialorder %v1393_v18, 0.0  ;;  %v2478_v31 = vmul.f32 0.2, %v1393_v18  ;;  %v1406_v40 = vpop.f32.mrb[69].mxu0 }
 0x180   :  { %4014 = vst.msk [vmem:[%s6870_s2 + $0x100] sm:$0xf] %vm3949_vm2, %v4666_v26  ;;  %v4669_v32 = vpack.c.bf16 %v2736_v30, %v2736_v30  ;;  %v2864_v33 = vsel %vm2352_vm14, %v5205_v14, %v2608_v28  ;;  %vm2350_vm0 = vcmp.gt.f32.partialorder %v1905_v19, 0.0  ;;  %v2606_v34 = vmul.f32 0.2, %v1905_v19  ;;  %v1918_v41 = vpop.f32.mrb[69].mxu1 }
 0x181   :  { %4142 = vst.msk [vmem:[%s6870_s2 + $0x300] sm:$0xf] %vm3949_vm2, %v4794_v29  ;;  %v4797_v37 = vpack.c.bf16 %v2864_v33, %v2864_v33  ;;  %v2734_v38 = vsel %vm2222_vm15, %v1393_v18, %v2478_v31  ;;  %vm2227_vm1 = vcmp.gt.f32.partialorder %v5080_v35, 0.0  ;;  %v2483_v39 = vmul.f32 0.2, %v5080_v35  ;;  %v5081_v45 = vpop.f32.mrb[70].mxu0 }
 0x182   :  { %4017 = vst.msk [vmem:[%s6870_s2 + $0x10c] sm:$0xf] %vm3949_vm2, %v4669_v32  ;;  %v4667_v42 = vpack.c.bf16 %v2734_v38, %v2734_v38  ;;  %v2862_v43 = vsel %vm2350_vm0, %v1905_v19, %v2606_v34  ;;  %vm2355_vm3 = vcmp.gt.f32.partialorder %v5208_v36, 0.0  ;;  %v2611_v44 = vmul.f32 0.2, %v5208_v36  ;;  %v5209_v46 = vpop.f32.mrb[70].mxu1 }
 0x183   :  { %4145 = vst.msk [vmem:[%s6870_s2 + $0x30c] sm:$0xf] %vm3949_vm2, %v4797_v37  ;;  %v4795_v47 = vpack.c.bf16 %v2862_v43, %v2862_v43  ;;  %v2739_v48 = vsel %vm2227_vm1, %v5080_v35, %v2483_v39  ;;  %vm2225_vm4 = vcmp.gt.f32.partialorder %v1406_v40, 0.0  ;;  %v2481_v49 = vmul.f32 0.2, %v1406_v40  ;;  %v1409_v50 = vpop.f32.mrb[71].mxu0 }
 0x184   :  { %v1921_v51 = vpop.f32.mrb[71].mxu1  ;;  %4015 = vst.msk [vmem:[%s6870_s2 + $0x104] sm:$0xf] %vm3949_vm2, %v4667_v42  ;;  %v4672_v52 = vpack.c.bf16 %v2739_v48, %v2739_v48  ;;  %v2867_v53 = vsel %vm2355_vm3, %v5208_v36, %v2611_v44  ;;  %vm2353_vm5 = vcmp.gt.f32.partialorder %v1918_v41, 0.0  ;;  %v2609_v54 = vmul.f32 0.2, %v1918_v41 }
 0x185   :  { %4143 = vst.msk [vmem:[%s6870_s2 + $0x304] sm:$0xf] %vm3949_vm2, %v4795_v47  ;;  %v4800_v55 = vpack.c.bf16 %v2867_v53, %v2867_v53  ;;  %v2737_v56 = vsel %vm2225_vm4, %v1406_v40, %v2481_v49  ;;  %vm2228_vm6 = vcmp.gt.f32.partialorder %v5081_v45, 0.0  ;;  %v2484_v57 = vmul.f32 0.2, %v5081_v45  ;;  %v5084_v3 = vpop.f32.mrb[72].mxu0 }
 0x186   :  { %4020 = vst.msk [vmem:[%s6870_s2 + $0x118] sm:$0xf] %vm3949_vm2, %v4672_v52  ;;  %v4670_v58 = vpack.c.bf16 %v2737_v56, %v2737_v56  ;;  %v2865_v59 = vsel %vm2353_vm5, %v1918_v41, %v2609_v54  ;;  %vm2356_vm7 = vcmp.gt.f32.partialorder %v5209_v46, 0.0  ;;  %v2612_v60 = vmul.f32 0.2, %v5209_v46  ;;  %v5212_v4 = vpop.f32.mrb[72].mxu1 }
 0x187   :  { %4148 = vst.msk [vmem:[%s6870_s2 + $0x318] sm:$0xf] %vm3949_vm2, %v4800_v55  ;;  %v4798_v61 = vpack.c.bf16 %v2865_v59, %v2865_v59  ;;  %v2740_v62 = vsel %vm2228_vm6, %v5081_v45, %v2484_v57  ;;  %vm2226_vm8 = vcmp.gt.f32.partialorder %v1409_v50, 0.0  ;;  %v2482_v63 = vmul.f32 0.2, %v1409_v50  ;;  %v1422_v8 = vpop.f32.mrb[73].mxu0 }
 0x188   :  { %4018 = vst.msk [vmem:[%s6870_s2 + $0x110] sm:$0xf] %vm3949_vm2, %v4670_v58  ;;  %v4673_v0 = vpack.c.bf16 %v2740_v62, %v2740_v62  ;;  %v2868_v1 = vsel %vm2356_vm7, %v5209_v46, %v2612_v60  ;;  %vm2354_vm9 = vcmp.gt.f32.partialorder %v1921_v51, 0.0  ;;  %v2610_v2 = vmul.f32 0.2, %v1921_v51  ;;  %v1934_v9 = vpop.f32.mrb[73].mxu1 }
 0x189   :  { %4146 = vst.msk [vmem:[%s6870_s2 + $0x310] sm:$0xf] %vm3949_vm2, %v4798_v61  ;;  %v4801_v5 = vpack.c.bf16 %v2868_v1, %v2868_v1  ;;  %v2738_v6 = vsel %vm2226_vm8, %v1409_v50, %v2482_v63  ;;  %vm2231_vm10 = vcmp.gt.f32.partialorder %v5084_v3, 0.0  ;;  %v2487_v7 = vmul.f32 0.2, %v5084_v3  ;;  %v5085_v13 = vpop.f32.mrb[74].mxu0 }
 0x18a   :  { %4021 = vst.msk [vmem:[%s6870_s2 + $0x11c] sm:$0xf] %vm3949_vm2, %v4673_v0  ;;  %v4671_v10 = vpack.c.bf16 %v2738_v6, %v2738_v6  ;;  %v2866_v11 = vsel %vm2354_vm9, %v1921_v51, %v2610_v2  ;;  %vm2359_vm11 = vcmp.gt.f32.partialorder %v5212_v4, 0.0  ;;  %v2615_v12 = vmul.f32 0.2, %v5212_v4  ;;  %v5213_v14 = vpop.f32.mrb[74].mxu1 }
 0x18b   :  { %4149 = vst.msk [vmem:[%s6870_s2 + $0x31c] sm:$0xf] %vm3949_vm2, %v4801_v5  ;;  %v4799_v15 = vpack.c.bf16 %v2866_v11, %v2866_v11  ;;  %v2743_v16 = vsel %vm2231_vm10, %v5084_v3, %v2487_v7  ;;  %vm2229_vm12 = vcmp.gt.f32.partialorder %v1422_v8, 0.0  ;;  %v2485_v17 = vmul.f32 0.2, %v1422_v8  ;;  %v1425_v18 = vpop.f32.mrb[75].mxu0 }
 0x18c   :  { %v1937_v19 = vpop.f32.mrb[75].mxu1  ;;  %4019 = vst.msk [vmem:[%s6870_s2 + $0x114] sm:$0xf] %vm3949_vm2, %v4671_v10  ;;  %v4676_v20 = vpack.c.bf16 %v2743_v16, %v2743_v16  ;;  %v2871_v21 = vsel %vm2359_vm11, %v5212_v4, %v2615_v12  ;;  %vm2357_vm13 = vcmp.gt.f32.partialorder %v1934_v9, 0.0  ;;  %v2613_v22 = vmul.f32 0.2, %v1934_v9 }
 0x18d   :  { %4147 = vst.msk [vmem:[%s6870_s2 + $0x314] sm:$0xf] %vm3949_vm2, %v4799_v15  ;;  %v4804_v23 = vpack.c.bf16 %v2871_v21, %v2871_v21  ;;  %v2741_v24 = vsel %vm2229_vm12, %v1422_v8, %v2485_v17  ;;  %vm2232_vm14 = vcmp.gt.f32.partialorder %v5085_v13, 0.0  ;;  %v2488_v25 = vmul.f32 0.2, %v5085_v13  ;;  %v5088_v35 = vpop.f32.mrb[76].mxu0 }
 0x18e   :  { %4024 = vst.msk [vmem:[%s6870_s2 + $0x128] sm:$0xf] %vm3949_vm2, %v4676_v20  ;;  %v4674_v26 = vpack.c.bf16 %v2741_v24, %v2741_v24  ;;  %v2869_v27 = vsel %vm2357_vm13, %v1934_v9, %v2613_v22  ;;  %vm2360_vm15 = vcmp.gt.f32.partialorder %v5213_v14, 0.0  ;;  %v2616_v28 = vmul.f32 0.2, %v5213_v14  ;;  %v5216_v36 = vpop.f32.mrb[76].mxu1 }
 0x18f   :  { %4152 = vst.msk [vmem:[%s6870_s2 + $0x328] sm:$0xf] %vm3949_vm2, %v4804_v23  ;;  %v4802_v29 = vpack.c.bf16 %v2869_v27, %v2869_v27  ;;  %v2744_v30 = vsel %vm2232_vm14, %v5085_v13, %v2488_v25  ;;  %vm2230_vm0 = vcmp.gt.f32.partialorder %v1425_v18, 0.0  ;;  %v2486_v31 = vmul.f32 0.2, %v1425_v18  ;;  %v1438_v40 = vpop.f32.mrb[77].mxu0 }
 0x190   :  { %4022 = vst.msk [vmem:[%s6870_s2 + $0x120] sm:$0xf] %vm3949_vm2, %v4674_v26  ;;  %v4677_v32 = vpack.c.bf16 %v2744_v30, %v2744_v30  ;;  %v2872_v33 = vsel %vm2360_vm15, %v5213_v14, %v2616_v28  ;;  %vm2358_vm1 = vcmp.gt.f32.partialorder %v1937_v19, 0.0  ;;  %v2614_v34 = vmul.f32 0.2, %v1937_v19  ;;  %v1950_v41 = vpop.f32.mrb[77].mxu1 }
 0x191   :  { %4150 = vst.msk [vmem:[%s6870_s2 + $0x320] sm:$0xf] %vm3949_vm2, %v4802_v29  ;;  %v4805_v37 = vpack.c.bf16 %v2872_v33, %v2872_v33  ;;  %v2742_v38 = vsel %vm2230_vm0, %v1425_v18, %v2486_v31  ;;  %vm2235_vm3 = vcmp.gt.f32.partialorder %v5088_v35, 0.0  ;;  %v2491_v39 = vmul.f32 0.2, %v5088_v35  ;;  %v5089_v45 = vpop.f32.mrb[78].mxu0 }
 0x192   :  { %4025 = vst.msk [vmem:[%s6870_s2 + $0x12c] sm:$0xf] %vm3949_vm2, %v4677_v32  ;;  %v4675_v42 = vpack.c.bf16 %v2742_v38, %v2742_v38  ;;  %v2870_v43 = vsel %vm2358_vm1, %v1937_v19, %v2614_v34  ;;  %vm2363_vm4 = vcmp.gt.f32.partialorder %v5216_v36, 0.0  ;;  %v2619_v44 = vmul.f32 0.2, %v5216_v36  ;;  %v5217_v46 = vpop.f32.mrb[78].mxu1 }
 0x193   :  { %4153 = vst.msk [vmem:[%s6870_s2 + $0x32c] sm:$0xf] %vm3949_vm2, %v4805_v37  ;;  %v4803_v47 = vpack.c.bf16 %v2870_v43, %v2870_v43  ;;  %v2747_v48 = vsel %vm2235_vm3, %v5088_v35, %v2491_v39  ;;  %vm2233_vm5 = vcmp.gt.f32.partialorder %v1438_v40, 0.0  ;;  %v2489_v49 = vmul.f32 0.2, %v1438_v40  ;;  %v1441_v50 = vpop.f32.mrb[79].mxu0 }
 0x194   :  { %v1953_v51 = vpop.f32.mrb[79].mxu1  ;;  %4023 = vst.msk [vmem:[%s6870_s2 + $0x124] sm:$0xf] %vm3949_vm2, %v4675_v42  ;;  %v4680_v52 = vpack.c.bf16 %v2747_v48, %v2747_v48  ;;  %v2875_v53 = vsel %vm2363_vm4, %v5216_v36, %v2619_v44  ;;  %vm2361_vm6 = vcmp.gt.f32.partialorder %v1950_v41, 0.0  ;;  %v2617_v54 = vmul.f32 0.2, %v1950_v41 }
 0x195   :  { %4151 = vst.msk [vmem:[%s6870_s2 + $0x324] sm:$0xf] %vm3949_vm2, %v4803_v47  ;;  %v4808_v55 = vpack.c.bf16 %v2875_v53, %v2875_v53  ;;  %v2745_v56 = vsel %vm2233_vm5, %v1438_v40, %v2489_v49  ;;  %vm2236_vm7 = vcmp.gt.f32.partialorder %v5089_v45, 0.0  ;;  %v2492_v57 = vmul.f32 0.2, %v5089_v45  ;;  %v5092_v3 = vpop.f32.mrb[80].mxu0 }
 0x196   :  { %4028 = vst.msk [vmem:[%s6870_s2 + $0x138] sm:$0xf] %vm3949_vm2, %v4680_v52  ;;  %v4678_v58 = vpack.c.bf16 %v2745_v56, %v2745_v56  ;;  %v2873_v59 = vsel %vm2361_vm6, %v1950_v41, %v2617_v54  ;;  %vm2364_vm8 = vcmp.gt.f32.partialorder %v5217_v46, 0.0  ;;  %v2620_v60 = vmul.f32 0.2, %v5217_v46  ;;  %v5220_v4 = vpop.f32.mrb[80].mxu1 }
 0x197   :  { %4156 = vst.msk [vmem:[%s6870_s2 + $0x338] sm:$0xf] %vm3949_vm2, %v4808_v55  ;;  %v4806_v61 = vpack.c.bf16 %v2873_v59, %v2873_v59  ;;  %v2748_v62 = vsel %vm2236_vm7, %v5089_v45, %v2492_v57  ;;  %vm2234_vm9 = vcmp.gt.f32.partialorder %v1441_v50, 0.0  ;;  %v2490_v63 = vmul.f32 0.2, %v1441_v50  ;;  %v1454_v8 = vpop.f32.mrb[81].mxu0 }
 0x198   :  { %4026 = vst.msk [vmem:[%s6870_s2 + $0x130] sm:$0xf] %vm3949_vm2, %v4678_v58  ;;  %v4681_v0 = vpack.c.bf16 %v2748_v62, %v2748_v62  ;;  %v2876_v1 = vsel %vm2364_vm8, %v5217_v46, %v2620_v60  ;;  %vm2362_vm10 = vcmp.gt.f32.partialorder %v1953_v51, 0.0  ;;  %v2618_v2 = vmul.f32 0.2, %v1953_v51  ;;  %v1966_v9 = vpop.f32.mrb[81].mxu1 }
 0x199   :  { %4154 = vst.msk [vmem:[%s6870_s2 + $0x330] sm:$0xf] %vm3949_vm2, %v4806_v61  ;;  %v4809_v5 = vpack.c.bf16 %v2876_v1, %v2876_v1  ;;  %v2746_v6 = vsel %vm2234_vm9, %v1441_v50, %v2490_v63  ;;  %vm2239_vm11 = vcmp.gt.f32.partialorder %v5092_v3, 0.0  ;;  %v2495_v7 = vmul.f32 0.2, %v5092_v3  ;;  %v5093_v13 = vpop.f32.mrb[82].mxu0 }
 0x19a   :  { %4029 = vst.msk [vmem:[%s6870_s2 + $0x13c] sm:$0xf] %vm3949_vm2, %v4681_v0  ;;  %v4679_v10 = vpack.c.bf16 %v2746_v6, %v2746_v6  ;;  %v2874_v11 = vsel %vm2362_vm10, %v1953_v51, %v2618_v2  ;;  %vm2367_vm12 = vcmp.gt.f32.partialorder %v5220_v4, 0.0  ;;  %v2623_v12 = vmul.f32 0.2, %v5220_v4  ;;  %v5221_v14 = vpop.f32.mrb[82].mxu1 }
 0x19b   :  { %4157 = vst.msk [vmem:[%s6870_s2 + $0x33c] sm:$0xf] %vm3949_vm2, %v4809_v5  ;;  %v4807_v15 = vpack.c.bf16 %v2874_v11, %v2874_v11  ;;  %v2751_v16 = vsel %vm2239_vm11, %v5092_v3, %v2495_v7  ;;  %vm2237_vm13 = vcmp.gt.f32.partialorder %v1454_v8, 0.0  ;;  %v2493_v17 = vmul.f32 0.2, %v1454_v8  ;;  %v1457_v18 = vpop.f32.mrb[83].mxu0 }
 0x19c   :  { %v1969_v19 = vpop.f32.mrb[83].mxu1  ;;  %4027 = vst.msk [vmem:[%s6870_s2 + $0x134] sm:$0xf] %vm3949_vm2, %v4679_v10  ;;  %v4684_v20 = vpack.c.bf16 %v2751_v16, %v2751_v16  ;;  %v2879_v21 = vsel %vm2367_vm12, %v5220_v4, %v2623_v12  ;;  %vm2365_vm14 = vcmp.gt.f32.partialorder %v1966_v9, 0.0  ;;  %v2621_v22 = vmul.f32 0.2, %v1966_v9 }
 0x19d   :  { %4155 = vst.msk [vmem:[%s6870_s2 + $0x334] sm:$0xf] %vm3949_vm2, %v4807_v15  ;;  %v4812_v23 = vpack.c.bf16 %v2879_v21, %v2879_v21  ;;  %v2749_v24 = vsel %vm2237_vm13, %v1454_v8, %v2493_v17  ;;  %vm2240_vm15 = vcmp.gt.f32.partialorder %v5093_v13, 0.0  ;;  %v2496_v25 = vmul.f32 0.2, %v5093_v13  ;;  %v5096_v35 = vpop.f32.mrb[84].mxu0 }
 0x19e   :  { %4032 = vst.msk [vmem:[%s6870_s2 + $0x148] sm:$0xf] %vm3949_vm2, %v4684_v20  ;;  %v4682_v26 = vpack.c.bf16 %v2749_v24, %v2749_v24  ;;  %v2877_v27 = vsel %vm2365_vm14, %v1966_v9, %v2621_v22  ;;  %vm2368_vm0 = vcmp.gt.f32.partialorder %v5221_v14, 0.0  ;;  %v2624_v28 = vmul.f32 0.2, %v5221_v14  ;;  %v5224_v36 = vpop.f32.mrb[84].mxu1 }
 0x19f   :  { %4160 = vst.msk [vmem:[%s6870_s2 + $0x348] sm:$0xf] %vm3949_vm2, %v4812_v23  ;;  %v4810_v29 = vpack.c.bf16 %v2877_v27, %v2877_v27  ;;  %v2752_v30 = vsel %vm2240_vm15, %v5093_v13, %v2496_v25  ;;  %vm2238_vm1 = vcmp.gt.f32.partialorder %v1457_v18, 0.0  ;;  %v2494_v31 = vmul.f32 0.2, %v1457_v18  ;;  %v1470_v40 = vpop.f32.mrb[85].mxu0 }
 0x1a0   :  { %4030 = vst.msk [vmem:[%s6870_s2 + $0x140] sm:$0xf] %vm3949_vm2, %v4682_v26  ;;  %v4685_v32 = vpack.c.bf16 %v2752_v30, %v2752_v30  ;;  %v2880_v33 = vsel %vm2368_vm0, %v5221_v14, %v2624_v28  ;;  %vm2366_vm3 = vcmp.gt.f32.partialorder %v1969_v19, 0.0  ;;  %v2622_v34 = vmul.f32 0.2, %v1969_v19  ;;  %v1982_v41 = vpop.f32.mrb[85].mxu1 }
 0x1a1   :  { %4158 = vst.msk [vmem:[%s6870_s2 + $0x340] sm:$0xf] %vm3949_vm2, %v4810_v29  ;;  %v4813_v37 = vpack.c.bf16 %v2880_v33, %v2880_v33  ;;  %v2750_v38 = vsel %vm2238_vm1, %v1457_v18, %v2494_v31  ;;  %vm2243_vm4 = vcmp.gt.f32.partialorder %v5096_v35, 0.0  ;;  %v2499_v39 = vmul.f32 0.2, %v5096_v35  ;;  %v5097_v45 = vpop.f32.mrb[86].mxu0 }
 0x1a2   :  { %4033 = vst.msk [vmem:[%s6870_s2 + $0x14c] sm:$0xf] %vm3949_vm2, %v4685_v32  ;;  %v4683_v42 = vpack.c.bf16 %v2750_v38, %v2750_v38  ;;  %v2878_v43 = vsel %vm2366_vm3, %v1969_v19, %v2622_v34  ;;  %vm2371_vm5 = vcmp.gt.f32.partialorder %v5224_v36, 0.0  ;;  %v2627_v44 = vmul.f32 0.2, %v5224_v36  ;;  %v5225_v46 = vpop.f32.mrb[86].mxu1 }
 0x1a3   :  { %4161 = vst.msk [vmem:[%s6870_s2 + $0x34c] sm:$0xf] %vm3949_vm2, %v4813_v37  ;;  %v4811_v47 = vpack.c.bf16 %v2878_v43, %v2878_v43  ;;  %v2755_v48 = vsel %vm2243_vm4, %v5096_v35, %v2499_v39  ;;  %vm2241_vm6 = vcmp.gt.f32.partialorder %v1470_v40, 0.0  ;;  %v2497_v49 = vmul.f32 0.2, %v1470_v40  ;;  %v1473_v50 = vpop.f32.mrb[87].mxu0 }
 0x1a4   :  { %v1985_v51 = vpop.f32.mrb[87].mxu1  ;;  %4031 = vst.msk [vmem:[%s6870_s2 + $0x144] sm:$0xf] %vm3949_vm2, %v4683_v42  ;;  %v4688_v52 = vpack.c.bf16 %v2755_v48, %v2755_v48  ;;  %v2883_v53 = vsel %vm2371_vm5, %v5224_v36, %v2627_v44  ;;  %vm2369_vm7 = vcmp.gt.f32.partialorder %v1982_v41, 0.0  ;;  %v2625_v54 = vmul.f32 0.2, %v1982_v41 }
 0x1a5   :  { %4159 = vst.msk [vmem:[%s6870_s2 + $0x344] sm:$0xf] %vm3949_vm2, %v4811_v47  ;;  %v4816_v55 = vpack.c.bf16 %v2883_v53, %v2883_v53  ;;  %v2753_v56 = vsel %vm2241_vm6, %v1470_v40, %v2497_v49  ;;  %vm2244_vm8 = vcmp.gt.f32.partialorder %v5097_v45, 0.0  ;;  %v2500_v57 = vmul.f32 0.2, %v5097_v45  ;;  %v5100_v3 = vpop.f32.mrb[88].mxu0 }
 0x1a6   :  { %4036 = vst.msk [vmem:[%s6870_s2 + $0x158] sm:$0xf] %vm3949_vm2, %v4688_v52  ;;  %v4686_v58 = vpack.c.bf16 %v2753_v56, %v2753_v56  ;;  %v2881_v59 = vsel %vm2369_vm7, %v1982_v41, %v2625_v54  ;;  %vm2372_vm9 = vcmp.gt.f32.partialorder %v5225_v46, 0.0  ;;  %v2628_v60 = vmul.f32 0.2, %v5225_v46  ;;  %v5228_v4 = vpop.f32.mrb[88].mxu1 }
 0x1a7   :  { %4164 = vst.msk [vmem:[%s6870_s2 + $0x358] sm:$0xf] %vm3949_vm2, %v4816_v55  ;;  %v4814_v61 = vpack.c.bf16 %v2881_v59, %v2881_v59  ;;  %v2756_v62 = vsel %vm2244_vm8, %v5097_v45, %v2500_v57  ;;  %vm2242_vm10 = vcmp.gt.f32.partialorder %v1473_v50, 0.0  ;;  %v2498_v63 = vmul.f32 0.2, %v1473_v50  ;;  %v1486_v8 = vpop.f32.mrb[89].mxu0 }
 0x1a8   :  { %4034 = vst.msk [vmem:[%s6870_s2 + $0x150] sm:$0xf] %vm3949_vm2, %v4686_v58  ;;  %v4689_v0 = vpack.c.bf16 %v2756_v62, %v2756_v62  ;;  %v2884_v1 = vsel %vm2372_vm9, %v5225_v46, %v2628_v60  ;;  %vm2370_vm11 = vcmp.gt.f32.partialorder %v1985_v51, 0.0  ;;  %v2626_v2 = vmul.f32 0.2, %v1985_v51  ;;  %v1998_v9 = vpop.f32.mrb[89].mxu1 }
 0x1a9   :  { %4162 = vst.msk [vmem:[%s6870_s2 + $0x350] sm:$0xf] %vm3949_vm2, %v4814_v61  ;;  %v4817_v5 = vpack.c.bf16 %v2884_v1, %v2884_v1  ;;  %v2754_v6 = vsel %vm2242_vm10, %v1473_v50, %v2498_v63  ;;  %vm2247_vm12 = vcmp.gt.f32.partialorder %v5100_v3, 0.0  ;;  %v2503_v7 = vmul.f32 0.2, %v5100_v3  ;;  %v5101_v13 = vpop.f32.mrb[90].mxu0 }
 0x1aa   :  { %4037 = vst.msk [vmem:[%s6870_s2 + $0x15c] sm:$0xf] %vm3949_vm2, %v4689_v0  ;;  %v4687_v10 = vpack.c.bf16 %v2754_v6, %v2754_v6  ;;  %v2882_v11 = vsel %vm2370_vm11, %v1985_v51, %v2626_v2  ;;  %vm2375_vm13 = vcmp.gt.f32.partialorder %v5228_v4, 0.0  ;;  %v2631_v12 = vmul.f32 0.2, %v5228_v4  ;;  %v5229_v14 = vpop.f32.mrb[90].mxu1 }
 0x1ab   :  { %4165 = vst.msk [vmem:[%s6870_s2 + $0x35c] sm:$0xf] %vm3949_vm2, %v4817_v5  ;;  %v4815_v15 = vpack.c.bf16 %v2882_v11, %v2882_v11  ;;  %v2759_v16 = vsel %vm2247_vm12, %v5100_v3, %v2503_v7  ;;  %vm2245_vm14 = vcmp.gt.f32.partialorder %v1486_v8, 0.0  ;;  %v2501_v17 = vmul.f32 0.2, %v1486_v8  ;;  %v1489_v18 = vpop.f32.mrb[91].mxu0 }
 0x1ac   :  { %v2001_v19 = vpop.f32.mrb[91].mxu1  ;;  %4035 = vst.msk [vmem:[%s6870_s2 + $0x154] sm:$0xf] %vm3949_vm2, %v4687_v10  ;;  %v4692_v20 = vpack.c.bf16 %v2759_v16, %v2759_v16  ;;  %v2887_v21 = vsel %vm2375_vm13, %v5228_v4, %v2631_v12  ;;  %vm2373_vm15 = vcmp.gt.f32.partialorder %v1998_v9, 0.0  ;;  %v2629_v22 = vmul.f32 0.2, %v1998_v9 }
 0x1ad   :  { %4163 = vst.msk [vmem:[%s6870_s2 + $0x354] sm:$0xf] %vm3949_vm2, %v4815_v15  ;;  %v4820_v23 = vpack.c.bf16 %v2887_v21, %v2887_v21  ;;  %v2757_v24 = vsel %vm2245_vm14, %v1486_v8, %v2501_v17  ;;  %vm2248_vm0 = vcmp.gt.f32.partialorder %v5101_v13, 0.0  ;;  %v2504_v25 = vmul.f32 0.2, %v5101_v13  ;;  %v5104_v35 = vpop.f32.mrb[92].mxu0 }
 0x1ae   :  { %4040 = vst.msk [vmem:[%s6870_s2 + $0x168] sm:$0xf] %vm3949_vm2, %v4692_v20  ;;  %v4690_v26 = vpack.c.bf16 %v2757_v24, %v2757_v24  ;;  %v2885_v27 = vsel %vm2373_vm15, %v1998_v9, %v2629_v22  ;;  %vm2376_vm1 = vcmp.gt.f32.partialorder %v5229_v14, 0.0  ;;  %v2632_v28 = vmul.f32 0.2, %v5229_v14  ;;  %v5232_v36 = vpop.f32.mrb[92].mxu1 }
 0x1af   :  { %4168 = vst.msk [vmem:[%s6870_s2 + $0x368] sm:$0xf] %vm3949_vm2, %v4820_v23  ;;  %v4818_v29 = vpack.c.bf16 %v2885_v27, %v2885_v27  ;;  %v2760_v30 = vsel %vm2248_vm0, %v5101_v13, %v2504_v25  ;;  %vm2246_vm3 = vcmp.gt.f32.partialorder %v1489_v18, 0.0  ;;  %v2502_v31 = vmul.f32 0.2, %v1489_v18  ;;  %v1502_v40 = vpop.f32.mrb[93].mxu0 }
 0x1b0   :  { %4038 = vst.msk [vmem:[%s6870_s2 + $0x160] sm:$0xf] %vm3949_vm2, %v4690_v26  ;;  %v4693_v32 = vpack.c.bf16 %v2760_v30, %v2760_v30  ;;  %v2888_v33 = vsel %vm2376_vm1, %v5229_v14, %v2632_v28  ;;  %vm2374_vm4 = vcmp.gt.f32.partialorder %v2001_v19, 0.0  ;;  %v2630_v34 = vmul.f32 0.2, %v2001_v19  ;;  %v2014_v41 = vpop.f32.mrb[93].mxu1 }
 0x1b1   :  { %4166 = vst.msk [vmem:[%s6870_s2 + $0x360] sm:$0xf] %vm3949_vm2, %v4818_v29  ;;  %v4821_v37 = vpack.c.bf16 %v2888_v33, %v2888_v33  ;;  %v2758_v38 = vsel %vm2246_vm3, %v1489_v18, %v2502_v31  ;;  %vm2251_vm5 = vcmp.gt.f32.partialorder %v5104_v35, 0.0  ;;  %v2507_v39 = vmul.f32 0.2, %v5104_v35  ;;  %v5105_v45 = vpop.f32.mrb[94].mxu0 }
 0x1b2   :  { %4041 = vst.msk [vmem:[%s6870_s2 + $0x16c] sm:$0xf] %vm3949_vm2, %v4693_v32  ;;  %v4691_v42 = vpack.c.bf16 %v2758_v38, %v2758_v38  ;;  %v2886_v43 = vsel %vm2374_vm4, %v2001_v19, %v2630_v34  ;;  %vm2379_vm6 = vcmp.gt.f32.partialorder %v5232_v36, 0.0  ;;  %v2635_v44 = vmul.f32 0.2, %v5232_v36  ;;  %v5233_v46 = vpop.f32.mrb[94].mxu1 }
 0x1b3   :  { %4169 = vst.msk [vmem:[%s6870_s2 + $0x36c] sm:$0xf] %vm3949_vm2, %v4821_v37  ;;  %v4819_v47 = vpack.c.bf16 %v2886_v43, %v2886_v43  ;;  %v2763_v48 = vsel %vm2251_vm5, %v5104_v35, %v2507_v39  ;;  %vm2249_vm7 = vcmp.gt.f32.partialorder %v1502_v40, 0.0  ;;  %v2505_v49 = vmul.f32 0.2, %v1502_v40  ;;  %v1505_v50 = vpop.f32.mrb[95].mxu0 }
 0x1b4   :  { %v2017_v51 = vpop.f32.mrb[95].mxu1  ;;  %4039 = vst.msk [vmem:[%s6870_s2 + $0x164] sm:$0xf] %vm3949_vm2, %v4691_v42  ;;  %v4696_v52 = vpack.c.bf16 %v2763_v48, %v2763_v48  ;;  %v2891_v53 = vsel %vm2379_vm6, %v5232_v36, %v2635_v44  ;;  %vm2377_vm8 = vcmp.gt.f32.partialorder %v2014_v41, 0.0  ;;  %v2633_v54 = vmul.f32 0.2, %v2014_v41 }
 0x1b5   :  { %4167 = vst.msk [vmem:[%s6870_s2 + $0x364] sm:$0xf] %vm3949_vm2, %v4819_v47  ;;  %v4824_v55 = vpack.c.bf16 %v2891_v53, %v2891_v53  ;;  %v2761_v56 = vsel %vm2249_vm7, %v1502_v40, %v2505_v49  ;;  %vm2252_vm9 = vcmp.gt.f32.partialorder %v5105_v45, 0.0  ;;  %v2508_v57 = vmul.f32 0.2, %v5105_v45  ;;  %v5108_v3 = vpop.f32.mrb[96].mxu0 }
 0x1b6   :  { %4044 = vst.msk [vmem:[%s6870_s2 + $0x178] sm:$0xf] %vm3949_vm2, %v4696_v52  ;;  %v4694_v58 = vpack.c.bf16 %v2761_v56, %v2761_v56  ;;  %v2889_v59 = vsel %vm2377_vm8, %v2014_v41, %v2633_v54  ;;  %vm2380_vm10 = vcmp.gt.f32.partialorder %v5233_v46, 0.0  ;;  %v2636_v60 = vmul.f32 0.2, %v5233_v46  ;;  %v5236_v4 = vpop.f32.mrb[96].mxu1 }
 0x1b7   :  { %4172 = vst.msk [vmem:[%s6870_s2 + $0x378] sm:$0xf] %vm3949_vm2, %v4824_v55  ;;  %v4822_v61 = vpack.c.bf16 %v2889_v59, %v2889_v59  ;;  %v2764_v62 = vsel %vm2252_vm9, %v5105_v45, %v2508_v57  ;;  %vm2250_vm11 = vcmp.gt.f32.partialorder %v1505_v50, 0.0  ;;  %v2506_v63 = vmul.f32 0.2, %v1505_v50  ;;  %v1518_v8 = vpop.f32.mrb[97].mxu0 }
 0x1b8   :  { %4042 = vst.msk [vmem:[%s6870_s2 + $0x170] sm:$0xf] %vm3949_vm2, %v4694_v58  ;;  %v4697_v0 = vpack.c.bf16 %v2764_v62, %v2764_v62  ;;  %v2892_v1 = vsel %vm2380_vm10, %v5233_v46, %v2636_v60  ;;  %vm2378_vm12 = vcmp.gt.f32.partialorder %v2017_v51, 0.0  ;;  %v2634_v2 = vmul.f32 0.2, %v2017_v51  ;;  %v2030_v9 = vpop.f32.mrb[97].mxu1 }
 0x1b9   :  { %4170 = vst.msk [vmem:[%s6870_s2 + $0x370] sm:$0xf] %vm3949_vm2, %v4822_v61  ;;  %v4825_v5 = vpack.c.bf16 %v2892_v1, %v2892_v1  ;;  %v2762_v6 = vsel %vm2250_vm11, %v1505_v50, %v2506_v63  ;;  %vm2255_vm13 = vcmp.gt.f32.partialorder %v5108_v3, 0.0  ;;  %v2511_v7 = vmul.f32 0.2, %v5108_v3  ;;  %v5109_v13 = vpop.f32.mrb[98].mxu0 }
 0x1ba   :  { %4045 = vst.msk [vmem:[%s6870_s2 + $0x17c] sm:$0xf] %vm3949_vm2, %v4697_v0  ;;  %v4695_v10 = vpack.c.bf16 %v2762_v6, %v2762_v6  ;;  %v2890_v11 = vsel %vm2378_vm12, %v2017_v51, %v2634_v2  ;;  %vm2383_vm14 = vcmp.gt.f32.partialorder %v5236_v4, 0.0  ;;  %v2639_v12 = vmul.f32 0.2, %v5236_v4  ;;  %v5237_v14 = vpop.f32.mrb[98].mxu1 }
 0x1bb   :  { %4173 = vst.msk [vmem:[%s6870_s2 + $0x37c] sm:$0xf] %vm3949_vm2, %v4825_v5  ;;  %v4823_v15 = vpack.c.bf16 %v2890_v11, %v2890_v11  ;;  %v2767_v16 = vsel %vm2255_vm13, %v5108_v3, %v2511_v7  ;;  %vm2253_vm15 = vcmp.gt.f32.partialorder %v1518_v8, 0.0  ;;  %v2509_v17 = vmul.f32 0.2, %v1518_v8  ;;  %v1521_v18 = vpop.f32.mrb[99].mxu0 }
 0x1bc   :  { %v2033_v19 = vpop.f32.mrb[99].mxu1  ;;  %4043 = vst.msk [vmem:[%s6870_s2 + $0x174] sm:$0xf] %vm3949_vm2, %v4695_v10  ;;  %v4700_v20 = vpack.c.bf16 %v2767_v16, %v2767_v16  ;;  %v2895_v21 = vsel %vm2383_vm14, %v5236_v4, %v2639_v12  ;;  %vm2381_vm0 = vcmp.gt.f32.partialorder %v2030_v9, 0.0  ;;  %v2637_v22 = vmul.f32 0.2, %v2030_v9 }
 0x1bd   :  { %4171 = vst.msk [vmem:[%s6870_s2 + $0x374] sm:$0xf] %vm3949_vm2, %v4823_v15  ;;  %v4828_v23 = vpack.c.bf16 %v2895_v21, %v2895_v21  ;;  %v2765_v24 = vsel %vm2253_vm15, %v1518_v8, %v2509_v17  ;;  %vm2256_vm1 = vcmp.gt.f32.partialorder %v5109_v13, 0.0  ;;  %v2512_v25 = vmul.f32 0.2, %v5109_v13  ;;  %v5112_v35 = vpop.f32.mrb[100].mxu0 }
 0x1be   :  { %4048 = vst.msk [vmem:[%s6870_s2 + $0x188] sm:$0xf] %vm3949_vm2, %v4700_v20  ;;  %v4698_v26 = vpack.c.bf16 %v2765_v24, %v2765_v24  ;;  %v2893_v27 = vsel %vm2381_vm0, %v2030_v9, %v2637_v22  ;;  %vm2384_vm3 = vcmp.gt.f32.partialorder %v5237_v14, 0.0  ;;  %v2640_v28 = vmul.f32 0.2, %v5237_v14  ;;  %v5240_v36 = vpop.f32.mrb[100].mxu1 }
 0x1bf   :  { %4176 = vst.msk [vmem:[%s6870_s2 + $0x388] sm:$0xf] %vm3949_vm2, %v4828_v23  ;;  %v4826_v29 = vpack.c.bf16 %v2893_v27, %v2893_v27  ;;  %v2768_v30 = vsel %vm2256_vm1, %v5109_v13, %v2512_v25  ;;  %vm2254_vm4 = vcmp.gt.f32.partialorder %v1521_v18, 0.0  ;;  %v2510_v31 = vmul.f32 0.2, %v1521_v18  ;;  %v1534_v40 = vpop.f32.mrb[101].mxu0 }
 0x1c0   :  { %4046 = vst.msk [vmem:[%s6870_s2 + $0x180] sm:$0xf] %vm3949_vm2, %v4698_v26  ;;  %v4701_v32 = vpack.c.bf16 %v2768_v30, %v2768_v30  ;;  %v2896_v33 = vsel %vm2384_vm3, %v5237_v14, %v2640_v28  ;;  %vm2382_vm5 = vcmp.gt.f32.partialorder %v2033_v19, 0.0  ;;  %v2638_v34 = vmul.f32 0.2, %v2033_v19  ;;  %v2046_v41 = vpop.f32.mrb[101].mxu1 }
 0x1c1   :  { %4174 = vst.msk [vmem:[%s6870_s2 + $0x380] sm:$0xf] %vm3949_vm2, %v4826_v29  ;;  %v4829_v37 = vpack.c.bf16 %v2896_v33, %v2896_v33  ;;  %v2766_v38 = vsel %vm2254_vm4, %v1521_v18, %v2510_v31  ;;  %vm2259_vm6 = vcmp.gt.f32.partialorder %v5112_v35, 0.0  ;;  %v2515_v39 = vmul.f32 0.2, %v5112_v35  ;;  %v5113_v45 = vpop.f32.mrb[102].mxu0 }
 0x1c2   :  { %4049 = vst.msk [vmem:[%s6870_s2 + $0x18c] sm:$0xf] %vm3949_vm2, %v4701_v32  ;;  %v4699_v42 = vpack.c.bf16 %v2766_v38, %v2766_v38  ;;  %v2894_v43 = vsel %vm2382_vm5, %v2033_v19, %v2638_v34  ;;  %vm2387_vm7 = vcmp.gt.f32.partialorder %v5240_v36, 0.0  ;;  %v2643_v44 = vmul.f32 0.2, %v5240_v36  ;;  %v5241_v46 = vpop.f32.mrb[102].mxu1 }
 0x1c3   :  { %4177 = vst.msk [vmem:[%s6870_s2 + $0x38c] sm:$0xf] %vm3949_vm2, %v4829_v37  ;;  %v4827_v47 = vpack.c.bf16 %v2894_v43, %v2894_v43  ;;  %v2771_v48 = vsel %vm2259_vm6, %v5112_v35, %v2515_v39  ;;  %vm2257_vm8 = vcmp.gt.f32.partialorder %v1534_v40, 0.0  ;;  %v2513_v49 = vmul.f32 0.2, %v1534_v40  ;;  %v1537_v50 = vpop.f32.mrb[103].mxu0 }
 0x1c4   :  { %v2049_v51 = vpop.f32.mrb[103].mxu1  ;;  %4047 = vst.msk [vmem:[%s6870_s2 + $0x184] sm:$0xf] %vm3949_vm2, %v4699_v42  ;;  %v4704_v52 = vpack.c.bf16 %v2771_v48, %v2771_v48  ;;  %v2899_v53 = vsel %vm2387_vm7, %v5240_v36, %v2643_v44  ;;  %vm2385_vm9 = vcmp.gt.f32.partialorder %v2046_v41, 0.0  ;;  %v2641_v54 = vmul.f32 0.2, %v2046_v41 }
 0x1c5   :  { %4175 = vst.msk [vmem:[%s6870_s2 + $0x384] sm:$0xf] %vm3949_vm2, %v4827_v47  ;;  %v4832_v55 = vpack.c.bf16 %v2899_v53, %v2899_v53  ;;  %v2769_v56 = vsel %vm2257_vm8, %v1534_v40, %v2513_v49  ;;  %vm2260_vm10 = vcmp.gt.f32.partialorder %v5113_v45, 0.0  ;;  %v2516_v57 = vmul.f32 0.2, %v5113_v45  ;;  %v5116_v3 = vpop.f32.mrb[104].mxu0 }
 0x1c6   :  { %4052 = vst.msk [vmem:[%s6870_s2 + $0x198] sm:$0xf] %vm3949_vm2, %v4704_v52  ;;  %v4702_v58 = vpack.c.bf16 %v2769_v56, %v2769_v56  ;;  %v2897_v59 = vsel %vm2385_vm9, %v2046_v41, %v2641_v54  ;;  %vm2388_vm11 = vcmp.gt.f32.partialorder %v5241_v46, 0.0  ;;  %v2644_v60 = vmul.f32 0.2, %v5241_v46  ;;  %v5244_v4 = vpop.f32.mrb[104].mxu1 }
 0x1c7   :  { %4180 = vst.msk [vmem:[%s6870_s2 + $0x398] sm:$0xf] %vm3949_vm2, %v4832_v55  ;;  %v4830_v61 = vpack.c.bf16 %v2897_v59, %v2897_v59  ;;  %v2772_v62 = vsel %vm2260_vm10, %v5113_v45, %v2516_v57  ;;  %vm2258_vm12 = vcmp.gt.f32.partialorder %v1537_v50, 0.0  ;;  %v2514_v63 = vmul.f32 0.2, %v1537_v50  ;;  %v1550_v8 = vpop.f32.mrb[105].mxu0 }
 0x1c8   :  { %4050 = vst.msk [vmem:[%s6870_s2 + $0x190] sm:$0xf] %vm3949_vm2, %v4702_v58  ;;  %v4705_v0 = vpack.c.bf16 %v2772_v62, %v2772_v62  ;;  %v2900_v1 = vsel %vm2388_vm11, %v5241_v46, %v2644_v60  ;;  %vm2386_vm13 = vcmp.gt.f32.partialorder %v2049_v51, 0.0  ;;  %v2642_v2 = vmul.f32 0.2, %v2049_v51  ;;  %v2062_v9 = vpop.f32.mrb[105].mxu1 }
 0x1c9   :  { %4178 = vst.msk [vmem:[%s6870_s2 + $0x390] sm:$0xf] %vm3949_vm2, %v4830_v61  ;;  %v4833_v5 = vpack.c.bf16 %v2900_v1, %v2900_v1  ;;  %v2770_v6 = vsel %vm2258_vm12, %v1537_v50, %v2514_v63  ;;  %vm2263_vm14 = vcmp.gt.f32.partialorder %v5116_v3, 0.0  ;;  %v2519_v7 = vmul.f32 0.2, %v5116_v3  ;;  %v5117_v13 = vpop.f32.mrb[106].mxu0 }
 0x1ca   :  { %4053 = vst.msk [vmem:[%s6870_s2 + $0x19c] sm:$0xf] %vm3949_vm2, %v4705_v0  ;;  %v4703_v10 = vpack.c.bf16 %v2770_v6, %v2770_v6  ;;  %v2898_v11 = vsel %vm2386_vm13, %v2049_v51, %v2642_v2  ;;  %vm2391_vm15 = vcmp.gt.f32.partialorder %v5244_v4, 0.0  ;;  %v2647_v12 = vmul.f32 0.2, %v5244_v4  ;;  %v5245_v14 = vpop.f32.mrb[106].mxu1 }
 0x1cb   :  { %4181 = vst.msk [vmem:[%s6870_s2 + $0x39c] sm:$0xf] %vm3949_vm2, %v4833_v5  ;;  %v4831_v15 = vpack.c.bf16 %v2898_v11, %v2898_v11  ;;  %v2775_v16 = vsel %vm2263_vm14, %v5116_v3, %v2519_v7  ;;  %vm2261_vm0 = vcmp.gt.f32.partialorder %v1550_v8, 0.0  ;;  %v2517_v17 = vmul.f32 0.2, %v1550_v8  ;;  %v1553_v18 = vpop.f32.mrb[107].mxu0 }
 0x1cc   :  { %v2065_v19 = vpop.f32.mrb[107].mxu1  ;;  %4051 = vst.msk [vmem:[%s6870_s2 + $0x194] sm:$0xf] %vm3949_vm2, %v4703_v10  ;;  %v4708_v20 = vpack.c.bf16 %v2775_v16, %v2775_v16  ;;  %v2903_v21 = vsel %vm2391_vm15, %v5244_v4, %v2647_v12  ;;  %vm2389_vm1 = vcmp.gt.f32.partialorder %v2062_v9, 0.0  ;;  %v2645_v22 = vmul.f32 0.2, %v2062_v9 }
 0x1cd   :  { %4179 = vst.msk [vmem:[%s6870_s2 + $0x394] sm:$0xf] %vm3949_vm2, %v4831_v15  ;;  %v4836_v23 = vpack.c.bf16 %v2903_v21, %v2903_v21  ;;  %v2773_v24 = vsel %vm2261_vm0, %v1550_v8, %v2517_v17  ;;  %vm2264_vm3 = vcmp.gt.f32.partialorder %v5117_v13, 0.0  ;;  %v2520_v25 = vmul.f32 0.2, %v5117_v13  ;;  %v5120_v35 = vpop.f32.mrb[108].mxu0 }
 0x1ce   :  { %4056 = vst.msk [vmem:[%s6870_s2 + $0x1a8] sm:$0xf] %vm3949_vm2, %v4708_v20  ;;  %v4706_v26 = vpack.c.bf16 %v2773_v24, %v2773_v24  ;;  %v2901_v27 = vsel %vm2389_vm1, %v2062_v9, %v2645_v22  ;;  %vm2392_vm4 = vcmp.gt.f32.partialorder %v5245_v14, 0.0  ;;  %v2648_v28 = vmul.f32 0.2, %v5245_v14  ;;  %v5248_v36 = vpop.f32.mrb[108].mxu1 }
 0x1cf   :  { %4184 = vst.msk [vmem:[%s6870_s2 + $0x3a8] sm:$0xf] %vm3949_vm2, %v4836_v23  ;;  %v4834_v29 = vpack.c.bf16 %v2901_v27, %v2901_v27  ;;  %v2776_v30 = vsel %vm2264_vm3, %v5117_v13, %v2520_v25  ;;  %vm2262_vm5 = vcmp.gt.f32.partialorder %v1553_v18, 0.0  ;;  %v2518_v31 = vmul.f32 0.2, %v1553_v18  ;;  %v1566_v40 = vpop.f32.mrb[109].mxu0 }
 0x1d0   :  { %4054 = vst.msk [vmem:[%s6870_s2 + $0x1a0] sm:$0xf] %vm3949_vm2, %v4706_v26  ;;  %v4709_v32 = vpack.c.bf16 %v2776_v30, %v2776_v30  ;;  %v2904_v33 = vsel %vm2392_vm4, %v5245_v14, %v2648_v28  ;;  %vm2390_vm6 = vcmp.gt.f32.partialorder %v2065_v19, 0.0  ;;  %v2646_v34 = vmul.f32 0.2, %v2065_v19  ;;  %v2078_v41 = vpop.f32.mrb[109].mxu1 }
 0x1d1   :  { %4182 = vst.msk [vmem:[%s6870_s2 + $0x3a0] sm:$0xf] %vm3949_vm2, %v4834_v29  ;;  %v4837_v37 = vpack.c.bf16 %v2904_v33, %v2904_v33  ;;  %v2774_v38 = vsel %vm2262_vm5, %v1553_v18, %v2518_v31  ;;  %vm2267_vm7 = vcmp.gt.f32.partialorder %v5120_v35, 0.0  ;;  %v2523_v39 = vmul.f32 0.2, %v5120_v35  ;;  %v5121_v45 = vpop.f32.mrb[110].mxu0 }
 0x1d2   :  { %4057 = vst.msk [vmem:[%s6870_s2 + $0x1ac] sm:$0xf] %vm3949_vm2, %v4709_v32  ;;  %v4707_v42 = vpack.c.bf16 %v2774_v38, %v2774_v38  ;;  %v2902_v43 = vsel %vm2390_vm6, %v2065_v19, %v2646_v34  ;;  %vm2395_vm8 = vcmp.gt.f32.partialorder %v5248_v36, 0.0  ;;  %v2651_v44 = vmul.f32 0.2, %v5248_v36  ;;  %v5249_v46 = vpop.f32.mrb[110].mxu1 }
 0x1d3   :  { %4185 = vst.msk [vmem:[%s6870_s2 + $0x3ac] sm:$0xf] %vm3949_vm2, %v4837_v37  ;;  %v4835_v47 = vpack.c.bf16 %v2902_v43, %v2902_v43  ;;  %v2779_v48 = vsel %vm2267_vm7, %v5120_v35, %v2523_v39  ;;  %vm2265_vm9 = vcmp.gt.f32.partialorder %v1566_v40, 0.0  ;;  %v2521_v49 = vmul.f32 0.2, %v1566_v40  ;;  %v1569_v50 = vpop.f32.mrb[111].mxu0 }
 0x1d4   :  { %v2081_v51 = vpop.f32.mrb[111].mxu1  ;;  %4055 = vst.msk [vmem:[%s6870_s2 + $0x1a4] sm:$0xf] %vm3949_vm2, %v4707_v42  ;;  %v4712_v52 = vpack.c.bf16 %v2779_v48, %v2779_v48  ;;  %v2907_v53 = vsel %vm2395_vm8, %v5248_v36, %v2651_v44  ;;  %vm2393_vm10 = vcmp.gt.f32.partialorder %v2078_v41, 0.0  ;;  %v2649_v54 = vmul.f32 0.2, %v2078_v41 }
 0x1d5   :  { %4183 = vst.msk [vmem:[%s6870_s2 + $0x3a4] sm:$0xf] %vm3949_vm2, %v4835_v47  ;;  %v4840_v55 = vpack.c.bf16 %v2907_v53, %v2907_v53  ;;  %v2777_v56 = vsel %vm2265_vm9, %v1566_v40, %v2521_v49  ;;  %vm2268_vm11 = vcmp.gt.f32.partialorder %v5121_v45, 0.0  ;;  %v2524_v57 = vmul.f32 0.2, %v5121_v45  ;;  %v5124_v3 = vpop.f32.mrb[112].mxu0 }
 0x1d6   :  { %4060 = vst.msk [vmem:[%s6870_s2 + $0x1b8] sm:$0xf] %vm3949_vm2, %v4712_v52  ;;  %v4710_v58 = vpack.c.bf16 %v2777_v56, %v2777_v56  ;;  %v2905_v59 = vsel %vm2393_vm10, %v2078_v41, %v2649_v54  ;;  %vm2396_vm12 = vcmp.gt.f32.partialorder %v5249_v46, 0.0  ;;  %v2652_v60 = vmul.f32 0.2, %v5249_v46  ;;  %v5252_v4 = vpop.f32.mrb[112].mxu1 }
 0x1d7   :  { %4188 = vst.msk [vmem:[%s6870_s2 + $0x3b8] sm:$0xf] %vm3949_vm2, %v4840_v55  ;;  %v4838_v61 = vpack.c.bf16 %v2905_v59, %v2905_v59  ;;  %v2780_v62 = vsel %vm2268_vm11, %v5121_v45, %v2524_v57  ;;  %vm2266_vm13 = vcmp.gt.f32.partialorder %v1569_v50, 0.0  ;;  %v2522_v63 = vmul.f32 0.2, %v1569_v50  ;;  %v1582_v8 = vpop.f32.mrb[113].mxu0 }
 0x1d8   :  { %4058 = vst.msk [vmem:[%s6870_s2 + $0x1b0] sm:$0xf] %vm3949_vm2, %v4710_v58  ;;  %v4713_v0 = vpack.c.bf16 %v2780_v62, %v2780_v62  ;;  %v2908_v1 = vsel %vm2396_vm12, %v5249_v46, %v2652_v60  ;;  %vm2394_vm14 = vcmp.gt.f32.partialorder %v2081_v51, 0.0  ;;  %v2650_v2 = vmul.f32 0.2, %v2081_v51  ;;  %v2094_v9 = vpop.f32.mrb[113].mxu1 }
 0x1d9   :  { %4186 = vst.msk [vmem:[%s6870_s2 + $0x3b0] sm:$0xf] %vm3949_vm2, %v4838_v61  ;;  %v4841_v5 = vpack.c.bf16 %v2908_v1, %v2908_v1  ;;  %v2778_v6 = vsel %vm2266_vm13, %v1569_v50, %v2522_v63  ;;  %vm2271_vm15 = vcmp.gt.f32.partialorder %v5124_v3, 0.0  ;;  %v2527_v7 = vmul.f32 0.2, %v5124_v3  ;;  %v5125_v13 = vpop.f32.mrb[114].mxu0 }
 0x1da   :  { %4061 = vst.msk [vmem:[%s6870_s2 + $0x1bc] sm:$0xf] %vm3949_vm2, %v4713_v0  ;;  %v4711_v10 = vpack.c.bf16 %v2778_v6, %v2778_v6  ;;  %v2906_v11 = vsel %vm2394_vm14, %v2081_v51, %v2650_v2  ;;  %vm2399_vm0 = vcmp.gt.f32.partialorder %v5252_v4, 0.0  ;;  %v2655_v12 = vmul.f32 0.2, %v5252_v4  ;;  %v5253_v14 = vpop.f32.mrb[114].mxu1 }
 0x1db   :  { %4189 = vst.msk [vmem:[%s6870_s2 + $0x3bc] sm:$0xf] %vm3949_vm2, %v4841_v5  ;;  %v4839_v15 = vpack.c.bf16 %v2906_v11, %v2906_v11  ;;  %v2783_v16 = vsel %vm2271_vm15, %v5124_v3, %v2527_v7  ;;  %vm2269_vm1 = vcmp.gt.f32.partialorder %v1582_v8, 0.0  ;;  %v2525_v17 = vmul.f32 0.2, %v1582_v8  ;;  %v1585_v18 = vpop.f32.mrb[115].mxu0 }
 0x1dc   :  { %v2097_v19 = vpop.f32.mrb[115].mxu1  ;;  %4059 = vst.msk [vmem:[%s6870_s2 + $0x1b4] sm:$0xf] %vm3949_vm2, %v4711_v10  ;;  %v4716_v20 = vpack.c.bf16 %v2783_v16, %v2783_v16  ;;  %v2911_v21 = vsel %vm2399_vm0, %v5252_v4, %v2655_v12  ;;  %vm2397_vm3 = vcmp.gt.f32.partialorder %v2094_v9, 0.0  ;;  %v2653_v22 = vmul.f32 0.2, %v2094_v9 }
 0x1dd   :  { %4187 = vst.msk [vmem:[%s6870_s2 + $0x3b4] sm:$0xf] %vm3949_vm2, %v4839_v15  ;;  %v4844_v23 = vpack.c.bf16 %v2911_v21, %v2911_v21  ;;  %v2781_v24 = vsel %vm2269_vm1, %v1582_v8, %v2525_v17  ;;  %vm2272_vm4 = vcmp.gt.f32.partialorder %v5125_v13, 0.0  ;;  %v2528_v25 = vmul.f32 0.2, %v5125_v13  ;;  %v5128_v35 = vpop.f32.mrb[116].mxu0 }
 0x1de   :  { %4064 = vst.msk [vmem:[%s6870_s2 + $0x1c8] sm:$0xf] %vm3949_vm2, %v4716_v20  ;;  %v4714_v26 = vpack.c.bf16 %v2781_v24, %v2781_v24  ;;  %v2909_v27 = vsel %vm2397_vm3, %v2094_v9, %v2653_v22  ;;  %vm2400_vm5 = vcmp.gt.f32.partialorder %v5253_v14, 0.0  ;;  %v2656_v28 = vmul.f32 0.2, %v5253_v14  ;;  %v5256_v36 = vpop.f32.mrb[116].mxu1 }
 0x1df   :  { %4192 = vst.msk [vmem:[%s6870_s2 + $0x3c8] sm:$0xf] %vm3949_vm2, %v4844_v23  ;;  %v4842_v29 = vpack.c.bf16 %v2909_v27, %v2909_v27  ;;  %v2784_v30 = vsel %vm2272_vm4, %v5125_v13, %v2528_v25  ;;  %vm2270_vm6 = vcmp.gt.f32.partialorder %v1585_v18, 0.0  ;;  %v2526_v31 = vmul.f32 0.2, %v1585_v18  ;;  %v1598_v40 = vpop.f32.mrb[117].mxu0 }
 0x1e0   :  { %4062 = vst.msk [vmem:[%s6870_s2 + $0x1c0] sm:$0xf] %vm3949_vm2, %v4714_v26  ;;  %v4717_v32 = vpack.c.bf16 %v2784_v30, %v2784_v30  ;;  %v2912_v33 = vsel %vm2400_vm5, %v5253_v14, %v2656_v28  ;;  %vm2398_vm7 = vcmp.gt.f32.partialorder %v2097_v19, 0.0  ;;  %v2654_v34 = vmul.f32 0.2, %v2097_v19  ;;  %v2110_v41 = vpop.f32.mrb[117].mxu1 }
 0x1e1   :  { %4190 = vst.msk [vmem:[%s6870_s2 + $0x3c0] sm:$0xf] %vm3949_vm2, %v4842_v29  ;;  %v4845_v37 = vpack.c.bf16 %v2912_v33, %v2912_v33  ;;  %v2782_v38 = vsel %vm2270_vm6, %v1585_v18, %v2526_v31  ;;  %vm2275_vm8 = vcmp.gt.f32.partialorder %v5128_v35, 0.0  ;;  %v2531_v39 = vmul.f32 0.2, %v5128_v35  ;;  %v5129_v45 = vpop.f32.mrb[118].mxu0 }
 0x1e2   :  { %4065 = vst.msk [vmem:[%s6870_s2 + $0x1cc] sm:$0xf] %vm3949_vm2, %v4717_v32  ;;  %v4715_v42 = vpack.c.bf16 %v2782_v38, %v2782_v38  ;;  %v2910_v43 = vsel %vm2398_vm7, %v2097_v19, %v2654_v34  ;;  %vm2403_vm9 = vcmp.gt.f32.partialorder %v5256_v36, 0.0  ;;  %v2659_v44 = vmul.f32 0.2, %v5256_v36  ;;  %v5257_v46 = vpop.f32.mrb[118].mxu1 }
 0x1e3   :  { %4193 = vst.msk [vmem:[%s6870_s2 + $0x3cc] sm:$0xf] %vm3949_vm2, %v4845_v37  ;;  %v4843_v47 = vpack.c.bf16 %v2910_v43, %v2910_v43  ;;  %v2787_v48 = vsel %vm2275_vm8, %v5128_v35, %v2531_v39  ;;  %vm2273_vm10 = vcmp.gt.f32.partialorder %v1598_v40, 0.0  ;;  %v2529_v49 = vmul.f32 0.2, %v1598_v40  ;;  %v1601_v50 = vpop.f32.mrb[119].mxu0 }
 0x1e4   :  { %v2113_v51 = vpop.f32.mrb[119].mxu1  ;;  %4063 = vst.msk [vmem:[%s6870_s2 + $0x1c4] sm:$0xf] %vm3949_vm2, %v4715_v42  ;;  %v4720_v52 = vpack.c.bf16 %v2787_v48, %v2787_v48  ;;  %v2915_v53 = vsel %vm2403_vm9, %v5256_v36, %v2659_v44  ;;  %vm2401_vm11 = vcmp.gt.f32.partialorder %v2110_v41, 0.0  ;;  %v2657_v54 = vmul.f32 0.2, %v2110_v41 }
 0x1e5   :  { %4191 = vst.msk [vmem:[%s6870_s2 + $0x3c4] sm:$0xf] %vm3949_vm2, %v4843_v47  ;;  %v4848_v55 = vpack.c.bf16 %v2915_v53, %v2915_v53  ;;  %v2785_v56 = vsel %vm2273_vm10, %v1598_v40, %v2529_v49  ;;  %vm2276_vm12 = vcmp.gt.f32.partialorder %v5129_v45, 0.0  ;;  %v2532_v57 = vmul.f32 0.2, %v5129_v45  ;;  %v5132_v3 = vpop.f32.mrb[120].mxu0 }
 0x1e6   :  { %4068 = vst.msk [vmem:[%s6870_s2 + $0x1d8] sm:$0xf] %vm3949_vm2, %v4720_v52  ;;  %v4718_v58 = vpack.c.bf16 %v2785_v56, %v2785_v56  ;;  %v2913_v59 = vsel %vm2401_vm11, %v2110_v41, %v2657_v54  ;;  %vm2404_vm13 = vcmp.gt.f32.partialorder %v5257_v46, 0.0  ;;  %v2660_v60 = vmul.f32 0.2, %v5257_v46  ;;  %v5260_v4 = vpop.f32.mrb[120].mxu1 }
 0x1e7   :  { %4196 = vst.msk [vmem:[%s6870_s2 + $0x3d8] sm:$0xf] %vm3949_vm2, %v4848_v55  ;;  %v4846_v61 = vpack.c.bf16 %v2913_v59, %v2913_v59  ;;  %v2788_v62 = vsel %vm2276_vm12, %v5129_v45, %v2532_v57  ;;  %vm2274_vm14 = vcmp.gt.f32.partialorder %v1601_v50, 0.0  ;;  %v2530_v63 = vmul.f32 0.2, %v1601_v50  ;;  %v1614_v8 = vpop.f32.mrb[121].mxu0 }
 0x1e8   :  { %4066 = vst.msk [vmem:[%s6870_s2 + $0x1d0] sm:$0xf] %vm3949_vm2, %v4718_v58  ;;  %v4721_v0 = vpack.c.bf16 %v2788_v62, %v2788_v62  ;;  %v2916_v1 = vsel %vm2404_vm13, %v5257_v46, %v2660_v60  ;;  %vm2402_vm15 = vcmp.gt.f32.partialorder %v2113_v51, 0.0  ;;  %v2658_v2 = vmul.f32 0.2, %v2113_v51  ;;  %v2126_v9 = vpop.f32.mrb[121].mxu1 }
 0x1e9   :  { %4194 = vst.msk [vmem:[%s6870_s2 + $0x3d0] sm:$0xf] %vm3949_vm2, %v4846_v61  ;;  %v4849_v5 = vpack.c.bf16 %v2916_v1, %v2916_v1  ;;  %v2786_v6 = vsel %vm2274_vm14, %v1601_v50, %v2530_v63  ;;  %vm2279_vm0 = vcmp.gt.f32.partialorder %v5132_v3, 0.0  ;;  %v2535_v7 = vmul.f32 0.2, %v5132_v3  ;;  %v5133_v13 = vpop.f32.mrb[122].mxu0 }
 0x1ea   :  { %4069 = vst.msk [vmem:[%s6870_s2 + $0x1dc] sm:$0xf] %vm3949_vm2, %v4721_v0  ;;  %v4719_v10 = vpack.c.bf16 %v2786_v6, %v2786_v6  ;;  %v2914_v11 = vsel %vm2402_vm15, %v2113_v51, %v2658_v2  ;;  %vm2407_vm1 = vcmp.gt.f32.partialorder %v5260_v4, 0.0  ;;  %v2663_v12 = vmul.f32 0.2, %v5260_v4  ;;  %v5261_v14 = vpop.f32.mrb[122].mxu1 }
 0x1eb   :  { %4197 = vst.msk [vmem:[%s6870_s2 + $0x3dc] sm:$0xf] %vm3949_vm2, %v4849_v5  ;;  %v4847_v15 = vpack.c.bf16 %v2914_v11, %v2914_v11  ;;  %v2791_v16 = vsel %vm2279_vm0, %v5132_v3, %v2535_v7  ;;  %vm2277_vm3 = vcmp.gt.f32.partialorder %v1614_v8, 0.0  ;;  %v2533_v17 = vmul.f32 0.2, %v1614_v8  ;;  %v1617_v18 = vpop.f32.mrb[123].mxu0 }
 0x1ec   :  { %v2129_v19 = vpop.f32.mrb[123].mxu1  ;;  %4067 = vst.msk [vmem:[%s6870_s2 + $0x1d4] sm:$0xf] %vm3949_vm2, %v4719_v10  ;;  %v4724_v20 = vpack.c.bf16 %v2791_v16, %v2791_v16  ;;  %v2919_v21 = vsel %vm2407_vm1, %v5260_v4, %v2663_v12  ;;  %vm2405_vm4 = vcmp.gt.f32.partialorder %v2126_v9, 0.0  ;;  %v2661_v22 = vmul.f32 0.2, %v2126_v9 }
 0x1ed   :  { %4195 = vst.msk [vmem:[%s6870_s2 + $0x3d4] sm:$0xf] %vm3949_vm2, %v4847_v15  ;;  %v4852_v23 = vpack.c.bf16 %v2919_v21, %v2919_v21  ;;  %v2789_v24 = vsel %vm2277_vm3, %v1614_v8, %v2533_v17  ;;  %vm2280_vm5 = vcmp.gt.f32.partialorder %v5133_v13, 0.0  ;;  %v2536_v25 = vmul.f32 0.2, %v5133_v13  ;;  %v5136_v35 = vpop.f32.mrb[124].mxu0 }
 0x1ee   :  { %4072 = vst.msk [vmem:[%s6870_s2 + $0x1e8] sm:$0xf] %vm3949_vm2, %v4724_v20  ;;  %v4722_v26 = vpack.c.bf16 %v2789_v24, %v2789_v24  ;;  %v2917_v27 = vsel %vm2405_vm4, %v2126_v9, %v2661_v22  ;;  %vm2408_vm6 = vcmp.gt.f32.partialorder %v5261_v14, 0.0  ;;  %v2664_v28 = vmul.f32 0.2, %v5261_v14  ;;  %v5264_v36 = vpop.f32.mrb[124].mxu1 }
 0x1ef   :  { %4200 = vst.msk [vmem:[%s6870_s2 + $0x3e8] sm:$0xf] %vm3949_vm2, %v4852_v23  ;;  %v4850_v29 = vpack.c.bf16 %v2917_v27, %v2917_v27  ;;  %v2792_v30 = vsel %vm2280_vm5, %v5133_v13, %v2536_v25  ;;  %vm2278_vm7 = vcmp.gt.f32.partialorder %v1617_v18, 0.0  ;;  %v2534_v31 = vmul.f32 0.2, %v1617_v18  ;;  %v1630_v40 = vpop.f32.mrb[125].mxu0 }
 0x1f0   :  { %4070 = vst.msk [vmem:[%s6870_s2 + $0x1e0] sm:$0xf] %vm3949_vm2, %v4722_v26  ;;  %v4725_v32 = vpack.c.bf16 %v2792_v30, %v2792_v30  ;;  %v2920_v33 = vsel %vm2408_vm6, %v5261_v14, %v2664_v28  ;;  %vm2406_vm8 = vcmp.gt.f32.partialorder %v2129_v19, 0.0  ;;  %v2662_v34 = vmul.f32 0.2, %v2129_v19  ;;  %v2142_v41 = vpop.f32.mrb[125].mxu1 }
 0x1f1   :  { %4198 = vst.msk [vmem:[%s6870_s2 + $0x3e0] sm:$0xf] %vm3949_vm2, %v4850_v29  ;;  %v4853_v37 = vpack.c.bf16 %v2920_v33, %v2920_v33  ;;  %v2790_v38 = vsel %vm2278_vm7, %v1617_v18, %v2534_v31  ;;  %vm2283_vm9 = vcmp.gt.f32.partialorder %v5136_v35, 0.0  ;;  %v2539_v39 = vmul.f32 0.2, %v5136_v35  ;;  %v5137_v45 = vpop.f32.mrb[126].mxu0 }
 0x1f2   :  { %4073 = vst.msk [vmem:[%s6870_s2 + $0x1ec] sm:$0xf] %vm3949_vm2, %v4725_v32  ;;  %v4723_v42 = vpack.c.bf16 %v2790_v38, %v2790_v38  ;;  %v2918_v43 = vsel %vm2406_vm8, %v2129_v19, %v2662_v34  ;;  %vm2411_vm10 = vcmp.gt.f32.partialorder %v5264_v36, 0.0  ;;  %v2667_v44 = vmul.f32 0.2, %v5264_v36  ;;  %v5265_v46 = vpop.f32.mrb[126].mxu1 }
 0x1f3   :  { %4201 = vst.msk [vmem:[%s6870_s2 + $0x3ec] sm:$0xf] %vm3949_vm2, %v4853_v37  ;;  %v4851_v47 = vpack.c.bf16 %v2918_v43, %v2918_v43  ;;  %v2795_v48 = vsel %vm2283_vm9, %v5136_v35, %v2539_v39  ;;  %vm2281_vm11 = vcmp.gt.f32.partialorder %v1630_v40, 0.0  ;;  %v2537_v49 = vmul.f32 0.2, %v1630_v40  ;;  %v1633_v50 = vpop.f32.mrb[127].mxu0 }
 0x1f4   :  { %v2145_v51 = vpop.f32.mrb[127].mxu1  ;;  %4071 = vst.msk [vmem:[%s6870_s2 + $0x1e4] sm:$0xf] %vm3949_vm2, %v4723_v42  ;;  %v4728_v52 = vpack.c.bf16 %v2795_v48, %v2795_v48  ;;  %v2923_v53 = vsel %vm2411_vm10, %v5264_v36, %v2667_v44  ;;  %vm2409_vm12 = vcmp.gt.f32.partialorder %v2142_v41, 0.0  ;;  %v2665_v54 = vmul.f32 0.2, %v2142_v41 }
 0x1f5   :  { %4199 = vst.msk [vmem:[%s6870_s2 + $0x3e4] sm:$0xf] %vm3949_vm2, %v4851_v47  ;;  %v4856_v55 = vpack.c.bf16 %v2923_v53, %v2923_v53  ;;  %v2793_v56 = vsel %vm2281_vm11, %v1630_v40, %v2537_v49  ;;  %vm2284_vm13 = vcmp.gt.f32.partialorder %v5137_v45, 0.0  ;;  %v2540_v57 = vmul.f32 0.2, %v5137_v45 }
 0x1f6   :  { %4076 = vst.msk [vmem:[%s6870_s2 + $0x1f8] sm:$0xf] %vm3949_vm2, %v4728_v52  ;;  %v4726_v58 = vpack.c.bf16 %v2793_v56, %v2793_v56  ;;  %v2921_v59 = vsel %vm2409_vm12, %v2142_v41, %v2665_v54  ;;  %vm2412_vm14 = vcmp.gt.f32.partialorder %v5265_v46, 0.0  ;;  %v2668_v60 = vmul.f32 0.2, %v5265_v46 }
 0x1f7   :  { %4204 = vst.msk [vmem:[%s6870_s2 + $0x3f8] sm:$0xf] %vm3949_vm2, %v4856_v55  ;;  %v4854_v61 = vpack.c.bf16 %v2921_v59, %v2921_v59  ;;  %v2796_v62 = vsel %vm2284_vm13, %v5137_v45, %v2540_v57  ;;  %vm2282_vm15 = vcmp.gt.f32.partialorder %v1633_v50, 0.0  ;;  %v2538_v63 = vmul.f32 0.2, %v1633_v50 }
 0x1f8   :  { %4074 = vst.msk [vmem:[%s6870_s2 + $0x1f0] sm:$0xf] %vm3949_vm2, %v4726_v58  ;;  %v4729_v0 = vpack.c.bf16 %v2796_v62, %v2796_v62  ;;  %v2924_v1 = vsel %vm2412_vm14, %v5265_v46, %v2668_v60  ;;  %vm2410_vm0 = vcmp.gt.f32.partialorder %v2145_v51, 0.0  ;;  %v2666_v2 = vmul.f32 0.2, %v2145_v51 }
 0x1f9   :  { %4202 = vst.msk [vmem:[%s6870_s2 + $0x3f0] sm:$0xf] %vm3949_vm2, %v4854_v61  ;;  %v4857_v3 = vpack.c.bf16 %v2924_v1, %v2924_v1  ;;  %v2794_v4 = vsel %vm2282_vm15, %v1633_v50, %v2538_v63 }
 0x1fa   :  { %4077 = vst.msk [vmem:[%s6870_s2 + $0x1fc] sm:$0xf] %vm3949_vm2, %v4729_v0  ;;  %v4727_v5 = vpack.c.bf16 %v2794_v4, %v2794_v4  ;;  %v2922_v6 = vsel %vm2410_vm0, %v2145_v51, %v2666_v2 }
 0x1fb   :  { %4205 = vst.msk [vmem:[%s6870_s2 + $0x3fc] sm:$0xf] %vm3949_vm2, %v4857_v3  ;;  %v4855_v7 = vpack.c.bf16 %v2922_v6, %v2922_v6 }
 0x1fc   :  { %4075 = vst.msk [vmem:[%s6870_s2 + $0x1f4] sm:$0xf] %vm3949_vm2, %v4727_v5 }
 0x1fd   :  { %4203 = vst.msk [vmem:[%s6870_s2 + $0x3f4] sm:$0xf] %vm3949_vm2, %v4855_v7 }

// kernel: discriminator_forward.9
= control target key start
LH: loop header
LB: loop body
LE: loop exit
PB: predicated region body
PF: predicated region fallthrough
CT: control target
= control target key end

     0   :  { %vm880_vm0 = vcmask 125952   ;;  %vm945_vm1 = vcmask 130048   ;;  %vm1276_vm2 = vcmask 122880   ;;  %s2394_s1 = inlined_call_operand.vmem [shape: bf16[128,128], index: 1, kind: input, shape index: {}]   ;;  %s2395_s0 = inlined_call_operand.vmem [shape: bf16[512,128], index: 0, kind: input, shape index: {}]   ;;  %s2396_s2 = inlined_call_operand.vmem [shape: bf16[512,16], index: 2, kind: output, shape index: {0}]   ;;  %s2397_s3 = inlined_call_operand.vmem [shape: f32[1,1,16], index: 3, kind: output, shape index: {1}]   ;;  %s2398_s4 = inlined_call_operand.vmem [shape: f32[1,1,16], index: 4, kind: output, shape index: {2}]  }
   0x1   :  { %v1595_v0 = vld [vmem:[%s2394_s1] sm:$0xff]   ;;  %v1596_v1 = vld [vmem:[%s2394_s1 + $0x8] sm:$0xff]   ;;  %v1597_v2 = vld [vmem:[%s2394_s1 + $0x10] sm:$0xff]  }
   0x2   :  { %1499 = vmatprep.subr.bf16.mxu0 %v1595_v0  ;;  %1579 = vmatprep.subr.bf16.mxu1 %v1595_v0  ;;  %v1598_v3 = vld [vmem:[%s2394_s1 + $0x18] sm:$0xff]   ;;  %v1603_v4 = vld [vmem:[%s2395_s0] sm:$0xff]   ;;  %v1600_v6 = vld [vmem:[%s2394_s1 + $0x28] sm:$0xff]  }
   0x3   :  { %1500 = vmatpush3.bf16.msra.mxu0 %v1595_v0  ;;  %1587 = vmatpush3.bf16.msra.mxu1 %v1595_v0  ;;  %v1599_v5 = vld [vmem:[%s2394_s1 + $0x20] sm:$0xff]   ;;  %v1601_v7 = vld [vmem:[%s2394_s1 + $0x30] sm:$0xff]   ;;  %v1602_v8 = vld [vmem:[%s2394_s1 + $0x38] sm:$0xff]  }
   0x4   :  { %1501 = vmatprep.subr.bf16.mxu0 %v1596_v1  ;;  %1580 = vmatprep.subr.bf16.mxu1 %v1596_v1  ;;  %v1619_v9 = vld [vmem:[%s2395_s0 + $0x80] sm:$0xff]   ;;  %v1604_v10 = vld [vmem:[%s2395_s0 + $0x8] sm:$0xff]   ;;  %v1605_v11 = vld [vmem:[%s2395_s0 + $0x10] sm:$0xff]  }
   0x5   :  { %1515 = vmatprep.mubr.bf16.mxu0 %v1603_v4  ;;  %1547 = vmatprep.mubr.bf16.mxu1 %v1619_v9  ;;  %v1620_v12 = vld [vmem:[%s2395_s0 + $0x88] sm:$0xff]   ;;  %v1621_v13 = vld [vmem:[%s2395_s0 + $0x90] sm:$0xff]   ;;  %v1606_v14 = vld [vmem:[%s2395_s0 + $0x18] sm:$0xff]  }
   0x6   :  { %v1607_v15 = vld [vmem:[%s2395_s0 + $0x20] sm:$0xff]   ;;  %v1622_v16 = vld [vmem:[%s2395_s0 + $0x98] sm:$0xff]   ;;  %v1608_v18 = vld [vmem:[%s2395_s0 + $0x28] sm:$0xff]  }
   0x7   :  { %1502 = vmatpush3.bf16.msra.mxu0 %v1596_v1  ;;  %1588 = vmatpush3.bf16.msra.mxu1 %v1596_v1  ;;  %v1623_v17 = vld [vmem:[%s2395_s0 + $0xa0] sm:$0xff]   ;;  %v1624_v19 = vld [vmem:[%s2395_s0 + $0xa8] sm:$0xff]   ;;  %v1609_v20 = vld [vmem:[%s2395_s0 + $0x30] sm:$0xff]  }
   0x8   :  { %1503 = vmatprep.subr.bf16.mxu0 %v1597_v2  ;;  %1581 = vmatprep.subr.bf16.mxu1 %v1597_v2  ;;  %v1625_v21 = vld [vmem:[%s2395_s0 + $0xb0] sm:$0xff]   ;;  %v1610_v22 = vld [vmem:[%s2395_s0 + $0x38] sm:$0xff]   ;;  %v1611_v24 = vld [vmem:[%s2395_s0 + $0x40] sm:$0xff]  }
   0x9   :  { %v1626_v23 = vld [vmem:[%s2395_s0 + $0xb8] sm:$0xff]   ;;  %v1627_v25 = vld [vmem:[%s2395_s0 + $0xc0] sm:$0xff]   ;;  %v1612_v26 = vld [vmem:[%s2395_s0 + $0x48] sm:$0xff]  }
   0xa   :  { %v1628_v27 = vld [vmem:[%s2395_s0 + $0xc8] sm:$0xff]   ;;  %v1613_v28 = vld [vmem:[%s2395_s0 + $0x50] sm:$0xff]   ;;  %v1614_v30 = vld [vmem:[%s2395_s0 + $0x58] sm:$0xff]  }
   0xb   :  { %1504 = vmatpush3.bf16.msra.mxu0 %v1597_v2  ;;  %1589 = vmatpush3.bf16.msra.mxu1 %v1597_v2  ;;  %v1629_v29 = vld [vmem:[%s2395_s0 + $0xd0] sm:$0xff]   ;;  %v1630_v31 = vld [vmem:[%s2395_s0 + $0xd8] sm:$0xff]   ;;  %v1615_v32 = vld [vmem:[%s2395_s0 + $0x60] sm:$0xff]  }
   0xc   :  { %1505 = vmatprep.subr.bf16.mxu0 %v1598_v3  ;;  %1582 = vmatprep.subr.bf16.mxu1 %v1598_v3  ;;  %v1631_v33 = vld [vmem:[%s2395_s0 + $0xe0] sm:$0xff]   ;;  %v1616_v34 = vld [vmem:[%s2395_s0 + $0x68] sm:$0xff]   ;;  %v1617_v36 = vld [vmem:[%s2395_s0 + $0x70] sm:$0xff]  }
   0xd   :  { %v1632_v35 = vld [vmem:[%s2395_s0 + $0xe8] sm:$0xff]   ;;  %v1633_v37 = vld [vmem:[%s2395_s0 + $0xf0] sm:$0xff]   ;;  %v1618_v38 = vld [vmem:[%s2395_s0 + $0x78] sm:$0xff]  }
   0xe   :  { %v1634_v39 = vld [vmem:[%s2395_s0 + $0xf8] sm:$0xff]  }
   0xf   :  { %1506 = vmatpush3.bf16.msra.mxu0 %v1598_v3  ;;  %1590 = vmatpush3.bf16.msra.mxu1 %v1598_v3 }
  0x10   :  { %1507 = vmatprep.subr.bf16.mxu0 %v1599_v5  ;;  %1583 = vmatprep.subr.bf16.mxu1 %v1599_v5 }
  0x13   :  { %1508 = vmatpush3.bf16.msra.mxu0 %v1599_v5  ;;  %1591 = vmatpush3.bf16.msra.mxu1 %v1599_v5 }
  0x14   :  { %1509 = vmatprep.subr.bf16.mxu0 %v1600_v6  ;;  %1584 = vmatprep.subr.bf16.mxu1 %v1600_v6 }
  0x17   :  { %1510 = vmatpush3.bf16.msra.mxu0 %v1600_v6  ;;  %1592 = vmatpush3.bf16.msra.mxu1 %v1600_v6 }
  0x18   :  { %1511 = vmatprep.subr.bf16.mxu0 %v1601_v7  ;;  %1585 = vmatprep.subr.bf16.mxu1 %v1601_v7 }
  0x1b   :  { %1512 = vmatpush3.bf16.msra.mxu0 %v1601_v7  ;;  %1593 = vmatpush3.bf16.msra.mxu1 %v1601_v7 }
  0x1c   :  { %1513 = vmatprep.subr.bf16.mxu0 %v1602_v8  ;;  %1586 = vmatprep.subr.bf16.mxu1 %v1602_v8 }
  0x1f   :  { %1514 = vmatpush3.bf16.msra.mxu0 %v1602_v8  ;;  %1594 = vmatpush3.bf16.msra.mxu1 %v1602_v8 }
  0x22   :  { %1516 = vmatmul.mubr.bf16.vlgmr.msra.gmra.mrb[0].mxu0 %v1604_v10  ;;  %1548 = vmatmul.mubr.bf16.vlgmr.msra.gmra.mrb[0].mxu1 %v1620_v12 }
  0x23   :  { %1519 = vmatprep.mubr.bf16.mxu0 %v1605_v11  ;;  %1551 = vmatprep.mubr.bf16.mxu1 %v1621_v13 }
  0x2a   :  { %1520 = vmatmul.mubr.bf16.gmra.mrb[4].mxu0 %v1606_v14  ;;  %1552 = vmatmul.mubr.bf16.gmra.mrb[4].mxu1 %v1622_v16 }
  0x2b   :  { %1523 = vmatprep.mubr.bf16.mxu0 %v1607_v15  ;;  %1555 = vmatprep.mubr.bf16.mxu1 %v1623_v17 }
  0x32   :  { %1524 = vmatmul.mubr.bf16.gmra.mrb[8].mxu0 %v1608_v18  ;;  %1556 = vmatmul.mubr.bf16.gmra.mrb[8].mxu1 %v1624_v19 }
  0x33   :  { %1527 = vmatprep.mubr.bf16.mxu0 %v1609_v20  ;;  %1559 = vmatprep.mubr.bf16.mxu1 %v1625_v21 }
  0x3a   :  { %1528 = vmatmul.mubr.bf16.gmra.mrb[12].mxu0 %v1610_v22  ;;  %1560 = vmatmul.mubr.bf16.gmra.mrb[12].mxu1 %v1626_v23 }
  0x3b   :  { %1531 = vmatprep.mubr.bf16.mxu0 %v1611_v24  ;;  %1563 = vmatprep.mubr.bf16.mxu1 %v1627_v25 }
  0x42   :  { %1532 = vmatmul.mubr.bf16.gmra.mrb[16].mxu0 %v1612_v26  ;;  %1564 = vmatmul.mubr.bf16.gmra.mrb[16].mxu1 %v1628_v27 }
  0x43   :  { %1535 = vmatprep.mubr.bf16.mxu0 %v1613_v28  ;;  %1567 = vmatprep.mubr.bf16.mxu1 %v1629_v29 }
  0x4a   :  { %1536 = vmatmul.mubr.bf16.gmra.mrb[20].mxu0 %v1614_v30  ;;  %1568 = vmatmul.mubr.bf16.gmra.mrb[20].mxu1 %v1630_v31 }
  0x4b   :  { %1539 = vmatprep.mubr.bf16.mxu0 %v1615_v32  ;;  %1571 = vmatprep.mubr.bf16.mxu1 %v1631_v33 }
  0x52   :  { %1540 = vmatmul.mubr.bf16.gmra.mrb[24].mxu0 %v1616_v34  ;;  %1572 = vmatmul.mubr.bf16.gmra.mrb[24].mxu1 %v1632_v35 }
  0x53   :  { %1543 = vmatprep.mubr.bf16.mxu0 %v1617_v36  ;;  %1575 = vmatprep.mubr.bf16.mxu1 %v1633_v37 }
  0x5a   :  { %1544 = vmatmul.mubr.bf16.gmra.mrb[28].mxu0 %v1618_v38  ;;  %1576 = vmatmul.mubr.bf16.gmra.mrb[28].mxu1 %v1634_v39 }
  0xf5   :  { %v1517_v40 = vpop.f32.mrb[0].mxu0  ;;  %v1780_v41 = vpop.f32.mrb[0].mxu1 }
  0xf6   :  { %v1397_v42 = vpack.c.bf16 %v1517_v40, %v1517_v40  ;;  %v369_v43 = vpop.f32.mrb[1].mxu0  ;;  %v1429_v44 = vpack.c.bf16 %v1780_v41, %v1780_v41  ;;  %v1784_v45 = vpop.f32.mrb[1].mxu1  ;;  %v1081_v50 = vmul.f32 %v1517_v40, %v1517_v40  ;;  %v949_v61 = vsel %vm945_vm1, %v1517_v40, 0.0 }
  0xf7   :  { %v1395_v46 = vpack.c.bf16 %v369_v43, %v369_v43  ;;  %v1079_v47 = vmul.f32 %v369_v43, %v369_v43  ;;  %v1518_v48 = vpop.f32.mrb[2].mxu0  ;;  %v1786_v49 = vpop.f32.mrb[2].mxu1  ;;  %v946_v54 = vsel %vm945_vm1, %v369_v43, 0.0  ;;  %v1427_v60 = vpack.c.bf16 %v1784_v45, %v1784_v45 }
  0xf8   :  { %883 = vst.msk [vmem:[%s2396_s2 + $0x8] sm:$0xf] %vm880_vm0, %v1397_v42  ;;  %v1398_v51 = vpack.c.bf16 %v1518_v48, %v1518_v48  ;;  %v372_v52 = vpop.f32.mrb[3].mxu0  ;;  %915 = vst.msk [vmem:[%s2396_s2 + $0x88] sm:$0xf] %vm880_vm0, %v1429_v44  ;;  %v1796_v53 = vpop.f32.mrb[3].mxu1  ;;  %v1082_v58 = vmul.f32 %v1518_v48, %v1518_v48  ;;  %v1430_v0 = vpack.c.bf16 %v1786_v49, %v1786_v49 }
  0xf9   :  { %881 = vst.msk [vmem:[%s2396_s2] sm:$0xf] %vm880_vm0, %v1395_v46  ;;  %v1396_v55 = vpack.c.bf16 %v372_v52, %v372_v52  ;;  %v947_v56 = vsel %vm945_vm1, %v372_v52, 0.0  ;;  %v1080_v57 = vmul.f32 %v372_v52, %v372_v52  ;;  %v1143_v62 = vsel %vm945_vm1, %v1079_v47, 0.0  ;;  %913 = vst.msk [vmem:[%s2396_s2 + $0x80] sm:$0xf] %vm880_vm0, %v1427_v60 }
  0xfa   :  { %884 = vst.msk [vmem:[%s2396_s2 + $0xc] sm:$0xf] %vm880_vm0, %v1398_v51  ;;  %v948_v59 = vadd.f32 %v947_v56, %v946_v54  ;;  %v1146_v3 = vsel %vm945_vm1, %v1081_v50, 0.0  ;;  %916 = vst.msk [vmem:[%s2396_s2 + $0x8c] sm:$0xf] %vm880_vm0, %v1430_v0  ;;  %v1428_v5 = vpack.c.bf16 %v1796_v53, %v1796_v53  ;;  %v951_v7 = vsel %vm945_vm1, %v1518_v48, 0.0 }
  0xfb   :  { %882 = vst.msk [vmem:[%s2396_s2 + $0x4] sm:$0xf] %vm880_vm0, %v1396_v55  ;;  %v1144_v63 = vsel %vm945_vm1, %v1080_v57, 0.0  ;;  %v1148_v8 = vsel %vm945_vm1, %v1082_v58, 0.0 }
  0xfc   :  { %v950_v1 = vadd.f32 %v949_v61, %v948_v59  ;;  %v1145_v2 = vadd.f32 %v1144_v63, %v1143_v62  ;;  %914 = vst.msk [vmem:[%s2396_s2 + $0x84] sm:$0xf] %vm880_vm0, %v1428_v5 }
  0xfd   :  { %v1521_v4 = vpop.f32.mrb[4].mxu0  ;;  %v1830_v6 = vpop.f32.mrb[4].mxu1 }
  0xfe   :  { %v1147_v9 = vadd.f32 %v1146_v3, %v1145_v2  ;;  %v1401_v10 = vpack.c.bf16 %v1521_v4, %v1521_v4  ;;  %v385_v11 = vpop.f32.mrb[5].mxu0  ;;  %v1834_v12 = vpop.f32.mrb[5].mxu1  ;;  %v952_v14 = vadd.f32 %v951_v7, %v950_v1  ;;  %v1085_v26 = vmul.f32 %v1521_v4, %v1521_v4 }
  0xff   :  { %v1399_v13 = vpack.c.bf16 %v385_v11, %v385_v11  ;;  %v953_v15 = vsel %vm945_vm1, %v385_v11, 0.0  ;;  %v1083_v16 = vmul.f32 %v385_v11, %v385_v11  ;;  %v1522_v17 = vpop.f32.mrb[6].mxu0  ;;  %v1841_v18 = vpop.f32.mrb[6].mxu1  ;;  %v1433_v31 = vpack.c.bf16 %v1830_v6, %v1830_v6 }
 0x100   :  { %887 = vst.msk [vmem:[%s2396_s2 + $0x18] sm:$0xf] %vm880_vm0, %v1401_v10  ;;  %v1149_v19 = vadd.f32 %v1148_v8, %v1147_v9  ;;  %v1402_v20 = vpack.c.bf16 %v1522_v17, %v1522_v17  ;;  %v388_v21 = vpop.f32.mrb[7].mxu0  ;;  %v1847_v22 = vpop.f32.mrb[7].mxu1  ;;  %v954_v23 = vadd.f32 %v953_v15, %v952_v14  ;;  %v957_v32 = vsel %vm945_vm1, %v1521_v4, 0.0 }
 0x101   :  { %885 = vst.msk [vmem:[%s2396_s2 + $0x10] sm:$0xf] %vm880_vm0, %v1399_v13  ;;  %v1150_v24 = vsel %vm945_vm1, %v1083_v16, 0.0  ;;  %v1400_v25 = vpack.c.bf16 %v388_v21, %v388_v21  ;;  %v955_v28 = vsel %vm945_vm1, %v388_v21, 0.0  ;;  %v1084_v29 = vmul.f32 %v388_v21, %v388_v21  ;;  %919 = vst.msk [vmem:[%s2396_s2 + $0x98] sm:$0xf] %vm880_vm0, %v1433_v31 }
 0x102   :  { %v1151_v27 = vadd.f32 %v1150_v24, %v1149_v19  ;;  %888 = vst.msk [vmem:[%s2396_s2 + $0x1c] sm:$0xf] %vm880_vm0, %v1402_v20  ;;  %v956_v30 = vadd.f32 %v955_v28, %v954_v23  ;;  %v1086_v33 = vmul.f32 %v1522_v17, %v1522_v17  ;;  %v1431_v35 = vpack.c.bf16 %v1834_v12, %v1834_v12 }
 0x103   :  { %886 = vst.msk [vmem:[%s2396_s2 + $0x14] sm:$0xf] %vm880_vm0, %v1400_v25  ;;  %v1152_v34 = vsel %vm945_vm1, %v1084_v29, 0.0  ;;  %v1154_v40 = vsel %vm945_vm1, %v1085_v26, 0.0  ;;  %v959_v42 = vsel %vm945_vm1, %v1522_v17, 0.0  ;;  %v1434_v5 = vpack.c.bf16 %v1841_v18, %v1841_v18 }
 0x104   :  { %v958_v36 = vadd.f32 %v957_v32, %v956_v30  ;;  %v1153_v37 = vadd.f32 %v1152_v34, %v1151_v27  ;;  %917 = vst.msk [vmem:[%s2396_s2 + $0x90] sm:$0xf] %vm880_vm0, %v1431_v35  ;;  %v1156_v55 = vsel %vm945_vm1, %v1086_v33, 0.0  ;;  %v1432_v14 = vpack.c.bf16 %v1847_v22, %v1847_v22 }
 0x105   :  { %v1525_v38 = vpop.f32.mrb[8].mxu0  ;;  %v1873_v39 = vpop.f32.mrb[8].mxu1  ;;  %920 = vst.msk [vmem:[%s2396_s2 + $0x9c] sm:$0xf] %vm880_vm0, %v1434_v5 }
 0x106   :  { %v1405_v43 = vpack.c.bf16 %v1525_v38, %v1525_v38  ;;  %v401_v44 = vpop.f32.mrb[9].mxu0  ;;  %v1881_v46 = vpop.f32.mrb[9].mxu1  ;;  %v1155_v47 = vadd.f32 %v1154_v40, %v1153_v37  ;;  %v960_v50 = vadd.f32 %v959_v42, %v958_v36  ;;  %v1089_v63 = vmul.f32 %v1525_v38, %v1525_v38  ;;  %918 = vst.msk [vmem:[%s2396_s2 + $0x94] sm:$0xf] %vm880_vm0, %v1432_v14 }
 0x107   :  { %v1403_v48 = vpack.c.bf16 %v401_v44, %v401_v44  ;;  %v961_v51 = vsel %vm945_vm1, %v401_v44, 0.0  ;;  %v1526_v52 = vpop.f32.mrb[10].mxu0  ;;  %v1884_v54 = vpop.f32.mrb[10].mxu1  ;;  %v1087_v56 = vmul.f32 %v401_v44, %v401_v44  ;;  %v965_v7 = vsel %vm945_vm1, %v1525_v38, 0.0 }
 0x108   :  { %891 = vst.msk [vmem:[%s2396_s2 + $0x28] sm:$0xf] %vm880_vm0, %v1405_v43  ;;  %v1406_v57 = vpack.c.bf16 %v1526_v52, %v1526_v52  ;;  %v404_v58 = vpop.f32.mrb[11].mxu0  ;;  %v1891_v59 = vpop.f32.mrb[11].mxu1  ;;  %v962_v60 = vadd.f32 %v961_v51, %v960_v50  ;;  %v1157_v61 = vadd.f32 %v1156_v55, %v1155_v47  ;;  %v1090_v8 = vmul.f32 %v1526_v52, %v1526_v52 }
 0x109   :  { %889 = vst.msk [vmem:[%s2396_s2 + $0x20] sm:$0xf] %vm880_vm0, %v1403_v48  ;;  %v1404_v62 = vpack.c.bf16 %v404_v58, %v404_v58  ;;  %v1158_v0 = vsel %vm945_vm1, %v1087_v56, 0.0  ;;  %v963_v1 = vsel %vm945_vm1, %v404_v58, 0.0  ;;  %v1088_v2 = vmul.f32 %v404_v58, %v404_v58 }
 0x10a   :  { %892 = vst.msk [vmem:[%s2396_s2 + $0x2c] sm:$0xf] %vm880_vm0, %v1406_v57  ;;  %v1159_v3 = vadd.f32 %v1158_v0, %v1157_v61  ;;  %v964_v4 = vadd.f32 %v963_v1, %v962_v60  ;;  %v1162_v16 = vsel %vm945_vm1, %v1089_v63, 0.0  ;;  %v967_v17 = vsel %vm945_vm1, %v1526_v52, 0.0 }
 0x10b   :  { %890 = vst.msk [vmem:[%s2396_s2 + $0x24] sm:$0xf] %vm880_vm0, %v1404_v62  ;;  %v1160_v9 = vsel %vm945_vm1, %v1088_v2, 0.0  ;;  %v1164_v29 = vsel %vm945_vm1, %v1090_v8, 0.0  ;;  %v1437_v47 = vpack.c.bf16 %v1873_v39, %v1873_v39  ;;  %v1435_v57 = vpack.c.bf16 %v1881_v46, %v1881_v46 }
 0x10c   :  { %v966_v10 = vadd.f32 %v965_v7, %v964_v4  ;;  %v1161_v11 = vadd.f32 %v1160_v9, %v1159_v3 }
 0x10d   :  { %v1529_v13 = vpop.f32.mrb[12].mxu0  ;;  %v1917_v15 = vpop.f32.mrb[12].mxu1  ;;  %923 = vst.msk [vmem:[%s2396_s2 + $0xa8] sm:$0xf] %vm880_vm0, %v1437_v47  ;;  %921 = vst.msk [vmem:[%s2396_s2 + $0xa0] sm:$0xf] %vm880_vm0, %v1435_v57 }
 0x10e   :  { %v1409_v19 = vpack.c.bf16 %v1529_v13, %v1529_v13  ;;  %v417_v20 = vpop.f32.mrb[13].mxu0  ;;  %v1921_v21 = vpop.f32.mrb[13].mxu1  ;;  %v1163_v23 = vadd.f32 %v1162_v16, %v1161_v11  ;;  %v968_v25 = vadd.f32 %v967_v17, %v966_v10  ;;  %v1093_v37 = vmul.f32 %v1529_v13, %v1529_v13 }
 0x10f   :  { %v1407_v24 = vpack.c.bf16 %v417_v20, %v417_v20  ;;  %v969_v26 = vsel %vm945_vm1, %v417_v20, 0.0  ;;  %v1530_v27 = vpop.f32.mrb[14].mxu0  ;;  %v1928_v28 = vpop.f32.mrb[14].mxu1  ;;  %v1091_v30 = vmul.f32 %v417_v20, %v417_v20  ;;  %v973_v48 = vsel %vm945_vm1, %v1529_v13, 0.0 }
 0x110   :  { %895 = vst.msk [vmem:[%s2396_s2 + $0x38] sm:$0xf] %vm880_vm0, %v1409_v19  ;;  %v1410_v31 = vpack.c.bf16 %v1530_v27, %v1530_v27  ;;  %v420_v32 = vpop.f32.mrb[15].mxu0  ;;  %v1935_v33 = vpop.f32.mrb[15].mxu1  ;;  %v970_v34 = vadd.f32 %v969_v26, %v968_v25  ;;  %v1165_v35 = vadd.f32 %v1164_v29, %v1163_v23  ;;  %v1094_v50 = vmul.f32 %v1530_v27, %v1530_v27 }
 0x111   :  { %893 = vst.msk [vmem:[%s2396_s2 + $0x30] sm:$0xf] %vm880_vm0, %v1407_v24  ;;  %v1408_v36 = vpack.c.bf16 %v420_v32, %v420_v32  ;;  %v1166_v38 = vsel %vm945_vm1, %v1091_v30, 0.0  ;;  %v971_v40 = vsel %vm945_vm1, %v420_v32, 0.0  ;;  %v1092_v42 = vmul.f32 %v420_v32, %v420_v32 }
 0x112   :  { %896 = vst.msk [vmem:[%s2396_s2 + $0x3c] sm:$0xf] %vm880_vm0, %v1410_v31  ;;  %v1167_v43 = vadd.f32 %v1166_v38, %v1165_v35  ;;  %v972_v44 = vadd.f32 %v971_v40, %v970_v34  ;;  %v1170_v60 = vsel %vm945_vm1, %v1093_v37, 0.0  ;;  %v975_v61 = vsel %vm945_vm1, %v1530_v27, 0.0 }
 0x113   :  { %894 = vst.msk [vmem:[%s2396_s2 + $0x34] sm:$0xf] %vm880_vm0, %v1408_v36  ;;  %v1168_v51 = vsel %vm945_vm1, %v1092_v42, 0.0  ;;  %v1172_v8 = vsel %vm945_vm1, %v1094_v50, 0.0  ;;  %v1438_v27 = vpack.c.bf16 %v1884_v54, %v1884_v54  ;;  %v1436_v36 = vpack.c.bf16 %v1891_v59, %v1891_v59 }
 0x114   :  { %v974_v52 = vadd.f32 %v973_v48, %v972_v44  ;;  %v1169_v55 = vadd.f32 %v1168_v51, %v1167_v43 }
 0x115   :  { %v1533_v56 = vpop.f32.mrb[16].mxu0  ;;  %v1961_v58 = vpop.f32.mrb[16].mxu1  ;;  %924 = vst.msk [vmem:[%s2396_s2 + $0xac] sm:$0xf] %vm880_vm0, %v1438_v27  ;;  %922 = vst.msk [vmem:[%s2396_s2 + $0xa4] sm:$0xf] %vm880_vm0, %v1436_v36 }
 0x116   :  { %v1413_v62 = vpack.c.bf16 %v1533_v56, %v1533_v56  ;;  %v433_v63 = vpop.f32.mrb[17].mxu0  ;;  %v1965_v0 = vpop.f32.mrb[17].mxu1  ;;  %v1171_v1 = vadd.f32 %v1170_v60, %v1169_v55  ;;  %v976_v3 = vadd.f32 %v975_v61, %v974_v52  ;;  %v1097_v19 = vmul.f32 %v1533_v56, %v1533_v56 }
 0x117   :  { %v1411_v2 = vpack.c.bf16 %v433_v63, %v433_v63  ;;  %v977_v4 = vsel %vm945_vm1, %v433_v63, 0.0  ;;  %v1534_v5 = vpop.f32.mrb[18].mxu0  ;;  %v1972_v7 = vpop.f32.mrb[18].mxu1  ;;  %v1095_v9 = vmul.f32 %v433_v63, %v433_v63  ;;  %v981_v29 = vsel %vm945_vm1, %v1533_v56, 0.0 }
 0x118   :  { %899 = vst.msk [vmem:[%s2396_s2 + $0x48] sm:$0xf] %vm880_vm0, %v1413_v62  ;;  %v1414_v10 = vpack.c.bf16 %v1534_v5, %v1534_v5  ;;  %v436_v11 = vpop.f32.mrb[19].mxu0  ;;  %v1979_v13 = vpop.f32.mrb[19].mxu1  ;;  %v978_v14 = vadd.f32 %v977_v4, %v976_v3  ;;  %v1173_v16 = vadd.f32 %v1172_v8, %v1171_v1  ;;  %v1098_v30 = vmul.f32 %v1534_v5, %v1534_v5 }
 0x119   :  { %897 = vst.msk [vmem:[%s2396_s2 + $0x40] sm:$0xf] %vm880_vm0, %v1411_v2  ;;  %v1412_v17 = vpack.c.bf16 %v436_v11, %v436_v11  ;;  %v1174_v20 = vsel %vm945_vm1, %v1095_v9, 0.0  ;;  %v979_v23 = vsel %vm945_vm1, %v436_v11, 0.0  ;;  %v1096_v24 = vmul.f32 %v436_v11, %v436_v11 }
 0x11a   :  { %900 = vst.msk [vmem:[%s2396_s2 + $0x4c] sm:$0xf] %vm880_vm0, %v1414_v10  ;;  %v1175_v25 = vadd.f32 %v1174_v20, %v1173_v16  ;;  %v980_v26 = vadd.f32 %v979_v23, %v978_v14  ;;  %v1178_v38 = vsel %vm945_vm1, %v1097_v19, 0.0  ;;  %v983_v40 = vsel %vm945_vm1, %v1534_v5, 0.0 }
 0x11b   :  { %898 = vst.msk [vmem:[%s2396_s2 + $0x44] sm:$0xf] %vm880_vm0, %v1412_v17  ;;  %v1176_v31 = vsel %vm945_vm1, %v1096_v24, 0.0  ;;  %v1180_v56 = vsel %vm945_vm1, %v1098_v30, 0.0  ;;  %v1441_v11 = vpack.c.bf16 %v1917_v15, %v1917_v15  ;;  %v1439_v24 = vpack.c.bf16 %v1921_v21, %v1921_v21 }
 0x11c   :  { %v982_v32 = vadd.f32 %v981_v29, %v980_v26  ;;  %v1177_v34 = vadd.f32 %v1176_v31, %v1175_v25 }
 0x11d   :  { %v1537_v35 = vpop.f32.mrb[20].mxu0  ;;  %v2005_v37 = vpop.f32.mrb[20].mxu1  ;;  %927 = vst.msk [vmem:[%s2396_s2 + $0xb8] sm:$0xf] %vm880_vm0, %v1441_v11  ;;  %925 = vst.msk [vmem:[%s2396_s2 + $0xb0] sm:$0xf] %vm880_vm0, %v1439_v24 }
 0x11e   :  { %v1417_v42 = vpack.c.bf16 %v1537_v35, %v1537_v35  ;;  %v449_v43 = vpop.f32.mrb[21].mxu0  ;;  %v2009_v44 = vpop.f32.mrb[21].mxu1  ;;  %v1179_v47 = vadd.f32 %v1178_v38, %v1177_v34  ;;  %v984_v50 = vadd.f32 %v983_v40, %v982_v32  ;;  %v1101_v3 = vmul.f32 %v1537_v35, %v1537_v35 }
 0x11f   :  { %v1415_v48 = vpack.c.bf16 %v449_v43, %v449_v43  ;;  %v985_v51 = vsel %vm945_vm1, %v449_v43, 0.0  ;;  %v1538_v52 = vpop.f32.mrb[22].mxu0  ;;  %v2016_v55 = vpop.f32.mrb[22].mxu1  ;;  %v1099_v57 = vmul.f32 %v449_v43, %v449_v43  ;;  %v989_v14 = vsel %vm945_vm1, %v1537_v35, 0.0 }
 0x120   :  { %903 = vst.msk [vmem:[%s2396_s2 + $0x58] sm:$0xf] %vm880_vm0, %v1417_v42  ;;  %v1418_v60 = vpack.c.bf16 %v1538_v52, %v1538_v52  ;;  %v452_v61 = vpop.f32.mrb[23].mxu0  ;;  %v2023_v62 = vpop.f32.mrb[23].mxu1  ;;  %v986_v63 = vadd.f32 %v985_v51, %v984_v50  ;;  %v1181_v1 = vadd.f32 %v1180_v56, %v1179_v47  ;;  %v1102_v16 = vmul.f32 %v1538_v52, %v1538_v52 }
 0x121   :  { %901 = vst.msk [vmem:[%s2396_s2 + $0x50] sm:$0xf] %vm880_vm0, %v1415_v48  ;;  %v1416_v2 = vpack.c.bf16 %v452_v61, %v452_v61  ;;  %v1182_v4 = vsel %vm945_vm1, %v1099_v57, 0.0  ;;  %v987_v5 = vsel %vm945_vm1, %v452_v61, 0.0  ;;  %v1100_v8 = vmul.f32 %v452_v61, %v452_v61 }
 0x122   :  { %904 = vst.msk [vmem:[%s2396_s2 + $0x5c] sm:$0xf] %vm880_vm0, %v1418_v60  ;;  %v1183_v9 = vadd.f32 %v1182_v4, %v1181_v1  ;;  %v988_v10 = vadd.f32 %v987_v5, %v986_v63  ;;  %v1186_v26 = vsel %vm945_vm1, %v1101_v3, 0.0  ;;  %v991_v27 = vsel %vm945_vm1, %v1538_v52, 0.0 }
 0x123   :  { %902 = vst.msk [vmem:[%s2396_s2 + $0x54] sm:$0xf] %vm880_vm0, %v1416_v2  ;;  %v1184_v17 = vsel %vm945_vm1, %v1100_v8, 0.0  ;;  %v1188_v42 = vsel %vm945_vm1, %v1102_v16, 0.0  ;;  %v1442_v3 = vpack.c.bf16 %v1928_v28, %v1928_v28 }
 0x124   :  { %v990_v19 = vadd.f32 %v989_v14, %v988_v10  ;;  %v1185_v20 = vadd.f32 %v1184_v17, %v1183_v9  ;;  %v1440_v14 = vpack.c.bf16 %v1935_v33, %v1935_v33 }
 0x125   :  { %v1541_v23 = vpop.f32.mrb[24].mxu0  ;;  %v2049_v25 = vpop.f32.mrb[24].mxu1  ;;  %928 = vst.msk [vmem:[%s2396_s2 + $0xbc] sm:$0xf] %vm880_vm0, %v1442_v3 }
 0x126   :  { %v1421_v29 = vpack.c.bf16 %v1541_v23, %v1541_v23  ;;  %v465_v30 = vpop.f32.mrb[25].mxu0  ;;  %v2053_v31 = vpop.f32.mrb[25].mxu1  ;;  %v1187_v32 = vadd.f32 %v1186_v26, %v1185_v20  ;;  %v992_v35 = vadd.f32 %v991_v27, %v990_v19  ;;  %v1105_v57 = vmul.f32 %v1541_v23, %v1541_v23  ;;  %926 = vst.msk [vmem:[%s2396_s2 + $0xb4] sm:$0xf] %vm880_vm0, %v1440_v14 }
 0x127   :  { %v1419_v34 = vpack.c.bf16 %v465_v30, %v465_v30  ;;  %v993_v36 = vsel %vm945_vm1, %v465_v30, 0.0  ;;  %v1542_v38 = vpop.f32.mrb[26].mxu0  ;;  %v2060_v40 = vpop.f32.mrb[26].mxu1  ;;  %v1103_v43 = vmul.f32 %v465_v30, %v465_v30  ;;  %v997_v4 = vsel %vm945_vm1, %v1541_v23, 0.0 }
 0x128   :  { %907 = vst.msk [vmem:[%s2396_s2 + $0x68] sm:$0xf] %vm880_vm0, %v1421_v29  ;;  %v1422_v47 = vpack.c.bf16 %v1542_v38, %v1542_v38  ;;  %v468_v48 = vpop.f32.mrb[27].mxu0  ;;  %v2067_v50 = vpop.f32.mrb[27].mxu1  ;;  %v994_v51 = vadd.f32 %v993_v36, %v992_v35  ;;  %v1189_v52 = vadd.f32 %v1188_v42, %v1187_v32  ;;  %v1106_v5 = vmul.f32 %v1542_v38, %v1542_v38 }
 0x129   :  { %905 = vst.msk [vmem:[%s2396_s2 + $0x60] sm:$0xf] %vm880_vm0, %v1419_v34  ;;  %v1420_v56 = vpack.c.bf16 %v468_v48, %v468_v48  ;;  %v1190_v60 = vsel %vm945_vm1, %v1103_v43, 0.0  ;;  %v995_v61 = vsel %vm945_vm1, %v468_v48, 0.0  ;;  %v1104_v63 = vmul.f32 %v468_v48, %v468_v48 }
 0x12a   :  { %908 = vst.msk [vmem:[%s2396_s2 + $0x6c] sm:$0xf] %vm880_vm0, %v1422_v47  ;;  %v1191_v1 = vadd.f32 %v1190_v60, %v1189_v52  ;;  %v996_v2 = vadd.f32 %v995_v61, %v994_v51  ;;  %v1194_v17 = vsel %vm945_vm1, %v1105_v57, 0.0  ;;  %v999_v19 = vsel %vm945_vm1, %v1542_v38, 0.0 }
 0x12b   :  { %906 = vst.msk [vmem:[%s2396_s2 + $0x64] sm:$0xf] %vm880_vm0, %v1420_v56  ;;  %v1192_v8 = vsel %vm945_vm1, %v1104_v63, 0.0  ;;  %v1196_v35 = vsel %vm945_vm1, %v1106_v5, 0.0  ;;  %v1111_v5 = vmul.f32 %v1784_v45, %v1784_v45 }
 0x12c   :  { %v998_v9 = vadd.f32 %v997_v4, %v996_v2  ;;  %v1193_v10 = vadd.f32 %v1192_v8, %v1191_v1  ;;  %v1445_v1 = vpack.c.bf16 %v1961_v58, %v1961_v58 }
 0x12d   :  { %v1545_v11 = vpop.f32.mrb[28].mxu0  ;;  %v2093_v16 = vpop.f32.mrb[28].mxu1 }
 0x12e   :  { %v1425_v20 = vpack.c.bf16 %v1545_v11, %v1545_v11  ;;  %v481_v23 = vpop.f32.mrb[29].mxu0  ;;  %v2097_v24 = vpop.f32.mrb[29].mxu1  ;;  %v1195_v26 = vadd.f32 %v1194_v17, %v1193_v10  ;;  %v1000_v29 = vadd.f32 %v999_v19, %v998_v9  ;;  %v1109_v52 = vmul.f32 %v1545_v11, %v1545_v11  ;;  %931 = vst.msk [vmem:[%s2396_s2 + $0xc8] sm:$0xf] %vm880_vm0, %v1445_v1 }
 0x12f   :  { %v1423_v27 = vpack.c.bf16 %v481_v23, %v481_v23  ;;  %v1001_v30 = vsel %vm945_vm1, %v481_v23, 0.0  ;;  %v1546_v32 = vpop.f32.mrb[30].mxu0  ;;  %v2104_v34 = vpop.f32.mrb[30].mxu1  ;;  %v1107_v36 = vmul.f32 %v481_v23, %v481_v23  ;;  %v1005_v2 = vsel %vm945_vm1, %v1545_v11, 0.0 }
 0x130   :  { %911 = vst.msk [vmem:[%s2396_s2 + $0x78] sm:$0xf] %vm880_vm0, %v1425_v20  ;;  %v1426_v38 = vpack.c.bf16 %v1546_v32, %v1546_v32  ;;  %v484_v42 = vpop.f32.mrb[31].mxu0  ;;  %v2111_v43 = vpop.f32.mrb[31].mxu1  ;;  %v1002_v47 = vadd.f32 %v1001_v30, %v1000_v29  ;;  %v1197_v48 = vadd.f32 %v1196_v35, %v1195_v26  ;;  %v1110_v3 = vmul.f32 %v1546_v32, %v1546_v32 }
 0x131   :  { %909 = vst.msk [vmem:[%s2396_s2 + $0x70] sm:$0xf] %vm880_vm0, %v1423_v27  ;;  %v1424_v51 = vpack.c.bf16 %v484_v42, %v484_v42  ;;  %v1198_v56 = vsel %vm945_vm1, %v1107_v36, 0.0  ;;  %v1003_v57 = vsel %vm945_vm1, %v484_v42, 0.0  ;;  %v1108_v60 = vmul.f32 %v484_v42, %v484_v42 }
 0x132   :  { %912 = vst.msk [vmem:[%s2396_s2 + $0x7c] sm:$0xf] %vm880_vm0, %v1426_v38  ;;  %v1199_v61 = vadd.f32 %v1198_v56, %v1197_v48  ;;  %v1004_v63 = vadd.f32 %v1003_v57, %v1002_v47  ;;  %v1443_v10 = vpack.c.bf16 %v1965_v0, %v1965_v0  ;;  %v1202_v14 = vsel %vm945_vm1, %v1109_v52, 0.0 }
 0x133   :  { %910 = vst.msk [vmem:[%s2396_s2 + $0x74] sm:$0xf] %vm880_vm0, %v1424_v51  ;;  %v1200_v4 = vsel %vm945_vm1, %v1108_v60, 0.0  ;;  %v1007_v11 = vsel %vm945_vm1, %v1546_v32, 0.0  ;;  %v1009_v17 = vsel %vm945_vm1, %v1784_v45, 0.0  ;;  %v1446_v19 = vpack.c.bf16 %v1972_v7, %v1972_v7 }
 0x134   :  { %v1006_v8 = vadd.f32 %v1005_v2, %v1004_v63  ;;  %v1201_v9 = vadd.f32 %v1200_v4, %v1199_v61  ;;  %929 = vst.msk [vmem:[%s2396_s2 + $0xc0] sm:$0xf] %vm880_vm0, %v1443_v10  ;;  %v1444_v26 = vpack.c.bf16 %v1979_v13, %v1979_v13  ;;  %v1204_v27 = vsel %vm945_vm1, %v1110_v3, 0.0 }
 0x135   :  { %v1206_v29 = vsel %vm945_vm1, %v1111_v5, 0.0  ;;  %v1112_v45 = vmul.f32 %v1796_v53, %v1796_v53  ;;  %932 = vst.msk [vmem:[%s2396_s2 + $0xcc] sm:$0xf] %vm880_vm0, %v1446_v19  ;;  %v1449_v30 = vpack.c.bf16 %v2005_v37, %v2005_v37  ;;  %v1113_v36 = vmul.f32 %v1780_v41, %v1780_v41 }
 0x136   :  { %v1203_v20 = vadd.f32 %v1202_v14, %v1201_v9  ;;  %v1008_v23 = vadd.f32 %v1007_v11, %v1006_v8  ;;  %930 = vst.msk [vmem:[%s2396_s2 + $0xc4] sm:$0xf] %vm880_vm0, %v1444_v26  ;;  %v1011_v38 = vsel %vm945_vm1, %v1796_v53, 0.0  ;;  %v1447_v42 = vpack.c.bf16 %v2009_v44, %v2009_v44 }
 0x137   :  { %935 = vst.msk [vmem:[%s2396_s2 + $0xd8] sm:$0xf] %vm880_vm0, %v1449_v30  ;;  %v1013_v47 = vsel %vm945_vm1, %v1780_v41, 0.0  ;;  %v1450_v52 = vpack.c.bf16 %v2016_v55, %v2016_v55  ;;  %v1114_v56 = vmul.f32 %v1786_v49, %v1786_v49  ;;  %v1208_v53 = vsel %vm945_vm1, %v1112_v45, 0.0 }
 0x138   :  { %v1010_v32 = vadd.f32 %v1009_v17, %v1008_v23  ;;  %v1205_v35 = vadd.f32 %v1204_v27, %v1203_v20  ;;  %v1115_v57 = vmul.f32 %v1834_v12, %v1834_v12  ;;  %933 = vst.msk [vmem:[%s2396_s2 + $0xd0] sm:$0xf] %vm880_vm0, %v1447_v42  ;;  %v1448_v41 = vpack.c.bf16 %v2023_v62, %v2023_v62 }
 0x139   :  { %936 = vst.msk [vmem:[%s2396_s2 + $0xdc] sm:$0xf] %vm880_vm0, %v1450_v52  ;;  %v1210_v63 = vsel %vm945_vm1, %v1113_v36, 0.0  ;;  %v1015_v1 = vsel %vm945_vm1, %v1786_v49, 0.0  ;;  %v1017_v2 = vsel %vm945_vm1, %v1834_v12, 0.0  ;;  %v1453_v3 = vpack.c.bf16 %v2049_v25, %v2049_v25 }
 0x13a   :  { %v1207_v48 = vadd.f32 %v1206_v29, %v1205_v35  ;;  %v1012_v51 = vadd.f32 %v1011_v38, %v1010_v32  ;;  %934 = vst.msk [vmem:[%s2396_s2 + $0xd4] sm:$0xf] %vm880_vm0, %v1448_v41  ;;  %v1451_v8 = vpack.c.bf16 %v2053_v31, %v2053_v31  ;;  %v1212_v9 = vsel %vm945_vm1, %v1114_v56, 0.0 }
 0x13b   :  { %v1214_v49 = vsel %vm945_vm1, %v1115_v57, 0.0  ;;  %v1116_v12 = vmul.f32 %v1847_v22, %v1847_v22  ;;  %939 = vst.msk [vmem:[%s2396_s2 + $0xe8] sm:$0xf] %vm880_vm0, %v1453_v3  ;;  %v1454_v10 = vpack.c.bf16 %v2060_v40, %v2060_v40  ;;  %v1117_v17 = vmul.f32 %v1830_v6, %v1830_v6 }
 0x13c   :  { %v1014_v60 = vadd.f32 %v1013_v47, %v1012_v51  ;;  %v1209_v61 = vadd.f32 %v1208_v53, %v1207_v48  ;;  %937 = vst.msk [vmem:[%s2396_s2 + $0xe0] sm:$0xf] %vm880_vm0, %v1451_v8  ;;  %v1019_v19 = vsel %vm945_vm1, %v1847_v22, 0.0  ;;  %v1452_v20 = vpack.c.bf16 %v2067_v50, %v2067_v50 }
 0x13d   :  { %940 = vst.msk [vmem:[%s2396_s2 + $0xec] sm:$0xf] %vm880_vm0, %v1454_v10  ;;  %v1021_v23 = vsel %vm945_vm1, %v1830_v6, 0.0  ;;  %v1457_v29 = vpack.c.bf16 %v2093_v16, %v2093_v16  ;;  %v1118_v45 = vmul.f32 %v1841_v18, %v1841_v18  ;;  %v1216_v22 = vsel %vm945_vm1, %v1116_v12, 0.0 }
 0x13e   :  { %v1211_v4 = vadd.f32 %v1210_v63, %v1209_v61  ;;  %v1016_v5 = vadd.f32 %v1015_v1, %v1014_v60  ;;  %v1119_v30 = vmul.f32 %v1881_v46, %v1881_v46  ;;  %938 = vst.msk [vmem:[%s2396_s2 + $0xe4] sm:$0xf] %vm880_vm0, %v1452_v20  ;;  %v1455_v6 = vpack.c.bf16 %v2097_v24, %v2097_v24 }
 0x13f   :  { %943 = vst.msk [vmem:[%s2396_s2 + $0xf8] sm:$0xf] %vm880_vm0, %v1457_v29  ;;  %v1218_v36 = vsel %vm945_vm1, %v1117_v17, 0.0  ;;  %v1023_v38 = vsel %vm945_vm1, %v1841_v18, 0.0  ;;  %v1025_v42 = vsel %vm945_vm1, %v1881_v46, 0.0  ;;  %v1458_v47 = vpack.c.bf16 %v2104_v34, %v2104_v34 }
 0x140   :  { %v1018_v14 = vadd.f32 %v1017_v2, %v1016_v5  ;;  %v1213_v11 = vadd.f32 %v1212_v9, %v1211_v4  ;;  %941 = vst.msk [vmem:[%s2396_s2 + $0xf0] sm:$0xf] %vm880_vm0, %v1455_v6  ;;  %v1456_v52 = vpack.c.bf16 %v2111_v43, %v2111_v43  ;;  %v1220_v56 = vsel %vm945_vm1, %v1118_v45, 0.0 }
 0x141   :  { %v1222_v18 = vsel %vm945_vm1, %v1119_v30, 0.0  ;;  %v1120_v46 = vmul.f32 %v1891_v59, %v1891_v59  ;;  %944 = vst.msk [vmem:[%s2396_s2 + $0xfc] sm:$0xf] %vm880_vm0, %v1458_v47  ;;  %v1121_v41 = vmul.f32 %v1873_v39, %v1873_v39  ;;  %v1027_v60 = vsel %vm945_vm1, %v1891_v59, 0.0 }
 0x142   :  { %v1215_v26 = vadd.f32 %v1214_v49, %v1213_v11  ;;  %v1020_v27 = vadd.f32 %v1019_v19, %v1018_v14  ;;  %942 = vst.msk [vmem:[%s2396_s2 + $0xf4] sm:$0xf] %vm880_vm0, %v1456_v52  ;;  %v1029_v1 = vsel %vm945_vm1, %v1873_v39, 0.0  ;;  %v1122_v2 = vmul.f32 %v1884_v54, %v1884_v54 }
 0x143   :  { %v1224_v3 = vsel %vm945_vm1, %v1120_v46, 0.0  ;;  %v1123_v4 = vmul.f32 %v1921_v21, %v1921_v21  ;;  %v1226_v9 = vsel %vm945_vm1, %v1121_v41, 0.0  ;;  %v1031_v59 = vsel %vm945_vm1, %v1884_v54, 0.0 }
 0x144   :  { %v1022_v32 = vadd.f32 %v1021_v23, %v1020_v27  ;;  %v1217_v35 = vadd.f32 %v1216_v22, %v1215_v26  ;;  %v1033_v49 = vsel %vm945_vm1, %v1921_v21, 0.0  ;;  %v1228_v10 = vsel %vm945_vm1, %v1122_v2, 0.0 }
 0x145   :  { %v1230_v14 = vsel %vm945_vm1, %v1123_v4, 0.0  ;;  %v1124_v11 = vmul.f32 %v1935_v33, %v1935_v33  ;;  %v1125_v20 = vmul.f32 %v1917_v15, %v1917_v15  ;;  %v1035_v54 = vsel %vm945_vm1, %v1935_v33, 0.0 }
 0x146   :  { %v1219_v48 = vadd.f32 %v1218_v36, %v1217_v35  ;;  %v1024_v51 = vadd.f32 %v1023_v38, %v1022_v32  ;;  %v1037_v21 = vsel %vm945_vm1, %v1917_v15, 0.0  ;;  %v1126_v27 = vmul.f32 %v1928_v28, %v1928_v28 }
 0x147   :  { %v1232_v29 = vsel %vm945_vm1, %v1124_v11, 0.0  ;;  %v1127_v45 = vmul.f32 %v1965_v0, %v1965_v0  ;;  %v1234_v6 = vsel %vm945_vm1, %v1125_v20, 0.0  ;;  %v1039_v33 = vsel %vm945_vm1, %v1928_v28, 0.0 }
 0x148   :  { %v1026_v53 = vadd.f32 %v1025_v42, %v1024_v51  ;;  %v1221_v57 = vadd.f32 %v1220_v56, %v1219_v48  ;;  %v1041_v32 = vsel %vm945_vm1, %v1965_v0, 0.0  ;;  %v1236_v36 = vsel %vm945_vm1, %v1126_v27, 0.0 }
 0x149   :  { %v1238_v38 = vsel %vm945_vm1, %v1127_v45, 0.0  ;;  %v1128_v42 = vmul.f32 %v1979_v13, %v1979_v13  ;;  %v1129_v51 = vmul.f32 %v1961_v58, %v1961_v58  ;;  %v1043_v28 = vsel %vm945_vm1, %v1979_v13, 0.0 }
 0x14a   :  { %v1223_v61 = vadd.f32 %v1222_v18, %v1221_v57  ;;  %v1028_v63 = vadd.f32 %v1027_v60, %v1026_v53  ;;  %v1045_v0 = vsel %vm945_vm1, %v1961_v58, 0.0  ;;  %v1130_v18 = vmul.f32 %v1972_v7, %v1972_v7 }
 0x14b   :  { %v1240_v46 = vsel %vm945_vm1, %v1128_v42, 0.0  ;;  %v1131_v53 = vmul.f32 %v2009_v44, %v2009_v44  ;;  %v1242_v60 = vsel %vm945_vm1, %v1129_v51, 0.0  ;;  %v1047_v13 = vsel %vm945_vm1, %v1972_v7, 0.0 }
 0x14c   :  { %v1030_v5 = vadd.f32 %v1029_v1, %v1028_v63  ;;  %v1225_v8 = vadd.f32 %v1224_v3, %v1223_v61  ;;  %v1049_v61 = vsel %vm945_vm1, %v2009_v44, 0.0  ;;  %v1244_v1 = vsel %vm945_vm1, %v1130_v18, 0.0 }
 0x14d   :  { %v1246_v2 = vsel %vm945_vm1, %v1131_v53, 0.0  ;;  %v1132_v3 = vmul.f32 %v2023_v62, %v2023_v62  ;;  %v1051_v7 = vsel %vm945_vm1, %v2023_v62, 0.0  ;;  %v1053_v44 = vsel %vm945_vm1, %v2005_v37, 0.0 }
 0x14e   :  { %v1227_v12 = vadd.f32 %v1226_v9, %v1225_v8  ;;  %v1032_v39 = vadd.f32 %v1031_v59, %v1030_v5  ;;  %v1133_v8 = vmul.f32 %v2005_v37, %v2005_v37  ;;  %v1055_v62 = vsel %vm945_vm1, %v2016_v55, 0.0 }
 0x14f   :  { %v1137_v27 = vmul.f32 %v2049_v25, %v2049_v25 }
 0x150   :  { %v1034_v17 = vadd.f32 %v1033_v49, %v1032_v39  ;;  %v1229_v19 = vadd.f32 %v1228_v10, %v1227_v12  ;;  %v1134_v49 = vmul.f32 %v2016_v55, %v2016_v55  ;;  %v1248_v12 = vsel %vm945_vm1, %v1132_v3, 0.0 }
 0x151   :  { %v1135_v39 = vmul.f32 %v2053_v31, %v2053_v31  ;;  %v1250_v11 = vsel %vm945_vm1, %v1133_v8, 0.0  ;;  %v1059_v55 = vsel %vm945_vm1, %v2067_v50, 0.0 }
 0x152   :  { %v1231_v23 = vadd.f32 %v1230_v14, %v1229_v19  ;;  %v1036_v26 = vadd.f32 %v1035_v54, %v1034_v17  ;;  %v1057_v17 = vsel %vm945_vm1, %v2053_v31, 0.0  ;;  %v1252_v20 = vsel %vm945_vm1, %v1134_v49, 0.0 }
 0x153   :  { %v1254_v54 = vsel %vm945_vm1, %v1135_v39, 0.0  ;;  %v1061_v31 = vsel %vm945_vm1, %v2049_v25, 0.0 }
 0x154   :  { %v1038_v22 = vadd.f32 %v1037_v21, %v1036_v26  ;;  %v1233_v30 = vadd.f32 %v1232_v29, %v1231_v23  ;;  %v1136_v23 = vmul.f32 %v2067_v50, %v2067_v50  ;;  %v1063_v50 = vsel %vm945_vm1, %v2060_v40, 0.0 }
 0x156   :  { %v1235_v35 = vadd.f32 %v1234_v6, %v1233_v30  ;;  %v1040_v15 = vadd.f32 %v1039_v33, %v1038_v22  ;;  %v1138_v22 = vmul.f32 %v2060_v40, %v2060_v40  ;;  %v1256_v30 = vsel %vm945_vm1, %v1136_v23, 0.0 }
 0x157   :  { %v1139_v6 = vmul.f32 %v2097_v24, %v2097_v24  ;;  %v1067_v40 = vsel %vm945_vm1, %v2111_v43, 0.0 }
 0x158   :  { %v1042_v47 = vadd.f32 %v1041_v32, %v1040_v15  ;;  %v1237_v48 = vadd.f32 %v1236_v36, %v1235_v35  ;;  %v1258_v35 = vsel %vm945_vm1, %v1137_v27, 0.0  ;;  %v1065_v15 = vsel %vm945_vm1, %v2097_v24, 0.0 }
 0x159   :  { %v1262_v42 = vsel %vm945_vm1, %v1139_v6, 0.0  ;;  %v1069_v24 = vsel %vm945_vm1, %v2093_v16, 0.0 }
 0x15a   :  { %v1239_v52 = vadd.f32 %v1238_v38, %v1237_v48  ;;  %v1044_v56 = vadd.f32 %v1043_v28, %v1042_v47  ;;  %v1260_v38 = vsel %vm945_vm1, %v1138_v22, 0.0  ;;  %v1140_v47 = vmul.f32 %v2111_v43, %v2111_v43 }
 0x15b   :  { %v1141_v28 = vmul.f32 %v2093_v16, %v2093_v16 }
 0x15c   :  { %v1046_v57 = vadd.f32 %v1045_v0, %v1044_v56  ;;  %v1241_v41 = vadd.f32 %v1240_v46, %v1239_v52  ;;  %v1142_v0 = vmul.f32 %v2104_v34, %v2104_v34  ;;  %v1264_v18 = vsel %vm945_vm1, %v1140_v47, 0.0 }
 0x15e   :  { %v1243_v63 = vadd.f32 %v1242_v60, %v1241_v41  ;;  %v1048_v58 = vadd.f32 %v1047_v13, %v1046_v57  ;;  %v1266_v57 = vsel %vm945_vm1, %v1141_v28, 0.0  ;;  %v1071_v41 = vsel %vm945_vm1, %v2104_v34, 0.0 }
 0x15f   :  { %v1268_v43 = vsel %vm945_vm1, %v1142_v0, 0.0 }
 0x160   :  { %v1050_v4 = vadd.f32 %v1049_v61, %v1048_v58  ;;  %v1245_v5 = vadd.f32 %v1244_v1, %v1243_v63 }
 0x162   :  { %v1247_v9 = vadd.f32 %v1246_v2, %v1245_v5  ;;  %v1052_v59 = vadd.f32 %v1051_v7, %v1050_v4 }
 0x164   :  { %v1054_v10 = vadd.f32 %v1053_v44, %v1052_v59  ;;  %v1249_v14 = vadd.f32 %v1248_v12, %v1247_v9 }
 0x166   :  { %v1251_v19 = vadd.f32 %v1250_v11, %v1249_v14  ;;  %v1056_v37 = vadd.f32 %v1055_v62, %v1054_v10 }
 0x168   :  { %v1058_v26 = vadd.f32 %v1057_v17, %v1056_v37  ;;  %v1253_v21 = vadd.f32 %v1252_v20, %v1251_v19 }
 0x16a   :  { %v1255_v29 = vadd.f32 %v1254_v54, %v1253_v21  ;;  %v1060_v45 = vadd.f32 %v1059_v55, %v1058_v26 }
 0x16c   :  { %v1062_v33 = vadd.f32 %v1061_v31, %v1060_v45  ;;  %v1257_v32 = vadd.f32 %v1256_v30, %v1255_v29 }
 0x16e   :  { %v1259_v36 = vadd.f32 %v1258_v35, %v1257_v32  ;;  %v1064_v25 = vadd.f32 %v1063_v50, %v1062_v33 }
 0x170   :  { %v1066_v48 = vadd.f32 %v1065_v15, %v1064_v25  ;;  %v1261_v51 = vadd.f32 %v1260_v38, %v1259_v36 }
 0x172   :  { %v1263_v52 = vadd.f32 %v1262_v42, %v1261_v51  ;;  %v1068_v56 = vadd.f32 %v1067_v40, %v1066_v48 }
 0x174   :  { %v1070_v46 = vadd.f32 %v1069_v24, %v1068_v56  ;;  %v1265_v53 = vadd.f32 %v1264_v18, %v1263_v52 }
 0x176   :  { %v1072_v60 = vadd.f32 %v1071_v41, %v1070_v46  ;;  %v1267_v13 = vadd.f32 %v1266_v57, %v1265_v53 }
 0x178   :  { %v1073_v61 = vrot.slane %v1072_v60, 4  ;;  %v1269_v63 = vadd.f32 %v1268_v43, %v1267_v13 }
 0x17a   :  { %v1074_v58 = vadd.f32 %v1073_v61, %v1072_v60  ;;  %v1270_v16 = vrot.slane %v1269_v63, 4 }
 0x17c   :  { %v1075_v1 = vrot.slane %v1074_v58, 2  ;;  %v1271_v2 = vadd.f32 %v1270_v16, %v1269_v63 }
 0x17e   :  { %v1076_v3 = vadd.f32 %v1075_v1, %v1074_v58  ;;  %v1272_v4 = vrot.slane %v1271_v2, 2 }
 0x180   :  { %v1077_v5 = vrot.slane %v1076_v3, 1  ;;  %v1273_v8 = vadd.f32 %v1272_v4, %v1271_v2 }
 0x182   :  { %v1078_v7 = vadd.f32 %v1077_v5, %v1076_v3  ;;  %v1274_v9 = vrot.slane %v1273_v8, 1 }
 0x184   :  { %v1275_v59 = vadd.f32 %v1274_v9, %v1273_v8  ;;  %1277 = vst.msk [vmem:[%s2397_s3] sm:$0x1] %vm1276_vm2, %v1078_v7 }
 0x186   :  { %1278 = vst.msk [vmem:[%s2398_s4] sm:$0x1] %vm1276_vm2, %v1275_v59 }

// kernel: discriminator_forward.10
= control target key start
LH: loop header
LB: loop body
LE: loop exit
PB: predicated region body
PF: predicated region fallthrough
CT: control target
= control target key end

     0   :  { %vm732_vm0 = vcmask 125952   ;;  %s1608_s0 = inlined_call_operand.vmem [shape: bf16[512,16], index: 0, kind: input, shape index: {}]   ;;  %s1609_s1 = inlined_call_operand.vmem [shape: f32[1,16], index: 1, kind: input, shape index: {}]   ;;  %s1610_s2 = inlined_call_operand.vmem [shape: f32[1,16], index: 2, kind: input, shape index: {}]   ;;  %s1611_s3 = inlined_call_operand.vmem [shape: bf16[512,16], index: 3, kind: output, shape index: {}]  }
   0x1   :  { %v932_v0 = vld [vmem:[%s1608_s0] sm:$0xff]   ;;  %v1059_v4 = vld [vmem:[%s1608_s0 + $0x8] sm:$0xff]   ;;  %v1060_v5 = vld [vmem:[%s1608_s0 + $0x10] sm:$0xff]  }
   0x2   :  { %v1118_v1 = vld [vmem:[%s1609_s1] ss:$0 sm:$0xff]  ;;  %v933_v2 = vunpack.c.l.bf16 %v932_v0  ;;  %v934_v3 = vunpack.c.h.bf16 %v932_v0  ;;  %v1061_v6 = vld [vmem:[%s1608_s0 + $0x18] sm:$0xff]   ;;  %v937_v8 = vunpack.c.l.bf16 %v1059_v4  ;;  %v938_v9 = vunpack.c.h.bf16 %v1059_v4  ;;  %v1063_v40 = vld [vmem:[%s1608_s0 + $0x28] sm:$0xff]  }
   0x3   :  { %v1132_v7 = vld [vmem:[%s1610_s2] ss:$0 sm:$0xff]  ;;  %v941_v10 = vunpack.c.l.bf16 %v1060_v5  ;;  %v942_v11 = vunpack.c.h.bf16 %v1060_v5  ;;  %v945_v14 = vunpack.c.l.bf16 %v1061_v6  ;;  %v946_v15 = vunpack.c.h.bf16 %v1061_v6  ;;  %v1064_v52 = vld [vmem:[%s1608_s0 + $0x30] sm:$0xff]  }
   0x4   :  { %v149_v12 = vmul.f32 %v933_v2, %v1118_v1  ;;  %v150_v13 = vmul.f32 %v934_v3, %v1118_v1  ;;  %v151_v16 = vmul.f32 %v937_v8, %v1118_v1  ;;  %v152_v17 = vmul.f32 %v938_v9, %v1118_v1  ;;  %v1062_v39 = vld [vmem:[%s1608_s0 + $0x20] sm:$0xff]  }
   0x5   :  { %v153_v18 = vmul.f32 %v941_v10, %v1118_v1  ;;  %v154_v19 = vmul.f32 %v942_v11, %v1118_v1  ;;  %v155_v22 = vmul.f32 %v945_v14, %v1118_v1  ;;  %v156_v23 = vmul.f32 %v946_v15, %v1118_v1 }
   0x6   :  { %v220_v20 = vadd.f32 %v1132_v7, %v149_v12  ;;  %v221_v21 = vadd.f32 %v1132_v7, %v150_v13  ;;  %v222_v24 = vadd.f32 %v1132_v7, %v151_v16  ;;  %v223_v25 = vadd.f32 %v1132_v7, %v152_v17  ;;  %v1065_v17 = vld [vmem:[%s1608_s0 + $0x38] sm:$0xff]  }
   0x7   :  { %v224_v26 = vadd.f32 %v1132_v7, %v153_v18  ;;  %v225_v27 = vadd.f32 %v1132_v7, %v154_v19  ;;  %v226_v46 = vadd.f32 %v1132_v7, %v155_v22  ;;  %v227_v47 = vadd.f32 %v1132_v7, %v156_v23  ;;  %v1066_v18 = vld [vmem:[%s1608_s0 + $0x40] sm:$0xff]   ;;  %v1067_v23 = vld [vmem:[%s1608_s0 + $0x48] sm:$0xff]  }
   0x8   :  { %vm284_vm1 = vcmp.gt.f32.partialorder %v220_v20, 0.0  ;;  %v348_v28 = vmul.f32 0.2, %v220_v20  ;;  %vm285_vm2 = vcmp.gt.f32.partialorder %v221_v21, 0.0  ;;  %v349_v29 = vmul.f32 0.2, %v221_v21 }
   0x9   :  { %vm286_vm3 = vcmp.gt.f32.partialorder %v222_v24, 0.0  ;;  %v350_v30 = vmul.f32 0.2, %v222_v24  ;;  %vm287_vm4 = vcmp.gt.f32.partialorder %v223_v25, 0.0  ;;  %v351_v31 = vmul.f32 0.2, %v223_v25 }
   0xa   :  { %v412_v32 = vsel %vm284_vm1, %v220_v20, %v348_v28  ;;  %v413_v33 = vsel %vm285_vm2, %v221_v21, %v349_v29  ;;  %vm288_vm5 = vcmp.gt.f32.partialorder %v224_v26, 0.0  ;;  %v352_v34 = vmul.f32 0.2, %v224_v26 }
   0xb   :  { %v867_v35 = vpack.c.bf16 %v412_v32, %v412_v32  ;;  %v868_v36 = vpack.c.bf16 %v413_v33, %v413_v33  ;;  %v414_v37 = vsel %vm286_vm3, %v222_v24, %v350_v30  ;;  %v415_v38 = vsel %vm287_vm4, %v223_v25, %v351_v31 }
   0xc   :  { %v869_v41 = vpack.c.bf16 %v414_v37, %v414_v37  ;;  %v870_v42 = vpack.c.bf16 %v415_v38, %v415_v38  ;;  %v416_v43 = vsel %vm288_vm5, %v224_v26, %v352_v34  ;;  %vm289_vm6 = vcmp.gt.f32.partialorder %v225_v27, 0.0 }
   0xd   :  { %733 = vst.msk [vmem:[%s1611_s3] sm:$0xf] %vm732_vm0, %v867_v35  ;;  %734 = vst.msk [vmem:[%s1611_s3 + $0x4] sm:$0xf] %vm732_vm0, %v868_v36  ;;  %v871_v44 = vpack.c.bf16 %v416_v43, %v416_v43  ;;  %v353_v45 = vmul.f32 0.2, %v225_v27  ;;  %v949_v48 = vunpack.c.l.bf16 %v1062_v39  ;;  %v950_v49 = vunpack.c.h.bf16 %v1062_v39 }
   0xe   :  { %735 = vst.msk [vmem:[%s1611_s3 + $0x8] sm:$0xf] %vm732_vm0, %v869_v41  ;;  %736 = vst.msk [vmem:[%s1611_s3 + $0xc] sm:$0xf] %vm732_vm0, %v870_v42  ;;  %v953_v50 = vunpack.c.l.bf16 %v1063_v40  ;;  %v954_v51 = vunpack.c.h.bf16 %v1063_v40  ;;  %vm290_vm7 = vcmp.gt.f32.partialorder %v226_v46, 0.0  ;;  %vm291_vm8 = vcmp.gt.f32.partialorder %v227_v47, 0.0 }
   0xf   :  { %737 = vst.msk [vmem:[%s1611_s3 + $0x10] sm:$0xf] %vm732_vm0, %v871_v44  ;;  %v417_v53 = vsel %vm289_vm6, %v225_v27, %v353_v45  ;;  %v354_v54 = vmul.f32 0.2, %v226_v46  ;;  %v355_v56 = vmul.f32 0.2, %v227_v47  ;;  %v157_v57 = vmul.f32 %v949_v48, %v1118_v1 }
  0x10   :  { %v872_v55 = vpack.c.bf16 %v417_v53, %v417_v53  ;;  %v158_v58 = vmul.f32 %v950_v49, %v1118_v1  ;;  %v159_v60 = vmul.f32 %v953_v50, %v1118_v1  ;;  %v160_v61 = vmul.f32 %v954_v51, %v1118_v1 }
  0x11   :  { %v418_v59 = vsel %vm290_vm7, %v226_v46, %v354_v54  ;;  %v957_v62 = vunpack.c.l.bf16 %v1064_v52  ;;  %v419_v0 = vsel %vm291_vm8, %v227_v47, %v355_v56  ;;  %v228_v2 = vadd.f32 %v1132_v7, %v157_v57  ;;  %v1068_v57 = vld [vmem:[%s1608_s0 + $0x50] sm:$0xff]  }
  0x12   :  { %738 = vst.msk [vmem:[%s1611_s3 + $0x14] sm:$0xf] %vm732_vm0, %v872_v55  ;;  %v873_v63 = vpack.c.bf16 %v418_v59, %v418_v59  ;;  %v229_v3 = vadd.f32 %v1132_v7, %v158_v58  ;;  %v874_v4 = vpack.c.bf16 %v419_v0, %v419_v0  ;;  %v230_v5 = vadd.f32 %v1132_v7, %v159_v60 }
  0x13   :  { %v231_v6 = vadd.f32 %v1132_v7, %v160_v61  ;;  %v161_v8 = vmul.f32 %v957_v62, %v1118_v1  ;;  %vm292_vm9 = vcmp.gt.f32.partialorder %v228_v2, 0.0  ;;  %v356_v9 = vmul.f32 0.2, %v228_v2  ;;  %v1069_v62 = vld [vmem:[%s1608_s0 + $0x58] sm:$0xff]  }
  0x14   :  { %739 = vst.msk [vmem:[%s1611_s3 + $0x18] sm:$0xf] %vm732_vm0, %v873_v63  ;;  %vm293_vm10 = vcmp.gt.f32.partialorder %v229_v3, 0.0  ;;  %v357_v10 = vmul.f32 0.2, %v229_v3  ;;  %vm294_vm11 = vcmp.gt.f32.partialorder %v230_v5, 0.0  ;;  %v958_v16 = vunpack.c.h.bf16 %v1064_v52 }
  0x15   :  { %740 = vst.msk [vmem:[%s1611_s3 + $0x1c] sm:$0xf] %vm732_vm0, %v874_v4  ;;  %v358_v11 = vmul.f32 0.2, %v230_v5  ;;  %vm295_vm12 = vcmp.gt.f32.partialorder %v231_v6, 0.0  ;;  %v420_v13 = vsel %vm292_vm9, %v228_v2, %v356_v9  ;;  %v232_v15 = vadd.f32 %v1132_v7, %v161_v8 }
  0x16   :  { %v359_v12 = vmul.f32 0.2, %v231_v6  ;;  %v421_v14 = vsel %vm293_vm10, %v229_v3, %v357_v10  ;;  %v875_v19 = vpack.c.bf16 %v420_v13, %v420_v13  ;;  %v162_v27 = vmul.f32 %v958_v16, %v1118_v1  ;;  %v1070_v3 = vld [vmem:[%s1608_s0 + $0x60] sm:$0xff]   ;;  %v1071_v13 = vld [vmem:[%s1608_s0 + $0x68] sm:$0xff]  }
  0x17   :  { %v876_v20 = vpack.c.bf16 %v421_v14, %v421_v14  ;;  %v422_v21 = vsel %vm294_vm11, %v230_v5, %v358_v11  ;;  %vm296_vm13 = vcmp.gt.f32.partialorder %v232_v15, 0.0  ;;  %v360_v26 = vmul.f32 0.2, %v232_v15 }
  0x18   :  { %v423_v22 = vsel %vm295_vm12, %v231_v6, %v359_v12  ;;  %v877_v24 = vpack.c.bf16 %v422_v21, %v422_v21  ;;  %741 = vst.msk [vmem:[%s1611_s3 + $0x20] sm:$0xf] %vm732_vm0, %v875_v19  ;;  %v961_v28 = vunpack.c.l.bf16 %v1065_v17  ;;  %v962_v29 = vunpack.c.h.bf16 %v1065_v17 }
  0x19   :  { %v878_v25 = vpack.c.bf16 %v423_v22, %v423_v22  ;;  %742 = vst.msk [vmem:[%s1611_s3 + $0x24] sm:$0xf] %vm732_vm0, %v876_v20  ;;  %v965_v30 = vunpack.c.l.bf16 %v1066_v18  ;;  %v424_v31 = vsel %vm296_vm13, %v232_v15, %v360_v26  ;;  %v966_v32 = vunpack.c.h.bf16 %v1066_v18 }
  0x1a   :  { %743 = vst.msk [vmem:[%s1611_s3 + $0x28] sm:$0xf] %vm732_vm0, %v877_v24  ;;  %v969_v33 = vunpack.c.l.bf16 %v1067_v23  ;;  %v970_v34 = vunpack.c.h.bf16 %v1067_v23  ;;  %v879_v35 = vpack.c.bf16 %v424_v31, %v424_v31  ;;  %v233_v36 = vadd.f32 %v1132_v7, %v162_v27 }
  0x1b   :  { %744 = vst.msk [vmem:[%s1611_s3 + $0x2c] sm:$0xf] %vm732_vm0, %v878_v25  ;;  %v163_v37 = vmul.f32 %v961_v28, %v1118_v1  ;;  %v164_v38 = vmul.f32 %v962_v29, %v1118_v1  ;;  %v165_v39 = vmul.f32 %v965_v30, %v1118_v1  ;;  %v166_v40 = vmul.f32 %v966_v32, %v1118_v1 }
  0x1c   :  { %v167_v41 = vmul.f32 %v969_v33, %v1118_v1  ;;  %v168_v42 = vmul.f32 %v970_v34, %v1118_v1  ;;  %745 = vst.msk [vmem:[%s1611_s3 + $0x30] sm:$0xf] %vm732_vm0, %v879_v35  ;;  %vm297_vm14 = vcmp.gt.f32.partialorder %v233_v36, 0.0  ;;  %v361_v43 = vmul.f32 0.2, %v233_v36 }
  0x1d   :  { %v234_v44 = vadd.f32 %v1132_v7, %v163_v37  ;;  %v235_v45 = vadd.f32 %v1132_v7, %v164_v38  ;;  %v236_v46 = vadd.f32 %v1132_v7, %v165_v39  ;;  %v237_v47 = vadd.f32 %v1132_v7, %v166_v40 }
  0x1e   :  { %v238_v48 = vadd.f32 %v1132_v7, %v167_v41  ;;  %v239_v49 = vadd.f32 %v1132_v7, %v168_v42  ;;  %v425_v50 = vsel %vm297_vm14, %v233_v36, %v361_v43  ;;  %v973_v8 = vunpack.c.l.bf16 %v1068_v57  ;;  %v1072_v41 = vld [vmem:[%s1608_s0 + $0x70] sm:$0xff]  }
  0x1f   :  { %vm298_vm15 = vcmp.gt.f32.partialorder %v234_v44, 0.0  ;;  %v362_v51 = vmul.f32 0.2, %v234_v44  ;;  %vm299_vm1 = vcmp.gt.f32.partialorder %v235_v45, 0.0  ;;  %v880_v52 = vpack.c.bf16 %v425_v50, %v425_v50 }
  0x20   :  { %v363_v53 = vmul.f32 0.2, %v235_v45  ;;  %vm300_vm2 = vcmp.gt.f32.partialorder %v236_v46, 0.0  ;;  %v364_v54 = vmul.f32 0.2, %v236_v46  ;;  %vm301_vm3 = vcmp.gt.f32.partialorder %v237_v47, 0.0 }
  0x21   :  { %v426_v55 = vsel %vm298_vm15, %v234_v44, %v362_v51  ;;  %v365_v56 = vmul.f32 0.2, %v237_v47  ;;  %vm302_vm4 = vcmp.gt.f32.partialorder %v238_v48, 0.0  ;;  %746 = vst.msk [vmem:[%s1611_s3 + $0x34] sm:$0xf] %vm732_vm0, %v880_v52  ;;  %vm303_vm5 = vcmp.gt.f32.partialorder %v239_v49, 0.0 }
  0x22   :  { %v881_v58 = vpack.c.bf16 %v426_v55, %v426_v55  ;;  %v427_v59 = vsel %vm299_vm1, %v235_v45, %v363_v53  ;;  %v428_v60 = vsel %vm300_vm2, %v236_v46, %v364_v54  ;;  %v366_v61 = vmul.f32 0.2, %v238_v48  ;;  %v1073_v45 = vld [vmem:[%s1608_s0 + $0x78] sm:$0xff]  }
  0x23   :  { %v882_v63 = vpack.c.bf16 %v427_v59, %v427_v59  ;;  %v883_v0 = vpack.c.bf16 %v428_v60, %v428_v60  ;;  %v429_v2 = vsel %vm301_vm3, %v237_v47, %v365_v56  ;;  %v367_v6 = vmul.f32 0.2, %v239_v49 }
  0x24   :  { %747 = vst.msk [vmem:[%s1611_s3 + $0x38] sm:$0xf] %vm732_vm0, %v881_v58  ;;  %v884_v4 = vpack.c.bf16 %v429_v2, %v429_v2  ;;  %v430_v5 = vsel %vm302_vm4, %v238_v48, %v366_v61  ;;  %v974_v10 = vunpack.c.h.bf16 %v1068_v57  ;;  %v977_v11 = vunpack.c.l.bf16 %v1069_v62 }
  0x25   :  { %748 = vst.msk [vmem:[%s1611_s3 + $0x3c] sm:$0xf] %vm732_vm0, %v882_v63  ;;  %749 = vst.msk [vmem:[%s1611_s3 + $0x40] sm:$0xf] %vm732_vm0, %v883_v0  ;;  %v885_v9 = vpack.c.bf16 %v430_v5, %v430_v5  ;;  %v978_v12 = vunpack.c.h.bf16 %v1069_v62  ;;  %v431_v14 = vsel %vm303_vm5, %v239_v49, %v367_v6  ;;  %v169_v15 = vmul.f32 %v973_v8, %v1118_v1  ;;  %v1074_v62 = vld [vmem:[%s1608_s0 + $0x80] sm:$0xff]  }
  0x26   :  { %750 = vst.msk [vmem:[%s1611_s3 + $0x44] sm:$0xf] %vm732_vm0, %v884_v4  ;;  %v981_v16 = vunpack.c.l.bf16 %v1070_v3  ;;  %v982_v17 = vunpack.c.h.bf16 %v1070_v3  ;;  %v886_v18 = vpack.c.bf16 %v431_v14, %v431_v14  ;;  %v170_v19 = vmul.f32 %v974_v10, %v1118_v1 }
  0x27   :  { %751 = vst.msk [vmem:[%s1611_s3 + $0x48] sm:$0xf] %vm732_vm0, %v885_v9  ;;  %v171_v20 = vmul.f32 %v977_v11, %v1118_v1  ;;  %v172_v21 = vmul.f32 %v978_v12, %v1118_v1  ;;  %v240_v22 = vadd.f32 %v1132_v7, %v169_v15  ;;  %v985_v25 = vunpack.c.l.bf16 %v1071_v13 }
  0x28   :  { %v173_v23 = vmul.f32 %v981_v16, %v1118_v1  ;;  %v174_v24 = vmul.f32 %v982_v17, %v1118_v1  ;;  %752 = vst.msk [vmem:[%s1611_s3 + $0x4c] sm:$0xf] %vm732_vm0, %v886_v18  ;;  %v241_v26 = vadd.f32 %v1132_v7, %v170_v19  ;;  %v986_v29 = vunpack.c.h.bf16 %v1071_v13  ;;  %v1075_v16 = vld [vmem:[%s1608_s0 + $0x88] sm:$0xff]  }
  0x29   :  { %v242_v27 = vadd.f32 %v1132_v7, %v171_v20  ;;  %v243_v28 = vadd.f32 %v1132_v7, %v172_v21  ;;  %vm304_vm6 = vcmp.gt.f32.partialorder %v240_v22, 0.0  ;;  %v368_v30 = vmul.f32 0.2, %v240_v22 }
  0x2a   :  { %v244_v31 = vadd.f32 %v1132_v7, %v173_v23  ;;  %v245_v32 = vadd.f32 %v1132_v7, %v174_v24  ;;  %vm305_vm7 = vcmp.gt.f32.partialorder %v241_v26, 0.0  ;;  %v369_v33 = vmul.f32 0.2, %v241_v26  ;;  %v1076_v24 = vld [vmem:[%s1608_s0 + $0x90] sm:$0xff]  }
  0x2b   :  { %vm306_vm8 = vcmp.gt.f32.partialorder %v242_v27, 0.0  ;;  %v370_v34 = vmul.f32 0.2, %v242_v27  ;;  %v432_v35 = vsel %vm304_vm6, %v240_v22, %v368_v30  ;;  %vm307_vm9 = vcmp.gt.f32.partialorder %v243_v28, 0.0 }
  0x2c   :  { %v371_v36 = vmul.f32 0.2, %v243_v28  ;;  %vm308_vm10 = vcmp.gt.f32.partialorder %v244_v31, 0.0  ;;  %v887_v37 = vpack.c.bf16 %v432_v35, %v432_v35  ;;  %v433_v38 = vsel %vm305_vm7, %v241_v26, %v369_v33 }
  0x2d   :  { %v434_v39 = vsel %vm306_vm8, %v242_v27, %v370_v34  ;;  %v372_v40 = vmul.f32 0.2, %v244_v31  ;;  %v888_v42 = vpack.c.bf16 %v433_v38, %v433_v38  ;;  %vm309_vm11 = vcmp.gt.f32.partialorder %v245_v32, 0.0 }
  0x2e   :  { %v889_v43 = vpack.c.bf16 %v434_v39, %v434_v39  ;;  %v435_v44 = vsel %vm307_vm9, %v243_v28, %v371_v36  ;;  %753 = vst.msk [vmem:[%s1611_s3 + $0x50] sm:$0xf] %vm732_vm0, %v887_v37  ;;  %v373_v48 = vmul.f32 0.2, %v245_v32  ;;  %v175_v49 = vmul.f32 %v985_v25, %v1118_v1 }
  0x2f   :  { %v890_v46 = vpack.c.bf16 %v435_v44, %v435_v44  ;;  %v436_v47 = vsel %vm308_vm10, %v244_v31, %v372_v40  ;;  %754 = vst.msk [vmem:[%s1611_s3 + $0x54] sm:$0xf] %vm732_vm0, %v888_v42  ;;  %v176_v51 = vmul.f32 %v986_v29, %v1118_v1  ;;  %v989_v52 = vunpack.c.l.bf16 %v1072_v41  ;;  %v1359_v29 = vld [vmem:[%s1608_s0 + $0x98] sm:$0xff]  }
  0x30   :  { %755 = vst.msk [vmem:[%s1611_s3 + $0x58] sm:$0xf] %vm732_vm0, %v889_v43  ;;  %v891_v50 = vpack.c.bf16 %v436_v47, %v436_v47  ;;  %v990_v53 = vunpack.c.h.bf16 %v1072_v41  ;;  %v437_v54 = vsel %vm309_vm11, %v245_v32, %v373_v48  ;;  %v246_v55 = vadd.f32 %v1132_v7, %v175_v49 }
  0x31   :  { %756 = vst.msk [vmem:[%s1611_s3 + $0x5c] sm:$0xf] %vm732_vm0, %v890_v46  ;;  %v993_v56 = vunpack.c.l.bf16 %v1073_v45  ;;  %v994_v57 = vunpack.c.h.bf16 %v1073_v45  ;;  %v892_v58 = vpack.c.bf16 %v437_v54, %v437_v54  ;;  %v247_v59 = vadd.f32 %v1132_v7, %v176_v51 }
  0x32   :  { %757 = vst.msk [vmem:[%s1611_s3 + $0x60] sm:$0xf] %vm732_vm0, %v891_v50  ;;  %v177_v60 = vmul.f32 %v989_v52, %v1118_v1  ;;  %v178_v61 = vmul.f32 %v990_v53, %v1118_v1  ;;  %vm310_vm12 = vcmp.gt.f32.partialorder %v246_v55, 0.0  ;;  %v374_v63 = vmul.f32 0.2, %v246_v55 }
  0x33   :  { %v179_v0 = vmul.f32 %v993_v56, %v1118_v1  ;;  %v180_v2 = vmul.f32 %v994_v57, %v1118_v1  ;;  %758 = vst.msk [vmem:[%s1611_s3 + $0x64] sm:$0xf] %vm732_vm0, %v892_v58  ;;  %vm311_vm13 = vcmp.gt.f32.partialorder %v247_v59, 0.0  ;;  %v375_v3 = vmul.f32 0.2, %v247_v59  ;;  %v1078_v58 = vld [vmem:[%s1608_s0 + $0xa0] sm:$0xff]  }
  0x34   :  { %v248_v4 = vadd.f32 %v1132_v7, %v177_v60  ;;  %v249_v5 = vadd.f32 %v1132_v7, %v178_v61  ;;  %v438_v6 = vsel %vm310_vm12, %v246_v55, %v374_v63  ;;  %v997_v10 = vunpack.c.l.bf16 %v1074_v62 }
  0x35   :  { %v250_v8 = vadd.f32 %v1132_v7, %v179_v0  ;;  %v251_v9 = vadd.f32 %v1132_v7, %v180_v2  ;;  %v893_v11 = vpack.c.bf16 %v438_v6, %v438_v6  ;;  %v439_v12 = vsel %vm311_vm13, %v247_v59, %v375_v3  ;;  %v1080_v6 = vld [vmem:[%s1608_s0 + $0xb0] sm:$0xff]  }
  0x36   :  { %vm312_vm14 = vcmp.gt.f32.partialorder %v248_v4, 0.0  ;;  %v376_v13 = vmul.f32 0.2, %v248_v4  ;;  %v894_v14 = vpack.c.bf16 %v439_v12, %v439_v12  ;;  %vm313_vm15 = vcmp.gt.f32.partialorder %v249_v5, 0.0  ;;  %v1081_v12 = vld [vmem:[%s1608_s0 + $0xb8] sm:$0xff]  }
  0x37   :  { %v377_v15 = vmul.f32 0.2, %v249_v5  ;;  %vm314_vm1 = vcmp.gt.f32.partialorder %v250_v8, 0.0  ;;  %759 = vst.msk [vmem:[%s1611_s3 + $0x68] sm:$0xf] %vm732_vm0, %v893_v11  ;;  %vm315_vm2 = vcmp.gt.f32.partialorder %v251_v9, 0.0  ;;  %v181_v22 = vmul.f32 %v997_v10, %v1118_v1 }
  0x38   :  { %v440_v17 = vsel %vm312_vm14, %v248_v4, %v376_v13  ;;  %v378_v18 = vmul.f32 0.2, %v250_v8  ;;  %v379_v19 = vmul.f32 0.2, %v251_v9  ;;  %760 = vst.msk [vmem:[%s1611_s3 + $0x6c] sm:$0xf] %vm732_vm0, %v894_v14  ;;  %v998_v23 = vunpack.c.h.bf16 %v1074_v62 }
  0x39   :  { %v895_v20 = vpack.c.bf16 %v440_v17, %v440_v17  ;;  %v441_v21 = vsel %vm313_vm15, %v249_v5, %v377_v15  ;;  %v1001_v28 = vunpack.c.l.bf16 %v1075_v16  ;;  %v252_v32 = vadd.f32 %v1132_v7, %v181_v22  ;;  %v1079_v5 = vld [vmem:[%s1608_s0 + $0xa8] sm:$0xff]  }
  0x3a   :  { %v896_v25 = vpack.c.bf16 %v441_v21, %v441_v21  ;;  %v442_v26 = vsel %vm314_vm1, %v250_v8, %v378_v18  ;;  %v443_v27 = vsel %vm315_vm2, %v251_v9, %v379_v19  ;;  %v182_v33 = vmul.f32 %v998_v23, %v1118_v1 }
  0x3b   :  { %761 = vst.msk [vmem:[%s1611_s3 + $0x70] sm:$0xf] %vm732_vm0, %v895_v20  ;;  %v897_v30 = vpack.c.bf16 %v442_v26, %v442_v26  ;;  %v898_v31 = vpack.c.bf16 %v443_v27, %v443_v27  ;;  %v183_v34 = vmul.f32 %v1001_v28, %v1118_v1  ;;  %v1002_v35 = vunpack.c.h.bf16 %v1075_v16 }
  0x3c   :  { %762 = vst.msk [vmem:[%s1611_s3 + $0x74] sm:$0xf] %vm732_vm0, %v896_v25  ;;  %v1005_v36 = vunpack.c.l.bf16 %v1076_v24  ;;  %v1006_v37 = vunpack.c.h.bf16 %v1076_v24  ;;  %vm316_vm3 = vcmp.gt.f32.partialorder %v252_v32, 0.0  ;;  %v380_v38 = vmul.f32 0.2, %v252_v32 }
  0x3d   :  { %763 = vst.msk [vmem:[%s1611_s3 + $0x78] sm:$0xf] %vm732_vm0, %v897_v30  ;;  %764 = vst.msk [vmem:[%s1611_s3 + $0x7c] sm:$0xf] %vm732_vm0, %v898_v31  ;;  %v253_v39 = vadd.f32 %v1132_v7, %v182_v33  ;;  %v1009_v40 = vunpack.c.l.bf16 %v1359_v29  ;;  %v254_v41 = vadd.f32 %v1132_v7, %v183_v34  ;;  %v184_v42 = vmul.f32 %v1002_v35, %v1118_v1 }
  0x3e   :  { %v185_v43 = vmul.f32 %v1005_v36, %v1118_v1  ;;  %v186_v44 = vmul.f32 %v1006_v37, %v1118_v1  ;;  %v444_v45 = vsel %vm316_vm3, %v252_v32, %v380_v38  ;;  %v1010_v3 = vunpack.c.h.bf16 %v1359_v29 }
  0x3f   :  { %vm317_vm4 = vcmp.gt.f32.partialorder %v253_v39, 0.0  ;;  %v381_v46 = vmul.f32 0.2, %v253_v39  ;;  %v187_v47 = vmul.f32 %v1009_v40, %v1118_v1  ;;  %v899_v48 = vpack.c.bf16 %v444_v45, %v444_v45 }
  0x40   :  { %vm318_vm5 = vcmp.gt.f32.partialorder %v254_v41, 0.0  ;;  %v382_v49 = vmul.f32 0.2, %v254_v41  ;;  %v255_v50 = vadd.f32 %v1132_v7, %v184_v42  ;;  %v256_v52 = vadd.f32 %v1132_v7, %v185_v43 }
  0x41   :  { %v445_v51 = vsel %vm317_vm4, %v253_v39, %v381_v46  ;;  %v257_v53 = vadd.f32 %v1132_v7, %v186_v44  ;;  %v258_v54 = vadd.f32 %v1132_v7, %v187_v47  ;;  %765 = vst.msk [vmem:[%s1611_s3 + $0x80] sm:$0xf] %vm732_vm0, %v899_v48  ;;  %v1013_v4 = vunpack.c.l.bf16 %v1078_v58 }
  0x42   :  { %v900_v55 = vpack.c.bf16 %v445_v51, %v445_v51  ;;  %v446_v56 = vsel %vm318_vm5, %v254_v41, %v382_v49  ;;  %vm319_vm6 = vcmp.gt.f32.partialorder %v255_v50, 0.0  ;;  %v383_v57 = vmul.f32 0.2, %v255_v50  ;;  %v1082_v41 = vld [vmem:[%s1608_s0 + $0xc0] sm:$0xff]  }
  0x43   :  { %v901_v59 = vpack.c.bf16 %v446_v56, %v446_v56  ;;  %vm320_vm7 = vcmp.gt.f32.partialorder %v256_v52, 0.0  ;;  %v384_v60 = vmul.f32 0.2, %v256_v52  ;;  %vm321_vm8 = vcmp.gt.f32.partialorder %v257_v53, 0.0 }
  0x44   :  { %766 = vst.msk [vmem:[%s1611_s3 + $0x84] sm:$0xf] %vm732_vm0, %v900_v55  ;;  %v447_v61 = vsel %vm319_vm6, %v255_v50, %v383_v57  ;;  %v385_v62 = vmul.f32 0.2, %v257_v53  ;;  %vm322_vm9 = vcmp.gt.f32.partialorder %v258_v54, 0.0  ;;  %v1014_v11 = vunpack.c.h.bf16 %v1078_v58 }
  0x45   :  { %v386_v63 = vmul.f32 0.2, %v258_v54  ;;  %767 = vst.msk [vmem:[%s1611_s3 + $0x88] sm:$0xf] %vm732_vm0, %v901_v59  ;;  %v902_v0 = vpack.c.bf16 %v447_v61, %v447_v61  ;;  %v448_v2 = vsel %vm320_vm7, %v256_v52, %v384_v60  ;;  %v188_v15 = vmul.f32 %v1010_v3, %v1118_v1  ;;  %v1083_v52 = vld [vmem:[%s1608_s0 + $0xc8] sm:$0xff]  }
  0x46   :  { %v903_v8 = vpack.c.bf16 %v448_v2, %v448_v2  ;;  %v449_v9 = vsel %vm321_vm8, %v257_v53, %v385_v62  ;;  %v189_v16 = vmul.f32 %v1013_v4, %v1118_v1  ;;  %v190_v17 = vmul.f32 %v1014_v11, %v1118_v1 }
  0x47   :  { %v450_v10 = vsel %vm322_vm9, %v258_v54, %v386_v63  ;;  %768 = vst.msk [vmem:[%s1611_s3 + $0x8c] sm:$0xf] %vm732_vm0, %v902_v0  ;;  %v904_v13 = vpack.c.bf16 %v449_v9, %v449_v9  ;;  %v1017_v18 = vunpack.c.l.bf16 %v1079_v5  ;;  %v1018_v19 = vunpack.c.h.bf16 %v1079_v5  ;;  %v1084_v9 = vld [vmem:[%s1608_s0 + $0xd0] sm:$0xff]  }
  0x48   :  { %v905_v14 = vpack.c.bf16 %v450_v10, %v450_v10  ;;  %769 = vst.msk [vmem:[%s1611_s3 + $0x90] sm:$0xf] %vm732_vm0, %v903_v8  ;;  %v1021_v20 = vunpack.c.l.bf16 %v1080_v6  ;;  %v259_v21 = vadd.f32 %v1132_v7, %v188_v15  ;;  %v260_v22 = vadd.f32 %v1132_v7, %v189_v16 }
  0x49   :  { %770 = vst.msk [vmem:[%s1611_s3 + $0x94] sm:$0xf] %vm732_vm0, %v904_v13  ;;  %v1022_v23 = vunpack.c.h.bf16 %v1080_v6  ;;  %v1025_v24 = vunpack.c.l.bf16 %v1081_v12  ;;  %v261_v25 = vadd.f32 %v1132_v7, %v190_v17  ;;  %v191_v26 = vmul.f32 %v1017_v18, %v1118_v1 }
  0x4a   :  { %771 = vst.msk [vmem:[%s1611_s3 + $0x98] sm:$0xf] %vm732_vm0, %v905_v14  ;;  %v192_v27 = vmul.f32 %v1018_v19, %v1118_v1  ;;  %v193_v28 = vmul.f32 %v1021_v20, %v1118_v1  ;;  %vm323_vm10 = vcmp.gt.f32.partialorder %v259_v21, 0.0  ;;  %v387_v29 = vmul.f32 0.2, %v259_v21 }
  0x4b   :  { %vm324_vm11 = vcmp.gt.f32.partialorder %v260_v22, 0.0  ;;  %v388_v30 = vmul.f32 0.2, %v260_v22  ;;  %vm325_vm12 = vcmp.gt.f32.partialorder %v261_v25, 0.0  ;;  %v389_v31 = vmul.f32 0.2, %v261_v25 }
  0x4c   :  { %v262_v32 = vadd.f32 %v1132_v7, %v191_v26  ;;  %v263_v33 = vadd.f32 %v1132_v7, %v192_v27  ;;  %v451_v34 = vsel %vm323_vm10, %v259_v21, %v387_v29  ;;  %v264_v36 = vadd.f32 %v1132_v7, %v193_v28 }
  0x4d   :  { %v452_v35 = vsel %vm324_vm11, %v260_v22, %v388_v30  ;;  %v194_v37 = vmul.f32 %v1022_v23, %v1118_v1  ;;  %v906_v38 = vpack.c.bf16 %v451_v34, %v451_v34  ;;  %v453_v40 = vsel %vm325_vm12, %v261_v25, %v389_v31  ;;  %v1085_v23 = vld [vmem:[%s1608_s0 + $0xd8] sm:$0xff]   ;;  %v1086_v30 = vld [vmem:[%s1608_s0 + $0xe0] sm:$0xff]  }
  0x4e   :  { %v907_v39 = vpack.c.bf16 %v452_v35, %v452_v35  ;;  %vm326_vm13 = vcmp.gt.f32.partialorder %v262_v32, 0.0  ;;  %v908_v42 = vpack.c.bf16 %v453_v40, %v453_v40  ;;  %v390_v43 = vmul.f32 0.2, %v262_v32 }
  0x4f   :  { %vm327_vm14 = vcmp.gt.f32.partialorder %v263_v33, 0.0  ;;  %v391_v44 = vmul.f32 0.2, %v263_v33  ;;  %772 = vst.msk [vmem:[%s1611_s3 + $0x9c] sm:$0xf] %vm732_vm0, %v906_v38  ;;  %vm328_vm15 = vcmp.gt.f32.partialorder %v264_v36, 0.0  ;;  %v265_v46 = vadd.f32 %v1132_v7, %v194_v37 }
  0x50   :  { %773 = vst.msk [vmem:[%s1611_s3 + $0xa0] sm:$0xf] %vm732_vm0, %v907_v39  ;;  %v392_v45 = vmul.f32 0.2, %v264_v36  ;;  %v195_v47 = vmul.f32 %v1025_v24, %v1118_v1  ;;  %774 = vst.msk [vmem:[%s1611_s3 + $0xa4] sm:$0xf] %vm732_vm0, %v908_v42  ;;  %v454_v48 = vsel %vm326_vm13, %v262_v32, %v390_v43  ;;  %v1026_v50 = vunpack.c.h.bf16 %v1081_v12 }
  0x51   :  { %v455_v49 = vsel %vm327_vm14, %v263_v33, %v391_v44  ;;  %v1029_v51 = vunpack.c.l.bf16 %v1082_v41  ;;  %v909_v53 = vpack.c.bf16 %v454_v48, %v454_v48  ;;  %vm329_vm1 = vcmp.gt.f32.partialorder %v265_v46, 0.0  ;;  %v1087_v39 = vld [vmem:[%s1608_s0 + $0xe8] sm:$0xff]  }
  0x52   :  { %v910_v54 = vpack.c.bf16 %v455_v49, %v455_v49  ;;  %v456_v55 = vsel %vm328_vm15, %v264_v36, %v392_v45  ;;  %v393_v57 = vmul.f32 0.2, %v265_v46  ;;  %v266_v58 = vadd.f32 %v1132_v7, %v195_v47 }
  0x53   :  { %v911_v56 = vpack.c.bf16 %v456_v55, %v456_v55  ;;  %v196_v59 = vmul.f32 %v1026_v50, %v1118_v1  ;;  %775 = vst.msk [vmem:[%s1611_s3 + $0xa8] sm:$0xf] %vm732_vm0, %v909_v53  ;;  %v197_v60 = vmul.f32 %v1029_v51, %v1118_v1  ;;  %v1030_v61 = vunpack.c.h.bf16 %v1082_v41 }
  0x54   :  { %776 = vst.msk [vmem:[%s1611_s3 + $0xac] sm:$0xf] %vm732_vm0, %v910_v54  ;;  %v1033_v62 = vunpack.c.l.bf16 %v1083_v52  ;;  %v1034_v63 = vunpack.c.h.bf16 %v1083_v52  ;;  %v457_v0 = vsel %vm329_vm1, %v265_v46, %v393_v57  ;;  %vm330_vm2 = vcmp.gt.f32.partialorder %v266_v58, 0.0 }
  0x55   :  { %777 = vst.msk [vmem:[%s1611_s3 + $0xb0] sm:$0xf] %vm732_vm0, %v911_v56  ;;  %v394_v2 = vmul.f32 0.2, %v266_v58  ;;  %v267_v3 = vadd.f32 %v1132_v7, %v196_v59  ;;  %v912_v4 = vpack.c.bf16 %v457_v0, %v457_v0  ;;  %v268_v5 = vadd.f32 %v1132_v7, %v197_v60  ;;  %v1088_v0 = vld [vmem:[%s1608_s0 + $0xf0] sm:$0xff]  }
  0x56   :  { %v198_v6 = vmul.f32 %v1030_v61, %v1118_v1  ;;  %v199_v8 = vmul.f32 %v1033_v62, %v1118_v1  ;;  %v200_v12 = vmul.f32 %v1034_v63, %v1118_v1  ;;  %v1037_v19 = vunpack.c.l.bf16 %v1084_v9 }
  0x57   :  { %v458_v10 = vsel %vm330_vm2, %v266_v58, %v394_v2  ;;  %vm331_vm3 = vcmp.gt.f32.partialorder %v267_v3, 0.0  ;;  %v395_v11 = vmul.f32 0.2, %v267_v3  ;;  %778 = vst.msk [vmem:[%s1611_s3 + $0xb4] sm:$0xf] %vm732_vm0, %v912_v4  ;;  %vm332_vm4 = vcmp.gt.f32.partialorder %v268_v5, 0.0 }
  0x58   :  { %v913_v13 = vpack.c.bf16 %v458_v10, %v458_v10  ;;  %v396_v14 = vmul.f32 0.2, %v268_v5  ;;  %v269_v15 = vadd.f32 %v1132_v7, %v198_v6  ;;  %v270_v17 = vadd.f32 %v1132_v7, %v199_v8 }
  0x59   :  { %v459_v16 = vsel %vm331_vm3, %v267_v3, %v395_v11  ;;  %v271_v18 = vadd.f32 %v1132_v7, %v200_v12  ;;  %v201_v28 = vmul.f32 %v1037_v19, %v1118_v1  ;;  %v1038_v29 = vunpack.c.h.bf16 %v1084_v9 }
  0x5a   :  { %779 = vst.msk [vmem:[%s1611_s3 + $0xb8] sm:$0xf] %vm732_vm0, %v913_v13  ;;  %v914_v20 = vpack.c.bf16 %v459_v16, %v459_v16  ;;  %v460_v21 = vsel %vm332_vm4, %v268_v5, %v396_v14  ;;  %vm333_vm5 = vcmp.gt.f32.partialorder %v269_v15, 0.0  ;;  %v397_v22 = vmul.f32 0.2, %v269_v15  ;;  %v1089_v13 = vld [vmem:[%s1608_s0 + $0xf8] sm:$0xff]  }
  0x5b   :  { %v915_v24 = vpack.c.bf16 %v460_v21, %v460_v21  ;;  %vm334_vm6 = vcmp.gt.f32.partialorder %v270_v17, 0.0  ;;  %v398_v25 = vmul.f32 0.2, %v270_v17  ;;  %vm335_vm7 = vcmp.gt.f32.partialorder %v271_v18, 0.0 }
  0x5c   :  { %780 = vst.msk [vmem:[%s1611_s3 + $0xbc] sm:$0xf] %vm732_vm0, %v914_v20  ;;  %v461_v26 = vsel %vm333_vm5, %v269_v15, %v397_v22  ;;  %v399_v27 = vmul.f32 0.2, %v271_v18  ;;  %v1041_v33 = vunpack.c.l.bf16 %v1085_v23  ;;  %v1042_v34 = vunpack.c.h.bf16 %v1085_v23 }
  0x5d   :  { %781 = vst.msk [vmem:[%s1611_s3 + $0xc0] sm:$0xf] %vm732_vm0, %v915_v24  ;;  %v916_v31 = vpack.c.bf16 %v461_v26, %v461_v26  ;;  %v462_v32 = vsel %vm334_vm6, %v270_v17, %v398_v25  ;;  %v272_v37 = vadd.f32 %v1132_v7, %v201_v28  ;;  %v202_v38 = vmul.f32 %v1038_v29, %v1118_v1 }
  0x5e   :  { %v917_v35 = vpack.c.bf16 %v462_v32, %v462_v32  ;;  %v463_v36 = vsel %vm335_vm7, %v271_v18, %v399_v27  ;;  %v203_v41 = vmul.f32 %v1041_v33, %v1118_v1  ;;  %v204_v42 = vmul.f32 %v1042_v34, %v1118_v1  ;;  %v1090_v27 = vld [vmem:[%s1609_s1] ss:$0 sm:$0xff] }
  0x5f   :  { %782 = vst.msk [vmem:[%s1611_s3 + $0xc4] sm:$0xf] %vm732_vm0, %v916_v31  ;;  %v918_v40 = vpack.c.bf16 %v463_v36, %v463_v36  ;;  %v1045_v43 = vunpack.c.l.bf16 %v1086_v30  ;;  %vm336_vm8 = vcmp.gt.f32.partialorder %v272_v37, 0.0  ;;  %v400_v44 = vmul.f32 0.2, %v272_v37 }
  0x60   :  { %783 = vst.msk [vmem:[%s1611_s3 + $0xc8] sm:$0xf] %vm732_vm0, %v917_v35  ;;  %v273_v45 = vadd.f32 %v1132_v7, %v202_v38  ;;  %v1046_v46 = vunpack.c.h.bf16 %v1086_v30  ;;  %v274_v47 = vadd.f32 %v1132_v7, %v203_v41  ;;  %v275_v48 = vadd.f32 %v1132_v7, %v204_v42 }
  0x61   :  { %784 = vst.msk [vmem:[%s1611_s3 + $0xcc] sm:$0xf] %vm732_vm0, %v918_v40  ;;  %v205_v49 = vmul.f32 %v1045_v43, %v1118_v1  ;;  %v1049_v50 = vunpack.c.l.bf16 %v1087_v39  ;;  %v464_v51 = vsel %vm336_vm8, %v272_v37, %v400_v44  ;;  %v1050_v63 = vunpack.c.h.bf16 %v1087_v39 }
  0x62   :  { %vm337_vm9 = vcmp.gt.f32.partialorder %v273_v45, 0.0  ;;  %v401_v52 = vmul.f32 0.2, %v273_v45  ;;  %v206_v53 = vmul.f32 %v1046_v46, %v1118_v1  ;;  %v919_v54 = vpack.c.bf16 %v464_v51, %v464_v51 }
  0x63   :  { %vm338_vm10 = vcmp.gt.f32.partialorder %v274_v47, 0.0  ;;  %v402_v55 = vmul.f32 0.2, %v274_v47  ;;  %vm339_vm11 = vcmp.gt.f32.partialorder %v275_v48, 0.0  ;;  %v403_v57 = vmul.f32 0.2, %v275_v48 }
  0x64   :  { %v465_v56 = vsel %vm337_vm9, %v273_v45, %v401_v52  ;;  %v276_v58 = vadd.f32 %v1132_v7, %v205_v49  ;;  %v277_v59 = vadd.f32 %v1132_v7, %v206_v53  ;;  %785 = vst.msk [vmem:[%s1611_s3 + $0xd0] sm:$0xf] %vm732_vm0, %v919_v54  ;;  %v207_v62 = vmul.f32 %v1049_v50, %v1118_v1 }
  0x65   :  { %v920_v60 = vpack.c.bf16 %v465_v56, %v465_v56  ;;  %v466_v61 = vsel %vm338_vm10, %v274_v47, %v402_v55  ;;  %v467_v3 = vsel %vm339_vm11, %v275_v48, %v403_v57  ;;  %v208_v10 = vmul.f32 %v1050_v63, %v1118_v1 }
  0x66   :  { %v921_v2 = vpack.c.bf16 %v466_v61, %v466_v61  ;;  %vm340_vm12 = vcmp.gt.f32.partialorder %v276_v58, 0.0  ;;  %v404_v4 = vmul.f32 0.2, %v276_v58  ;;  %v922_v5 = vpack.c.bf16 %v467_v3, %v467_v3 }
  0x67   :  { %786 = vst.msk [vmem:[%s1611_s3 + $0xd4] sm:$0xf] %vm732_vm0, %v920_v60  ;;  %vm341_vm13 = vcmp.gt.f32.partialorder %v277_v59, 0.0  ;;  %v405_v6 = vmul.f32 0.2, %v277_v59  ;;  %v278_v8 = vadd.f32 %v1132_v7, %v207_v62  ;;  %v1053_v11 = vunpack.c.l.bf16 %v1088_v0 }
  0x68   :  { %787 = vst.msk [vmem:[%s1611_s3 + $0xd8] sm:$0xf] %vm732_vm0, %v921_v2  ;;  %v468_v9 = vsel %vm340_vm12, %v276_v58, %v404_v4  ;;  %v1054_v12 = vunpack.c.h.bf16 %v1088_v0  ;;  %788 = vst.msk [vmem:[%s1611_s3 + $0xdc] sm:$0xf] %vm732_vm0, %v922_v5  ;;  %v279_v18 = vadd.f32 %v1132_v7, %v208_v10  ;;  %v1057_v22 = vunpack.c.l.bf16 %v1089_v13 }
  0x69   :  { %v923_v14 = vpack.c.bf16 %v468_v9, %v468_v9  ;;  %v469_v15 = vsel %vm341_vm13, %v277_v59, %v405_v6  ;;  %vm342_vm14 = vcmp.gt.f32.partialorder %v278_v8, 0.0  ;;  %v406_v16 = vmul.f32 0.2, %v278_v8 }
  0x6a   :  { %v924_v17 = vpack.c.bf16 %v469_v15, %v469_v15  ;;  %v209_v19 = vmul.f32 %v1053_v11, %v1118_v1  ;;  %v210_v20 = vmul.f32 %v1054_v12, %v1118_v1  ;;  %v1058_v23 = vunpack.c.h.bf16 %v1089_v13 }
  0x6b   :  { %789 = vst.msk [vmem:[%s1611_s3 + $0xe0] sm:$0xf] %vm732_vm0, %v923_v14  ;;  %v470_v21 = vsel %vm342_vm14, %v278_v8, %v406_v16  ;;  %vm343_vm15 = vcmp.gt.f32.partialorder %v279_v18, 0.0  ;;  %v407_v25 = vmul.f32 0.2, %v279_v18  ;;  %v211_v28 = vmul.f32 %v1090_v27, %v1057_v22 }
  0x6c   :  { %790 = vst.msk [vmem:[%s1611_s3 + $0xe4] sm:$0xf] %vm732_vm0, %v924_v17  ;;  %v925_v24 = vpack.c.bf16 %v470_v21, %v470_v21  ;;  %v280_v26 = vadd.f32 %v1132_v7, %v209_v19  ;;  %v281_v1 = vadd.f32 %v1132_v7, %v210_v20  ;;  %v212_v29 = vmul.f32 %v1090_v27, %v1058_v23  ;;  %v1091_v7 = vld [vmem:[%s1610_s2] ss:$0 sm:$0xff] }
  0x6d   :  { %v471_v30 = vsel %vm343_vm15, %v279_v18, %v407_v25  ;;  %v282_v34 = vadd.f32 %v1091_v7, %v211_v28 }
  0x6e   :  { %791 = vst.msk [vmem:[%s1611_s3 + $0xe8] sm:$0xf] %vm732_vm0, %v925_v24  ;;  %vm344_vm1 = vcmp.gt.f32.partialorder %v280_v26, 0.0  ;;  %v408_v31 = vmul.f32 0.2, %v280_v26  ;;  %v926_v32 = vpack.c.bf16 %v471_v30, %v471_v30  ;;  %vm345_vm2 = vcmp.gt.f32.partialorder %v281_v1, 0.0 }
  0x6f   :  { %v409_v33 = vmul.f32 0.2, %v281_v1  ;;  %v283_v36 = vadd.f32 %v1091_v7, %v212_v29  ;;  %vm346_vm3 = vcmp.gt.f32.partialorder %v282_v34, 0.0  ;;  %v410_v39 = vmul.f32 0.2, %v282_v34 }
  0x70   :  { %v472_v35 = vsel %vm344_vm1, %v280_v26, %v408_v31  ;;  %792 = vst.msk [vmem:[%s1611_s3 + $0xec] sm:$0xf] %vm732_vm0, %v926_v32 }
  0x71   :  { %v927_v37 = vpack.c.bf16 %v472_v35, %v472_v35  ;;  %v473_v38 = vsel %vm345_vm2, %v281_v1, %v409_v33  ;;  %vm347_vm4 = vcmp.gt.f32.partialorder %v283_v36, 0.0  ;;  %v411_v41 = vmul.f32 0.2, %v283_v36 }
  0x72   :  { %v928_v40 = vpack.c.bf16 %v473_v38, %v473_v38  ;;  %v474_v42 = vsel %vm346_vm3, %v282_v34, %v410_v39 }
  0x73   :  { %793 = vst.msk [vmem:[%s1611_s3 + $0xf0] sm:$0xf] %vm732_vm0, %v927_v37  ;;  %v929_v43 = vpack.c.bf16 %v474_v42, %v474_v42  ;;  %v475_v44 = vsel %vm347_vm4, %v283_v36, %v411_v41 }
  0x74   :  { %794 = vst.msk [vmem:[%s1611_s3 + $0xf4] sm:$0xf] %vm732_vm0, %v928_v40  ;;  %v930_v45 = vpack.c.bf16 %v475_v44, %v475_v44 }
  0x75   :  { %795 = vst.msk [vmem:[%s1611_s3 + $0xf8] sm:$0xf] %vm732_vm0, %v929_v43 }
  0x76   :  { %796 = vst.msk [vmem:[%s1611_s3 + $0xfc] sm:$0xf] %vm732_vm0, %v930_v45 }

// kernel: discriminator_forward.11
= control target key start
LH: loop header
LB: loop body
LE: loop exit
PB: predicated region body
PF: predicated region fallthrough
CT: control target
= control target key end

     0   :  { %vm400_vm0 = vcmask 257024   ;;  %vm417_vm1 = vcmask 261120   ;;  %vm508_vm2 = vcmask 253952   ;;  %s965_s1 = inlined_call_operand.vmem [shape: bf16[256,128], index: 1, kind: input, shape index: {}]   ;;  %s966_s0 = inlined_call_operand.vmem [shape: bf16[128,256], index: 0, kind: input, shape index: {}]   ;;  %s967_s2 = inlined_call_operand.vmem [shape: bf16[128,32], index: 2, kind: output, shape index: {0}]   ;;  %s968_s3 = inlined_call_operand.vmem [shape: f32[1,1,32], index: 3, kind: output, shape index: {1}]   ;;  %s969_s4 = inlined_call_operand.vmem [shape: f32[1,1,32], index: 4, kind: output, shape index: {2}]  }
   0x1   :  { %v667_v0 = vld [vmem:[%s965_s1 + $0x40] sm:$0xff]   ;;  %v669_v2 = vld [vmem:[%s965_s1 + $0x48] sm:$0xff]   ;;  %v671_v4 = vld [vmem:[%s965_s1 + $0x50] sm:$0xff]  }
   0x2   :  { %v668_v1 = vld [vmem:[%s965_s1] sm:$0xff]   ;;  %587 = vmatprep.subr.bf16.mxu0 %v667_v0  ;;  %651 = vmatprep.subr.bf16.mxu1 %v667_v0  ;;  %v670_v3 = vld [vmem:[%s965_s1 + $0x8] sm:$0xff]   ;;  %v672_v5 = vld [vmem:[%s965_s1 + $0x10] sm:$0xff]  }
   0x3   :  { %588 = vmatpush3.bf16.msra.mxu0 %v668_v1  ;;  %659 = vmatpush3.bf16.msra.mxu1 %v668_v1  ;;  %v673_v6 = vld [vmem:[%s965_s1 + $0x58] sm:$0xff]   ;;  %v675_v8 = vld [vmem:[%s965_s1 + $0x60] sm:$0xff]   ;;  %v677_v10 = vld [vmem:[%s965_s1 + $0x68] sm:$0xff]  }
   0x4   :  { %589 = vmatprep.subr.bf16.mxu0 %v669_v2  ;;  %652 = vmatprep.subr.bf16.mxu1 %v669_v2  ;;  %v674_v7 = vld [vmem:[%s965_s1 + $0x18] sm:$0xff]   ;;  %v676_v9 = vld [vmem:[%s965_s1 + $0x20] sm:$0xff]   ;;  %v678_v12 = vld [vmem:[%s965_s1 + $0x28] sm:$0xff]  }
   0x5   :  { %v685_v11 = vld [vmem:[%s966_s0 + $0x4] ss:$8 sps:$4 sm:$0xff]   ;;  %v679_v14 = vld [vmem:[%s965_s1 + $0x70] sm:$0xff]   ;;  %v681_v16 = vld [vmem:[%s965_s1 + $0x78] sm:$0xff]  }
   0x6   :  { %v691_v13 = vld [vmem:[%s966_s0 + $0x44] ss:$8 sps:$4 sm:$0xff]   ;;  %271 = vmatprep.mubr.bf16.mxu0 %v685_v11  ;;  %v680_v15 = vld [vmem:[%s965_s1 + $0x30] sm:$0xff]   ;;  %v682_v17 = vld [vmem:[%s965_s1 + $0x38] sm:$0xff]  }
   0x7   :  { %590 = vmatpush3.bf16.msra.mxu0 %v670_v3  ;;  %660 = vmatpush3.bf16.msra.mxu1 %v670_v3  ;;  %v683_v18 = vld [vmem:[%s966_s0] ss:$8 sps:$4 sm:$0xff]   ;;  %v686_v20 = vld [vmem:[%s966_s0 + $0x14] ss:$8 sps:$4 sm:$0xff]   ;;  %v688_v22 = vld [vmem:[%s966_s0 + $0x10] ss:$8 sps:$4 sm:$0xff]  }
   0x8   :  { %591 = vmatprep.subr.bf16.mxu0 %v671_v4  ;;  %653 = vmatprep.subr.bf16.mxu1 %v671_v4  ;;  %v689_v19 = vld [vmem:[%s966_s0 + $0x40] ss:$8 sps:$4 sm:$0xff]   ;;  %v695_v21 = vld [vmem:[%s966_s0 + $0x54] ss:$8 sps:$4 sm:$0xff]   ;;  %v697_v23 = vld [vmem:[%s966_s0 + $0x50] ss:$8 sps:$4 sm:$0xff]  }
   0x9   :  { %303 = vmatprep.mubr.bf16.mxu1 %v691_v13  ;;  %v692_v24 = vld [vmem:[%s966_s0 + $0x24] ss:$8 sps:$4 sm:$0xff]   ;;  %v694_v26 = vld [vmem:[%s966_s0 + $0x20] ss:$8 sps:$4 sm:$0xff]   ;;  %v698_v28 = vld [vmem:[%s966_s0 + $0x34] ss:$8 sps:$4 sm:$0xff]  }
   0xa   :  { %v701_v25 = vld [vmem:[%s966_s0 + $0x64] ss:$8 sps:$4 sm:$0xff]   ;;  %v703_v27 = vld [vmem:[%s966_s0 + $0x60] ss:$8 sps:$4 sm:$0xff]   ;;  %v704_v29 = vld [vmem:[%s966_s0 + $0x74] ss:$8 sps:$4 sm:$0xff]  }
   0xb   :  { %592 = vmatpush3.bf16.msra.mxu0 %v672_v5  ;;  %661 = vmatpush3.bf16.msra.mxu1 %v672_v5  ;;  %v700_v30 = vld [vmem:[%s966_s0 + $0x30] ss:$8 sps:$4 sm:$0xff]  }
   0xc   :  { %593 = vmatprep.subr.bf16.mxu0 %v673_v6  ;;  %654 = vmatprep.subr.bf16.mxu1 %v673_v6  ;;  %v706_v31 = vld [vmem:[%s966_s0 + $0x70] ss:$8 sps:$4 sm:$0xff]  }
   0xf   :  { %594 = vmatpush3.bf16.msra.mxu0 %v674_v7  ;;  %662 = vmatpush3.bf16.msra.mxu1 %v674_v7 }
  0x10   :  { %595 = vmatprep.subr.bf16.mxu0 %v675_v8  ;;  %655 = vmatprep.subr.bf16.mxu1 %v675_v8 }
  0x13   :  { %596 = vmatpush3.bf16.msra.mxu0 %v676_v9  ;;  %663 = vmatpush3.bf16.msra.mxu1 %v676_v9 }
  0x14   :  { %597 = vmatprep.subr.bf16.mxu0 %v677_v10  ;;  %656 = vmatprep.subr.bf16.mxu1 %v677_v10 }
  0x17   :  { %598 = vmatpush3.bf16.msra.mxu0 %v678_v12  ;;  %664 = vmatpush3.bf16.msra.mxu1 %v678_v12 }
  0x18   :  { %599 = vmatprep.subr.bf16.mxu0 %v679_v14  ;;  %657 = vmatprep.subr.bf16.mxu1 %v679_v14 }
  0x1b   :  { %600 = vmatpush3.bf16.msra.mxu0 %v680_v15  ;;  %665 = vmatpush3.bf16.msra.mxu1 %v680_v15 }
  0x1c   :  { %601 = vmatprep.subr.bf16.mxu0 %v681_v16  ;;  %658 = vmatprep.subr.bf16.mxu1 %v681_v16 }
  0x1f   :  { %602 = vmatpush3.bf16.msra.mxu0 %v682_v17  ;;  %666 = vmatpush3.bf16.msra.mxu1 %v682_v17 }
  0x22   :  { %272 = vmatmul.mubr.bf16.vlgmr.msra.gmra.mrb[0].mxu0 %v683_v18  ;;  %304 = vmatmul.mubr.bf16.vlgmr.msra.gmra.mrb[0].mxu1 %v689_v19 }
  0x23   :  { %279 = vmatprep.mubr.bf16.mxu0 %v686_v20  ;;  %311 = vmatprep.mubr.bf16.mxu1 %v695_v21 }
  0x2a   :  { %280 = vmatmul.mubr.bf16.gmra.mrb[4].mxu0 %v688_v22  ;;  %312 = vmatmul.mubr.bf16.gmra.mrb[4].mxu1 %v697_v23 }
  0x2b   :  { %287 = vmatprep.mubr.bf16.mxu0 %v692_v24  ;;  %319 = vmatprep.mubr.bf16.mxu1 %v701_v25 }
  0x32   :  { %288 = vmatmul.mubr.bf16.gmra.mrb[8].mxu0 %v694_v26  ;;  %320 = vmatmul.mubr.bf16.gmra.mrb[8].mxu1 %v703_v27 }
  0x33   :  { %295 = vmatprep.mubr.bf16.mxu0 %v698_v28  ;;  %327 = vmatprep.mubr.bf16.mxu1 %v704_v29 }
  0x3a   :  { %296 = vmatmul.mubr.bf16.gmra.mrb[12].mxu0 %v700_v30  ;;  %328 = vmatmul.mubr.bf16.gmra.mrb[12].mxu1 %v706_v31 }
  0xf5   :  { %v603_v32 = vpop.f32.mrb[0].mxu0  ;;  %v627_v33 = vpop.f32.mrb[0].mxu1 }
  0xf6   :  { %v604_v34 = vpop.f32.mrb[1].mxu0  ;;  %v628_v35 = vpop.f32.mrb[1].mxu1 }
  0xf7   :  { %v605_v36 = vadd.f32 %v604_v34, %v603_v32  ;;  %v606_v37 = vpop.f32.mrb[2].mxu0  ;;  %v828_v38 = vadd.f32 %v628_v35, %v627_v33  ;;  %v630_v39 = vpop.f32.mrb[2].mxu1 }
  0xf8   :  { %v607_v40 = vpop.f32.mrb[3].mxu0  ;;  %v631_v41 = vpop.f32.mrb[3].mxu1 }
  0xf9   :  { %v571_v42 = vpack.c.bf16 %v605_v36, %v605_v36  ;;  %v455_v43 = vmul.f32 %v605_v36, %v605_v36  ;;  %v608_v44 = vadd.f32 %v607_v40, %v606_v37  ;;  %v579_v45 = vpack.c.bf16 %v828_v38, %v828_v38 }
  0xfa   :  { %v832_v46 = vadd.f32 %v631_v41, %v630_v39  ;;  %v418_v47 = vsel %vm417_vm1, %v605_v36, 0.0 }
  0xfb   :  { %401 = vst.msk [vmem:[%s967_s2] sm:$0xf] %vm400_vm0, %v571_v42  ;;  %v572_v48 = vpack.c.bf16 %v608_v44, %v608_v44  ;;  %v419_v49 = vsel %vm417_vm1, %v608_v44, 0.0  ;;  %v456_v50 = vmul.f32 %v608_v44, %v608_v44  ;;  %409 = vst.msk [vmem:[%s967_s2 + $0x20] sm:$0xf] %vm400_vm0, %v579_v45  ;;  %v471_v53 = vsel %vm417_vm1, %v455_v43, 0.0 }
  0xfc   :  { %v420_v51 = vadd.f32 %v419_v49, %v418_v47  ;;  %v580_v52 = vpack.c.bf16 %v832_v46, %v832_v46 }
  0xfd   :  { %402 = vst.msk [vmem:[%s967_s2 + $0x4] sm:$0xf] %vm400_vm0, %v572_v48  ;;  %v472_v54 = vsel %vm417_vm1, %v456_v50, 0.0  ;;  %v609_v55 = vpop.f32.mrb[4].mxu0  ;;  %v633_v56 = vpop.f32.mrb[4].mxu1 }
  0xfe   :  { %v473_v57 = vadd.f32 %v472_v54, %v471_v53  ;;  %v610_v58 = vpop.f32.mrb[5].mxu0  ;;  %410 = vst.msk [vmem:[%s967_s2 + $0x24] sm:$0xf] %vm400_vm0, %v580_v52  ;;  %v634_v59 = vpop.f32.mrb[5].mxu1 }
  0xff   :  { %v611_v60 = vadd.f32 %v610_v58, %v609_v55  ;;  %v612_v61 = vpop.f32.mrb[6].mxu0  ;;  %v856_v62 = vadd.f32 %v634_v59, %v633_v56  ;;  %v636_v63 = vpop.f32.mrb[6].mxu1 }
 0x100   :  { %v613_v0 = vpop.f32.mrb[7].mxu0  ;;  %v637_v1 = vpop.f32.mrb[7].mxu1 }
 0x101   :  { %v573_v2 = vpack.c.bf16 %v611_v60, %v611_v60  ;;  %v421_v3 = vsel %vm417_vm1, %v611_v60, 0.0  ;;  %v457_v4 = vmul.f32 %v611_v60, %v611_v60  ;;  %v614_v5 = vadd.f32 %v613_v0, %v612_v61 }
 0x102   :  { %v422_v6 = vadd.f32 %v421_v3, %v420_v51  ;;  %v581_v7 = vpack.c.bf16 %v856_v62, %v856_v62  ;;  %v871_v14 = vadd.f32 %v637_v1, %v636_v63  ;;  %v463_v60 = vmul.f32 %v828_v38, %v828_v38 }
 0x103   :  { %403 = vst.msk [vmem:[%s967_s2 + $0x8] sm:$0xf] %vm400_vm0, %v573_v2  ;;  %v474_v8 = vsel %vm417_vm1, %v457_v4, 0.0  ;;  %v574_v9 = vpack.c.bf16 %v614_v5, %v614_v5  ;;  %v423_v10 = vsel %vm417_vm1, %v614_v5, 0.0  ;;  %v458_v11 = vmul.f32 %v614_v5, %v614_v5 }
 0x104   :  { %v475_v12 = vadd.f32 %v474_v8, %v473_v57  ;;  %v424_v13 = vadd.f32 %v423_v10, %v422_v6  ;;  %411 = vst.msk [vmem:[%s967_s2 + $0x28] sm:$0xf] %vm400_vm0, %v581_v7  ;;  %v582_v20 = vpack.c.bf16 %v871_v14, %v871_v14  ;;  %v433_v7 = vsel %vm417_vm1, %v828_v38, 0.0 }
 0x105   :  { %404 = vst.msk [vmem:[%s967_s2 + $0xc] sm:$0xf] %vm400_vm0, %v574_v9  ;;  %v476_v15 = vsel %vm417_vm1, %v458_v11, 0.0  ;;  %v615_v16 = vpop.f32.mrb[8].mxu0  ;;  %v639_v17 = vpop.f32.mrb[8].mxu1  ;;  %v464_v8 = vmul.f32 %v832_v46, %v832_v46  ;;  %v465_v38 = vmul.f32 %v856_v62, %v856_v62 }
 0x106   :  { %v477_v18 = vadd.f32 %v476_v15, %v475_v12  ;;  %v616_v19 = vpop.f32.mrb[9].mxu0  ;;  %v640_v21 = vpop.f32.mrb[9].mxu1  ;;  %412 = vst.msk [vmem:[%s967_s2 + $0x2c] sm:$0xf] %vm400_vm0, %v582_v20  ;;  %v435_v15 = vsel %vm417_vm1, %v832_v46, 0.0  ;;  %v466_v20 = vmul.f32 %v871_v14, %v871_v14 }
 0x107   :  { %v617_v22 = vadd.f32 %v616_v19, %v615_v16  ;;  %v618_v23 = vpop.f32.mrb[10].mxu0  ;;  %v880_v24 = vadd.f32 %v640_v21, %v639_v17  ;;  %v642_v25 = vpop.f32.mrb[10].mxu1  ;;  %v437_v19 = vsel %vm417_vm1, %v856_v62, 0.0 }
 0x108   :  { %v619_v26 = vpop.f32.mrb[11].mxu0  ;;  %v643_v27 = vpop.f32.mrb[11].mxu1 }
 0x109   :  { %v575_v28 = vpack.c.bf16 %v617_v22, %v617_v22  ;;  %v425_v29 = vsel %vm417_vm1, %v617_v22, 0.0  ;;  %v459_v30 = vmul.f32 %v617_v22, %v617_v22  ;;  %v620_v31 = vadd.f32 %v619_v26, %v618_v23 }
 0x10a   :  { %v426_v32 = vadd.f32 %v425_v29, %v424_v13  ;;  %v583_v33 = vpack.c.bf16 %v880_v24, %v880_v24  ;;  %v644_v41 = vadd.f32 %v643_v27, %v642_v25  ;;  %v486_v13 = vsel %vm417_vm1, %v463_v60, 0.0 }
 0x10b   :  { %405 = vst.msk [vmem:[%s967_s2 + $0x10] sm:$0xf] %vm400_vm0, %v575_v28  ;;  %v478_v34 = vsel %vm417_vm1, %v459_v30, 0.0  ;;  %v576_v35 = vpack.c.bf16 %v620_v31, %v620_v31  ;;  %v427_v36 = vsel %vm417_vm1, %v620_v31, 0.0  ;;  %v460_v37 = vmul.f32 %v620_v31, %v620_v31 }
 0x10c   :  { %v479_v39 = vadd.f32 %v478_v34, %v477_v18  ;;  %v428_v40 = vadd.f32 %v427_v36, %v426_v32  ;;  %413 = vst.msk [vmem:[%s967_s2 + $0x30] sm:$0xf] %vm400_vm0, %v583_v33  ;;  %v584_v48 = vpack.c.bf16 %v644_v41, %v644_v41  ;;  %v488_v18 = vsel %vm417_vm1, %v464_v8, 0.0 }
 0x10d   :  { %406 = vst.msk [vmem:[%s967_s2 + $0x14] sm:$0xf] %vm400_vm0, %v576_v35  ;;  %v480_v42 = vsel %vm417_vm1, %v460_v37, 0.0  ;;  %v621_v43 = vpop.f32.mrb[12].mxu0  ;;  %v645_v44 = vpop.f32.mrb[12].mxu1  ;;  %v490_v22 = vsel %vm417_vm1, %v465_v38, 0.0  ;;  %v467_v25 = vmul.f32 %v880_v24, %v880_v24  ;;  %v468_v29 = vmul.f32 %v644_v41, %v644_v41 }
 0x10e   :  { %v481_v45 = vadd.f32 %v480_v42, %v479_v39  ;;  %v622_v47 = vpop.f32.mrb[13].mxu0  ;;  %v646_v49 = vpop.f32.mrb[13].mxu1  ;;  %414 = vst.msk [vmem:[%s967_s2 + $0x34] sm:$0xf] %vm400_vm0, %v584_v48  ;;  %v439_v23 = vsel %vm417_vm1, %v871_v14, 0.0  ;;  %v492_v28 = vsel %vm417_vm1, %v466_v20, 0.0 }
 0x10f   :  { %v623_v50 = vadd.f32 %v622_v47, %v621_v43  ;;  %v624_v51 = vpop.f32.mrb[14].mxu0  ;;  %v647_v52 = vadd.f32 %v646_v49, %v645_v44  ;;  %v648_v53 = vpop.f32.mrb[14].mxu1  ;;  %v441_v62 = vsel %vm417_vm1, %v880_v24, 0.0  ;;  %v494_v33 = vsel %vm417_vm1, %v467_v25, 0.0 }
 0x110   :  { %v625_v54 = vpop.f32.mrb[15].mxu0  ;;  %v649_v55 = vpop.f32.mrb[15].mxu1  ;;  %v443_v34 = vsel %vm417_vm1, %v644_v41, 0.0  ;;  %v496_v37 = vsel %vm417_vm1, %v468_v29, 0.0 }
 0x111   :  { %v577_v56 = vpack.c.bf16 %v623_v50, %v623_v50  ;;  %v429_v57 = vsel %vm417_vm1, %v623_v50, 0.0  ;;  %v461_v58 = vmul.f32 %v623_v50, %v623_v50  ;;  %v626_v59 = vadd.f32 %v625_v54, %v624_v51 }
 0x112   :  { %v430_v61 = vadd.f32 %v429_v57, %v428_v40  ;;  %v585_v63 = vpack.c.bf16 %v647_v52, %v647_v52  ;;  %v650_v6 = vadd.f32 %v649_v55, %v648_v53  ;;  %v469_v30 = vmul.f32 %v647_v52, %v647_v52 }
 0x113   :  { %407 = vst.msk [vmem:[%s967_s2 + $0x18] sm:$0xf] %vm400_vm0, %v577_v56  ;;  %v482_v0 = vsel %vm417_vm1, %v461_v58, 0.0  ;;  %v578_v1 = vpack.c.bf16 %v626_v59, %v626_v59  ;;  %v431_v2 = vsel %vm417_vm1, %v626_v59, 0.0  ;;  %v462_v3 = vmul.f32 %v626_v59, %v626_v59 }
 0x114   :  { %v483_v4 = vadd.f32 %v482_v0, %v481_v45  ;;  %v432_v5 = vadd.f32 %v431_v2, %v430_v61  ;;  %415 = vst.msk [vmem:[%s967_s2 + $0x38] sm:$0xf] %vm400_vm0, %v585_v63  ;;  %v586_v12 = vpack.c.bf16 %v650_v6, %v650_v6  ;;  %v445_v14 = vsel %vm417_vm1, %v647_v52, 0.0 }
 0x115   :  { %408 = vst.msk [vmem:[%s967_s2 + $0x1c] sm:$0xf] %vm400_vm0, %v578_v1  ;;  %v484_v9 = vsel %vm417_vm1, %v462_v3, 0.0  ;;  %v498_v39 = vsel %vm417_vm1, %v469_v30, 0.0  ;;  %v470_v40 = vmul.f32 %v650_v6, %v650_v6  ;;  %v447_v24 = vsel %vm417_vm1, %v650_v6, 0.0 }
 0x116   :  { %v434_v10 = vadd.f32 %v433_v7, %v432_v5  ;;  %v485_v11 = vadd.f32 %v484_v9, %v483_v4  ;;  %416 = vst.msk [vmem:[%s967_s2 + $0x3c] sm:$0xf] %vm400_vm0, %v586_v12 }
 0x117   :  { %v500_v47 = vsel %vm417_vm1, %v470_v40, 0.0 }
 0x118   :  { %v436_v16 = vadd.f32 %v435_v15, %v434_v10  ;;  %v487_v17 = vadd.f32 %v486_v13, %v485_v11 }
 0x11a   :  { %v489_v21 = vadd.f32 %v488_v18, %v487_v17  ;;  %v438_v46 = vadd.f32 %v437_v19, %v436_v16 }
 0x11c   :  { %v440_v26 = vadd.f32 %v439_v23, %v438_v46  ;;  %v491_v27 = vadd.f32 %v490_v22, %v489_v21 }
 0x11e   :  { %v442_v31 = vadd.f32 %v441_v62, %v440_v26  ;;  %v493_v32 = vadd.f32 %v492_v28, %v491_v27 }
 0x120   :  { %v495_v35 = vadd.f32 %v494_v33, %v493_v32  ;;  %v444_v36 = vadd.f32 %v443_v34, %v442_v31 }
 0x122   :  { %v497_v42 = vadd.f32 %v496_v37, %v495_v35  ;;  %v446_v43 = vadd.f32 %v445_v14, %v444_v36 }
 0x124   :  { %v499_v44 = vadd.f32 %v498_v39, %v497_v42  ;;  %v448_v45 = vadd.f32 %v447_v24, %v446_v43 }
 0x126   :  { %v449_v48 = vrot.slane %v448_v45, 4  ;;  %v501_v49 = vadd.f32 %v500_v47, %v499_v44 }
 0x128   :  { %v450_v41 = vadd.f32 %v449_v48, %v448_v45  ;;  %v502_v50 = vrot.slane %v501_v49, 4 }
 0x12a   :  { %v451_v51 = vrot.slane %v450_v41, 2  ;;  %v503_v52 = vadd.f32 %v502_v50, %v501_v49 }
 0x12c   :  { %v452_v53 = vadd.f32 %v451_v51, %v450_v41  ;;  %v504_v54 = vrot.slane %v503_v52, 2 }
 0x12e   :  { %v453_v55 = vrot.slane %v452_v53, 1  ;;  %v505_v56 = vadd.f32 %v504_v54, %v503_v52 }
 0x130   :  { %v454_v57 = vadd.f32 %v453_v55, %v452_v53  ;;  %v506_v58 = vrot.slane %v505_v56, 1 }
 0x132   :  { %v507_v59 = vadd.f32 %v506_v58, %v505_v56  ;;  %509 = vst.msk [vmem:[%s968_s3] sm:$0x1] %vm508_vm2, %v454_v57 }
 0x134   :  { %510 = vst.msk [vmem:[%s969_s4] sm:$0x1] %vm508_vm2, %v507_v59 }

// kernel: discriminator_forward.12
= control target key start
LH: loop header
LB: loop body
LE: loop exit
PB: predicated region body
PF: predicated region fallthrough
CT: control target
= control target key end

     0   :  { %vm204_vm0 = vcmask 257024   ;;  %s448_s0 = inlined_call_operand.vmem [shape: bf16[128,32], index: 0, kind: input, shape index: {}]   ;;  %s449_s1 = inlined_call_operand.vmem [shape: f32[1,32], index: 1, kind: input, shape index: {}]   ;;  %s450_s2 = inlined_call_operand.vmem [shape: f32[1,32], index: 2, kind: input, shape index: {}]   ;;  %s451_s3 = inlined_call_operand.vmem [shape: bf16[128,32], index: 3, kind: output, shape index: {}]  }
   0x1   :  { %v260_v0 = vld [vmem:[%s448_s0] sm:$0xff]   ;;  %v291_v4 = vld [vmem:[%s448_s0 + $0x8] sm:$0xff]   ;;  %v292_v5 = vld [vmem:[%s448_s0 + $0x10] sm:$0xff]  }
   0x2   :  { %v324_v1 = vld [vmem:[%s449_s1] ss:$0 sm:$0xff]  ;;  %v261_v2 = vunpack.c.l.bf16 %v260_v0  ;;  %v262_v3 = vunpack.c.h.bf16 %v260_v0  ;;  %v293_v6 = vld [vmem:[%s448_s0 + $0x18] sm:$0xff]   ;;  %v265_v8 = vunpack.c.l.bf16 %v291_v4  ;;  %v266_v9 = vunpack.c.h.bf16 %v291_v4  ;;  %v295_v40 = vld [vmem:[%s448_s0 + $0x28] sm:$0xff]  }
   0x3   :  { %v338_v7 = vld [vmem:[%s450_s2] ss:$0 sm:$0xff]  ;;  %v269_v10 = vunpack.c.l.bf16 %v292_v5  ;;  %v270_v11 = vunpack.c.h.bf16 %v292_v5  ;;  %v273_v14 = vunpack.c.l.bf16 %v293_v6  ;;  %v274_v15 = vunpack.c.h.bf16 %v293_v6  ;;  %v296_v52 = vld [vmem:[%s448_s0 + $0x30] sm:$0xff]  }
   0x4   :  { %v53_v12 = vmul.f32 %v261_v2, %v324_v1  ;;  %v54_v13 = vmul.f32 %v262_v3, %v324_v1  ;;  %v55_v16 = vmul.f32 %v265_v8, %v324_v1  ;;  %v56_v17 = vmul.f32 %v266_v9, %v324_v1  ;;  %v294_v39 = vld [vmem:[%s448_s0 + $0x20] sm:$0xff]  }
   0x5   :  { %v57_v18 = vmul.f32 %v269_v10, %v324_v1  ;;  %v58_v19 = vmul.f32 %v270_v11, %v324_v1  ;;  %v59_v22 = vmul.f32 %v273_v14, %v324_v1  ;;  %v60_v23 = vmul.f32 %v274_v15, %v324_v1 }
   0x6   :  { %v76_v20 = vadd.f32 %v338_v7, %v53_v12  ;;  %v77_v21 = vadd.f32 %v338_v7, %v54_v13  ;;  %v78_v24 = vadd.f32 %v338_v7, %v55_v16  ;;  %v79_v25 = vadd.f32 %v338_v7, %v56_v17  ;;  %v297_v17 = vld [vmem:[%s448_s0 + $0x38] sm:$0xff]  }
   0x7   :  { %v80_v26 = vadd.f32 %v338_v7, %v57_v18  ;;  %v81_v27 = vadd.f32 %v338_v7, %v58_v19  ;;  %v82_v46 = vadd.f32 %v338_v7, %v59_v22  ;;  %v83_v47 = vadd.f32 %v338_v7, %v60_v23 }
   0x8   :  { %vm92_vm1 = vcmp.gt.f32.partialorder %v76_v20, 0.0  ;;  %v108_v28 = vmul.f32 0.2, %v76_v20  ;;  %vm93_vm2 = vcmp.gt.f32.partialorder %v77_v21, 0.0  ;;  %v109_v29 = vmul.f32 0.2, %v77_v21 }
   0x9   :  { %vm94_vm3 = vcmp.gt.f32.partialorder %v78_v24, 0.0  ;;  %v110_v30 = vmul.f32 0.2, %v78_v24  ;;  %vm95_vm4 = vcmp.gt.f32.partialorder %v79_v25, 0.0  ;;  %v111_v31 = vmul.f32 0.2, %v79_v25 }
   0xa   :  { %v124_v32 = vsel %vm92_vm1, %v76_v20, %v108_v28  ;;  %v125_v33 = vsel %vm93_vm2, %v77_v21, %v109_v29  ;;  %vm96_vm5 = vcmp.gt.f32.partialorder %v80_v26, 0.0  ;;  %v112_v34 = vmul.f32 0.2, %v80_v26 }
   0xb   :  { %v243_v35 = vpack.c.bf16 %v124_v32, %v124_v32  ;;  %v244_v36 = vpack.c.bf16 %v125_v33, %v125_v33  ;;  %v126_v37 = vsel %vm94_vm3, %v78_v24, %v110_v30  ;;  %v127_v38 = vsel %vm95_vm4, %v79_v25, %v111_v31 }
   0xc   :  { %v245_v41 = vpack.c.bf16 %v126_v37, %v126_v37  ;;  %v246_v42 = vpack.c.bf16 %v127_v38, %v127_v38  ;;  %v128_v43 = vsel %vm96_vm5, %v80_v26, %v112_v34  ;;  %vm97_vm6 = vcmp.gt.f32.partialorder %v81_v27, 0.0 }
   0xd   :  { %205 = vst.msk [vmem:[%s451_s3] sm:$0xf] %vm204_vm0, %v243_v35  ;;  %206 = vst.msk [vmem:[%s451_s3 + $0x4] sm:$0xf] %vm204_vm0, %v244_v36  ;;  %v247_v44 = vpack.c.bf16 %v128_v43, %v128_v43  ;;  %v113_v45 = vmul.f32 0.2, %v81_v27  ;;  %v277_v48 = vunpack.c.l.bf16 %v294_v39  ;;  %v278_v49 = vunpack.c.h.bf16 %v294_v39 }
   0xe   :  { %207 = vst.msk [vmem:[%s451_s3 + $0x8] sm:$0xf] %vm204_vm0, %v245_v41  ;;  %208 = vst.msk [vmem:[%s451_s3 + $0xc] sm:$0xf] %vm204_vm0, %v246_v42  ;;  %v281_v50 = vunpack.c.l.bf16 %v295_v40  ;;  %v282_v51 = vunpack.c.h.bf16 %v295_v40  ;;  %vm98_vm7 = vcmp.gt.f32.partialorder %v82_v46, 0.0  ;;  %vm99_vm8 = vcmp.gt.f32.partialorder %v83_v47, 0.0 }
   0xf   :  { %209 = vst.msk [vmem:[%s451_s3 + $0x10] sm:$0xf] %vm204_vm0, %v247_v44  ;;  %v129_v53 = vsel %vm97_vm6, %v81_v27, %v113_v45  ;;  %v114_v54 = vmul.f32 0.2, %v82_v46  ;;  %v115_v56 = vmul.f32 0.2, %v83_v47  ;;  %v61_v57 = vmul.f32 %v277_v48, %v324_v1 }
  0x10   :  { %v248_v55 = vpack.c.bf16 %v129_v53, %v129_v53  ;;  %v62_v58 = vmul.f32 %v278_v49, %v324_v1  ;;  %v63_v60 = vmul.f32 %v281_v50, %v324_v1  ;;  %v64_v61 = vmul.f32 %v282_v51, %v324_v1 }
  0x11   :  { %v130_v59 = vsel %vm98_vm7, %v82_v46, %v114_v54  ;;  %v285_v62 = vunpack.c.l.bf16 %v296_v52  ;;  %v131_v0 = vsel %vm99_vm8, %v83_v47, %v115_v56  ;;  %v84_v2 = vadd.f32 %v338_v7, %v61_v57 }
  0x12   :  { %210 = vst.msk [vmem:[%s451_s3 + $0x14] sm:$0xf] %vm204_vm0, %v248_v55  ;;  %v249_v63 = vpack.c.bf16 %v130_v59, %v130_v59  ;;  %v85_v3 = vadd.f32 %v338_v7, %v62_v58  ;;  %v250_v4 = vpack.c.bf16 %v131_v0, %v131_v0  ;;  %v86_v5 = vadd.f32 %v338_v7, %v63_v60 }
  0x13   :  { %v87_v6 = vadd.f32 %v338_v7, %v64_v61  ;;  %v65_v8 = vmul.f32 %v285_v62, %v324_v1  ;;  %vm100_vm9 = vcmp.gt.f32.partialorder %v84_v2, 0.0  ;;  %v116_v9 = vmul.f32 0.2, %v84_v2 }
  0x14   :  { %211 = vst.msk [vmem:[%s451_s3 + $0x18] sm:$0xf] %vm204_vm0, %v249_v63  ;;  %vm101_vm10 = vcmp.gt.f32.partialorder %v85_v3, 0.0  ;;  %v117_v10 = vmul.f32 0.2, %v85_v3  ;;  %vm102_vm11 = vcmp.gt.f32.partialorder %v86_v5, 0.0  ;;  %v286_v16 = vunpack.c.h.bf16 %v296_v52 }
  0x15   :  { %212 = vst.msk [vmem:[%s451_s3 + $0x1c] sm:$0xf] %vm204_vm0, %v250_v4  ;;  %v118_v11 = vmul.f32 0.2, %v86_v5  ;;  %vm103_vm12 = vcmp.gt.f32.partialorder %v87_v6, 0.0  ;;  %v132_v13 = vsel %vm100_vm9, %v84_v2, %v116_v9  ;;  %v88_v15 = vadd.f32 %v338_v7, %v65_v8 }
  0x16   :  { %v119_v12 = vmul.f32 0.2, %v87_v6  ;;  %v133_v14 = vsel %vm101_vm10, %v85_v3, %v117_v10  ;;  %v251_v18 = vpack.c.bf16 %v132_v13, %v132_v13  ;;  %v66_v25 = vmul.f32 %v286_v16, %v324_v1 }
  0x17   :  { %v252_v19 = vpack.c.bf16 %v133_v14, %v133_v14  ;;  %v134_v20 = vsel %vm102_vm11, %v86_v5, %v118_v11  ;;  %vm104_vm13 = vcmp.gt.f32.partialorder %v88_v15, 0.0  ;;  %v120_v24 = vmul.f32 0.2, %v88_v15 }
  0x18   :  { %v135_v21 = vsel %vm103_vm12, %v87_v6, %v119_v12  ;;  %v253_v22 = vpack.c.bf16 %v134_v20, %v134_v20  ;;  %213 = vst.msk [vmem:[%s451_s3 + $0x20] sm:$0xf] %vm204_vm0, %v251_v18  ;;  %v289_v26 = vunpack.c.l.bf16 %v297_v17  ;;  %v290_v27 = vunpack.c.h.bf16 %v297_v17 }
  0x19   :  { %v254_v23 = vpack.c.bf16 %v135_v21, %v135_v21  ;;  %214 = vst.msk [vmem:[%s451_s3 + $0x24] sm:$0xf] %vm204_vm0, %v252_v19  ;;  %v136_v28 = vsel %vm104_vm13, %v88_v15, %v120_v24  ;;  %v89_v30 = vadd.f32 %v338_v7, %v66_v25 }
  0x1a   :  { %215 = vst.msk [vmem:[%s451_s3 + $0x28] sm:$0xf] %vm204_vm0, %v253_v22  ;;  %v255_v29 = vpack.c.bf16 %v136_v28, %v136_v28  ;;  %v67_v31 = vmul.f32 %v289_v26, %v324_v1  ;;  %v68_v32 = vmul.f32 %v290_v27, %v324_v1 }
  0x1b   :  { %216 = vst.msk [vmem:[%s451_s3 + $0x2c] sm:$0xf] %vm204_vm0, %v254_v23  ;;  %vm105_vm14 = vcmp.gt.f32.partialorder %v89_v30, 0.0  ;;  %v121_v33 = vmul.f32 0.2, %v89_v30 }
  0x1c   :  { %217 = vst.msk [vmem:[%s451_s3 + $0x30] sm:$0xf] %vm204_vm0, %v255_v29  ;;  %v90_v34 = vadd.f32 %v338_v7, %v67_v31  ;;  %v91_v35 = vadd.f32 %v338_v7, %v68_v32 }
  0x1d   :  { %v137_v36 = vsel %vm105_vm14, %v89_v30, %v121_v33 }
  0x1e   :  { %vm106_vm15 = vcmp.gt.f32.partialorder %v90_v34, 0.0  ;;  %v122_v37 = vmul.f32 0.2, %v90_v34  ;;  %vm107_vm1 = vcmp.gt.f32.partialorder %v91_v35, 0.0  ;;  %v256_v38 = vpack.c.bf16 %v137_v36, %v137_v36 }
  0x1f   :  { %v123_v39 = vmul.f32 0.2, %v91_v35 }
  0x20   :  { %v138_v40 = vsel %vm106_vm15, %v90_v34, %v122_v37  ;;  %218 = vst.msk [vmem:[%s451_s3 + $0x34] sm:$0xf] %vm204_vm0, %v256_v38 }
  0x21   :  { %v257_v1 = vpack.c.bf16 %v138_v40, %v138_v40  ;;  %v139_v41 = vsel %vm107_vm1, %v91_v35, %v123_v39 }
  0x22   :  { %v258_v42 = vpack.c.bf16 %v139_v41, %v139_v41 }
  0x23   :  { %219 = vst.msk [vmem:[%s451_s3 + $0x38] sm:$0xf] %vm204_vm0, %v257_v1 }
  0x24   :  { %220 = vst.msk [vmem:[%s451_s3 + $0x3c] sm:$0xf] %vm204_vm0, %v258_v42 }

// kernel: discriminator_forward.14
= control target key start
LH: loop header
LB: loop body
LE: loop exit
PB: predicated region body
PF: predicated region fallthrough
CT: control target
= control target key end

     0   :  { %vm72_vm4 = vcmask 519168   ;;  %s144_s0 = inlined_call_operand.vmem [shape: bf16[32,64], index: 0, kind: input, shape index: {}]   ;;  %s145_s1 = inlined_call_operand.vmem [shape: f32[1,64], index: 1, kind: input, shape index: {}]   ;;  %s146_s2 = inlined_call_operand.vmem [shape: f32[1,64], index: 2, kind: input, shape index: {}]   ;;  %s147_s3 = inlined_call_operand.vmem [shape: bf16[32,64], index: 3, kind: output, shape index: {}]  }
   0x1   :  { %v92_v0 = vld [vmem:[%s144_s0] sm:$0xff]   ;;  %v99_v4 = vld [vmem:[%s144_s0 + $0x8] sm:$0xff]  }
   0x2   :  { %v81_v1 = vld [vmem:[%s145_s1] ss:$0 sm:$0xff]  ;;  %v93_v2 = vunpack.c.l.bf16 %v92_v0  ;;  %v94_v3 = vunpack.c.h.bf16 %v92_v0  ;;  %v97_v6 = vunpack.c.l.bf16 %v99_v4  ;;  %v98_v7 = vunpack.c.h.bf16 %v99_v4 }
   0x3   :  { %v82_v5 = vld [vmem:[%s146_s2] ss:$0 sm:$0xff] }
   0x4   :  { %v29_v8 = vmul.f32 %v93_v2, %v81_v1  ;;  %v30_v9 = vmul.f32 %v94_v3, %v81_v1  ;;  %v31_v10 = vmul.f32 %v97_v6, %v81_v1  ;;  %v32_v11 = vmul.f32 %v98_v7, %v81_v1 }
   0x6   :  { %v40_v12 = vadd.f32 %v82_v5, %v29_v8  ;;  %v41_v13 = vadd.f32 %v82_v5, %v30_v9  ;;  %v42_v14 = vadd.f32 %v82_v5, %v31_v10  ;;  %v43_v15 = vadd.f32 %v82_v5, %v32_v11 }
   0x8   :  { %vm44_vm0 = vcmp.gt.f32.partialorder %v40_v12, 0.0  ;;  %v48_v16 = vmul.f32 0.2, %v40_v12  ;;  %vm45_vm1 = vcmp.gt.f32.partialorder %v41_v13, 0.0  ;;  %v49_v17 = vmul.f32 0.2, %v41_v13 }
   0x9   :  { %vm46_vm2 = vcmp.gt.f32.partialorder %v42_v14, 0.0  ;;  %v50_v18 = vmul.f32 0.2, %v42_v14  ;;  %vm47_vm3 = vcmp.gt.f32.partialorder %v43_v15, 0.0  ;;  %v51_v19 = vmul.f32 0.2, %v43_v15 }
   0xa   :  { %v52_v20 = vsel %vm44_vm0, %v40_v12, %v48_v16  ;;  %v53_v21 = vsel %vm45_vm1, %v41_v13, %v49_v17 }
   0xb   :  { %v87_v22 = vpack.c.bf16 %v52_v20, %v52_v20  ;;  %v88_v23 = vpack.c.bf16 %v53_v21, %v53_v21  ;;  %v54_v24 = vsel %vm46_vm2, %v42_v14, %v50_v18  ;;  %v55_v25 = vsel %vm47_vm3, %v43_v15, %v51_v19 }
   0xc   :  { %v89_v26 = vpack.c.bf16 %v54_v24, %v54_v24  ;;  %v90_v27 = vpack.c.bf16 %v55_v25, %v55_v25 }
   0xd   :  { %73 = vst.msk [vmem:[%s147_s3] sm:$0xf] %vm72_vm4, %v87_v22  ;;  %74 = vst.msk [vmem:[%s147_s3 + $0x4] sm:$0xf] %vm72_vm4, %v88_v23 }
   0xe   :  { %75 = vst.msk [vmem:[%s147_s3 + $0x8] sm:$0xf] %vm72_vm4, %v89_v26  ;;  %76 = vst.msk [vmem:[%s147_s3 + $0xc] sm:$0xf] %vm72_vm4, %v90_v27 }

// kernel: discriminator_forward.13
= control target key start
LH: loop header
LB: loop body
LE: loop exit
PB: predicated region body
PF: predicated region fallthrough
CT: control target
= control target key end

     0   :  { %vm433_vm0 = vcmask 519168   ;;  %vm438_vm1 = vcmask 523264   ;;  %vm469_vm2 = vcmask 516096   ;;  %s807_s1 = inlined_call_operand.vmem [shape: bf16[512,128], index: 1, kind: input, shape index: {}]   ;;  %s808_s0 = inlined_call_operand.vmem [shape: bf16[32,512], index: 0, kind: input, shape index: {}]   ;;  %s809_s2 = inlined_call_operand.vmem [shape: bf16[32,64], index: 2, kind: output, shape index: {0}]   ;;  %s810_s3 = inlined_call_operand.vmem [shape: f32[1,1,64], index: 3, kind: output, shape index: {1}]   ;;  %s811_s4 = inlined_call_operand.vmem [shape: f32[1,1,64], index: 4, kind: output, shape index: {2}]  }
   0x1   :  { %v588_v0 = vld [vmem:[%s807_s1 + $0x40] sm:$0xff]   ;;  %v592_v4 = vld [vmem:[%s807_s1 + $0x48] sm:$0xff]   ;;  %v596_v8 = vld [vmem:[%s807_s1 + $0x50] sm:$0xff]  }
   0x2   :  { %v589_v1 = vld [vmem:[%s807_s1 + $0xc0] sm:$0xff]   ;;  %532 = vmatprep.subr.bf16.mxu0 %v588_v0  ;;  %v593_v5 = vld [vmem:[%s807_s1 + $0xc8] sm:$0xff]   ;;  %v597_v9 = vld [vmem:[%s807_s1 + $0xd0] sm:$0xff]  }
   0x3   :  { %v590_v2 = vld [vmem:[%s807_s1] sm:$0xff]   ;;  %560 = vmatprep.subr.bf16.mxu1 %v589_v1  ;;  %v594_v6 = vld [vmem:[%s807_s1 + $0x8] sm:$0xff]   ;;  %v598_v10 = vld [vmem:[%s807_s1 + $0x10] sm:$0xff]  }
   0x4   :  { %v591_v3 = vld [vmem:[%s807_s1 + $0x80] sm:$0xff]   ;;  %533 = vmatpush3.bf16.msra.mxu0 %v590_v2  ;;  %v595_v7 = vld [vmem:[%s807_s1 + $0x88] sm:$0xff]   ;;  %v599_v11 = vld [vmem:[%s807_s1 + $0x90] sm:$0xff]  }
   0x5   :  { %561 = vmatpush3.bf16.msra.mxu1 %v591_v3  ;;  %534 = vmatprep.subr.bf16.mxu0 %v592_v4  ;;  %v600_v12 = vld [vmem:[%s807_s1 + $0x58] sm:$0xff]   ;;  %v604_v16 = vld [vmem:[%s807_s1 + $0x60] sm:$0xff]   ;;  %v608_v20 = vld [vmem:[%s807_s1 + $0x68] sm:$0xff]  }
   0x6   :  { %562 = vmatprep.subr.bf16.mxu1 %v593_v5  ;;  %v601_v13 = vld [vmem:[%s807_s1 + $0xd8] sm:$0xff]   ;;  %v605_v17 = vld [vmem:[%s807_s1 + $0xe0] sm:$0xff]   ;;  %v609_v21 = vld [vmem:[%s807_s1 + $0xe8] sm:$0xff]  }
   0x7   :  { %v602_v14 = vld [vmem:[%s807_s1 + $0x18] sm:$0xff]   ;;  %v606_v18 = vld [vmem:[%s807_s1 + $0x20] sm:$0xff]   ;;  %v610_v22 = vld [vmem:[%s807_s1 + $0x28] sm:$0xff]  }
   0x8   :  { %535 = vmatpush3.bf16.msra.mxu0 %v594_v6  ;;  %v603_v15 = vld [vmem:[%s807_s1 + $0x98] sm:$0xff]   ;;  %v607_v19 = vld [vmem:[%s807_s1 + $0xa0] sm:$0xff]   ;;  %v611_v23 = vld [vmem:[%s807_s1 + $0xa8] sm:$0xff]  }
   0x9   :  { %563 = vmatpush3.bf16.msra.mxu1 %v595_v7  ;;  %536 = vmatprep.subr.bf16.mxu0 %v596_v8  ;;  %v612_v24 = vld [vmem:[%s807_s1 + $0x70] sm:$0xff]   ;;  %v616_v28 = vld [vmem:[%s807_s1 + $0x78] sm:$0xff]  }
   0xa   :  { %564 = vmatprep.subr.bf16.mxu1 %v597_v9  ;;  %v613_v25 = vld [vmem:[%s807_s1 + $0xf0] sm:$0xff]   ;;  %v617_v29 = vld [vmem:[%s807_s1 + $0xf8] sm:$0xff]  }
   0xb   :  { %v614_v26 = vld [vmem:[%s807_s1 + $0x30] sm:$0xff]   ;;  %v618_v30 = vld [vmem:[%s807_s1 + $0x38] sm:$0xff]  }
   0xc   :  { %537 = vmatpush3.bf16.msra.mxu0 %v598_v10  ;;  %v615_v27 = vld [vmem:[%s807_s1 + $0xb0] sm:$0xff]   ;;  %v619_v31 = vld [vmem:[%s807_s1 + $0xb8] sm:$0xff]  }
   0xd   :  { %565 = vmatpush3.bf16.msra.mxu1 %v599_v11  ;;  %538 = vmatprep.subr.bf16.mxu0 %v600_v12  ;;  %v620_v32 = vld [vmem:[%s808_s0] ss:$16 sps:$4 sm:$0xff]   ;;  %v622_v33 = vld [vmem:[%s808_s0 + $0x4] ss:$16 sps:$4 sm:$0xff]   ;;  %v623_v34 = vld [vmem:[%s808_s0 + $0x8] ss:$16 sps:$4 sm:$0xff]  }
   0xe   :  { %566 = vmatprep.subr.bf16.mxu1 %v601_v13  ;;  %v625_v35 = vld [vmem:[%s808_s0 + $0xc] ss:$16 sps:$4 sm:$0xff]   ;;  %351 = vmatprep.mubr.bf16.mxu0 %v622_v33  ;;  %v626_v36 = vld [vmem:[%s808_s0 + $0x24] ss:$16 sps:$4 sm:$0xff]   ;;  %v630_v38 = vld [vmem:[%s808_s0 + $0x20] ss:$16 sps:$4 sm:$0xff]  }
   0xf   :  { %400 = vmatprep.mubr.bf16.mxu1 %v625_v35  ;;  %v628_v37 = vld [vmem:[%s808_s0 + $0x2c] ss:$16 sps:$4 sm:$0xff]   ;;  %v631_v39 = vld [vmem:[%s808_s0 + $0x28] ss:$16 sps:$4 sm:$0xff]  }
  0x10   :  { %539 = vmatpush3.bf16.msra.mxu0 %v602_v14 }
  0x11   :  { %567 = vmatpush3.bf16.msra.mxu1 %v603_v15  ;;  %540 = vmatprep.subr.bf16.mxu0 %v604_v16 }
  0x12   :  { %568 = vmatprep.subr.bf16.mxu1 %v605_v17 }
  0x14   :  { %541 = vmatpush3.bf16.msra.mxu0 %v606_v18 }
  0x15   :  { %569 = vmatpush3.bf16.msra.mxu1 %v607_v19  ;;  %542 = vmatprep.subr.bf16.mxu0 %v608_v20 }
  0x16   :  { %570 = vmatprep.subr.bf16.mxu1 %v609_v21 }
  0x18   :  { %543 = vmatpush3.bf16.msra.mxu0 %v610_v22 }
  0x19   :  { %571 = vmatpush3.bf16.msra.mxu1 %v611_v23  ;;  %544 = vmatprep.subr.bf16.mxu0 %v612_v24 }
  0x1a   :  { %572 = vmatprep.subr.bf16.mxu1 %v613_v25 }
  0x1c   :  { %545 = vmatpush3.bf16.msra.mxu0 %v614_v26 }
  0x1d   :  { %573 = vmatpush3.bf16.msra.mxu1 %v615_v27  ;;  %546 = vmatprep.subr.bf16.mxu0 %v616_v28 }
  0x1e   :  { %574 = vmatprep.subr.bf16.mxu1 %v617_v29 }
  0x20   :  { %547 = vmatpush3.bf16.msra.mxu0 %v618_v30 }
  0x21   :  { %575 = vmatpush3.bf16.msra.mxu1 %v619_v31 }
  0x23   :  { %352 = vmatmul.mubr.bf16.vlgmr.msra.gmra.mrb[0].mxu0 %v620_v32 }
  0x24   :  { %401 = vmatmul.mubr.bf16.vlgmr.msra.gmra.mrb[0].mxu1 %v623_v34  ;;  %359 = vmatprep.mubr.bf16.mxu0 %v626_v36 }
  0x25   :  { %408 = vmatprep.mubr.bf16.mxu1 %v628_v37 }
  0x2b   :  { %360 = vmatmul.mubr.bf16.gmra.mrb[4].mxu0 %v630_v38 }
  0x2c   :  { %409 = vmatmul.mubr.bf16.gmra.mrb[4].mxu1 %v631_v39 }
  0xf6   :  { %v548_v40 = vpop.f32.mrb[0].mxu0 }
  0xf7   :  { %v576_v41 = vpop.f32.mrb[0].mxu1  ;;  %v549_v42 = vpop.f32.mrb[1].mxu0 }
  0xf8   :  { %v550_v43 = vadd.f32 %v549_v42, %v548_v40  ;;  %v577_v44 = vpop.f32.mrb[1].mxu1  ;;  %v551_v45 = vpop.f32.mrb[2].mxu0 }
  0xf9   :  { %v578_v46 = vadd.f32 %v577_v44, %v576_v41  ;;  %v579_v47 = vpop.f32.mrb[2].mxu1  ;;  %v552_v48 = vpop.f32.mrb[3].mxu0 }
  0xfa   :  { %v553_v49 = vadd.f32 %v552_v48, %v551_v45  ;;  %v580_v50 = vpop.f32.mrb[3].mxu1 }
  0xfb   :  { %v403_v51 = vadd.f32 %v578_v46, %v550_v43  ;;  %v581_v52 = vadd.f32 %v580_v50, %v579_v47 }
  0xfd   :  { %v528_v53 = vpack.c.bf16 %v403_v51, %v403_v51  ;;  %v452_v54 = vmul.f32 %v403_v51, %v403_v51  ;;  %v406_v55 = vadd.f32 %v581_v52, %v553_v49  ;;  %v439_v57 = vsel %vm438_vm1, %v403_v51, 0.0 }
  0xfe   :  { %v554_v56 = vpop.f32.mrb[4].mxu0 }
  0xff   :  { %434 = vst.msk [vmem:[%s809_s2] sm:$0xf] %vm433_vm0, %v528_v53  ;;  %v529_v58 = vpack.c.bf16 %v406_v55, %v406_v55  ;;  %v440_v59 = vsel %vm438_vm1, %v406_v55, 0.0  ;;  %v453_v60 = vmul.f32 %v406_v55, %v406_v55  ;;  %v582_v61 = vpop.f32.mrb[4].mxu1  ;;  %v555_v62 = vpop.f32.mrb[5].mxu0  ;;  %v456_v3 = vsel %vm438_vm1, %v452_v54, 0.0 }
 0x100   :  { %v441_v63 = vadd.f32 %v440_v59, %v439_v57  ;;  %v556_v0 = vadd.f32 %v555_v62, %v554_v56  ;;  %v583_v1 = vpop.f32.mrb[5].mxu1  ;;  %v557_v2 = vpop.f32.mrb[6].mxu0 }
 0x101   :  { %435 = vst.msk [vmem:[%s809_s2 + $0x4] sm:$0xf] %vm433_vm0, %v529_v58  ;;  %v457_v4 = vsel %vm438_vm1, %v453_v60, 0.0  ;;  %v584_v5 = vadd.f32 %v583_v1, %v582_v61  ;;  %v585_v6 = vpop.f32.mrb[6].mxu1  ;;  %v558_v7 = vpop.f32.mrb[7].mxu0 }
 0x102   :  { %v458_v8 = vadd.f32 %v457_v4, %v456_v3  ;;  %v559_v9 = vadd.f32 %v558_v7, %v557_v2  ;;  %v586_v10 = vpop.f32.mrb[7].mxu1 }
 0x103   :  { %v411_v11 = vadd.f32 %v584_v5, %v556_v0  ;;  %v587_v12 = vadd.f32 %v586_v10, %v585_v6 }
 0x105   :  { %v530_v13 = vpack.c.bf16 %v411_v11, %v411_v11  ;;  %v442_v14 = vsel %vm438_vm1, %v411_v11, 0.0  ;;  %v454_v15 = vmul.f32 %v411_v11, %v411_v11  ;;  %v414_v16 = vadd.f32 %v587_v12, %v559_v9 }
 0x106   :  { %v443_v17 = vadd.f32 %v442_v14, %v441_v63 }
 0x107   :  { %436 = vst.msk [vmem:[%s809_s2 + $0x8] sm:$0xf] %vm433_vm0, %v530_v13  ;;  %v459_v18 = vsel %vm438_vm1, %v454_v15, 0.0  ;;  %v531_v19 = vpack.c.bf16 %v414_v16, %v414_v16  ;;  %v444_v20 = vsel %vm438_vm1, %v414_v16, 0.0  ;;  %v455_v21 = vmul.f32 %v414_v16, %v414_v16 }
 0x108   :  { %v460_v22 = vadd.f32 %v459_v18, %v458_v8  ;;  %v445_v23 = vadd.f32 %v444_v20, %v443_v17 }
 0x109   :  { %437 = vst.msk [vmem:[%s809_s2 + $0xc] sm:$0xf] %vm433_vm0, %v531_v19  ;;  %v461_v24 = vsel %vm438_vm1, %v455_v21, 0.0 }
 0x10a   :  { %v446_v25 = vrot.slane %v445_v23, 4  ;;  %v462_v26 = vadd.f32 %v461_v24, %v460_v22 }
 0x10c   :  { %v447_v27 = vadd.f32 %v446_v25, %v445_v23  ;;  %v463_v28 = vrot.slane %v462_v26, 4 }
 0x10e   :  { %v448_v29 = vrot.slane %v447_v27, 2  ;;  %v464_v30 = vadd.f32 %v463_v28, %v462_v26 }
 0x110   :  { %v449_v31 = vadd.f32 %v448_v29, %v447_v27  ;;  %v465_v32 = vrot.slane %v464_v30, 2 }
 0x112   :  { %v450_v33 = vrot.slane %v449_v31, 1  ;;  %v466_v34 = vadd.f32 %v465_v32, %v464_v30 }
 0x114   :  { %v451_v35 = vadd.f32 %v450_v33, %v449_v31  ;;  %v467_v36 = vrot.slane %v466_v34, 1 }
 0x116   :  { %v468_v37 = vadd.f32 %v467_v36, %v466_v34  ;;  %470 = vst.msk [vmem:[%s810_s3] sm:$0x1] %vm469_vm2, %v451_v35 }
 0x118   :  { %471 = vst.msk [vmem:[%s811_s4] sm:$0x1] %vm469_vm2, %v468_v37 }

// kernel: discriminator_forward.15
= control target key start
LH: loop header
LB: loop body
LE: loop exit
PB: predicated region body
PF: predicated region fallthrough
CT: control target
= control target key end

     0   :  { %vm748_vm0 = vcmask 7168   ;;  %s1226_s1 = inlined_call_operand.vmem [shape: bf16[1024,128], index: 1, kind: input, shape index: {}]   ;;  %s1227_s0 = inlined_call_operand.vmem [shape: bf16[16,1024], index: 0, kind: input, shape index: {}]   ;;  %s1228_s2 = inlined_call_operand.vmem [shape: f32[16,1], index: 2, kind: output, shape index: {}]  }
   0x1   :  { %v917_v0 = vld [vmem:[%s1226_s1 + $0x40] sm:$0xff]   ;;  %v921_v4 = vld [vmem:[%s1226_s1 + $0x48] sm:$0xff]   ;;  %v925_v8 = vld [vmem:[%s1226_s1 + $0x50] sm:$0xff]  }
   0x2   :  { %v918_v1 = vld [vmem:[%s1226_s1 + $0xc0] sm:$0xff]   ;;  %829 = vmatprep.subr.bf16.mxu0 %v917_v0  ;;  %v922_v5 = vld [vmem:[%s1226_s1 + $0xc8] sm:$0xff]   ;;  %v926_v9 = vld [vmem:[%s1226_s1 + $0xd0] sm:$0xff]  }
   0x3   :  { %v919_v2 = vld [vmem:[%s1226_s1] sm:$0xff]   ;;  %851 = vmatprep.subr.bf16.mxu1 %v918_v1  ;;  %v923_v6 = vld [vmem:[%s1226_s1 + $0x8] sm:$0xff]   ;;  %v927_v10 = vld [vmem:[%s1226_s1 + $0x10] sm:$0xff]  }
   0x4   :  { %v920_v3 = vld [vmem:[%s1226_s1 + $0x80] sm:$0xff]   ;;  %830 = vmatpush3.bf16.msra.mxu0 %v919_v2  ;;  %v924_v7 = vld [vmem:[%s1226_s1 + $0x88] sm:$0xff]   ;;  %v928_v11 = vld [vmem:[%s1226_s1 + $0x90] sm:$0xff]  }
   0x5   :  { %852 = vmatpush3.bf16.msra.mxu1 %v920_v3  ;;  %831 = vmatprep.subr.bf16.mxu0 %v921_v4  ;;  %v929_v12 = vld [vmem:[%s1226_s1 + $0x58] sm:$0xff]   ;;  %v933_v16 = vld [vmem:[%s1226_s1 + $0x60] sm:$0xff]   ;;  %v937_v20 = vld [vmem:[%s1226_s1 + $0x68] sm:$0xff]  }
   0x6   :  { %853 = vmatprep.subr.bf16.mxu1 %v922_v5  ;;  %v930_v13 = vld [vmem:[%s1226_s1 + $0xd8] sm:$0xff]   ;;  %v934_v17 = vld [vmem:[%s1226_s1 + $0xe0] sm:$0xff]   ;;  %v938_v21 = vld [vmem:[%s1226_s1 + $0xe8] sm:$0xff]  }
   0x7   :  { %v931_v14 = vld [vmem:[%s1226_s1 + $0x18] sm:$0xff]   ;;  %v935_v18 = vld [vmem:[%s1226_s1 + $0x20] sm:$0xff]   ;;  %v939_v22 = vld [vmem:[%s1226_s1 + $0x28] sm:$0xff]  }
   0x8   :  { %832 = vmatpush3.bf16.msra.mxu0 %v923_v6  ;;  %v932_v15 = vld [vmem:[%s1226_s1 + $0x98] sm:$0xff]   ;;  %v936_v19 = vld [vmem:[%s1226_s1 + $0xa0] sm:$0xff]   ;;  %v940_v23 = vld [vmem:[%s1226_s1 + $0xa8] sm:$0xff]  }
   0x9   :  { %854 = vmatpush3.bf16.msra.mxu1 %v924_v7  ;;  %833 = vmatprep.subr.bf16.mxu0 %v925_v8  ;;  %v941_v24 = vld [vmem:[%s1226_s1 + $0x70] sm:$0xff]   ;;  %v945_v28 = vld [vmem:[%s1226_s1 + $0x78] sm:$0xff]   ;;  %v12_v32 = vld [vmem:[%s1227_s0] sm:$0xff] }
   0xa   :  { %855 = vmatprep.subr.bf16.mxu1 %v926_v9  ;;  %v942_v25 = vld [vmem:[%s1226_s1 + $0xf0] sm:$0xff]   ;;  %v946_v29 = vld [vmem:[%s1226_s1 + $0xf8] sm:$0xff]   ;;  %v16_v33 = vld [vmem:[%s1227_s0 + $0x20] sm:$0xff] }
   0xb   :  { %v943_v26 = vld [vmem:[%s1226_s1 + $0x30] sm:$0xff]   ;;  %v947_v30 = vld [vmem:[%s1226_s1 + $0x38] sm:$0xff]   ;;  %v13_v34 = vld [vmem:[%s1227_s0 + $0x8] sm:$0xff]  ;;  %v755_v35 = vcombine.low %v12_v32, %v16_v33  ;;  %v756_v36 = vcombine.high %v12_v32, %v16_v33 }
   0xc   :  { %834 = vmatpush3.bf16.msra.mxu0 %v927_v10  ;;  %v944_v27 = vld [vmem:[%s1226_s1 + $0xb0] sm:$0xff]   ;;  %v948_v31 = vld [vmem:[%s1226_s1 + $0xb8] sm:$0xff]   ;;  %v17_v37 = vld [vmem:[%s1227_s0 + $0x28] sm:$0xff] }
   0xd   :  { %856 = vmatpush3.bf16.msra.mxu1 %v928_v11  ;;  %835 = vmatprep.subr.bf16.mxu0 %v929_v12  ;;  %v757_v38 = vcombine.low %v13_v34, %v17_v37  ;;  %v758_v39 = vcombine.high %v13_v34, %v17_v37  ;;  %v949_v40 = vld [vmem:[%s1226_s1 + $0x140] sm:$0xff]   ;;  %v953_v44 = vld [vmem:[%s1226_s1 + $0x148] sm:$0xff]   ;;  %v957_v48 = vld [vmem:[%s1226_s1 + $0x150] sm:$0xff]  }
   0xe   :  { %857 = vmatprep.subr.bf16.mxu1 %v930_v13  ;;  %604 = vmatprep.mubr.bf16.mxu0 %v756_v36  ;;  %v950_v41 = vld [vmem:[%s1226_s1 + $0x1c0] sm:$0xff]   ;;  %v954_v45 = vld [vmem:[%s1226_s1 + $0x1c8] sm:$0xff]   ;;  %v958_v49 = vld [vmem:[%s1226_s1 + $0x1d0] sm:$0xff]  }
   0xf   :  { %645 = vmatprep.mubr.bf16.mxu1 %v758_v39  ;;  %v951_v42 = vld [vmem:[%s1226_s1 + $0x100] sm:$0xff]   ;;  %v955_v46 = vld [vmem:[%s1226_s1 + $0x108] sm:$0xff]   ;;  %v959_v50 = vld [vmem:[%s1226_s1 + $0x110] sm:$0xff]  }
  0x10   :  { %836 = vmatpush3.bf16.msra.mxu0 %v931_v14  ;;  %v952_v43 = vld [vmem:[%s1226_s1 + $0x180] sm:$0xff]   ;;  %v956_v47 = vld [vmem:[%s1226_s1 + $0x188] sm:$0xff]   ;;  %v960_v51 = vld [vmem:[%s1226_s1 + $0x190] sm:$0xff]  }
  0x11   :  { %858 = vmatpush3.bf16.msra.mxu1 %v932_v15  ;;  %837 = vmatprep.subr.bf16.mxu0 %v933_v16  ;;  %v961_v52 = vld [vmem:[%s1226_s1 + $0x158] sm:$0xff]   ;;  %v965_v56 = vld [vmem:[%s1226_s1 + $0x160] sm:$0xff]   ;;  %v969_v60 = vld [vmem:[%s1226_s1 + $0x168] sm:$0xff]  }
  0x12   :  { %859 = vmatprep.subr.bf16.mxu1 %v934_v17  ;;  %v962_v53 = vld [vmem:[%s1226_s1 + $0x1d8] sm:$0xff]   ;;  %v966_v57 = vld [vmem:[%s1226_s1 + $0x1e0] sm:$0xff]   ;;  %v970_v61 = vld [vmem:[%s1226_s1 + $0x1e8] sm:$0xff]  }
  0x13   :  { %v963_v54 = vld [vmem:[%s1226_s1 + $0x118] sm:$0xff]   ;;  %v967_v58 = vld [vmem:[%s1226_s1 + $0x120] sm:$0xff]   ;;  %v971_v62 = vld [vmem:[%s1226_s1 + $0x128] sm:$0xff]  }
  0x14   :  { %838 = vmatpush3.bf16.msra.mxu0 %v935_v18  ;;  %v964_v55 = vld [vmem:[%s1226_s1 + $0x198] sm:$0xff]   ;;  %v968_v59 = vld [vmem:[%s1226_s1 + $0x1a0] sm:$0xff]   ;;  %v972_v63 = vld [vmem:[%s1226_s1 + $0x1a8] sm:$0xff]  }
  0x15   :  { %860 = vmatpush3.bf16.msra.mxu1 %v936_v19  ;;  %839 = vmatprep.subr.bf16.mxu0 %v937_v20  ;;  %v973_v0 = vld [vmem:[%s1226_s1 + $0x170] sm:$0xff]   ;;  %v977_v4 = vld [vmem:[%s1226_s1 + $0x178] sm:$0xff]  }
  0x16   :  { %861 = vmatprep.subr.bf16.mxu1 %v938_v21  ;;  %v974_v1 = vld [vmem:[%s1226_s1 + $0x1f0] sm:$0xff]   ;;  %v978_v5 = vld [vmem:[%s1226_s1 + $0x1f8] sm:$0xff]  }
  0x17   :  { %v975_v2 = vld [vmem:[%s1226_s1 + $0x130] sm:$0xff]   ;;  %v979_v6 = vld [vmem:[%s1226_s1 + $0x138] sm:$0xff]  }
  0x18   :  { %840 = vmatpush3.bf16.msra.mxu0 %v939_v22  ;;  %v976_v3 = vld [vmem:[%s1226_s1 + $0x1b0] sm:$0xff]   ;;  %v980_v7 = vld [vmem:[%s1226_s1 + $0x1b8] sm:$0xff]  }
  0x19   :  { %862 = vmatpush3.bf16.msra.mxu1 %v940_v23  ;;  %841 = vmatprep.subr.bf16.mxu0 %v941_v24  ;;  %v14_v8 = vld [vmem:[%s1227_s0 + $0x10] sm:$0xff]  ;;  %v15_v12 = vld [vmem:[%s1227_s0 + $0x18] sm:$0xff] }
  0x1a   :  { %863 = vmatprep.subr.bf16.mxu1 %v942_v25  ;;  %v18_v9 = vld [vmem:[%s1227_s0 + $0x30] sm:$0xff]  ;;  %v19_v13 = vld [vmem:[%s1227_s0 + $0x38] sm:$0xff] }
  0x1b   :  { %v759_v10 = vcombine.low %v14_v8, %v18_v9  ;;  %v760_v11 = vcombine.high %v14_v8, %v18_v9  ;;  %v761_v14 = vcombine.low %v15_v12, %v19_v13  ;;  %v762_v15 = vcombine.high %v15_v12, %v19_v13 }
  0x1c   :  { %842 = vmatpush3.bf16.msra.mxu0 %v943_v26 }
  0x1d   :  { %864 = vmatpush3.bf16.msra.mxu1 %v944_v27  ;;  %843 = vmatprep.subr.bf16.mxu0 %v945_v28 }
  0x1e   :  { %865 = vmatprep.subr.bf16.mxu1 %v946_v29 }
  0x20   :  { %844 = vmatpush3.bf16.msra.mxu0 %v947_v30 }
  0x21   :  { %866 = vmatpush3.bf16.msra.mxu1 %v948_v31  ;;  %873 = vmatprep.subr.bf16.mxu0 %v949_v40 }
  0x22   :  { %895 = vmatprep.subr.bf16.mxu1 %v950_v41 }
  0x23   :  { %605 = vmatmul.mubr.bf16.vlgmr.msra.gmra.mrb[0].mxu0 %v755_v35 }
  0x24   :  { %646 = vmatmul.mubr.bf16.vlgmr.msra.gmra.mrb[0].mxu1 %v757_v38  ;;  %874 = vmatpush3.bf16.msra.mxu0 %v951_v42 }
  0x25   :  { %896 = vmatpush3.bf16.msra.mxu1 %v952_v43  ;;  %875 = vmatprep.subr.bf16.mxu0 %v953_v44 }
  0x26   :  { %897 = vmatprep.subr.bf16.mxu1 %v954_v45  ;;  %686 = vmatprep.mubr.bf16.mxu0 %v760_v11 }
  0x27   :  { %727 = vmatprep.mubr.bf16.mxu1 %v762_v15 }
  0x28   :  { %876 = vmatpush3.bf16.msra.mxu0 %v955_v46 }
  0x29   :  { %898 = vmatpush3.bf16.msra.mxu1 %v956_v47  ;;  %877 = vmatprep.subr.bf16.mxu0 %v957_v48 }
  0x2a   :  { %899 = vmatprep.subr.bf16.mxu1 %v958_v49 }
  0x2c   :  { %878 = vmatpush3.bf16.msra.mxu0 %v959_v50 }
  0x2d   :  { %900 = vmatpush3.bf16.msra.mxu1 %v960_v51  ;;  %879 = vmatprep.subr.bf16.mxu0 %v961_v52 }
  0x2e   :  { %901 = vmatprep.subr.bf16.mxu1 %v962_v53 }
  0x30   :  { %880 = vmatpush3.bf16.msra.mxu0 %v963_v54 }
  0x31   :  { %902 = vmatpush3.bf16.msra.mxu1 %v964_v55  ;;  %881 = vmatprep.subr.bf16.mxu0 %v965_v56 }
  0x32   :  { %903 = vmatprep.subr.bf16.mxu1 %v966_v57 }
  0x34   :  { %882 = vmatpush3.bf16.msra.mxu0 %v967_v58 }
  0x35   :  { %904 = vmatpush3.bf16.msra.mxu1 %v968_v59  ;;  %883 = vmatprep.subr.bf16.mxu0 %v969_v60 }
  0x36   :  { %905 = vmatprep.subr.bf16.mxu1 %v970_v61 }
  0x38   :  { %884 = vmatpush3.bf16.msra.mxu0 %v971_v62 }
  0x39   :  { %906 = vmatpush3.bf16.msra.mxu1 %v972_v63  ;;  %885 = vmatprep.subr.bf16.mxu0 %v973_v0 }
  0x3a   :  { %907 = vmatprep.subr.bf16.mxu1 %v974_v1 }
  0x3c   :  { %886 = vmatpush3.bf16.msra.mxu0 %v975_v2 }
  0x3d   :  { %908 = vmatpush3.bf16.msra.mxu1 %v976_v3  ;;  %887 = vmatprep.subr.bf16.mxu0 %v977_v4 }
  0x3e   :  { %909 = vmatprep.subr.bf16.mxu1 %v978_v5 }
  0x40   :  { %888 = vmatpush3.bf16.msra.mxu0 %v979_v6 }
  0x41   :  { %910 = vmatpush3.bf16.msra.mxu1 %v980_v7 }
  0x43   :  { %687 = vmatmul.mubr.bf16.vlgmr.msra.gmra.mrb[4].mxu0 %v759_v10 }
  0x44   :  { %728 = vmatmul.mubr.bf16.vlgmr.msra.gmra.mrb[4].mxu1 %v761_v14 }
  0xf6   :  { %v845_v16 = vpop.f32.mrb[0].mxu0 }
  0xf7   :  { %v867_v17 = vpop.f32.mrb[0].mxu1  ;;  %v846_v18 = vpop.f32.mrb[1].mxu0 }
  0xf8   :  { %v847_v19 = vadd.f32 %v846_v18, %v845_v16  ;;  %v868_v20 = vpop.f32.mrb[1].mxu1  ;;  %v848_v21 = vpop.f32.mrb[2].mxu0 }
  0xf9   :  { %v869_v22 = vadd.f32 %v868_v20, %v867_v17  ;;  %v870_v23 = vpop.f32.mrb[2].mxu1  ;;  %v849_v24 = vpop.f32.mrb[3].mxu0 }
  0xfa   :  { %v850_v25 = vadd.f32 %v849_v24, %v848_v21  ;;  %v871_v26 = vpop.f32.mrb[3].mxu1 }
  0xfb   :  { %v648_v27 = vadd.f32 %v869_v22, %v847_v19  ;;  %v872_v28 = vadd.f32 %v871_v26, %v870_v23 }
  0xfd   :  { %v651_v29 = vadd.f32 %v872_v28, %v850_v25 }
 0x116   :  { %v889_v30 = vpop.f32.mrb[4].mxu0 }
 0x117   :  { %v911_v31 = vpop.f32.mrb[4].mxu1  ;;  %v890_v32 = vpop.f32.mrb[5].mxu0 }
 0x118   :  { %v891_v33 = vadd.f32 %v890_v32, %v889_v30  ;;  %v912_v34 = vpop.f32.mrb[5].mxu1  ;;  %v892_v35 = vpop.f32.mrb[6].mxu0 }
 0x119   :  { %v913_v36 = vadd.f32 %v912_v34, %v911_v31  ;;  %v914_v37 = vpop.f32.mrb[6].mxu1  ;;  %v893_v38 = vpop.f32.mrb[7].mxu0 }
 0x11a   :  { %v689_v39 = vadd.f32 %v891_v33, %v648_v27  ;;  %v894_v40 = vadd.f32 %v893_v38, %v892_v35  ;;  %v915_v41 = vpop.f32.mrb[7].mxu1 }
 0x11b   :  { %v916_v42 = vadd.f32 %v915_v41, %v914_v37 }
 0x11c   :  { %v730_v43 = vadd.f32 %v913_v36, %v689_v39  ;;  %v692_v44 = vadd.f32 %v894_v40, %v651_v29 }
 0x11e   :  { %v827_v45 = vmul.f32 -1.442695, %v730_v43  ;;  %v733_v46 = vadd.f32 %v916_v42, %v692_v44 }
 0x120   :  { %981 = vpow2.f32 %v827_v45  ;;  %v828_v47 = vmul.f32 -1.442695, %v733_v46 }
 0x122   :  { %983 = vpow2.f32 %v828_v47 }
 0x12a   :  { %v982_v48 = vpop.eup %981 }
 0x12b   :  { %v742_v49 = vadd.f32 1.0, %v982_v48 }
 0x12c   :  { %v984_v50 = vpop.eup %983 }
 0x12d   :  { %985 = vrcp.f32 %v742_v49  ;;  %v743_v51 = vadd.f32 1.0, %v984_v50 }
 0x12f   :  { %987 = vrcp.f32 %v743_v51 }
 0x137   :  { %v986_v52 = vpop.eup %985 }
 0x138   :  { %749 = vst.msk [vmem:[%s1228_s2] sm:$0xff] %vm748_vm0, %v986_v52 }
 0x139   :  { %v988_v53 = vpop.eup %987 }
 0x13a   :  { %750 = vst.msk [vmem:[%s1228_s2 + $0x8] sm:$0xff] %vm748_vm0, %v988_v53 }

</bundles_post_ra>
